<compile_context>
chip_gen: v6e
topology: v6e:2x2x1
jax: 0.10.0
libtpu: 0.0.40
codegen_flags: <defaults>
</compile_context>

<pallas_src>
import functools

import jax
import jax.numpy as jnp
from jax.experimental import pallas as pl
from jax.experimental.pallas import tpu as pltpu


def _conv_fused_kernel(x_ref, w_ref, b_ref, o_ref, lhs_ref, *,
                       KH, KW, stride, OH, OW):
    """One grid step: nb batch elements x one Cout tile.

    x_ref  : (nb, Hp, Wp, Cin)        compute-dtype padded NHWC input
    w_ref  : (KH*KW*Cin, tn)          compute-dtype flattened weights
    b_ref  : (1, tn)                  f32 bias row
    o_ref  : (nb*OH*OW, tn)           output block (lane-dense)
    lhs_ref: (nb*OH*OW, KH*KW*Cin)    VMEM scratch im2col slab
    """
    nb, Hp, Wp, cin = x_ref.shape
    M = nb * OH * OW

    # Build the im2col lhs once in VMEM: fold the whole KHxKW window into the
    # MXU contraction dim -> one fat matmul instead of KH*KW thin ones, and
    # zero f32-accumulator read-modify-write passes.
    for kh in range(KH):
        if stride == 1:
            slab = x_ref[:, kh:kh + OH]                      # (nb, OH, Wp, Cin)
        else:
            slab = x_ref[:, pl.ds(kh, OH, stride)]           # strided rows
        for kw in range(KW):
            if stride == 1:
                xs = slab[:, :, kw:kw + OW, :]               # (nb, OH, OW, Cin)
            else:
                xs = jax.lax.slice(
                    slab, (0, 0, kw, 0),
                    (nb, OH, kw + (OW - 1) * stride + 1, cin),
                    (1, 1, stride, 1))
            t = kh * KW + kw
            lhs_ref[:, t * cin:(t + 1) * cin] = xs.reshape(M, cin)

    # Single MXU matmul; bias folded into the epilogue; single lane-dense store.
    acc = jnp.dot(lhs_ref[...], w_ref[...], preferred_element_type=jnp.float32)
    o_ref[...] = (acc + b_ref[...]).astype(o_ref.dtype)


def _pick_cout_tile(cout_p):
    """Cout tile width: 256 for v6e/v7x (2x256 MXU), 128 for v5e (4x128 MXU)."""
    tn = 256 if cout_p % 256 == 0 else 128
    try:
        kind = jax.devices()[0].device_kind.lower()
        if "v5" in kind:
            tn = 128
    except Exception:
        pass
    return tn


def prepare_conv2d_params(weight, bias, *, compute_dtype=jnp.bfloat16):
    """One-time per-layer weight/bias preparation (hoisted out of the per-call
    path): OIHW -> flattened (KH*KW*Cin, Cout) HWIO, Cout zero-padded to a
    multiple of 128, cast to the compute dtype; bias padded, kept f32."""
    Cout, Cin, KH, KW = weight.shape
    Cout_p = pl.cdiv(Cout, 128) * 128
    w = jnp.transpose(weight, (2, 3, 1, 0)).reshape(KH * KW * Cin, Cout)
    w = jnp.pad(w, ((0, 0), (0, Cout_p - Cout))).astype(compute_dtype)
    if bias is None:
        b = jnp.zeros((1, Cout_p), jnp.float32)
    else:
        b = jnp.pad(bias.astype(jnp.float32), (0, Cout_p - Cout)).reshape(1, Cout_p)
    return dict(w=w, b=b, Cout=Cout, Cout_p=Cout_p, Cin=Cin, KH=KH, KW=KW,
                compute_dtype=compute_dtype)


def conv2d_pallas_nhwc(x_nhwc, params, *, stride=1, padding=0):
    """Conv2d on NHWC input using prepared params; returns NHWC with Cout
    padded to a multiple of 128 (lane-dense)."""
    N, H, W, Cin = x_nhwc.shape
    assert Cin == params["Cin"], (Cin, params["Cin"])
    KH, KW = params["KH"], params["KW"]
    Cout_p = params["Cout_p"]
    compute_dtype = params["compute_dtype"]

    OH = (H + 2 * padding - KH) // stride + 1
    OW = (W + 2 * padding - KW) // stride + 1
    Hp, Wp = H + 2 * padding, W + 2 * padding
    M_img, K_tot = OH * OW, KH * KW * Cin

    # Pad spatially once (cheap) and cast the matmul lhs operand.
    x = jnp.pad(x_nhwc, ((0, 0), (padding, padding), (padding, padding), (0, 0)))
    x = x.astype(compute_dtype)

    tn = _pick_cout_tile(Cout_p)
    CT = Cout_p // tn

    # Fold several batch elements into one grid step so the matmul M dim is
    # >= ~512 rows (amortizes per-step overhead, keeps the MXU fed).
    nb = 1
    if M_img % 8 == 0:
        for d in range(1, N + 1):
            if N % d == 0 and d * M_img <= 2048:
                nb = d
    else:
        nb = N          # M block must then equal the full (N*M_img) dim
    NB = N // nb
    M_step = nb * M_img

    itemsize = jnp.dtype(compute_dtype).itemsize
    out_itemsize = jnp.dtype(x_nhwc.dtype).itemsize
    x_block_bytes = nb * Hp * Wp * Cin * itemsize
    w_tile_bytes = K_tot * tn * itemsize

    # Grid order: keep the bigger operand resident across the inner grid axis
    # (weight-resident for weight-heavy layers, image-resident otherwise).
    weight_resident = w_tile_bytes >= x_block_bytes
    if weight_resident:
        grid = (CT, NB)
        x_map = lambda j, n: (n, 0, 0, 0)
        w_map = lambda j, n: (0, j)
        b_map = lambda j, n: (0, j)
        o_map = lambda j, n: (n, j)
    else:
        grid = (NB, CT)
        x_map = lambda n, j: (n, 0, 0, 0)
        w_map = lambda n, j: (0, j)
        b_map = lambda n, j: (0, j)
        o_map = lambda n, j: (n, j)

    # VMEM budget from actual block shapes (double-buffered ins/outs + im2col
    # scratch + f32 dot-result headroom); capped well under v7x's 64 MiB/TC.
    need = (2 * (x_block_bytes + w_tile_bytes + tn * 4)
            + 2 * M_step * tn * out_itemsize
            + M_step * K_tot * itemsize
            + M_step * tn * 4)
    vmem_limit = int(min(max(2 * need, 16 * 1024 * 1024), 48 * 1024 * 1024))

    kernel = functools.partial(_conv_fused_kernel, KH=KH, KW=KW,
                               stride=stride, OH=OH, OW=OW)

    out = pl.pallas_call(
        kernel,
        out_shape=jax.ShapeDtypeStruct((N * M_img, Cout_p), x_nhwc.dtype),
        grid_spec=pltpu.PrefetchScalarGridSpec(
            num_scalar_prefetch=0,
            grid=grid,
            in_specs=[
                pl.BlockSpec((nb, Hp, Wp, Cin), x_map),
                pl.BlockSpec((K_tot, tn), w_map),
                pl.BlockSpec((1, tn), b_map),
            ],
            out_specs=pl.BlockSpec((M_step, tn), o_map),
            scratch_shapes=[pltpu.VMEM((M_step, K_tot), compute_dtype)],
        ),
        compiler_params=pltpu.CompilerParams(
            dimension_semantics=("parallel", "parallel"),
            vmem_limit_bytes=vmem_limit,
        ),
    )(x, params["w"], params["b"])

    return out.reshape(N, OH, OW, Cout_p)


def conv2d_pallas(x_nchw, weight, bias, *, stride=1, padding=0,
                  compute_dtype=jnp.bfloat16, params=None):
    """Equivalent to torch.nn.Conv2d(...).forward(x) for NCHW input/output.

    NCHW <-> NHWC transposes happen only at the public boundary; everything
    inside is channels-last (lane-dense).  Pass `params` (from
    prepare_conv2d_params) to skip the per-call weight transform.
    """
    if params is None:
        # TODO(synk): in a real model, prepare once per layer and cache/reuse.
        params = prepare_conv2d_params(weight, bias, compute_dtype=compute_dtype)
    x_nhwc = jnp.transpose(x_nchw, (0, 2, 3, 1))
    y = conv2d_pallas_nhwc(x_nhwc, params, stride=stride, padding=padding)
    # Drop padded channels and return to NCHW in one fused boundary op.
    y = jnp.transpose(y[..., :params["Cout"]], (0, 3, 1, 2))
    return y


def conv2d_forward(x, weight, bias, *, stride=1, padding=0):
    """Reproduces the PyTorch Module's forward: if x is a tuple/list, cat along
    batch, convolve, then split back to the original sizes."""
    split = isinstance(x, (tuple, list))
    if split:
        sizes = [k.shape[0] for k in x]
        x = jnp.concatenate(x, axis=0)
    y = conv2d_pallas(x, weight, bias, stride=stride, padding=padding)
    if split:
        offs = [0]
        for s in sizes:
            offs.append(offs[-1] + s)
        y = tuple(y[offs[i]:offs[i + 1]] for i in range(len(sizes)))
    return y


if __name__ == "__main__":
    # Deterministic parameter / input construction (synthetic, no checkpoint).
    N, Cin, H, W = 2, 4, 16, 16
    Cout, KH, KW = 8, 3, 3
    stride, padding = 1, 1

    key = jax.random.PRNGKey(0)
    kx, kwt, kb = jax.random.split(key, 3)
    x = jax.random.normal(kx, (N, Cin, H, W), dtype=jnp.float32)
    fan_in = Cin * KH * KW
    bound = 1.0 / (fan_in ** 0.5)
    weight = jax.random.uniform(kwt, (Cout, Cin, KH, KW), jnp.float32, -bound, bound)
    bias = jax.random.uniform(kb, (Cout,), jnp.float32, -bound, bound)

    y = conv2d_forward(x, weight, bias, stride=stride, padding=padding)
    y = jax.block_until_ready(y)
    assert y.shape == (N, Cout, H, W)

    # Reference 1: same bf16 operands, f32 accumulation -> tight tolerance.
    y_ref_bf16 = jax.lax.conv_general_dilated(
        x.astype(jnp.bfloat16), weight.astype(jnp.bfloat16),
        window_strides=(stride, stride),
        padding=[(padding, padding), (padding, padding)],
        dimension_numbers=("NCHW", "OIHW", "NCHW"),
        preferred_element_type=jnp.float32,
    ) + bias[None, :, None, None]
    assert jnp.allclose(y, y_ref_bf16, atol=1e-3, rtol=1e-3)

    # Reference 2: full-f32 conv -> loose tolerance (bf16 operand rounding).
    y_ref_f32 = jax.lax.conv_general_dilated(
        x, weight, window_strides=(stride, stride),
        padding=[(padding, padding), (padding, padding)],
        dimension_numbers=("NCHW", "OIHW", "NCHW"),
    ) + bias[None, :, None, None]
    assert jnp.allclose(y, y_ref_f32, atol=5e-2, rtol=5e-2)

    # Also exercise the tuple/list ("split") path of the original forward.
    y_split = conv2d_forward([x[:1], x[1:]], weight, bias,
                             stride=stride, padding=padding)
    jax.block_until_ready(y_split)
    assert isinstance(y_split, tuple) and y_split[0].shape == (1, Cout, H, W)
    assert jnp.allclose(jnp.concatenate(y_split, axis=0), y, atol=1e-6, rtol=1e-6)

    print("KERNEL_OK")
</pallas_src>

<mosaic_0001>
module attributes {stable_mosaic.version = 11 : i64} {
  func.func @_conv_fused_kernel(%arg0: i32, %arg1: i32, %arg2: memref<2x18x18x4xbf16, #tpu.memory_space<vmem>>, %arg3: memref<36x128xbf16, #tpu.memory_space<vmem>>, %arg4: memref<1x128xf32, #tpu.memory_space<vmem>>, %arg5: memref<512x128xf32, #tpu.memory_space<vmem>>, %arg6: memref<512x36xbf16, #tpu.memory_space<vmem>>) attributes {dimension_semantics = [#tpu.dimension_semantics<parallel>, #tpu.dimension_semantics<parallel>], iteration_bounds = array<i64: 1, 1>, scalar_prefetch = 0 : i64, scratch_operands = 1 : i64, tpu.core_type = #tpu.core_type<tc>, window_params = [{transform_indices = @transform_0, window_bounds = array<i64: 2, 18, 18, 4>}, {transform_indices = @transform_1, window_bounds = array<i64: 36, 128>}, {transform_indices = @transform_2, window_bounds = array<i64: 1, 128>}, {transform_indices = @transform_3, window_bounds = array<i64: 512, 128>}]} {
    %c0 = arith.constant 0 : index
    %c0_0 = arith.constant 0 : index
    %c0_1 = arith.constant 0 : index
    %c0_2 = arith.constant 0 : index
    %0 = vector.load %arg2[%c0, %c0_0, %c0_1, %c0_2] : memref<2x18x18x4xbf16, #tpu.memory_space<vmem>>, vector<2x16x18x4xbf16>
    %1 = vector.extract_strided_slice %0 {offsets = [0, 0, 0, 0], sizes = [2, 16, 16, 4], strides = [1, 1, 1, 1]} : vector<2x16x18x4xbf16> to vector<2x16x16x4xbf16>
    %2 = vector.shape_cast %1 : vector<2x16x16x4xbf16> to vector<512x4xbf16>
    %c0_3 = arith.constant 0 : index
    %c0_4 = arith.constant 0 : index
    %3 = vector.load %arg6[%c0_3, %c0_4] : memref<512x36xbf16, #tpu.memory_space<vmem>>, vector<512x4xbf16>
    tpu.vector_store %arg6[%c0_3, %c0_4], %2 {strides = array<i32>} : memref<512x36xbf16, #tpu.memory_space<vmem>>, vector<512x4xbf16>,
    %4 = vector.extract_strided_slice %0 {offsets = [0, 0, 1, 0], sizes = [2, 16, 16, 4], strides = [1, 1, 1, 1]} : vector<2x16x18x4xbf16> to vector<2x16x16x4xbf16>
    %5 = vector.shape_cast %4 : vector<2x16x16x4xbf16> to vector<512x4xbf16>
    %c0_5 = arith.constant 0 : index
    %c4 = arith.constant 4 : index
    %6 = vector.load %arg6[%c0_5, %c4] : memref<512x36xbf16, #tpu.memory_space<vmem>>, vector<512x4xbf16>
    tpu.vector_store %arg6[%c0_5, %c4], %5 {strides = array<i32>} : memref<512x36xbf16, #tpu.memory_space<vmem>>, vector<512x4xbf16>,
    %7 = vector.extract_strided_slice %0 {offsets = [0, 0, 2, 0], sizes = [2, 16, 16, 4], strides = [1, 1, 1, 1]} : vector<2x16x18x4xbf16> to vector<2x16x16x4xbf16>
    %8 = vector.shape_cast %7 : vector<2x16x16x4xbf16> to vector<512x4xbf16>
    %c0_6 = arith.constant 0 : index
    %c8 = arith.constant 8 : index
    %9 = vector.load %arg6[%c0_6, %c8] : memref<512x36xbf16, #tpu.memory_space<vmem>>, vector<512x4xbf16>
    tpu.vector_store %arg6[%c0_6, %c8], %8 {strides = array<i32>} : memref<512x36xbf16, #tpu.memory_space<vmem>>, vector<512x4xbf16>,
    %c0_7 = arith.constant 0 : index
    %c1 = arith.constant 1 : index
    %c0_8 = arith.constant 0 : index
    %c0_9 = arith.constant 0 : index
    %10 = vector.load %arg2[%c0_7, %c1, %c0_8, %c0_9] : memref<2x18x18x4xbf16, #tpu.memory_space<vmem>>, vector<2x16x18x4xbf16>
    %11 = vector.extract_strided_slice %10 {offsets = [0, 0, 0, 0], sizes = [2, 16, 16, 4], strides = [1, 1, 1, 1]} : vector<2x16x18x4xbf16> to vector<2x16x16x4xbf16>
    %12 = vector.shape_cast %11 : vector<2x16x16x4xbf16> to vector<512x4xbf16>
    %c0_10 = arith.constant 0 : index
    %c12 = arith.constant 12 : index
    %13 = vector.load %arg6[%c0_10, %c12] : memref<512x36xbf16, #tpu.memory_space<vmem>>, vector<512x4xbf16>
    tpu.vector_store %arg6[%c0_10, %c12], %12 {strides = array<i32>} : memref<512x36xbf16, #tpu.memory_space<vmem>>, vector<512x4xbf16>,
    %14 = vector.extract_strided_slice %10 {offsets = [0, 0, 1, 0], sizes = [2, 16, 16, 4], strides = [1, 1, 1, 1]} : vector<2x16x18x4xbf16> to vector<2x16x16x4xbf16>
    %15 = vector.shape_cast %14 : vector<2x16x16x4xbf16> to vector<512x4xbf16>
    %c0_11 = arith.constant 0 : index
    %c16 = arith.constant 16 : index
    %16 = vector.load %arg6[%c0_11, %c16] : memref<512x36xbf16, #tpu.memory_space<vmem>>, vector<512x4xbf16>
    tpu.vector_store %arg6[%c0_11, %c16], %15 {strides = array<i32>} : memref<512x36xbf16, #tpu.memory_space<vmem>>, vector<512x4xbf16>,
    %17 = vector.extract_strided_slice %10 {offsets = [0, 0, 2, 0], sizes = [2, 16, 16, 4], strides = [1, 1, 1, 1]} : vector<2x16x18x4xbf16> to vector<2x16x16x4xbf16>
    %18 = vector.shape_cast %17 : vector<2x16x16x4xbf16> to vector<512x4xbf16>
    %c0_12 = arith.constant 0 : index
    %c20 = arith.constant 20 : index
    %19 = vector.load %arg6[%c0_12, %c20] : memref<512x36xbf16, #tpu.memory_space<vmem>>, vector<512x4xbf16>
    tpu.vector_store %arg6[%c0_12, %c20], %18 {strides = array<i32>} : memref<512x36xbf16, #tpu.memory_space<vmem>>, vector<512x4xbf16>,
    %c0_13 = arith.constant 0 : index
    %c2 = arith.constant 2 : index
    %c0_14 = arith.constant 0 : index
    %c0_15 = arith.constant 0 : index
    %20 = vector.load %arg2[%c0_13, %c2, %c0_14, %c0_15] : memref<2x18x18x4xbf16, #tpu.memory_space<vmem>>, vector<2x16x18x4xbf16>
    %21 = vector.extract_strided_slice %20 {offsets = [0, 0, 0, 0], sizes = [2, 16, 16, 4], strides = [1, 1, 1, 1]} : vector<2x16x18x4xbf16> to vector<2x16x16x4xbf16>
    %22 = vector.shape_cast %21 : vector<2x16x16x4xbf16> to vector<512x4xbf16>
    %c0_16 = arith.constant 0 : index
    %c24 = arith.constant 24 : index
    %23 = vector.load %arg6[%c0_16, %c24] : memref<512x36xbf16, #tpu.memory_space<vmem>>, vector<512x4xbf16>
    tpu.vector_store %arg6[%c0_16, %c24], %22 {strides = array<i32>} : memref<512x36xbf16, #tpu.memory_space<vmem>>, vector<512x4xbf16>,
    %24 = vector.extract_strided_slice %20 {offsets = [0, 0, 1, 0], sizes = [2, 16, 16, 4], strides = [1, 1, 1, 1]} : vector<2x16x18x4xbf16> to vector<2x16x16x4xbf16>
    %25 = vector.shape_cast %24 : vector<2x16x16x4xbf16> to vector<512x4xbf16>
    %c0_17 = arith.constant 0 : index
    %c28 = arith.constant 28 : index
    %26 = vector.load %arg6[%c0_17, %c28] : memref<512x36xbf16, #tpu.memory_space<vmem>>, vector<512x4xbf16>
    tpu.vector_store %arg6[%c0_17, %c28], %25 {strides = array<i32>} : memref<512x36xbf16, #tpu.memory_space<vmem>>, vector<512x4xbf16>,
    %27 = vector.extract_strided_slice %20 {offsets = [0, 0, 2, 0], sizes = [2, 16, 16, 4], strides = [1, 1, 1, 1]} : vector<2x16x18x4xbf16> to vector<2x16x16x4xbf16>
    %28 = vector.shape_cast %27 : vector<2x16x16x4xbf16> to vector<512x4xbf16>
    %c0_18 = arith.constant 0 : index
    %c32 = arith.constant 32 : index
    %29 = vector.load %arg6[%c0_18, %c32] : memref<512x36xbf16, #tpu.memory_space<vmem>>, vector<512x4xbf16>
    tpu.vector_store %arg6[%c0_18, %c32], %28 {strides = array<i32>} : memref<512x36xbf16, #tpu.memory_space<vmem>>, vector<512x4xbf16>,
    %c0_19 = arith.constant 0 : index
    %c0_20 = arith.constant 0 : index
    %30 = vector.load %arg6[%c0_19, %c0_20] : memref<512x36xbf16, #tpu.memory_space<vmem>>, vector<512x36xbf16>
    %c0_21 = arith.constant 0 : index
    %c0_22 = arith.constant 0 : index
    %31 = vector.load %arg3[%c0_21, %c0_22] : memref<36x128xbf16, #tpu.memory_space<vmem>>, vector<36x128xbf16>
    %cst = arith.constant dense<0.000000e+00> : vector<512x128xf32>
    %32 = tpu.matmul %30, %31, %cst {dimension_numbers = #tpu.dot_dimension_numbers<[1], [0], [0], [1], [0, 0, 1, 1], [], []>} : vector<512x36xbf16>, vector<36x128xbf16>, vector<512x128xf32> -> vector<512x128xf32>
    %c0_23 = arith.constant 0 : index
    %c0_24 = arith.constant 0 : index
    %33 = vector.load %arg4[%c0_23, %c0_24] : memref<1x128xf32, #tpu.memory_space<vmem>>, vector<1x128xf32>
    %34 = vector.broadcast %33 : vector<1x128xf32> to vector<512x128xf32>
    %35 = arith.addf %32, %34 : vector<512x128xf32>
    %c0_25 = arith.constant 0 : index
    %c0_26 = arith.constant 0 : index
    %36 = vector.load %arg5[%c0_25, %c0_26] : memref<512x128xf32, #tpu.memory_space<vmem>>, vector<512x128xf32>
    tpu.vector_store %arg5[%c0_25, %c0_26], %35 {strides = array<i32>} : memref<512x128xf32, #tpu.memory_space<vmem>>, vector<512x128xf32>,
    return
  }
  func.func @transform_0(%arg0: i32, %arg1: i32) -> (i32, i32, i32, i32) {
    %c0_i32 = arith.constant 0 : i32
    %c0_i32_0 = arith.constant 0 : i32
    %c0_i32_1 = arith.constant 0 : i32
    %c0_i32_2 = arith.constant 0 : i32
    return %arg1, %c0_i32, %c0_i32_0, %c0_i32_1 : i32, i32, i32, i32
  }
  func.func @transform_1(%arg0: i32, %arg1: i32) -> (i32, i32) {
    %c0_i32 = arith.constant 0 : i32
    %c0_i32_0 = arith.constant 0 : i32
    return %c0_i32, %arg0 : i32, i32
  }
  func.func @transform_2(%arg0: i32, %arg1: i32) -> (i32, i32) {
    %c0_i32 = arith.constant 0 : i32
    %c0_i32_0 = arith.constant 0 : i32
    return %c0_i32, %arg0 : i32, i32
  }
  func.func @transform_3(%arg0: i32, %arg1: i32) -> (i32, i32) {
    %c0_i32 = arith.constant 0 : i32
    return %arg1, %arg0 : i32, i32
  }
}

</mosaic_0001>

<bundles_post_ra>
// kernel: tpu_custom_call.1
= control target key start
LH: loop header
LB: loop body
LE: loop exit
PB: predicated region body
PF: predicated region fallthrough
CT: control target
= control target key end

     0   :  { %vm177_vm0 = vsmask.f32 3328  ;;  %vm178_vm1 = vsmask.f32 7440  ;;  %vm112_vm2 = vcmask 27648   ;;  %s7088_s9 = smov 4   ;;  %s12004_s0 = inlined_call_operand.vmem [shape: bf16[2,18,18,4], index: 0, kind: input, shape index: {}]   ;;  %s12005_s1 = inlined_call_operand.vmem [shape: bf16[36,128], index: 1, kind: input, shape index: {}]   ;;  %s12006_s2 = inlined_call_operand.vmem [shape: f32[1,128], index: 2, kind: input, shape index: {}]   ;;  %s12007_s3 = inlined_call_operand.hbm [shape: f32[512,128], index: 3, kind: output, shape index: {}]  }
   0x1   :  { %v7121_v0 = vld [vmem:[%s12004_s0 + $0xc] sm:$0xf]  ;;  %v7126_v1 = vld [vmem:[%s12004_s0 + $0x10] sm:$0xf]  ;;  %v7134_v5 = vld [vmem:[%s12004_s0] sm:$0xf] }
   0x2   :  { %v205_v2 = vshrl.u32 %v7121_v0, 16  ;;  %v208_v3 = vshll.u32 %v7121_v0, 16  ;;  %v214_v4 = vshll.u32 %v7126_v1, 16  ;;  %v7139_v6 = vld [vmem:[%s12004_s0 + $0x4] sm:$0xf]  ;;  %v218_v7 = vshrl.u32 %v7126_v1, 16  ;;  %vm7167_vm3 = vmor %vm177_vm0, %vm178_vm1 }
   0x3   :  { %v181_v11 = vshrl.u32 %v7134_v5, 16  ;;  %v21_v12 = vld [vmem:[%s12004_s0 + $0x14] sm:$0x1]  ;;  %115 = vst.msk [vmem:[#allocation2 + $0x8] sm:$0xf] %vm112_vm2, %v7121_v0  ;;  %v184_v13 = vshll.u32 %v7134_v5, 16 }
   0x4   :  { %v207_v8 = vrot.slane %v205_v2, 4  ;;  %v210_v9 = vrot.slane %v208_v3, 5  ;;  %v216_v10 = vrot.slane %v214_v4, 5  ;;  %113 = vst.msk [vmem:[#allocation2] sm:$0xf] %vm112_vm2, %v7134_v5  ;;  %v190_v14 = vshll.u32 %v7139_v6, 16 }
   0x5   :  { %114 = vst.msk [vmem:[#allocation2 + $0x4] sm:$0xf] %vm112_vm2, %v7139_v6  ;;  %116 = vst.msk [vmem:[#allocation2 + $0xc] sm:$0xf] %vm112_vm2, %v7126_v1  ;;  %v220_v15 = vrot.slane %v218_v7, 4  ;;  %v224_v16 = vshll.u32 %v21_v12, 16 }
   0x6   :  { %v18_v17 = vld [vmem:[%s12004_s0 + $0x8] sm:$0x1]  ;;  %v211_v18 = vor.u32 %v210_v9, %v207_v8  ;;  %v183_v19 = vrot.slane %v181_v11, 4  ;;  %v194_v20 = vshrl.u32 %v7139_v6, 16  ;;  %v7163_v22 = vld [vmem:[%s12004_s0 + $0x1c] sm:$0xf] }
   0x7   :  { %v200_v21 = vshll.u32 %v18_v17, 16  ;;  %v186_v24 = vrot.slane %v184_v13, 5  ;;  %v192_v25 = vrot.slane %v190_v14, 5  ;;  %v221_v26 = vor.u32 %v220_v15, %v216_v10  ;;  %v24_v28 = vld [vmem:[%s12004_s0 + $0x20] sm:$0x1] }
   0x8   :  { %v226_v27 = vrot.slane %v224_v16, 5  ;;  %118 = vst.msk [vmem:[#allocation2 + $0x14] sm:$0xf] %vm112_vm2, %v7163_v22  ;;  %v212_v29 = vrot.slane %v211_v18, 4  ;;  %v196_v30 = vrot.slane %v194_v20, 4  ;;  %v238_v32 = vshll.u32 %v7163_v22, 16 }
   0x9   :  { %v202_v31 = vrot.slane %v200_v21, 5  ;;  %v7180_v33 = vld [vmem:[%s12004_s0 + $0x18] sm:$0xf]  ;;  %v187_v34 = vor.u32 %v186_v24, %v183_v19  ;;  %v222_v35 = vrot.slane %v221_v26, 4  ;;  %v242_v36 = vshrl.u32 %v7163_v22, 16 }
   0xa   :  { %v248_v37 = vshll.u32 %v24_v28, 16  ;;  %v7186_v38 = vld [vmem:[%s12004_s0 + $0x28] sm:$0xf]  ;;  %117 = vst.msk [vmem:[#allocation2 + $0x10] sm:$0xf] %vm112_vm2, %v7180_v33  ;;  %v217_v39 = vsel %vm7167_vm3, %v212_v29, %v216_v10  ;;  %v197_v40 = vor.u32 %v196_v30, %v192_v25  ;;  %v7192_v41 = vrot.slane %v238_v32, 5 }
   0xb   :  { %v229_v42 = vshrl.u32 %v7180_v33, 16  ;;  %v27_v43 = vld [vmem:[%s12004_s0 + $0x2c] sm:$0x1]  ;;  %v7201_v44 = vld [vmem:[%s12004_s0 + $0x24] sm:$0xf]  ;;  %952 = vrot.lane.b32.xlu1 %v217_v39, %s7088_s9  ;;  %v188_v45 = vrot.slane %v187_v34, 4  ;;  %v227_v46 = vsel %vm7167_vm3, %v222_v35, %v226_v27 }
   0xc   :  { %120 = vst.msk [vmem:[#allocation2 + $0x1c] sm:$0xf] %vm112_vm2, %v7186_v38  ;;  %v244_v47 = vrot.slane %v242_v36, 4  ;;  %v250_v48 = vrot.slane %v248_v37, 5  ;;  %v7211_v49 = vld [vmem:[%s12004_s0 + $0x34] sm:$0xf] }
   0xd   :  { %119 = vst.msk [vmem:[#allocation2 + $0x18] sm:$0xf] %vm112_vm2, %v7201_v44  ;;  %v198_v50 = vrot.slane %v197_v40, 4  ;;  %v231_v51 = vrot.slane %v229_v42, 4  ;;  %v232_v52 = vshll.u32 %v7180_v33, 16  ;;  %v262_v53 = vshll.u32 %v7186_v38, 16 }
   0xe   :  { %122 = vst.msk [vmem:[#allocation2 + $0x24] sm:$0xf] %vm112_vm2, %v7211_v49  ;;  %v193_v54 = vsel %vm7167_vm3, %v188_v45, %v192_v25  ;;  %v245_v55 = vor.u32 %v244_v47, %v7192_v41  ;;  %v266_v56 = vshrl.u32 %v7186_v38, 16  ;;  %v272_v57 = vshll.u32 %v27_v43, 16  ;;  %v7226_v58 = vld [vmem:[%s12004_s0 + $0x30] sm:$0xf] }
   0xf   :  { %v7231_v59 = vld [vmem:[%s12004_s0 + $0x40] sm:$0xf]  ;;  %948 = vrot.lane.b32.xlu0 %v193_v54, %s7088_s9  ;;  %v203_v60 = vsel %vm7167_vm3, %v198_v50, %v202_v31  ;;  %v234_v61 = vrot.slane %v232_v52, 5  ;;  %v7236_v62 = vrot.slane %v262_v53, 5  ;;  %v253_v63 = vshrl.u32 %v7201_v44, 16  ;;  %954 = vrot.lane.b32.xlu1 %v227_v46, %s7088_s9 }
  0x10   :  { %v30_v2 = vld [vmem:[%s12004_s0 + $0x38] sm:$0x1]  ;;  %121 = vst.msk [vmem:[#allocation2 + $0x20] sm:$0xf] %vm112_vm2, %v7226_v58  ;;  %124 = vst.msk [vmem:[#allocation2 + $0x2c] sm:$0xf] %vm112_vm2, %v7231_v59 }
  0x11   :  { %v246_v3 = vrot.slane %v245_v55, 4  ;;  %v268_v4 = vrot.slane %v266_v56, 4  ;;  %v274_v7 = vrot.slane %v272_v57, 5  ;;  %v256_v8 = vshll.u32 %v7201_v44, 16  ;;  %v7251_v9 = vld [vmem:[%s12004_s0 + $0x3c] sm:$0xf] }
  0x12   :  { %v235_v10 = vor.u32 %v234_v61, %v231_v51  ;;  %v255_v11 = vrot.slane %v253_v63, 4  ;;  %v286_v12 = vshll.u32 %v7211_v49, 16  ;;  %v290_v13 = vshrl.u32 %v7211_v49, 16  ;;  %v7258_v14 = vld [vmem:[%s12004_s0 + $0x4c] sm:$0xf] }
  0x13   :  { %123 = vst.msk [vmem:[#allocation2 + $0x28] sm:$0xf] %vm112_vm2, %v7251_v9  ;;  %v251_v15 = vsel %vm7167_vm3, %v246_v3, %v250_v48  ;;  %v269_v16 = vor.u32 %v268_v4, %v7236_v62  ;;  %v258_v17 = vrot.slane %v256_v8, 5  ;;  %v296_v18 = vshll.u32 %v30_v2, 16  ;;  %v7268_v19 = vld [vmem:[%s12004_s0 + $0x48] sm:$0xf]  ;;  %950 = vrot.lane.b32.xlu0 %v203_v60, %s7088_s9 }
  0x14   :  { %12054 = vst [vmem:[#allocation6_spill] sm:$0xff] %v7268_v19  ;;  %126 = vst.msk [vmem:[#allocation2 + $0x34] sm:$0xf] %vm112_vm2, %v7258_v14  ;;  %v236_v20 = vrot.slane %v235_v10, 4  ;;  %v7273_v21 = vrot.slane %v286_v12, 5  ;;  %v292_v24 = vrot.slane %v290_v13, 4  ;;  %958 = vrot.lane.b32.xlu1 %v251_v15, %s7088_s9 }
  0x15   :  { %v277_v25 = vshrl.u32 %v7226_v58, 16  ;;  %v7279_v26 = vld [vmem:[%s12004_s0 + $0x58] sm:$0xf]  ;;  %125 = vst.msk [vmem:[#allocation2 + $0x30] sm:$0xf] %vm112_vm2, %v7268_v19  ;;  %v270_v27 = vrot.slane %v269_v16, 4  ;;  %v259_v28 = vor.u32 %v258_v17, %v255_v11 }
  0x16   :  { %v298_v29 = vrot.slane %v296_v18, 5  ;;  %v280_v30 = vshll.u32 %v7226_v58, 16  ;;  %v33_v31 = vld [vmem:[%s12004_s0 + $0x44] sm:$0x1]  ;;  %128 = vst.msk [vmem:[#allocation2 + $0x3c] sm:$0xf] %vm112_vm2, %v7279_v26  ;;  %v241_v32 = vsel %vm7167_vm3, %v236_v20, %v7192_v41  ;;  %v293_v34 = vor.u32 %v292_v24, %v7273_v21 }
  0x17   :  { %v279_v35 = vrot.slane %v277_v25, 4  ;;  %v310_v36 = vshll.u32 %v7231_v59, 16  ;;  %v7298_v37 = vld [vmem:[%s12004_s0 + $0x54] sm:$0xf]  ;;  %v7303_v39 = vld [vmem:[%s12004_s0 + $0x64] sm:$0xf]  ;;  %v275_v40 = vsel %vm7167_vm3, %v270_v27, %v274_v7  ;;  %956 = vrot.lane.b32.xlu0 %v241_v32, %s7088_s9 }
  0x18   :  { %12055 = vst [vmem:[#allocation7_spill] sm:$0xff] %v7298_v37  ;;  %12056 = vst [vmem:[#allocation8_spill] sm:$0xff] %v7303_v39  ;;  %v260_v42 = vrot.slane %v259_v28, 4  ;;  %v282_v41 = vrot.slane %v280_v30, 5  ;;  %v314_v43 = vshrl.u32 %v7231_v59, 16  ;;  %v294_v45 = vrot.slane %v293_v34, 4  ;;  %962 = vrot.lane.b32.xlu1 %v275_v40, %s7088_s9 }
  0x19   :  { %127 = vst.msk [vmem:[#allocation2 + $0x38] sm:$0xf] %vm112_vm2, %v7298_v37  ;;  %130 = vst.msk [vmem:[#allocation2 + $0x44] sm:$0xf] %vm112_vm2, %v7303_v39  ;;  %v7313_v46 = vrot.slane %v310_v36, 5  ;;  %v320_v47 = vshll.u32 %v33_v31, 16 }
  0x1a   :  { %v301_v48 = vshrl.u32 %v7251_v9, 16  ;;  %v7319_v50 = vld [vmem:[%s12004_s0 + $0x60] sm:$0xf]  ;;  %v265_v51 = vsel %vm7167_vm3, %v260_v42, %v7236_v62  ;;  %v283_v52 = vor.u32 %v282_v41, %v279_v35  ;;  %v316_v53 = vrot.slane %v314_v43, 4  ;;  %v36_v55 = vld [vmem:[%s12004_s0 + $0x50] sm:$0x1] }
  0x1b   :  { %12057 = vst [vmem:[#allocation9_spill] sm:$0xff] %v7319_v50  ;;  %v304_v54 = vshll.u32 %v7251_v9, 16  ;;  %v7332_v56 = vld [vmem:[%s12004_s0 + $0x70] sm:$0xf]  ;;  %129 = vst.msk [vmem:[#allocation2 + $0x40] sm:$0xf] %vm112_vm2, %v7319_v50  ;;  %v299_v57 = vsel %vm7167_vm3, %v294_v45, %v298_v29  ;;  %960 = vrot.lane.b32.xlu0 %v265_v51, %s7088_s9 }
  0x1c   :  { %12058 = vst [vmem:[#allocation10_spill] sm:$0xff] %v7332_v56  ;;  %v322_v60 = vrot.slane %v320_v47, 5  ;;  %v303_v61 = vrot.slane %v301_v48, 4  ;;  %v334_v62 = vshll.u32 %v7258_v14, 16  ;;  %v7342_v63 = vld [vmem:[%s12004_s0 + $0x6c] sm:$0xf]  ;;  %v317_v3 = vor.u32 %v316_v53, %v7313_v46  ;;  %966 = vrot.lane.b32.xlu1 %v299_v57, %s7088_s9 }
  0x1d   :  { %12059 = vst [vmem:[#allocation11_spill] sm:$0xff] %v7342_v63  ;;  %132 = vst.msk [vmem:[#allocation2 + $0x4c] sm:$0xf] %vm112_vm2, %v7332_v56  ;;  %v284_v2 = vrot.slane %v283_v52, 4  ;;  %v306_v4 = vrot.slane %v304_v54, 5  ;;  %v338_v7 = vshrl.u32 %v7258_v14, 16 }
  0x1e   :  { %v7351_v8 = vld [vmem:[%s12004_s0 + $0x7c] sm:$0xf]  ;;  %131 = vst.msk [vmem:[#allocation2 + $0x48] sm:$0xf] %vm112_vm2, %v7342_v63  ;;  %v7356_v10 = vrot.slane %v334_v62, 5  ;;  %v344_v11 = vshll.u32 %v36_v55, 16 }
  0x1f   :  { %12060 = vst [vmem:[#allocation12_spill] sm:$0xff] %v7351_v8  ;;  %v325_v12 = vshrl.u32 %v7268_v19, 16  ;;  %v328_v13 = vshll.u32 %v7268_v19, 16  ;;  %v39_v15 = vld [vmem:[%s12004_s0 + $0x5c] sm:$0x1]  ;;  %v289_v16 = vsel %vm7167_vm3, %v284_v2, %v7273_v21  ;;  %v318_v17 = vrot.slane %v317_v3, 4 }
  0x20   :  { %134 = vst.msk [vmem:[#allocation2 + $0x54] sm:$0xf] %vm112_vm2, %v7351_v8  ;;  %v307_v18 = vor.u32 %v306_v4, %v303_v61  ;;  %v340_v20 = vrot.slane %v338_v7, 4  ;;  %v7372_v24 = vld [vmem:[%s12004_s0 + $0x78] sm:$0xf]  ;;  %v346_v27 = vrot.slane %v344_v11, 5  ;;  %964 = vrot.lane.b32.xlu0 %v289_v16, %s7088_s9 }
  0x21   :  { %12061 = vst [vmem:[#allocation13_spill] sm:$0xff] %v7372_v24  ;;  %v7377_v25 = vld [vmem:[%s12004_s0 + $0x88] sm:$0xf]  ;;  %v327_v28 = vrot.slane %v325_v12, 4  ;;  %v330_v29 = vrot.slane %v328_v13, 5  ;;  %v358_v30 = vshll.u32 %v7279_v26, 16  ;;  %v323_v21 = vsel %vm7167_vm3, %v318_v17, %v322_v60 }
  0x22   :  { %12062 = vst [vmem:[#allocation14_spill] sm:$0xff] %v7377_v25  ;;  %133 = vst.msk [vmem:[#allocation2 + $0x50] sm:$0xf] %vm112_vm2, %v7372_v24  ;;  %v308_v31 = vrot.slane %v307_v18, 4  ;;  %v341_v32 = vor.u32 %v340_v20, %v7356_v10  ;;  %v362_v34 = vshrl.u32 %v7279_v26, 16  ;;  %v368_v41 = vshll.u32 %v39_v15, 16  ;;  %970 = vrot.lane.b32.xlu1 %v323_v21, %s7088_s9 }
  0x23   :  { %136 = vst.msk [vmem:[#allocation2 + $0x5c] sm:$0xf] %vm112_vm2, %v7377_v25  ;;  %v7391_v35 = vld [vmem:[%s12004_s0 + $0x84] sm:$0xf]  ;;  %v7396_v36 = vld [vmem:[%s12004_s0 + $0x94] sm:$0xf]  ;;  %v331_v40 = vor.u32 %v330_v29, %v327_v28 }
  0x24   :  { %12063 = vst [vmem:[#allocation15_spill] sm:$0xff] %v7391_v35  ;;  %12064 = vst [vmem:[#allocation16_spill] sm:$0xff] %v7396_v36  ;;  %v7399_v42 = vrot.slane %v358_v30, 5  ;;  %v349_v43 = vshrl.u32 %v7298_v37, 16  ;;  %v42_v45 = vld [vmem:[%s12004_s0 + $0x68] sm:$0x1]  ;;  %v313_v47 = vsel %vm7167_vm3, %v308_v31, %v7313_v46 }
  0x25   :  { %135 = vst.msk [vmem:[#allocation2 + $0x58] sm:$0xf] %vm112_vm2, %v7391_v35  ;;  %138 = vst.msk [vmem:[#allocation2 + $0x64] sm:$0xf] %vm112_vm2, %v7396_v36  ;;  %v342_v48 = vrot.slane %v341_v32, 4  ;;  %v364_v51 = vrot.slane %v362_v34, 4  ;;  %968 = vrot.lane.b32.xlu0 %v313_v47, %s7088_s9 }
  0x26   :  { %v352_v52 = vshll.u32 %v7298_v37, 16  ;;  %v7417_v53 = vld [vmem:[%s12004_s0 + $0x90] sm:$0xf]  ;;  %v332_v54 = vrot.slane %v331_v40, 4  ;;  %v370_v55 = vrot.slane %v368_v41, 5  ;;  %v351_v57 = vrot.slane %v349_v43, 4 }
  0x27   :  { %12065 = vst [vmem:[#allocation17_spill] sm:$0xff] %v7417_v53  ;;  %v382_v60 = vshll.u32 %v7303_v39, 16  ;;  %v7423_v61 = vld [vmem:[%s12004_s0 + $0xa0] sm:$0xf]  ;;  %137 = vst.msk [vmem:[#allocation2 + $0x60] sm:$0xf] %vm112_vm2, %v7417_v53  ;;  %v347_v46 = vsel %vm7167_vm3, %v342_v48, %v346_v27  ;;  %v365_v62 = vor.u32 %v364_v51, %v7399_v42 }
  0x28   :  { %12066 = vst [vmem:[#allocation18_spill] sm:$0xff] %v7423_v61  ;;  %v354_v2 = vrot.slane %v352_v52, 5  ;;  %v386_v3 = vshrl.u32 %v7303_v39, 16  ;;  %v7434_v4 = vld [vmem:[%s12004_s0 + $0x9c] sm:$0xf]  ;;  %v337_v7 = vsel %vm7167_vm3, %v332_v54, %v7356_v10  ;;  %v392_v12 = vshll.u32 %v42_v45, 16  ;;  %974 = vrot.lane.b32.xlu1 %v347_v46, %s7088_s9 }
  0x29   :  { %12067 = vst [vmem:[#allocation19_spill] sm:$0xff] %v7434_v4  ;;  %140 = vst.msk [vmem:[#allocation2 + $0x6c] sm:$0xf] %vm112_vm2, %v7423_v61  ;;  %v7442_v11 = vrot.slane %v382_v60, 5  ;;  %v373_v13 = vshrl.u32 %v7319_v50, 16  ;;  %v366_v16 = vrot.slane %v365_v62, 4  ;;  %972 = vrot.lane.b32.xlu0 %v337_v7, %s7088_s9 }
  0x2a   :  { %v7448_v15 = vld [vmem:[%s12004_s0 + $0xac] sm:$0xf]  ;;  %139 = vst.msk [vmem:[#allocation2 + $0x68] sm:$0xf] %vm112_vm2, %v7434_v4  ;;  %v355_v17 = vor.u32 %v354_v2, %v351_v57  ;;  %v388_v18 = vrot.slane %v386_v3, 4  ;;  %v376_v10 = vshll.u32 %v7319_v50, 16 }
  0x2b   :  { %12068 = vst [vmem:[#allocation20_spill] sm:$0xff] %v7448_v15  ;;  %v45_v20 = vld [vmem:[%s12004_s0 + $0x74] sm:$0x1]  ;;  %142 = vst.msk [vmem:[#allocation2 + $0x74] sm:$0xf] %vm112_vm2, %v7448_v15  ;;  %v394_v27 = vrot.slane %v392_v12, 5  ;;  %v371_v31 = vsel %vm7167_vm3, %v366_v16, %v370_v55 }
  0x2c   :  { %v375_v28 = vrot.slane %v373_v13, 4  ;;  %v406_v29 = vshll.u32 %v7332_v56, 16  ;;  %v410_v30 = vshrl.u32 %v7332_v56, 16  ;;  %v7464_v21 = vld [vmem:[%s12004_s0 + $0xa8] sm:$0xf]  ;;  %v356_v32 = vrot.slane %v355_v17, 4  ;;  %978 = vrot.lane.b32.xlu1 %v371_v31, %s7088_s9 }
  0x2d   :  { %12069 = vst [vmem:[#allocation21_spill] sm:$0xff] %v7464_v21  ;;  %v389_v34 = vor.u32 %v388_v18, %v7442_v11  ;;  %v378_v40 = vrot.slane %v376_v10, 5  ;;  %v7472_v41 = vld [vmem:[%s12004_s0 + $0xb8] sm:$0xf]  ;;  %141 = vst.msk [vmem:[#allocation2 + $0x70] sm:$0xf] %vm112_vm2, %v7464_v21 }
  0x2e   :  { %12070 = vst [vmem:[#allocation22_spill] sm:$0xff] %v7472_v41  ;;  %v7477_v43 = vrot.slane %v406_v29, 5  ;;  %v412_v45 = vrot.slane %v410_v30, 4  ;;  %v416_v47 = vshll.u32 %v45_v20, 16  ;;  %v397_v48 = vshrl.u32 %v7342_v63, 16 }
  0x2f   :  { %v7483_v51 = vld [vmem:[%s12004_s0 + $0xb4] sm:$0xf]  ;;  %144 = vst.msk [vmem:[#allocation2 + $0x7c] sm:$0xf] %vm112_vm2, %v7472_v41  ;;  %v361_v52 = vsel %vm7167_vm3, %v356_v32, %v7399_v42  ;;  %v390_v54 = vrot.slane %v389_v34, 4  ;;  %v379_v55 = vor.u32 %v378_v40, %v375_v28  ;;  %v400_v57 = vshll.u32 %v7342_v63, 16 }
  0x30   :  { %12071 = vst [vmem:[#allocation23_spill] sm:$0xff] %v7483_v51  ;;  %v48_v60 = vld [vmem:[%s12004_s0 + $0x80] sm:$0x1]  ;;  %v7498_v46 = vld [vmem:[%s12004_s0 + $0xdc] sm:$0xf]  ;;  %v413_v62 = vor.u32 %v412_v45, %v7477_v43  ;;  %v418_v2 = vrot.slane %v416_v47, 5  ;;  %976 = vrot.lane.b32.xlu0 %v361_v52, %s7088_s9 }
  0x31   :  { %12072 = vst [vmem:[#allocation24_spill] sm:$0xff] %v7498_v46  ;;  %143 = vst.msk [vmem:[#allocation2 + $0x78] sm:$0xf] %vm112_vm2, %v7483_v51  ;;  %v399_v42 = vrot.slane %v397_v48, 4  ;;  %v430_v3 = vshll.u32 %v7351_v8, 16  ;;  %v395_v12 = vsel %vm7167_vm3, %v390_v54, %v394_v27  ;;  %v380_v13 = vrot.slane %v379_v55, 4 }
  0x32   :  { %v7507_v7 = vld [vmem:[%s12004_s0 + $0xd8] sm:$0xf]  ;;  %146 = vst.msk [vmem:[#allocation2 + $0x84] sm:$0xf] %vm112_vm2, %v7498_v46  ;;  %v402_v16 = vrot.slane %v400_v57, 5  ;;  %v434_v17 = vshrl.u32 %v7351_v8, 16  ;;  %982 = vrot.lane.b32.xlu1 %v395_v12, %s7088_s9 }
  0x33   :  { %12073 = vst [vmem:[#allocation25_spill] sm:$0xff] %v7507_v7  ;;  %v7517_v18 = vld [vmem:[%s12004_s0 + $0xe8] sm:$0xf]  ;;  %145 = vst.msk [vmem:[#allocation2 + $0x80] sm:$0xf] %vm112_vm2, %v7507_v7  ;;  %v414_v10 = vrot.slane %v413_v62, 4  ;;  %v385_v30 = vsel %vm7167_vm3, %v380_v13, %v7442_v11 }
  0x34   :  { %12074 = vst [vmem:[#allocation26_spill] sm:$0xff] %v7517_v18  ;;  %v7522_v20 = vrot.slane %v430_v3, 5  ;;  %v440_v28 = vshll.u32 %v48_v60, 16  ;;  %v421_v27 = vshrl.u32 %v7372_v24, 16  ;;  %v51_v29 = vld [vmem:[%s12004_s0 + $0x8c] sm:$0x1]  ;;  %v403_v31 = vor.u32 %v402_v16, %v399_v42  ;;  %980 = vrot.lane.b32.xlu0 %v385_v30, %s7088_s9 }
  0x35   :  { %148 = vst.msk [vmem:[#allocation2 + $0x8c] sm:$0xf] %vm112_vm2, %v7517_v18  ;;  %v436_v32 = vrot.slane %v434_v17, 4  ;;  %v424_v34 = vshll.u32 %v7372_v24, 16  ;;  %v7538_v40 = vld [vmem:[%s12004_s0 + $0xe4] sm:$0xf]  ;;  %v419_v47 = vsel %vm7167_vm3, %v414_v10, %v418_v2 }
  0x36   :  { %12075 = vst [vmem:[#allocation27_spill] sm:$0xff] %v7538_v40  ;;  %v7543_v45 = vld [vmem:[%s12004_s0 + $0xf4] sm:$0xf]  ;;  %v442_v48 = vrot.slane %v440_v28, 5  ;;  %v423_v52 = vrot.slane %v421_v27, 4  ;;  %v454_v11 = vshll.u32 %v7377_v25, 16  ;;  %986 = vrot.lane.b32.xlu1 %v419_v47, %s7088_s9 }
  0x37   :  { %12076 = vst [vmem:[#allocation28_spill] sm:$0xff] %v7543_v45  ;;  %147 = vst.msk [vmem:[#allocation2 + $0x88] sm:$0xf] %vm112_vm2, %v7538_v40  ;;  %v404_v54 = vrot.slane %v403_v31, 4  ;;  %v437_v55 = vor.u32 %v436_v32, %v7522_v20  ;;  %v426_v57 = vrot.slane %v424_v34, 5  ;;  %v458_v60 = vshrl.u32 %v7377_v25, 16 }
  0x38   :  { %150 = vst.msk [vmem:[#allocation2 + $0x94] sm:$0xf] %vm112_vm2, %v7543_v45  ;;  %v7557_v62 = vld [vmem:[%s12004_s0 + $0xf0] sm:$0xf]  ;;  %v7560_v2 = vrot.slane %v454_v11, 5  ;;  %v464_v42 = vshll.u32 %v51_v29, 16 }
  0x39   :  { %12077 = vst [vmem:[#allocation29_spill] sm:$0xff] %v7557_v62  ;;  %v445_v3 = vshrl.u32 %v7391_v35, 16  ;;  %v448_v12 = vshll.u32 %v7391_v35, 16  ;;  %v7567_v13 = vld [vmem:[%s12004_s0 + $0x100] sm:$0xf]  ;;  %v409_v16 = vsel %vm7167_vm3, %v404_v54, %v7477_v43  ;;  %v438_v17 = vrot.slane %v437_v55, 4 }
  0x3a   :  { %12078 = vst [vmem:[#allocation30_spill] sm:$0xff] %v7567_v13  ;;  %149 = vst.msk [vmem:[#allocation2 + $0x90] sm:$0xf] %vm112_vm2, %v7557_v62  ;;  %v427_v10 = vor.u32 %v426_v57, %v423_v52  ;;  %v460_v28 = vrot.slane %v458_v60, 4  ;;  %v54_v27 = vld [vmem:[%s12004_s0 + $0x98] sm:$0x1]  ;;  %984 = vrot.lane.b32.xlu0 %v409_v16, %s7088_s9 }
  0x3b   :  { %v7581_v29 = vld [vmem:[%s12004_s0 + $0xfc] sm:$0xf]  ;;  %152 = vst.msk [vmem:[#allocation2 + $0x9c] sm:$0xf] %vm112_vm2, %v7567_v13  ;;  %v466_v30 = vrot.slane %v464_v42, 5  ;;  %v447_v31 = vrot.slane %v445_v3, 4  ;;  %v443_v47 = vsel %vm7167_vm3, %v438_v17, %v442_v48 }
  0x3c   :  { %v450_v32 = vrot.slane %v448_v12, 5  ;;  %v478_v43 = vshll.u32 %v7396_v36, 16  ;;  %v7589_v34 = vld [vmem:[%s12004_s0 + $0x10c] sm:$0xf]  ;;  %151 = vst.msk [vmem:[#allocation2 + $0x98] sm:$0xf] %vm112_vm2, %v7581_v29  ;;  %v461_v11 = vor.u32 %v460_v28, %v7560_v2  ;;  %990 = vrot.lane.b32.xlu1 %v443_v47, %s7088_s9 }
  0x3d   :  { %v428_v52 = vrot.slane %v427_v10, 4  ;;  %v482_v54 = vshrl.u32 %v7396_v36, 16  ;;  %v7600_v55 = vld [vmem:[%s12004_s0 + $0x108] sm:$0xf]  ;;  %154 = vst.msk [vmem:[#allocation2 + $0xa4] sm:$0xf] %vm112_vm2, %v7589_v34 }
  0x3e   :  { %v451_v57 = vor.u32 %v450_v32, %v447_v31  ;;  %v7605_v60 = vrot.slane %v478_v43, 5  ;;  %v488_v42 = vshll.u32 %v54_v27, 16  ;;  %v469_v48 = vshrl.u32 %v7417_v53, 16  ;;  %v7611_v3 = vld [vmem:[%s12004_s0 + $0x118] sm:$0xf] }
  0x3f   :  { %153 = vst.msk [vmem:[#allocation2 + $0xa0] sm:$0xf] %vm112_vm2, %v7600_v55  ;;  %v433_v12 = vsel %vm7167_vm3, %v428_v52, %v7522_v20  ;;  %v462_v16 = vrot.slane %v461_v11, 4  ;;  %v484_v17 = vrot.slane %v482_v54, 4  ;;  %v472_v10 = vshll.u32 %v7417_v53, 16 }
  0x40   :  { %v57_v28 = vld [vmem:[%s12004_s0 + $0xa4] sm:$0x1]  ;;  %156 = vst.msk [vmem:[#allocation2 + $0xac] sm:$0xf] %vm112_vm2, %v7611_v3  ;;  %v452_v27 = vrot.slane %v451_v57, 4  ;;  %v490_v31 = vrot.slane %v488_v42, 5  ;;  %988 = vrot.lane.b32.xlu0 %v433_v12, %s7088_s9 }
  0x41   :  { %v471_v32 = vrot.slane %v469_v48, 4  ;;  %v502_v43 = vshll.u32 %v7423_v61, 16  ;;  %v7629_v20 = vld [vmem:[%s12004_s0 + $0x114] sm:$0xf]  ;;  %v467_v47 = vsel %vm7167_vm3, %v462_v16, %v466_v30  ;;  %v485_v52 = vor.u32 %v484_v17, %v7605_v60  ;;  %v60_v57 = vld [vmem:[%s12004_s0 + $0xb0] sm:$0x1] }
  0x42   :  { %12079 = vst [vmem:[#allocation31_spill] sm:$0xff] %v7629_v20  ;;  %v474_v11 = vrot.slane %v472_v10, 5  ;;  %v506_v54 = vshrl.u32 %v7423_v61, 16  ;;  %v7641_v42 = vld [vmem:[%s12004_s0 + $0x124] sm:$0xf]  ;;  %v457_v30 = vsel %vm7167_vm3, %v452_v27, %v7560_v2  ;;  %v512_v16 = vshll.u32 %v57_v28, 16  ;;  %994 = vrot.lane.b32.xlu1 %v467_v47, %s7088_s9 }
  0x43   :  { %155 = vst.msk [vmem:[#allocation2 + $0xa8] sm:$0xf] %vm112_vm2, %v7629_v20  ;;  %v7649_v48 = vrot.slane %v502_v43, 5  ;;  %v493_v17 = vshrl.u32 %v7434_v4, 16  ;;  %v7655_v10 = vld [vmem:[%s12004_s0 + $0x120] sm:$0xf] }
  0x44   :  { %158 = vst.msk [vmem:[#allocation2 + $0xb4] sm:$0xf] %vm112_vm2, %v7641_v42  ;;  %v486_v12 = vrot.slane %v485_v52, 4  ;;  %v475_v53 = vor.u32 %v474_v11, %v471_v32  ;;  %v508_v61 = vrot.slane %v506_v54, 4  ;;  %v496_v2 = vshll.u32 %v7434_v4, 16  ;;  %992 = vrot.lane.b32.xlu0 %v457_v30, %s7088_s9 }
  0x45   :  { %v7664_v28 = vld [vmem:[%s12004_s0 + $0x130] sm:$0xf]  ;;  %157 = vst.msk [vmem:[#allocation2 + $0xb0] sm:$0xf] %vm112_vm2, %v7655_v10  ;;  %v514_v27 = vrot.slane %v512_v16, 5  ;;  %v495_v43 = vrot.slane %v493_v17, 4 }
  0x46   :  { %v526_v35 = vshll.u32 %v7448_v15, 16  ;;  %v530_v36 = vshrl.u32 %v7448_v15, 16  ;;  %160 = vst.msk [vmem:[#allocation2 + $0xbc] sm:$0xf] %vm112_vm2, %v7664_v28  ;;  %v491_v32 = vsel %vm7167_vm3, %v486_v12, %v490_v31  ;;  %v476_v47 = vrot.slane %v475_v53, 4 }
  0x47   :  { %v509_v52 = vor.u32 %v508_v61, %v7649_v48  ;;  %v498_v11 = vrot.slane %v496_v2, 5  ;;  %v7678_v54 = vld [vmem:[%s12004_s0 + $0x12c] sm:$0xf]  ;;  %v7683_v16 = vld [vmem:[%s12004_s0 + $0x13c] sm:$0xf]  ;;  %v536_v31 = vshll.u32 %v60_v57, 16  ;;  %998 = vrot.lane.b32.xlu1 %v491_v32, %s7088_s9 }
  0x48   :  { %12080 = vst [vmem:[#allocation32_spill] sm:$0xff] %v7678_v54  ;;  %12081 = vst [vmem:[#allocation33_spill] sm:$0xff] %v7683_v16  ;;  %v7686_v17 = vrot.slane %v526_v35, 5  ;;  %v532_v4 = vrot.slane %v530_v36, 4  ;;  %v517_v53 = vshrl.u32 %v7464_v21, 16  ;;  %v481_v35 = vsel %vm7167_vm3, %v476_v47, %v7605_v60 }
  0x49   :  { %v63_v61 = vld [vmem:[%s12004_s0 + $0xbc] sm:$0x1]  ;;  %159 = vst.msk [vmem:[#allocation2 + $0xb8] sm:$0xf] %vm112_vm2, %v7678_v54  ;;  %162 = vst.msk [vmem:[#allocation2 + $0xc4] sm:$0xf] %vm112_vm2, %v7683_v16  ;;  %v499_v57 = vor.u32 %v498_v11, %v495_v43  ;;  %996 = vrot.lane.b32.xlu0 %v481_v35, %s7088_s9 }
  0x4a   :  { %v510_v36 = vrot.slane %v509_v52, 4  ;;  %v520_v30 = vshll.u32 %v7464_v21, 16  ;;  %v7704_v12 = vld [vmem:[%s12004_s0 + $0x138] sm:$0xf]  ;;  %v7709_v2 = vld [vmem:[%s12004_s0 + $0x148] sm:$0xf]  ;;  %v533_v32 = vor.u32 %v532_v4, %v7686_v17 }
  0x4b   :  { %v538_v15 = vrot.slane %v536_v31, 5  ;;  %v519_v24 = vrot.slane %v517_v53, 4  ;;  %v550_v60 = vshll.u32 %v7472_v41, 16  ;;  %161 = vst.msk [vmem:[#allocation2 + $0xc0] sm:$0xf] %vm112_vm2, %v7704_v12  ;;  %v500_v47 = vrot.slane %v499_v57, 4 }
  0x4c   :  { %164 = vst.msk [vmem:[#allocation2 + $0xcc] sm:$0xf] %vm112_vm2, %v7709_v2  ;;  %v515_v43 = vsel %vm7167_vm3, %v510_v36, %v514_v27  ;;  %v522_v52 = vrot.slane %v520_v30, 5  ;;  %v554_v11 = vshrl.u32 %v7472_v41, 16  ;;  %v7723_v4 = vld [vmem:[%s12004_s0 + $0x144] sm:$0xf] }
  0x4d   :  { %v534_v31 = vrot.slane %v533_v32, 4  ;;  %v7726_v53 = vrot.slane %v550_v60, 5  ;;  %v560_v21 = vshll.u32 %v63_v61, 16  ;;  %v541_v25 = vshrl.u32 %v7483_v51, 16  ;;  %v7732_v27 = vld [vmem:[%s12004_s0 + $0x154] sm:$0xf]  ;;  %1002 = vrot.lane.b32.xlu1 %v515_v43, %s7088_s9 }
  0x4e   :  { %163 = vst.msk [vmem:[#allocation2 + $0xc8] sm:$0xf] %vm112_vm2, %v7723_v4  ;;  %v505_v35 = vsel %vm7167_vm3, %v500_v47, %v7649_v48  ;;  %v523_v36 = vor.u32 %v522_v52, %v519_v24  ;;  %v556_v57 = vrot.slane %v554_v11, 4  ;;  %v544_v61 = vshll.u32 %v7483_v51, 16  ;;  %v66_v30 = vld [vmem:[%s12004_s0 + $0xe0] sm:$0x1] }
  0x4f   :  { %v7747_v32 = vld [vmem:[%s12004_s0 + $0x150] sm:$0xf]  ;;  %166 = vst.msk [vmem:[#allocation2 + $0xd4] sm:$0xf] %vm112_vm2, %v7732_v27  ;;  %v539_v60 = vsel %vm7167_vm3, %v534_v31, %v538_v15  ;;  %v562_v48 = vrot.slane %v560_v21, 5  ;;  %v543_v24 = vrot.slane %v541_v25, 4  ;;  %1000 = vrot.lane.b32.xlu0 %v505_v35, %s7088_s9 }
  0x50   :  { %12082 = vst [vmem:[#allocation34_spill] sm:$0xff] %v7747_v32  ;;  %v574_v43 = vshll.u32 %v7498_v46, 16  ;;  %v7757_v47 = vld [vmem:[%s12004_s0 + $0x160] sm:$0xf]  ;;  %165 = vst.msk [vmem:[#allocation2 + $0xd0] sm:$0xf] %vm112_vm2, %v7747_v32  ;;  %v557_v11 = vor.u32 %v556_v57, %v7726_v53 }
  0x51   :  { %v524_v52 = vrot.slane %v523_v36, 4  ;;  %v546_v51 = vrot.slane %v544_v61, 5  ;;  %v578_v41 = vshrl.u32 %v7498_v46, 16  ;;  %168 = vst.msk [vmem:[#allocation2 + $0xdc] sm:$0xf] %vm112_vm2, %v7757_v47  ;;  %v584_v15 = vshll.u32 %v66_v30, 16  ;;  %1006 = vrot.lane.b32.xlu1 %v539_v60, %s7088_s9 }
  0x52   :  { %v7766_v25 = vrot.slane %v574_v43, 5  ;;  %v565_v21 = vshrl.u32 %v7507_v7, 16  ;;  %v568_v31 = vshll.u32 %v7507_v7, 16  ;;  %v7773_v36 = vld [vmem:[%s12004_s0 + $0x15c] sm:$0xf]  ;;  %v558_v61 = vrot.slane %v557_v11, 4 }
  0x53   :  { %v529_v57 = vsel %vm7167_vm3, %v524_v52, %v7686_v17  ;;  %v547_v35 = vor.u32 %v546_v51, %v543_v24  ;;  %v580_v43 = vrot.slane %v578_v41, 4  ;;  %v69_v30 = vld [vmem:[%s12004_s0 + $0xec] sm:$0x1]  ;;  %167 = vst.msk [vmem:[#allocation2 + $0xd8] sm:$0xf] %vm112_vm2, %v7773_v36  ;;  %v586_v60 = vrot.slane %v584_v15, 5 }
  0x54   :  { %v7785_v7 = vld [vmem:[%s12004_s0 + $0x16c] sm:$0xf]  ;;  %v567_v46 = vrot.slane %v565_v21, 4  ;;  %v570_v63 = vrot.slane %v568_v31, 5  ;;  %v598_v17 = vshll.u32 %v7517_v18, 16  ;;  %v563_v51 = vsel %vm7167_vm3, %v558_v61, %v562_v48  ;;  %1004 = vrot.lane.b32.xlu0 %v529_v57, %s7088_s9 }
  0x55   :  { %v7793_v41 = vld [vmem:[%s12004_s0 + $0x168] sm:$0xf]  ;;  %170 = vst.msk [vmem:[#allocation2 + $0xe4] sm:$0xf] %vm112_vm2, %v7785_v7  ;;  %v548_v24 = vrot.slane %v547_v35, 4  ;;  %v581_v52 = vor.u32 %v580_v43, %v7766_v25  ;;  %v602_v11 = vshrl.u32 %v7517_v18, 16  ;;  %1010 = vrot.lane.b32.xlu1 %v563_v51, %s7088_s9 }
  0x56   :  { %12083 = vst [vmem:[#allocation35_spill] sm:$0xff] %v7793_v41  ;;  %v72_v15 = vld [vmem:[%s12004_s0 + $0xf8] sm:$0x1]  ;;  %169 = vst.msk [vmem:[#allocation2 + $0xe0] sm:$0xf] %vm112_vm2, %v7793_v41  ;;  %v571_v48 = vor.u32 %v570_v63, %v567_v46  ;;  %v7812_v31 = vrot.slane %v598_v17, 5 }
  0x57   :  { %v7809_v21 = vld [vmem:[%s12004_s0 + $0x178] sm:$0xf]  ;;  %v608_v61 = vshll.u32 %v69_v30, 16  ;;  %v589_v35 = vshrl.u32 %v7538_v40, 16  ;;  %v7820_v43 = vld [vmem:[%s12004_s0 + $0x174] sm:$0xf]  ;;  %v553_v57 = vsel %vm7167_vm3, %v548_v24, %v7726_v53 }
  0x58   :  { %172 = vst.msk [vmem:[#allocation2 + $0xec] sm:$0xf] %vm112_vm2, %v7809_v21  ;;  %12084 = vst [vmem:[#allocation36_spill] sm:$0xff] %v7820_v43  ;;  %v582_v63 = vrot.slane %v581_v52, 4  ;;  %v604_v46 = vrot.slane %v602_v11, 4  ;;  %v592_v30 = vshll.u32 %v7538_v40, 16  ;;  %1008 = vrot.lane.b32.xlu0 %v553_v57, %s7088_s9 }
  0x59   :  { %171 = vst.msk [vmem:[#allocation2 + $0xe8] sm:$0xf] %vm112_vm2, %v7820_v43  ;;  %v7832_v17 = vld [vmem:[%s12004_s0 + $0x184] sm:$0xf]  ;;  %v572_v18 = vrot.slane %v571_v48, 4  ;;  %v610_v8 = vrot.slane %v608_v61, 5 }
  0x5a   :  { %v591_v50 = vrot.slane %v589_v35, 4  ;;  %v622_v51 = vshll.u32 %v7543_v45, 16  ;;  %174 = vst.msk [vmem:[#allocation2 + $0xf4] sm:$0xf] %vm112_vm2, %v7832_v17  ;;  %v587_v53 = vsel %vm7167_vm3, %v582_v63, %v586_v60  ;;  %v605_v24 = vor.u32 %v604_v46, %v7812_v31  ;;  %v7844_v40 = vld [vmem:[%s12004_s0 + $0x180] sm:$0xf] }
  0x5b   :  { %v594_v52 = vrot.slane %v592_v30, 5  ;;  %v626_v11 = vshrl.u32 %v7543_v45, 16  ;;  %v7849_v48 = vld [vmem:[%s12004_s0 + $0x190] sm:$0xf]  ;;  %v577_v60 = vsel %vm7167_vm3, %v572_v18, %v7766_v25  ;;  %v632_v35 = vshll.u32 %v72_v15, 16  ;;  %1014 = vrot.lane.b32.xlu1 %v587_v53, %s7088_s9 }
  0x5c   :  { %v624_v61 = vrot.slane %v622_v51, 5  ;;  %v613_v63 = vshrl.u32 %v7557_v62, 16  ;;  %v75_v46 = vld [vmem:[%s12004_s0 + $0x104] sm:$0x1]  ;;  %173 = vst.msk [vmem:[#allocation2 + $0xf0] sm:$0xf] %vm112_vm2, %v7844_v40  ;;  %1012 = vrot.lane.b32.xlu0 %v577_v60, %s7088_s9 }
  0x5d   :  { %176 = vst.msk [vmem:[#allocation2 + $0xfc] sm:$0xf] %vm112_vm2, %v7849_v48  ;;  %v606_v57 = vrot.slane %v605_v24, 4  ;;  %v595_v30 = vor.u32 %v594_v52, %v591_v50  ;;  %v628_v45 = vrot.slane %v626_v11, 4  ;;  %v616_v18 = vshll.u32 %v7557_v62, 16 }
  0x5e   :  { %v7868_v25 = vld [vmem:[%s12004_s0 + $0x18c] sm:$0xf]  ;;  %v634_v15 = vrot.slane %v632_v35, 5  ;;  %v615_v51 = vrot.slane %v613_v63, 4  ;;  %v646_v56 = vshll.u32 %v7567_v13, 16  ;;  %v650_v37 = vshrl.u32 %v7567_v13, 16 }
  0x5f   :  { %175 = vst.msk [vmem:[#allocation2 + $0xf8] sm:$0xf] %vm112_vm2, %v7868_v25  ;;  %v611_v50 = vsel %vm7167_vm3, %v606_v57, %v610_v8  ;;  %v596_v53 = vrot.slane %v595_v30, 4  ;;  %v629_v24 = vor.u32 %v628_v45, %v624_v61  ;;  %v618_v52 = vrot.slane %v616_v18, 5  ;;  %v7879_v11 = vld [vmem:[%s12004_s0 + $0x110] sm:$0x1] }
  0x60   :  { %v648_v35 = vrot.slane %v646_v56, 5  ;;  %v652_v63 = vrot.slane %v650_v37, 4  ;;  %v656_v62 = vshll.u32 %v75_v46, 16  ;;  %v637_v13 = vshrl.u32 %v7581_v29, 16  ;;  %1018 = vrot.lane.b32.xlu1 %v611_v50, %s7088_s9 }
  0x61   :  { %v601_v8 = vsel %vm7167_vm3, %v596_v53, %v7812_v31  ;;  %v630_v45 = vrot.slane %v629_v24, 4  ;;  %v619_v57 = vor.u32 %v618_v52, %v615_v51  ;;  %v640_v30 = vshll.u32 %v7581_v29, 16 }
  0x62   :  { %8 = vsyncpa [#allocation4], 0  ;;  %v653_v18 = vor.u32 %v652_v63, %v648_v35  ;;  %v658_v39 = vrot.slane %v656_v62, 5  ;;  %v639_v19 = vrot.slane %v637_v13, 4  ;;  %v670_v56 = vshll.u32 %v7589_v34, 16  ;;  %1016 = vrot.lane.b32.xlu0 %v601_v8, %s7088_s9  ;;  %s7089_s26 = smov 8  }
  0x63   :  { %v635_v37 = vsel %vm7167_vm3, %v630_v45, %v634_v15  ;;  %v620_v60 = vrot.slane %v619_v57, 4  ;;  %v642_v46 = vrot.slane %v640_v30, 5  ;;  %v674_v50 = vshrl.u32 %v7589_v34, 16  ;;  %v7902_v63 = vld [vmem:[%s12004_s0 + $0x11c] sm:$0x1]  ;;  %s7090_s12 = smov 12  }
  0x64   :  { %v654_v31 = vrot.slane %v653_v18, 4  ;;  %v672_v53 = vrot.slane %v670_v56, 5  ;;  %v680_v51 = vshll.u32 %v7879_v11, 16  ;;  %v661_v24 = vshrl.u32 %v7600_v55, 16  ;;  %1022 = vrot.lane.b32.xlu1 %v635_v37, %s7088_s9  ;;  %12085 = vst [vmem:[#allocation37_spill] sm:$0xff] %v7902_v63  ;;  %s7091_s22 = smov 16  }
  0x65   :  { %v625_v62 = vsel %vm7167_vm3, %v620_v60, %v624_v61  ;;  %v643_v13 = vor.u32 %v642_v46, %v639_v19  ;;  %v676_v52 = vrot.slane %v674_v50, 4  ;;  %v664_v15 = vshll.u32 %v7600_v55, 16  ;;  %s7092_s13 = smov 20   ;;  %s7093_s20 = smov 24  }
  0x66   :  { %v659_v8 = vsel %vm7167_vm3, %v654_v31, %v658_v39  ;;  %v682_v45 = vrot.slane %v680_v51, 5  ;;  %v663_v57 = vrot.slane %v661_v24, 4  ;;  %v694_v30 = vshll.u32 %v7611_v3, 16  ;;  %1020 = vrot.lane.b32.xlu0 %v625_v62, %s7088_s9  ;;  %s7095_s21 = smov 32  }
  0x67   :  { %v644_v18 = vrot.slane %v643_v13, 4  ;;  %v677_v56 = vor.u32 %v676_v52, %v672_v53  ;;  %v666_v37 = vrot.slane %v664_v15, 5  ;;  %v698_v19 = vshrl.u32 %v7611_v3, 16  ;;  %v7918_v13 = vld [vmem:[%s12004_s0 + $0x128] sm:$0x1] }
  0x68   :  { %v696_v61 = vrot.slane %v694_v30, 5  ;;  %v704_v60 = vshll.u32 %v7902_v63, 16  ;;  %v685_v46 = vshrl.u32 %v7629_v20, 16  ;;  %v688_v50 = vshll.u32 %v7629_v20, 16  ;;  %1026 = vrot.lane.b32.xlu1 %v659_v8, %s7088_s9 }
  0x69   :  { %v649_v39 = vsel %vm7167_vm3, %v644_v18, %v648_v35  ;;  %v678_v31 = vrot.slane %v677_v56, 4  ;;  %v667_v51 = vor.u32 %v666_v37, %v663_v57  ;;  %v700_v24 = vrot.slane %v698_v19, 4 }
  0x6a   :  { %v706_v62 = vrot.slane %v704_v60, 5  ;;  %v687_v52 = vrot.slane %v685_v46, 4  ;;  %v690_v15 = vrot.slane %v688_v50, 5  ;;  %v718_v30 = vshll.u32 %v7641_v42, 16  ;;  %1024 = vrot.lane.b32.xlu0 %v649_v39, %s7088_s9  ;;  %v7934_v50 = vld [vmem:[%s12004_s0 + $0x134] sm:$0x1] }
  0x6b   :  { %v683_v20 = vsel %vm7167_vm3, %v678_v31, %v682_v45  ;;  %v668_v8 = vrot.slane %v667_v51, 4  ;;  %v701_v63 = vor.u32 %v700_v24, %v696_v61  ;;  %v722_v35 = vshrl.u32 %v7641_v42, 16 }
  0x6c   :  { %v691_v57 = vor.u32 %v690_v15, %v687_v52  ;;  %v720_v18 = vrot.slane %v718_v30, 5  ;;  %v728_v56 = vshll.u32 %v7918_v13, 16  ;;  %v709_v37 = vshrl.u32 %v7655_v10, 16  ;;  %1030 = vrot.lane.b32.xlu1 %v683_v20, %s7088_s9 }
  0x6d   :  { %v673_v19 = vsel %vm7167_vm3, %v668_v8, %v672_v53  ;;  %v702_v60 = vrot.slane %v701_v63, 4  ;;  %v724_v46 = vrot.slane %v722_v35, 4  ;;  %v712_v45 = vshll.u32 %v7655_v10, 16 }
  0x6e   :  { %v692_v39 = vrot.slane %v691_v57, 4  ;;  %v730_v31 = vrot.slane %v728_v56, 5  ;;  %v711_v51 = vrot.slane %v709_v37, 4  ;;  %v742_v24 = vshll.u32 %v7664_v28, 16  ;;  %1028 = vrot.lane.b32.xlu0 %v673_v19, %s7088_s9 }
  0x6f   :  { %v707_v20 = vsel %vm7167_vm3, %v702_v60, %v706_v62  ;;  %v725_v52 = vor.u32 %v724_v46, %v720_v18  ;;  %v714_v15 = vrot.slane %v712_v45, 5  ;;  %v746_v53 = vshrl.u32 %v7664_v28, 16  ;;  %v7950_v60 = vld [vmem:[%s12004_s0 + $0x140] sm:$0x1] }
  0x70   :  { %v697_v63 = vsel %vm7167_vm3, %v692_v39, %v696_v61  ;;  %v744_v30 = vrot.slane %v742_v24, 5  ;;  %v752_v8 = vshll.u32 %v7934_v50, 16  ;;  %v733_v35 = vshrl.u32 %v7678_v54, 16  ;;  %1034 = vrot.lane.b32.xlu1 %v707_v20, %s7088_s9 }
  0x71   :  { %v726_v57 = vrot.slane %v725_v52, 4  ;;  %v715_v56 = vor.u32 %v714_v15, %v711_v51  ;;  %v748_v37 = vrot.slane %v746_v53, 4  ;;  %v736_v62 = vshll.u32 %v7678_v54, 16 }
  0x72   :  { %v754_v19 = vrot.slane %v752_v8, 5  ;;  %v735_v46 = vrot.slane %v733_v35, 4  ;;  %v766_v61 = vshll.u32 %v7683_v16, 16  ;;  %v770_v45 = vshrl.u32 %v7683_v16, 16  ;;  %1032 = vrot.lane.b32.xlu0 %v697_v63, %s7088_s9 }
  0x73   :  { %v731_v39 = vsel %vm7167_vm3, %v726_v57, %v730_v31  ;;  %v716_v24 = vrot.slane %v715_v56, 4  ;;  %v749_v20 = vor.u32 %v748_v37, %v744_v30  ;;  %v738_v51 = vrot.slane %v736_v62, 5  ;;  %v7966_v57 = vld [vmem:[%s12004_s0 + $0x14c] sm:$0x1] }
  0x74   :  { %v768_v52 = vrot.slane %v766_v61, 5  ;;  %v772_v15 = vrot.slane %v770_v45, 4  ;;  %v776_v53 = vshll.u32 %v7950_v60, 16  ;;  %v757_v54 = vshrl.u32 %v7704_v12, 16  ;;  %1038 = vrot.lane.b32.xlu1 %v731_v39, %s7088_s9  ;;  %12086 = vst [vmem:[#allocation38_spill] sm:$0xff] %v7966_v57 }
  0x75   :  { %v721_v8 = vsel %vm7167_vm3, %v716_v24, %v720_v18  ;;  %v750_v35 = vrot.slane %v749_v20, 4  ;;  %v739_v16 = vor.u32 %v738_v51, %v735_v46  ;;  %v760_v31 = vshll.u32 %v7704_v12, 16 }
  0x76   :  { %v773_v63 = vor.u32 %v772_v15, %v768_v52  ;;  %v778_v56 = vrot.slane %v776_v53, 5  ;;  %v759_v37 = vrot.slane %v757_v54, 4  ;;  %v790_v62 = vshll.u32 %v7709_v2, 16  ;;  %1036 = vrot.lane.b32.xlu0 %v721_v8, %s7088_s9 }
  0x77   :  { %v755_v61 = vsel %vm7167_vm3, %v750_v35, %v754_v19  ;;  %v740_v45 = vrot.slane %v739_v16, 4  ;;  %v762_v39 = vrot.slane %v760_v31, 5  ;;  %v794_v18 = vshrl.u32 %v7709_v2, 16  ;;  %v7982_v19 = vld [vmem:[%s12004_s0 + $0x158] sm:$0x1] }
  0x78   :  { %v774_v46 = vrot.slane %v773_v63, 4  ;;  %v792_v24 = vrot.slane %v790_v62, 5  ;;  %v800_v20 = vshll.u32 %v7966_v57, 16  ;;  %v781_v51 = vshrl.u32 %v7723_v4, 16  ;;  %1042 = vrot.lane.b32.xlu1 %v755_v61, %s7088_s9  ;;  %12087 = vst [vmem:[#allocation39_spill] sm:$0xff] %v7982_v19 }
  0x79   :  { %v745_v54 = vsel %vm7167_vm3, %v740_v45, %v744_v30  ;;  %v763_v15 = vor.u32 %v762_v39, %v759_v37  ;;  %v796_v53 = vrot.slane %v794_v18, 4  ;;  %v784_v16 = vshll.u32 %v7723_v4, 16 }
  0x7a   :  { %v779_v8 = vsel %vm7167_vm3, %v774_v46, %v778_v56  ;;  %v802_v35 = vrot.slane %v800_v20, 5  ;;  %v783_v31 = vrot.slane %v781_v51, 4  ;;  %v814_v63 = vshll.u32 %v7732_v27, 16  ;;  %1040 = vrot.lane.b32.xlu0 %v745_v54, %s7088_s9 }
  0x7b   :  { %v764_v62 = vrot.slane %v763_v15, 4  ;;  %v797_v61 = vor.u32 %v796_v53, %v792_v24  ;;  %v786_v57 = vrot.slane %v784_v16, 5  ;;  %v818_v30 = vshrl.u32 %v7732_v27, 16  ;;  %v7998_v15 = vld [vmem:[%s12004_s0 + $0x164] sm:$0x1] }
  0x7c   :  { %v816_v37 = vrot.slane %v814_v63, 5  ;;  %v824_v45 = vshll.u32 %v7982_v19, 16  ;;  %v805_v39 = vshrl.u32 %v7747_v32, 16  ;;  %v808_v18 = vshll.u32 %v7747_v32, 16  ;;  %1046 = vrot.lane.b32.xlu1 %v779_v8, %s7088_s9 }
  0x7d   :  { %v769_v56 = vsel %vm7167_vm3, %v764_v62, %v768_v52  ;;  %v798_v46 = vrot.slane %v797_v61, 4  ;;  %v787_v20 = vor.u32 %v786_v57, %v783_v31  ;;  %v820_v51 = vrot.slane %v818_v30, 4 }
  0x7e   :  { %v826_v54 = vrot.slane %v824_v45, 5  ;;  %v807_v53 = vrot.slane %v805_v39, 4  ;;  %v810_v16 = vrot.slane %v808_v18, 5  ;;  %v838_v63 = vshll.u32 %v7757_v47, 16  ;;  %1044 = vrot.lane.b32.xlu0 %v769_v56, %s7088_s9  ;;  %v8014_v18 = vld [vmem:[%s12004_s0 + $0x170] sm:$0x1] }
  0x7f   :  { %v803_v32 = vsel %vm7167_vm3, %v798_v46, %v802_v35  ;;  %v788_v8 = vrot.slane %v787_v20, 4  ;;  %v821_v19 = vor.u32 %v820_v51, %v816_v37  ;;  %v842_v52 = vshrl.u32 %v7757_v47, 16 }
  0x80   :  { %v811_v57 = vor.u32 %v810_v16, %v807_v53  ;;  %v840_v31 = vrot.slane %v838_v63, 5  ;;  %v848_v62 = vshll.u32 %v7998_v15, 16  ;;  %v829_v61 = vshrl.u32 %v7773_v36, 16  ;;  %1050 = vrot.lane.b32.xlu1 %v803_v32, %s7088_s9 }
  0x81   :  { %v793_v30 = vsel %vm7167_vm3, %v788_v8, %v792_v24  ;;  %v822_v45 = vrot.slane %v821_v19, 4  ;;  %v844_v39 = vrot.slane %v842_v52, 4  ;;  %v832_v35 = vshll.u32 %v7773_v36, 16 }
  0x82   :  { %v812_v56 = vrot.slane %v811_v57, 4  ;;  %v850_v46 = vrot.slane %v848_v62, 5  ;;  %v831_v20 = vrot.slane %v829_v61, 4  ;;  %v862_v51 = vshll.u32 %v7785_v7, 16  ;;  %1048 = vrot.lane.b32.xlu0 %v793_v30, %s7088_s9 }
  0x83   :  { %v827_v32 = vsel %vm7167_vm3, %v822_v45, %v826_v54  ;;  %v845_v53 = vor.u32 %v844_v39, %v840_v31  ;;  %v834_v16 = vrot.slane %v832_v35, 5  ;;  %v866_v24 = vshrl.u32 %v7785_v7, 16  ;;  %v8030_v45 = vld [vmem:[%s12004_s0 + $0x17c] sm:$0x1] }
  0x84   :  { %v817_v19 = vsel %vm7167_vm3, %v812_v56, %v816_v37  ;;  %v864_v63 = vrot.slane %v862_v51, 5  ;;  %v872_v8 = vshll.u32 %v8014_v18, 16  ;;  %v853_v52 = vshrl.u32 %v7793_v41, 16  ;;  %1054 = vrot.lane.b32.xlu1 %v827_v32, %s7088_s9  ;;  %12088 = vst [vmem:[#allocation40_spill] sm:$0xff] %v8030_v45 }
  0x85   :  { %v846_v57 = vrot.slane %v845_v53, 4  ;;  %v835_v62 = vor.u32 %v834_v16, %v831_v20  ;;  %v868_v61 = vrot.slane %v866_v24, 4  ;;  %v856_v54 = vshll.u32 %v7793_v41, 16 }
  0x86   :  { %v874_v30 = vrot.slane %v872_v8, 5  ;;  %v855_v39 = vrot.slane %v853_v52, 4  ;;  %vm1140_vm4 = vcmask 60448   ;;  %v886_v37 = vshll.u32 %v7809_v21, 16  ;;  %1052 = vrot.lane.b32.xlu0 %v817_v19, %s7088_s9  ;;  %v8046_v19 = vld [vmem:[%s12004_s0 + $0x188] sm:$0x1] }
  0x87   :  { %v851_v35 = vsel %vm7167_vm3, %v846_v57, %v850_v46  ;;  %v836_v56 = vrot.slane %v835_v62, 4  ;;  %v869_v51 = vor.u32 %v868_v61, %v864_v63  ;;  %v858_v32 = vrot.slane %v856_v54, 5  ;;  %12089 = vst [vmem:[#allocation41_spill] sm:$0xff] %v8046_v19 }
  0x88   :  { %v888_v20 = vrot.slane %v886_v37, 5  ;;  %v890_v53 = vshrl.u32 %v7809_v21, 16  ;;  %v896_v16 = vshll.u32 %v8030_v45, 16  ;;  %v877_v24 = vshrl.u32 %v7820_v43, 16  ;;  %1058 = vrot.lane.b32.xlu1 %v851_v35, %s7088_s9 }
  0x89   :  { %v841_v8 = vsel %vm7167_vm3, %v836_v56, %v840_v31  ;;  %v870_v52 = vrot.slane %v869_v51, 4  ;;  %v859_v41 = vor.u32 %v858_v32, %v855_v39  ;;  %v880_v46 = vshll.u32 %v7820_v43, 16 }
  0x8a   :  { %v892_v57 = vrot.slane %v890_v53, 4  ;;  %v898_v62 = vrot.slane %v896_v16, 5  ;;  %v879_v61 = vrot.slane %v877_v24, 4  ;;  %v910_v54 = vshll.u32 %v7832_v17, 16  ;;  %1056 = vrot.lane.b32.xlu0 %v841_v8, %s7088_s9 }
  0x8b   :  { %v875_v37 = vsel %vm7167_vm3, %v870_v52, %v874_v30  ;;  %v860_v35 = vrot.slane %v859_v41, 4  ;;  %v882_v45 = vrot.slane %v880_v46, 5  ;;  %v914_v31 = vshrl.u32 %v7832_v17, 16  ;;  %v8062_v30 = vld [vmem:[%s12004_s0 + $0x194] sm:$0x1] }
  0x8c   :  { %v893_v39 = vor.u32 %v892_v57, %v888_v20  ;;  %v912_v56 = vrot.slane %v910_v54, 5  ;;  %v920_v51 = vshll.u32 %v8046_v19, 16  ;;  %v901_v32 = vshrl.u32 %v7844_v40, 16  ;;  %1062 = vrot.lane.b32.xlu1 %v875_v37, %s7088_s9  ;;  %12090 = vst [vmem:[#allocation42_spill] sm:$0xff] %v8062_v30  ;;  %v953_v54 = vpop.permute.xlu1 %952 }
  0x8d   :  { %v865_v53 = vsel %vm7167_vm3, %v860_v35, %v864_v63  ;;  %v883_v16 = vor.u32 %v882_v45, %v879_v61  ;;  %v916_v24 = vrot.slane %v914_v31, 4  ;;  %v904_v41 = vshll.u32 %v7844_v40, 16  ;;  %1143 = vst.msk [vmem:[#allocation2 + $0x8] sm:$0xf] %vm1140_vm4, %v953_v54 }
  0x8e   :  { %v894_v8 = vrot.slane %v893_v39, 4  ;;  %v922_v52 = vrot.slane %v920_v51, 5  ;;  %v903_v46 = vrot.slane %v901_v32, 4  ;;  %v934_v57 = vshll.u32 %v7849_v48, 16  ;;  %1060 = vrot.lane.b32.xlu0 %v865_v53, %s7088_s9 }
  0x8f   :  { %v884_v19 = vrot.slane %v883_v16, 4  ;;  %v917_v37 = vor.u32 %v916_v24, %v912_v56  ;;  %v906_v43 = vrot.slane %v904_v41, 5  ;;  %v938_v63 = vshrl.u32 %v7849_v48, 16  ;;  %v949_v24 = vpop.permute.xlu0 %948 }
  0x90   :  { %v899_v45 = vsel %vm7167_vm3, %v894_v8, %v898_v62  ;;  %v936_v61 = vrot.slane %v934_v57, 5  ;;  %v944_v35 = vshll.u32 %v8062_v30, 16  ;;  %v925_v31 = vshrl.u32 %v7868_v25, 16  ;;  %1141 = vst.msk [vmem:[#allocation2] sm:$0xf] %vm1140_vm4, %v949_v24  ;;  %v955_v62 = vpop.permute.xlu1 %954 }
  0x91   :  { %1066 = vrot.lane.b32.xlu1 %v899_v45, %s7088_s9  ;;  %v889_v39 = vsel %vm7167_vm3, %v884_v19, %v888_v20  ;;  %v918_v51 = vrot.slane %v917_v37, 4  ;;  %v907_v32 = vor.u32 %v906_v43, %v903_v46  ;;  %v940_v16 = vrot.slane %v938_v63, 4  ;;  %1144 = vst.msk [vmem:[#allocation2 + $0xc] sm:$0xf] %vm1140_vm4, %v955_v62  ;;  %v6932_v45 = vld [vmem:[%s12004_s0 + $0x8] sm:$0x1] }
  0x92   :  { %v927_v53 = vrot.slane %v925_v31, 4  ;;  %v928_v41 = vshll.u32 %v7868_v25, 16  ;;  %v946_v30 = vrot.slane %v944_v35, 5  ;;  %1064 = vrot.lane.b32.xlu0 %v889_v39, %s7088_s9  ;;  %vm1301_vm5 = vcmask 1042432  }
  0x93   :  { %v923_v8 = vsel %vm7167_vm3, %v918_v51, %v922_v52  ;;  %v908_v57 = vrot.slane %v907_v32, 4  ;;  %v941_v54 = vor.u32 %v940_v16, %v936_v61  ;;  %vm1302_vm6 = vcmask 1046532   ;;  %v951_v37 = vpop.permute.xlu0 %950  ;;  %v6933_v32 = vld [vmem:[%s12004_s0 + $0x14] sm:$0x1] }
  0x94   :  { %v930_v20 = vrot.slane %v928_v41, 5  ;;  %v1306_v43 = vrot.slane %v7139_v6, 5  ;;  %v1309_v35 = vrot.slane %v6932_v45, 5  ;;  %v1313_v31 = vrot.slane %v7126_v1, 5  ;;  %1142 = vst.msk [vmem:[#allocation2 + $0x4] sm:$0xf] %vm1140_vm4, %v951_v37  ;;  %v959_v39 = vpop.permute.xlu1 %958  ;;  %vm8093_vm7 = vmor %vm1301_vm5, %vm1302_vm6 }
  0x95   :  { %1070 = vrot.lane.b32.xlu1 %v923_v8, %s7088_s9  ;;  %v913_v19 = vsel %vm7167_vm3, %v908_v57, %v912_v56  ;;  %v942_v46 = vrot.slane %v941_v54, 4  ;;  %v12091_v56 = vmov 0  ;;  %1146 = vst.msk [vmem:[#allocation2 + $0x14] sm:$0xf] %vm1140_vm4, %v959_v39  ;;  %v6418_v1 = vrot.slane %v7134_v5, 9 }
  0x96   :  { %v931_v52 = vor.u32 %v930_v20, %v927_v53  ;;  %v1308_v63 = vrot.slane %v1306_v43, 4  ;;  %v12092_v56 = vsel %vm8093_vm7, 4294967295, %v12091_v56  ;;  %1068 = vrot.lane.b32.xlu0 %v913_v19, %s7088_s9  ;;  %v1316_v16 = vrot.slane %v6933_v32, 5  ;;  %v6934_v20 = vld [vmem:[%s12004_s0 + $0x20] sm:$0x1] }
  0x97   :  { %v947_v6 = vsel %vm7167_vm3, %v942_v46, %v946_v30  ;;  %12093 = vst [vmem:[#allocation43_spill] sm:$0xff] %v12092_v56  ;;  %v957_v30 = vpop.permute.xlu0 %956  ;;  %v1315_v41 = vrot.slane %v1313_v31, 4  ;;  %v1320_v62 = vrot.slane %v7163_v22, 5  ;;  %v1307_v5 = vsel %vm8093_vm7, %v6418_v1, %v1306_v43 }
  0x98   :  { %v932_v51 = vrot.slane %v931_v52, 4  ;;  %v1310_v53 = vsel %vm8093_vm7, %v1308_v63, %v1309_v35  ;;  %1145 = vst.msk [vmem:[#allocation2 + $0x10] sm:$0xf] %vm1140_vm4, %v957_v30  ;;  %v963_v8 = vpop.permute.xlu1 %962  ;;  %v1323_v19 = vrot.slane %v6934_v20, 5  ;;  %v1327_v46 = vrot.slane %v7186_v38, 5 }
  0x99   :  { %1074 = vrot.lane.b32.xlu1 %v947_v6, %s7088_s9  ;;  %1148 = vst.msk [vmem:[#allocation2 + $0x1c] sm:$0xf] %vm1140_vm4, %v963_v8  ;;  %v1317_v54 = vsel %vm8093_vm7, %v1315_v41, %v1316_v16  ;;  %v1322_v22 = vrot.slane %v1320_v62, 4  ;;  %v6420_v43 = vrot.slane %v7180_v33, 9  ;;  %v6935_v38 = vld [vmem:[%s12004_s0 + $0x2c] sm:$0x1] }
  0x9a   :  { %v937_v24 = vsel %vm7167_vm3, %v932_v51, %v936_v61  ;;  %v6419_v61 = vrot.slane %v7121_v0, 9  ;;  %v1329_v45 = vrot.slane %v1327_v46, 4  ;;  %v1330_v35 = vrot.slane %v6935_v38, 5 }
  0x9b   :  { %1072 = vrot.lane.b32.xlu0 %v937_v24, %s7088_s9  ;;  %v961_v57 = vpop.permute.xlu0 %960  ;;  %v1324_v63 = vsel %vm8093_vm7, %v1322_v22, %v1323_v19  ;;  %v1334_v39 = vrot.slane %v7211_v49, 5  ;;  %v1321_v33 = vsel %vm8093_vm7, %v6420_v43, %v1320_v62  ;;  %v6936_v49 = vld [vmem:[%s12004_s0 + $0x38] sm:$0x1]  ;;  %v1341_v30 = vrot.slane %v7231_v59, 5  ;;  %v6937_v59 = vld [vmem:[%s12004_s0 + $0x44] sm:$0x1] }
  0x9c   :  { %1147 = vst.msk [vmem:[#allocation2 + $0x18] sm:$0xf] %vm1140_vm4, %v961_v57  ;;  %v967_v37 = vpop.permute.xlu1 %966  ;;  %v1314_v0 = vsel %vm8093_vm7, %v6419_v61, %v1313_v31  ;;  %v6421_v31 = vrot.slane %v7201_v44, 9  ;;  %v1331_v1 = vsel %vm8093_vm7, %v1329_v45, %v1330_v35  ;;  %v1337_v16 = vrot.slane %v6936_v49, 5  ;;  %v12094_v43 = vld [vmem:[#allocation6_spill] sm:$0xff] }
  0x9d   :  { %1530 = vrot.lane.b32.xlu1 %v1310_v53, %s7089_s26  ;;  %1150 = vst.msk [vmem:[#allocation2 + $0x24] sm:$0xf] %vm1140_vm4, %v967_v37  ;;  %v1336_v32 = vrot.slane %v1334_v39, 4  ;;  %v6422_v53 = vrot.slane %v7226_v58, 9  ;;  %v1343_v8 = vrot.slane %v1341_v30, 4  ;;  %v1348_v61 = vrot.slane %v7258_v14, 5 }
  0x9e   :  { %v1328_v44 = vsel %vm8093_vm7, %v6421_v31, %v1327_v46  ;;  %v6938_v14 = vld [vmem:[%s12004_s0 + $0x50] sm:$0x1]  ;;  %v1355_v37 = vrot.slane %v7279_v26, 5  ;;  %v6939_v26 = vld [vmem:[%s12004_s0 + $0x5c] sm:$0x1]  ;;  %vm1720_vm8 = vcmask 93248  }
  0x9f   :  { %1528 = vrot.lane.b32.xlu0 %v1307_v5, %s7089_s26  ;;  %v965_v52 = vpop.permute.xlu0 %964  ;;  %v1338_v62 = vsel %vm8093_vm7, %v1336_v32, %v1337_v16  ;;  %v1344_v5 = vrot.slane %v6937_v59, 5  ;;  %v1335_v58 = vsel %vm8093_vm7, %v6422_v53, %v1334_v39  ;;  %v1350_v19 = vrot.slane %v1348_v61, 4  ;;  %v12095_v39 = vld [vmem:[#allocation8_spill] sm:$0xff] }
  0xa0   :  { %1149 = vst.msk [vmem:[#allocation2 + $0x20] sm:$0xf] %vm1140_vm4, %v965_v52  ;;  %v971_v6 = vpop.permute.xlu1 %970  ;;  %v1351_v46 = vrot.slane %v6938_v14, 5  ;;  %v6424_v52 = vrot.slane %v12094_v43, 9  ;;  %v1357_v38 = vrot.slane %v1355_v37, 4  ;;  %v1358_v35 = vrot.slane %v6939_v26, 5 }
  0xa1   :  { %1534 = vrot.lane.b32.xlu1 %v1317_v54, %s7089_s26  ;;  %1152 = vst.msk [vmem:[#allocation2 + $0x2c] sm:$0xf] %vm1140_vm4, %v971_v6  ;;  %v6423_v54 = vrot.slane %v7251_v9, 9  ;;  %v1345_v20 = vsel %vm8093_vm7, %v1343_v8, %v1344_v5  ;;  %v1362_v6 = vrot.slane %v12095_v39, 5  ;;  %v12098_v8 = vld [vmem:[#allocation9_spill] sm:$0xff]  ;;  %vm2138_vm9 = vcmask 126048  }
  0xa2   :  { %v1352_v45 = vsel %vm8093_vm7, %v1350_v19, %v1351_v46  ;;  %v1349_v31 = vsel %vm8093_vm7, %v6424_v52, %v1348_v61  ;;  %v1359_v49 = vsel %vm8093_vm7, %v1357_v38, %v1358_v35  ;;  %v6426_v59 = vrot.slane %v12098_v8, 9  ;;  %v12100_v46 = vld [vmem:[#allocation11_spill] sm:$0xff]  ;;  %v6942_v52 = vld [vmem:[%s12004_s0 + $0x80] sm:$0x1]  ;;  %v12102_v39 = vld [vmem:[#allocation13_spill] sm:$0xff] }
  0xa3   :  { %1532 = vrot.lane.b32.xlu0 %v1314_v0, %s7089_s26  ;;  %v969_v51 = vpop.permute.xlu0 %968  ;;  %v1342_v9 = vsel %vm8093_vm7, %v6423_v54, %v1341_v30  ;;  %v1364_v16 = vrot.slane %v1362_v6, 4  ;;  %v6940_v30 = vld [vmem:[%s12004_s0 + $0x68] sm:$0x1]  ;;  %vm3163_vm10 = vcmask 158848   ;;  %vm3676_vm11 = vcmask 191648  }
  0xa4   :  { %1151 = vst.msk [vmem:[#allocation2 + $0x28] sm:$0xf] %vm1140_vm4, %v969_v51  ;;  %v975_v24 = vpop.permute.xlu1 %974  ;;  %v12096_v51 = vld [vmem:[#allocation7_spill] sm:$0xff]  ;;  %v1363_v14 = vsel %vm8093_vm7, %v6426_v59, %v1362_v6  ;;  %v6428_v6 = vrot.slane %v12102_v39, 9  ;;  %v6944_v59 = vld [vmem:[%s12004_s0 + $0x98] sm:$0x1] }
  0xa5   :  { %1538 = vrot.lane.b32.xlu1 %v1324_v63, %s7089_s26  ;;  %1154 = vst.msk [vmem:[#allocation2 + $0x34] sm:$0xf] %vm1140_vm4, %v975_v24  ;;  %v1365_v24 = vrot.slane %v6940_v30, 5  ;;  %vm6045_vm12 = vcmask 1041408   ;;  %vm4094_vm13 = vcmask 224448   ;;  %vm5119_vm14 = vcmask 257248  }
  0xa6   :  { %vm5632_vm15 = vcmask 290048   ;;  %vm5948_vm0 = vcmask 293888  }
  0xa7   :  { %1536 = vrot.lane.b32.xlu0 %v1321_v33, %s7089_s26  ;;  %v973_v41 = vpop.permute.xlu0 %972  ;;  %v1366_v61 = vsel %vm8093_vm7, %v1364_v16, %v1365_v24 }
  0xa8   :  { %1153 = vst.msk [vmem:[#allocation2 + $0x30] sm:$0xf] %vm1140_vm4, %v973_v41  ;;  %v979_v57 = vpop.permute.xlu1 %978 }
  0xa9   :  { %1542 = vrot.lane.b32.xlu1 %v1331_v1, %s7089_s26  ;;  %1156 = vst.msk [vmem:[#allocation2 + $0x3c] sm:$0xf] %vm1140_vm4, %v979_v57  ;;  %v6425_v1 = vrot.slane %v12096_v51, 9 }
  0xab   :  { %1540 = vrot.lane.b32.xlu0 %v1328_v44, %s7089_s26  ;;  %v977_v22 = vpop.permute.xlu0 %976  ;;  %v12097_v44 = vld [vmem:[#allocation10_spill] sm:$0xff] }
  0xac   :  { %1155 = vst.msk [vmem:[#allocation2 + $0x38] sm:$0xf] %vm1140_vm4, %v977_v22  ;;  %v983_v0 = vpop.permute.xlu1 %982  ;;  %v1369_v53 = vrot.slane %v12097_v44, 5  ;;  %v12099_v22 = vld [vmem:[#allocation12_spill] sm:$0xff]  ;;  %v12104_v44 = vld [vmem:[#allocation15_spill] sm:$0xff] }
  0xad   :  { %1546 = vrot.lane.b32.xlu1 %v1338_v62, %s7089_s26  ;;  %1158 = vst.msk [vmem:[#allocation2 + $0x44] sm:$0xf] %vm1140_vm4, %v983_v0  ;;  %v1356_v62 = vsel %vm8093_vm7, %v6425_v1, %v1355_v37  ;;  %v6427_v37 = vrot.slane %v12100_v46, 9  ;;  %v6943_v1 = vld [vmem:[%s12004_s0 + $0x8c] sm:$0x1] }
  0xae   :  { %v1371_v57 = vrot.slane %v1369_v53, 4 }
  0xaf   :  { %1544 = vrot.lane.b32.xlu0 %v1335_v58, %s7089_s26  ;;  %v981_v63 = vpop.permute.xlu0 %980  ;;  %v6941_v58 = vld [vmem:[%s12004_s0 + $0x74] sm:$0x1]  ;;  %v1370_v35 = vsel %vm8093_vm7, %v6427_v37, %v1369_v53  ;;  %v6429_v53 = vrot.slane %v12104_v44, 9  ;;  %v6945_v37 = vld [vmem:[%s12004_s0 + $0xa4] sm:$0x1] }
  0xb0   :  { %1157 = vst.msk [vmem:[#allocation2 + $0x40] sm:$0xf] %vm1140_vm4, %v981_v63  ;;  %v987_v33 = vpop.permute.xlu1 %986  ;;  %v1372_v54 = vrot.slane %v6941_v58, 5  ;;  %v1379_v63 = vrot.slane %v6942_v52, 5 }
  0xb1   :  { %1550 = vrot.lane.b32.xlu1 %v1345_v20, %s7089_s26  ;;  %1160 = vst.msk [vmem:[#allocation2 + $0x4c] sm:$0xf] %vm1140_vm4, %v987_v33  ;;  %v1376_v20 = vrot.slane %v12099_v22, 5  ;;  %v12106_v22 = vld [vmem:[#allocation17_spill] sm:$0xff] }
  0xb3   :  { %1548 = vrot.lane.b32.xlu0 %v1342_v9, %s7089_s26  ;;  %v985_v32 = vpop.permute.xlu0 %984  ;;  %v1373_v9 = vsel %vm8093_vm7, %v1371_v57, %v1372_v54  ;;  %v1378_v43 = vrot.slane %v1376_v20, 4  ;;  %v1377_v24 = vsel %vm8093_vm7, %v6428_v6, %v1376_v20  ;;  %v6430_v20 = vrot.slane %v12106_v22, 9  ;;  %v6946_v6 = vld [vmem:[%s12004_s0 + $0xb0] sm:$0x1] }
  0xb4   :  { %1159 = vst.msk [vmem:[#allocation2 + $0x48] sm:$0xf] %vm1140_vm4, %v985_v32  ;;  %v991_v41 = vpop.permute.xlu1 %990  ;;  %v1386_v32 = vrot.slane %v6943_v1, 5 }
  0xb5   :  { %1554 = vrot.lane.b32.xlu1 %v1352_v45, %s7089_s26  ;;  %1162 = vst.msk [vmem:[#allocation2 + $0x54] sm:$0xf] %vm1140_vm4, %v991_v41  ;;  %v12101_v45 = vld [vmem:[#allocation14_spill] sm:$0xff] }
  0xb6   :  { %v1383_v38 = vrot.slane %v12101_v45, 5  ;;  %v12108_v45 = vld [vmem:[#allocation19_spill] sm:$0xff] }
  0xb7   :  { %1552 = vrot.lane.b32.xlu0 %v1349_v31, %s7089_s26  ;;  %v989_v5 = vpop.permute.xlu0 %988  ;;  %v1380_v31 = vsel %vm8093_vm7, %v1378_v43, %v1379_v63 }
  0xb8   :  { %1161 = vst.msk [vmem:[#allocation2 + $0x50] sm:$0xf] %vm1140_vm4, %v989_v5  ;;  %v995_v19 = vpop.permute.xlu1 %994  ;;  %v1385_v51 = vrot.slane %v1383_v38, 4  ;;  %v1393_v5 = vrot.slane %v6944_v59, 5  ;;  %v1384_v54 = vsel %vm8093_vm7, %v6429_v53, %v1383_v38  ;;  %v6431_v38 = vrot.slane %v12108_v45, 9 }
  0xb9   :  { %1558 = vrot.lane.b32.xlu1 %v1359_v49, %s7089_s26  ;;  %1164 = vst.msk [vmem:[#allocation2 + $0x5c] sm:$0xf] %vm1140_vm4, %v995_v19  ;;  %v12103_v49 = vld [vmem:[#allocation16_spill] sm:$0xff]  ;;  %v6947_v53 = vld [vmem:[%s12004_s0 + $0xbc] sm:$0x1] }
  0xba   :  { %v1390_v16 = vrot.slane %v12103_v49, 5  ;;  %v12110_v49 = vld [vmem:[#allocation21_spill] sm:$0xff] }
  0xbb   :  { %1556 = vrot.lane.b32.xlu0 %v1356_v62, %s7089_s26  ;;  %v993_v0 = vpop.permute.xlu0 %992  ;;  %v1387_v62 = vsel %vm8093_vm7, %v1385_v51, %v1386_v32 }
  0xbc   :  { %1163 = vst.msk [vmem:[#allocation2 + $0x58] sm:$0xf] %vm1140_vm4, %v993_v0  ;;  %v999_v26 = vpop.permute.xlu1 %998  ;;  %v1392_v8 = vrot.slane %v1390_v16, 4  ;;  %v1400_v0 = vrot.slane %v6945_v37, 5  ;;  %v1391_v63 = vsel %vm8093_vm7, %v6430_v20, %v1390_v16  ;;  %v6432_v16 = vrot.slane %v12110_v49, 9 }
  0xbd   :  { %1562 = vrot.lane.b32.xlu1 %v1366_v61, %s7089_s26  ;;  %1166 = vst.msk [vmem:[#allocation2 + $0x64] sm:$0xf] %vm1140_vm4, %v999_v26  ;;  %v12105_v61 = vld [vmem:[#allocation18_spill] sm:$0xff] }
  0xbe   :  { %v1397_v57 = vrot.slane %v12105_v61, 5  ;;  %v12112_v61 = vld [vmem:[#allocation23_spill] sm:$0xff]  ;;  %v6948_v20 = vld [vmem:[%s12004_s0 + $0xe0] sm:$0x1] }
  0xbf   :  { %1560 = vrot.lane.b32.xlu0 %v1363_v14, %s7089_s26  ;;  %v997_v33 = vpop.permute.xlu0 %996  ;;  %v1394_v14 = vsel %vm8093_vm7, %v1392_v8, %v1393_v5 }
  0xc0   :  { %1165 = vst.msk [vmem:[#allocation2 + $0x60] sm:$0xf] %vm1140_vm4, %v997_v33  ;;  %v1003_v30 = vpop.permute.xlu1 %1002  ;;  %v1399_v46 = vrot.slane %v1397_v57, 4  ;;  %v1407_v33 = vrot.slane %v6946_v6, 5  ;;  %v1398_v32 = vsel %vm8093_vm7, %v6431_v38, %v1397_v57  ;;  %v6433_v57 = vrot.slane %v12112_v61, 9 }
  0xc1   :  { %1566 = vrot.lane.b32.xlu1 %v1373_v9, %s7089_s26  ;;  %1168 = vst.msk [vmem:[#allocation2 + $0x6c] sm:$0xf] %vm1140_vm4, %v1003_v30  ;;  %v12107_v9 = vld [vmem:[#allocation20_spill] sm:$0xff]  ;;  %v6949_v38 = vld [vmem:[%s12004_s0 + $0xec] sm:$0x1] }
  0xc2   :  { %v1404_v43 = vrot.slane %v12107_v9, 5  ;;  %v12114_v9 = vld [vmem:[#allocation25_spill] sm:$0xff] }
  0xc3   :  { %1564 = vrot.lane.b32.xlu0 %v1370_v35, %s7089_s26  ;;  %v1001_v41 = vpop.permute.xlu0 %1000  ;;  %v1401_v35 = vsel %vm8093_vm7, %v1399_v46, %v1400_v0 }
  0xc4   :  { %1167 = vst.msk [vmem:[#allocation2 + $0x68] sm:$0xf] %vm1140_vm4, %v1001_v41  ;;  %v1007_v58 = vpop.permute.xlu1 %1006  ;;  %v1406_v39 = vrot.slane %v1404_v43, 4  ;;  %v1414_v41 = vrot.slane %v6947_v53, 5  ;;  %v1405_v5 = vsel %vm8093_vm7, %v6432_v16, %v1404_v43  ;;  %v6434_v43 = vrot.slane %v12114_v9, 9 }
  0xc5   :  { %1570 = vrot.lane.b32.xlu1 %v1380_v31, %s7089_s26  ;;  %1170 = vst.msk [vmem:[#allocation2 + $0x74] sm:$0xf] %vm1140_vm4, %v1007_v58  ;;  %v12109_v31 = vld [vmem:[#allocation22_spill] sm:$0xff]  ;;  %v6950_v16 = vld [vmem:[%s12004_s0 + $0xf8] sm:$0x1] }
  0xc6   :  { %v1411_v51 = vrot.slane %v12109_v31, 5  ;;  %v12116_v31 = vld [vmem:[#allocation27_spill] sm:$0xff] }
  0xc7   :  { %1568 = vrot.lane.b32.xlu0 %v1377_v24, %s7089_s26  ;;  %v1005_v19 = vpop.permute.xlu0 %1004  ;;  %v1408_v24 = vsel %vm8093_vm7, %v1406_v39, %v1407_v33 }
  0xc8   :  { %1169 = vst.msk [vmem:[#allocation2 + $0x70] sm:$0xf] %vm1140_vm4, %v1005_v19  ;;  %v1011_v52 = vpop.permute.xlu1 %1010  ;;  %v1413_v44 = vrot.slane %v1411_v51, 4  ;;  %v1421_v19 = vrot.slane %v6948_v20, 5  ;;  %v1412_v0 = vsel %vm8093_vm7, %v6433_v57, %v1411_v51  ;;  %v6435_v51 = vrot.slane %v12116_v31, 9 }
  0xc9   :  { %1574 = vrot.lane.b32.xlu1 %v1387_v62, %s7089_s26  ;;  %1172 = vst.msk [vmem:[#allocation2 + $0x7c] sm:$0xf] %vm1140_vm4, %v1011_v52  ;;  %v12111_v62 = vld [vmem:[#allocation24_spill] sm:$0xff]  ;;  %v6951_v57 = vld [vmem:[%s12004_s0 + $0x104] sm:$0x1] }
  0xca   :  { %v1418_v8 = vrot.slane %v12111_v62, 5  ;;  %v12118_v62 = vld [vmem:[#allocation29_spill] sm:$0xff] }
  0xcb   :  { %1572 = vrot.lane.b32.xlu0 %v1384_v54, %s7089_s26  ;;  %v1009_v26 = vpop.permute.xlu0 %1008  ;;  %v1415_v54 = vsel %vm8093_vm7, %v1413_v44, %v1414_v41 }
  0xcc   :  { %1171 = vst.msk [vmem:[#allocation2 + $0x78] sm:$0xf] %vm1140_vm4, %v1009_v26  ;;  %v1420_v22 = vrot.slane %v1418_v8, 4  ;;  %v1428_v26 = vrot.slane %v6949_v38, 5  ;;  %v1419_v33 = vsel %vm8093_vm7, %v6434_v43, %v1418_v8  ;;  %v6436_v8 = vrot.slane %v12118_v62, 9 }
  0xcd   :  { %1578 = vrot.lane.b32.xlu1 %v1394_v14, %s7089_s26  ;;  %v1015_v1 = vpop.permute.xlu1 %1014  ;;  %v12113_v14 = vld [vmem:[#allocation26_spill] sm:$0xff]  ;;  %v6438_v43 = vrot.slane %v7600_v55, 9  ;;  %v1460_v38 = vrot.slane %v7641_v42, 5  ;;  %v1463_v42 = vrot.slane %v7918_v13, 5 }
  0xce   :  { %1174 = vst.msk [vmem:[#allocation2 + $0x84] sm:$0xf] %vm1140_vm4, %v1015_v1  ;;  %v1425_v46 = vrot.slane %v12113_v14, 5 }
  0xcf   :  { %1576 = vrot.lane.b32.xlu0 %v1391_v63, %s7089_s26  ;;  %v1013_v30 = vpop.permute.xlu0 %1012  ;;  %v1422_v63 = vsel %vm8093_vm7, %v1420_v22, %v1421_v19  ;;  %v6437_v19 = vrot.slane %v7581_v29, 9  ;;  %v1462_v31 = vrot.slane %v1460_v38, 4 }
  0xd0   :  { %1173 = vst.msk [vmem:[#allocation2 + $0x80] sm:$0xf] %vm1140_vm4, %v1013_v30  ;;  %v1427_v45 = vrot.slane %v1425_v46, 4  ;;  %v1435_v30 = vrot.slane %v6950_v16, 5  ;;  %v1426_v41 = vsel %vm8093_vm7, %v6435_v51, %v1425_v46  ;;  %v1467_v51 = vrot.slane %v7664_v28, 5 }
  0xd1   :  { %1582 = vrot.lane.b32.xlu1 %v1401_v35, %s7089_s26  ;;  %v12115_v35 = vld [vmem:[#allocation28_spill] sm:$0xff]  ;;  %v1464_v13 = vsel %vm8093_vm7, %v1462_v31, %v1463_v42  ;;  %v1470_v28 = vrot.slane %v7934_v50, 5  ;;  %v1509_v31 = vrot.slane %v7809_v21, 5 }
  0xd2   :  { %v1019_v59 = vpop.permute.xlu1 %1018  ;;  %v1432_v39 = vrot.slane %v12115_v35, 5  ;;  %v12120_v35 = vld [vmem:[#allocation31_spill] sm:$0xff]  ;;  %v12127_v21 = vld [vmem:[#allocation40_spill] sm:$0xff] }
  0xd3   :  { %1580 = vrot.lane.b32.xlu0 %v1398_v32, %s7089_s26  ;;  %1176 = vst.msk [vmem:[#allocation2 + $0x8c] sm:$0xf] %vm1140_vm4, %v1019_v59  ;;  %v1429_v32 = vsel %vm8093_vm7, %v1427_v45, %v1428_v26 }
  0xd4   :  { %v1017_v58 = vpop.permute.xlu0 %1016  ;;  %v1434_v49 = vrot.slane %v1432_v39, 4  ;;  %v1433_v20 = vsel %vm8093_vm7, %v6436_v8, %v1432_v39  ;;  %v6439_v39 = vrot.slane %v12120_v35, 9 }
  0xd5   :  { %1586 = vrot.lane.b32.xlu1 %v1408_v24, %s7089_s26  ;;  %1175 = vst.msk [vmem:[#allocation2 + $0x88] sm:$0xf] %vm1140_vm4, %v1017_v58  ;;  %v12117_v24 = vld [vmem:[#allocation30_spill] sm:$0xff]  ;;  %v1442_v58 = vrot.slane %v6951_v57, 5 }
  0xd6   :  { %v1023_v37 = vpop.permute.xlu1 %1022  ;;  %v1439_v44 = vrot.slane %v12117_v24, 5  ;;  %v12121_v24 = vld [vmem:[#allocation33_spill] sm:$0xff] }
  0xd7   :  { %1584 = vrot.lane.b32.xlu0 %v1405_v5, %s7089_s26  ;;  %1178 = vst.msk [vmem:[#allocation2 + $0x94] sm:$0xf] %vm1140_vm4, %v1023_v37  ;;  %v1436_v5 = vsel %vm8093_vm7, %v1434_v49, %v1435_v30  ;;  %v6440_v49 = vrot.slane %v7655_v10, 9  ;;  %v1469_v30 = vrot.slane %v1467_v51, 4 }
  0xd8   :  { %v1021_v52 = vpop.permute.xlu0 %1020  ;;  %v1441_v61 = vrot.slane %v1439_v44, 4  ;;  %v1440_v29 = vsel %vm8093_vm7, %v6437_v19, %v1439_v44  ;;  %v1474_v44 = vrot.slane %v12121_v24, 5  ;;  %v12128_v24 = vld [vmem:[#allocation36_spill] sm:$0xff] }
  0xd9   :  { %1590 = vrot.lane.b32.xlu1 %v1415_v54, %s7089_s26  ;;  %1177 = vst.msk [vmem:[#allocation2 + $0x90] sm:$0xf] %vm1140_vm4, %v1021_v52  ;;  %v1446_v54 = vrot.slane %v7589_v34, 5  ;;  %v1449_v34 = vrot.slane %v7879_v11, 5  ;;  %v1461_v10 = vsel %vm8093_vm7, %v6440_v49, %v1460_v38  ;;  %v1471_v50 = vsel %vm8093_vm7, %v1469_v30, %v1470_v28 }
  0xda   :  { %v1027_v6 = vpop.permute.xlu1 %1026  ;;  %v1443_v46 = vsel %vm8093_vm7, %v1441_v61, %v1442_v58  ;;  %v1481_v61 = vrot.slane %v7709_v2, 5  ;;  %v12123_v2 = vld [vmem:[#allocation38_spill] sm:$0xff]  ;;  %v1511_v49 = vrot.slane %v1509_v31, 4 }
  0xdb   :  { %1588 = vrot.lane.b32.xlu0 %v1412_v0, %s7089_s26  ;;  %1180 = vst.msk [vmem:[#allocation2 + $0x9c] sm:$0xf] %vm1140_vm4, %v1027_v6  ;;  %v1448_v37 = vrot.slane %v1446_v54, 4  ;;  %v1453_v0 = vrot.slane %v7611_v3, 5  ;;  %v12119_v3 = vld [vmem:[#allocation37_spill] sm:$0xff]  ;;  %v1447_v55 = vsel %vm8093_vm7, %v6438_v43, %v1446_v54  ;;  %v6442_v54 = vrot.slane %v7704_v12, 9 }
  0xdc   :  { %v1025_v1 = vpop.permute.xlu0 %1024  ;;  %v1456_v45 = vrot.slane %v12119_v3, 5  ;;  %v1484_v19 = vrot.slane %v12123_v2, 5  ;;  %v1495_v43 = vrot.slane %v7757_v47, 5  ;;  %v1498_v47 = vrot.slane %v7998_v15, 5 }
  0xdd   :  { %1594 = vrot.lane.b32.xlu1 %v1422_v63, %s7089_s26  ;;  %1179 = vst.msk [vmem:[#allocation2 + $0x98] sm:$0xf] %vm1140_vm4, %v1025_v1  ;;  %v1450_v11 = vsel %vm8093_vm7, %v1448_v37, %v1449_v34  ;;  %v1455_v63 = vrot.slane %v1453_v0, 4  ;;  %v1475_v12 = vsel %vm8093_vm7, %v6442_v54, %v1474_v44  ;;  %v6443_v37 = vrot.slane %v7723_v4, 9 }
  0xde   :  { %v1031_v53 = vpop.permute.xlu1 %1030  ;;  %v1497_v38 = vrot.slane %v1495_v43, 4 }
  0xdf   :  { %1592 = vrot.lane.b32.xlu0 %v1419_v33, %s7089_s26  ;;  %1182 = vst.msk [vmem:[#allocation2 + $0xa4] sm:$0xf] %vm1140_vm4, %v1031_v53  ;;  %v1457_v33 = vsel %vm8093_vm7, %v1455_v63, %v1456_v45  ;;  %v1482_v4 = vsel %vm8093_vm7, %v6443_v37, %v1481_v61  ;;  %v8502_v37 = vld [vmem:[%s12004_s0 + $0xc] sm:$0xf] }
  0xe0   :  { %v1029_v59 = vpop.permute.xlu0 %1028  ;;  %v1499_v15 = vsel %vm8093_vm7, %v1497_v38, %v1498_v47  ;;  %v8555_v47 = vld [vmem:[%s12004_s0 + $0x40] sm:$0xf] }
  0xe1   :  { %1598 = vrot.lane.b32.xlu1 %v1429_v32, %s7089_s26  ;;  %1181 = vst.msk [vmem:[#allocation2 + $0xa0] sm:$0xf] %vm1140_vm4, %v1029_v59  ;;  %v1454_v32 = vsel %vm8093_vm7, %v6439_v39, %v1453_v0  ;;  %v1476_v59 = vrot.slane %v1474_v44, 4  ;;  %v6445_v39 = vrot.slane %v7773_v36, 9  ;;  %v6447_v44 = vrot.slane %v12128_v24, 9 }
  0xe2   :  { %v1035_v22 = vpop.permute.xlu1 %1034  ;;  %v8646_v24 = vld [vmem:[%s12004_s0 + $0x78] sm:$0xf] }
  0xe3   :  { %1596 = vrot.lane.b32.xlu0 %v1426_v41, %s7089_s26  ;;  %1184 = vst.msk [vmem:[#allocation2 + $0xac] sm:$0xf] %vm1140_vm4, %v1035_v22  ;;  %v12122_v41 = vld [vmem:[#allocation32_spill] sm:$0xff]  ;;  %v1496_v36 = vsel %vm8093_vm7, %v6445_v39, %v1495_v43  ;;  %v8523_v43 = vld [vmem:[%s12004_s0 + $0x28] sm:$0xf] }
  0xe4   :  { %v1033_v14 = vpop.permute.xlu0 %1032  ;;  %v6441_v62 = vrot.slane %v12122_v41, 9  ;;  %v12129_v41 = vld [vmem:[#allocation41_spill] sm:$0xff]  ;;  %v8571_v39 = vld [vmem:[%s12004_s0 + $0x4c] sm:$0xf] }
  0xe5   :  { %1602 = vrot.lane.b32.xlu1 %v1436_v5, %s7089_s26  ;;  %1183 = vst.msk [vmem:[#allocation2 + $0xa8] sm:$0xf] %vm1140_vm4, %v1033_v14  ;;  %v1477_v5 = vrot.slane %v7950_v60, 5  ;;  %v1488_v14 = vrot.slane %v7732_v27, 5  ;;  %v12124_v27 = vld [vmem:[#allocation39_spill] sm:$0xff] }
  0xe6   :  { %v1039_v9 = vpop.permute.xlu1 %1038  ;;  %v1468_v58 = vsel %vm8093_vm7, %v6441_v62, %v1467_v51  ;;  %v12126_v51 = vld [vmem:[#allocation35_spill] sm:$0xff]  ;;  %v1519_v62 = vrot.slane %v12129_v41, 5 }
  0xe7   :  { %1600 = vrot.lane.b32.xlu0 %v1433_v20, %s7089_s26  ;;  %1186 = vst.msk [vmem:[#allocation2 + $0xb4] sm:$0xf] %vm1140_vm4, %v1039_v9  ;;  %v1478_v60 = vsel %vm8093_vm7, %v1476_v59, %v1477_v5  ;;  %v1483_v20 = vrot.slane %v1481_v61, 4  ;;  %v1490_v9 = vrot.slane %v1488_v14, 4  ;;  %v1510_v59 = vsel %vm8093_vm7, %v6447_v44, %v1509_v31 }
  0xe8   :  { %v1037_v52 = vpop.permute.xlu0 %1036  ;;  %v6448_v5 = vrot.slane %v7844_v40, 9  ;;  %v6449_v40 = vrot.slane %v7868_v25, 9  ;;  %v8492_v25 = vld [vmem:[%s12004_s0 + $0x10] sm:$0xf] }
  0xe9   :  { %1606 = vrot.lane.b32.xlu1 %v1443_v46, %s7089_s26  ;;  %1185 = vst.msk [vmem:[#allocation2 + $0xb0] sm:$0xf] %vm1140_vm4, %v1037_v52  ;;  %v1485_v0 = vsel %vm8093_vm7, %v1483_v20, %v1484_v19 }
  0xea   :  { %v1043_v26 = vpop.permute.xlu1 %1042 }
  0xeb   :  { %1604 = vrot.lane.b32.xlu0 %v1440_v29, %s7089_s26  ;;  %1188 = vst.msk [vmem:[#allocation2 + $0xbc] sm:$0xf] %vm1140_vm4, %v1043_v26  ;;  %v1491_v29 = vrot.slane %v12124_v27, 5  ;;  %v1502_v26 = vrot.slane %v7785_v7, 5  ;;  %v1505_v7 = vrot.slane %v8014_v18, 5 }
  0xec   :  { %v1041_v6 = vpop.permute.xlu0 %1040  ;;  %v8518_v27 = vld [vmem:[%s12004_s0 + $0x18] sm:$0xf] }
  0xed   :  { %1610 = vrot.lane.b32.xlu1 %v1450_v11, %s7089_s26  ;;  %1187 = vst.msk [vmem:[#allocation2 + $0xb8] sm:$0xf] %vm1140_vm4, %v1041_v6  ;;  %v12125_v11 = vld [vmem:[#allocation34_spill] sm:$0xff]  ;;  %v1492_v45 = vsel %vm8093_vm7, %v1490_v9, %v1491_v29 }
  0xee   :  { %v1047_v1 = vpop.permute.xlu1 %1046  ;;  %v6444_v63 = vrot.slane %v12125_v11, 9 }
  0xef   :  { %1608 = vrot.lane.b32.xlu0 %v1447_v55, %s7089_s26  ;;  %1190 = vst.msk [vmem:[#allocation2 + $0xc4] sm:$0xf] %vm1140_vm4, %v1047_v1  ;;  %v6446_v1 = vrot.slane %v12126_v51, 9  ;;  %v8603_v51 = vld [vmem:[%s12004_s0 + $0x64] sm:$0xf] }
  0xf0   :  { %v1045_v16 = vpop.permute.xlu0 %1044  ;;  %v1489_v35 = vsel %vm8093_vm7, %v6444_v63, %v1488_v14  ;;  %v8539_v63 = vld [vmem:[%s12004_s0 + $0x34] sm:$0xf] }
  0xf1   :  { %1614 = vrot.lane.b32.xlu1 %v1457_v33, %s7089_s26  ;;  %1189 = vst.msk [vmem:[#allocation2 + $0xc0] sm:$0xf] %vm1140_vm4, %v1045_v16  ;;  %v1504_v33 = vrot.slane %v1502_v26, 4  ;;  %v1512_v16 = vrot.slane %v12127_v21, 5  ;;  %v1503_v28 = vsel %vm8093_vm7, %v6446_v1, %v1502_v26 }
  0xf2   :  { %v1051_v53 = vpop.permute.xlu1 %1050 }
  0xf3   :  { %1612 = vrot.lane.b32.xlu0 %v1454_v32, %s7089_s26  ;;  %1192 = vst.msk [vmem:[#allocation2 + $0xcc] sm:$0xf] %vm1140_vm4, %v1051_v53  ;;  %v1506_v18 = vsel %vm8093_vm7, %v1504_v33, %v1505_v7  ;;  %v8587_v7 = vld [vmem:[%s12004_s0 + $0x58] sm:$0xf] }
  0xf4   :  { %v1049_v8 = vpop.permute.xlu0 %1048 }
  0xf5   :  { %1618 = vrot.lane.b32.xlu1 %v1464_v13, %s7089_s26  ;;  %1191 = vst.msk [vmem:[#allocation2 + $0xc8] sm:$0xf] %vm1140_vm4, %v1049_v8  ;;  %v1516_v13 = vrot.slane %v7832_v17, 5  ;;  %v1523_v8 = vrot.slane %v7849_v48, 5  ;;  %v12130_v48 = vld [vmem:[#allocation42_spill] sm:$0xff] }
  0xf6   :  { %v1055_v57 = vpop.permute.xlu1 %1054  ;;  %v1526_v54 = vrot.slane %v12130_v48, 5  ;;  %v8699_v48 = vld [vmem:[%s12004_s0 + $0xac] sm:$0xf] }
  0xf7   :  { %1616 = vrot.lane.b32.xlu0 %v1461_v10, %s7089_s26  ;;  %1194 = vst.msk [vmem:[#allocation2 + $0xd4] sm:$0xf] %vm1140_vm4, %v1055_v57  ;;  %v1513_v10 = vsel %vm8093_vm7, %v1511_v49, %v1512_v16  ;;  %v1518_v17 = vrot.slane %v1516_v13, 4  ;;  %v1524_v14 = vsel %vm8093_vm7, %v6449_v40, %v1523_v8  ;;  %v8619_v49 = vld [vmem:[%s12004_s0 + $0x70] sm:$0xf] }
  0xf8   :  { %v1053_v22 = vpop.permute.xlu0 %1052  ;;  %v8630_v16 = vld [vmem:[%s12004_s0 + $0x6c] sm:$0xf]  ;;  %v8715_v40 = vld [vmem:[%s12004_s0 + $0xb8] sm:$0xf] }
  0xf9   :  { %1622 = vrot.lane.b32.xlu1 %v1471_v50, %s7089_s26  ;;  %1193 = vst.msk [vmem:[#allocation2 + $0xd0] sm:$0xf] %vm1140_vm4, %v1053_v22  ;;  %v1520_v57 = vsel %vm8093_vm7, %v1518_v17, %v1519_v62  ;;  %v8662_v17 = vld [vmem:[%s12004_s0 + $0x84] sm:$0xf]  ;;  %v8667_v62 = vld [vmem:[%s12004_s0 + $0x94] sm:$0xf] }
  0xfa   :  { %v1059_v46 = vpop.permute.xlu1 %1058 }
  0xfb   :  { %1620 = vrot.lane.b32.xlu0 %v1468_v58, %s7089_s26  ;;  %1196 = vst.msk [vmem:[#allocation2 + $0xdc] sm:$0xf] %vm1140_vm4, %v1059_v46  ;;  %v1525_v58 = vrot.slane %v1523_v8, 4 }
  0xfc   :  { %v1057_v34 = vpop.permute.xlu0 %1056 }
  0xfd   :  { %1626 = vrot.lane.b32.xlu1 %v1478_v60, %s7089_s26  ;;  %1195 = vst.msk [vmem:[#allocation2 + $0xd8] sm:$0xf] %vm1140_vm4, %v1057_v34  ;;  %v1517_v60 = vsel %vm8093_vm7, %v6448_v5, %v1516_v13  ;;  %v1527_v2 = vsel %vm8093_vm7, %v1525_v58, %v1526_v54  ;;  %v8683_v5 = vld [vmem:[%s12004_s0 + $0xa0] sm:$0xf] }
  0xfe   :  { %v1063_v52 = vpop.permute.xlu1 %1062 }
  0xff   :  { %1624 = vrot.lane.b32.xlu0 %v1475_v12, %s7089_s26  ;;  %1198 = vst.msk [vmem:[#allocation2 + $0xe4] sm:$0xf] %vm1140_vm4, %v1063_v52 }
 0x100   :  { %v1061_v3 = vpop.permute.xlu0 %1060 }
 0x101   :  { %1630 = vrot.lane.b32.xlu1 %v1485_v0, %s7089_s26  ;;  %1197 = vst.msk [vmem:[#allocation2 + $0xe0] sm:$0xf] %vm1140_vm4, %v1061_v3  ;;  %v8507_v0 = vld [vmem:[%s12004_s0 + $0x1c] sm:$0xf] }
 0x103   :  { %v1067_v55 = vpop.permute.xlu1 %1066  ;;  %1628 = vrot.lane.b32.xlu0 %v1482_v4, %s7089_s26  ;;  %v8534_v4 = vld [vmem:[%s12004_s0 + $0x24] sm:$0xf] }
 0x104   :  { %1200 = vst.msk [vmem:[#allocation2 + $0xec] sm:$0xf] %vm1140_vm4, %v1067_v55  ;;  %v1065_v6 = vpop.permute.xlu0 %1064  ;;  %v8566_v55 = vld [vmem:[%s12004_s0 + $0x3c] sm:$0xf] }
 0x105   :  { %1634 = vrot.lane.b32.xlu1 %v1492_v45, %s7089_s26  ;;  %1199 = vst.msk [vmem:[#allocation2 + $0xe8] sm:$0xf] %vm1140_vm4, %v1065_v6  ;;  %v8550_v45 = vld [vmem:[%s12004_s0 + $0x30] sm:$0xf] }
 0x107   :  { %v1071_v42 = vpop.permute.xlu1 %1070  ;;  %1632 = vrot.lane.b32.xlu0 %v1489_v35, %s7089_s26 }
 0x108   :  { %1202 = vst.msk [vmem:[#allocation2 + $0xf4] sm:$0xf] %vm1140_vm4, %v1071_v42  ;;  %v1069_v32 = vpop.permute.xlu0 %1068  ;;  %v8598_v42 = vld [vmem:[%s12004_s0 + $0x54] sm:$0xf] }
 0x109   :  { %1638 = vrot.lane.b32.xlu1 %v1499_v15, %s7089_s26  ;;  %1201 = vst.msk [vmem:[#allocation2 + $0xf0] sm:$0xf] %vm1140_vm4, %v1069_v32  ;;  %v8582_v15 = vld [vmem:[%s12004_s0 + $0x48] sm:$0xf]  ;;  %v8614_v32 = vld [vmem:[%s12004_s0 + $0x60] sm:$0xf] }
 0x10b   :  { %v1075_v30 = vpop.permute.xlu1 %1074  ;;  %1636 = vrot.lane.b32.xlu0 %v1496_v36, %s7089_s26 }
 0x10c   :  { %1204 = vst.msk [vmem:[#allocation2 + $0xfc] sm:$0xf] %vm1140_vm4, %v1075_v30  ;;  %v8635_v30 = vld [vmem:[%s12004_s0 + $0x7c] sm:$0xf] }
 0x10d   :  { %1642 = vrot.lane.b32.xlu1 %v1506_v18, %s7089_s26  ;;  %v1073_v53 = vpop.permute.xlu0 %1072 }
 0x10e   :  { %1203 = vst.msk [vmem:[#allocation2 + $0xf8] sm:$0xf] %vm1140_vm4, %v1073_v53  ;;  %v8651_v53 = vld [vmem:[%s12004_s0 + $0x88] sm:$0xf] }
 0x10f   :  { %v1531_v50 = vpop.permute.xlu1 %1530  ;;  %1640 = vrot.lane.b32.xlu0 %v1503_v28, %s7089_s26 }
 0x110   :  { %1722 = vst.msk [vmem:[#allocation2 + $0x4] sm:$0xf] %vm1720_vm8, %v1531_v50  ;;  %v8678_v50 = vld [vmem:[%s12004_s0 + $0x90] sm:$0xf] }
 0x111   :  { %1646 = vrot.lane.b32.xlu1 %v1513_v10, %s7089_s26  ;;  %v1529_v61 = vpop.permute.xlu0 %1528 }
 0x112   :  { %1721 = vst.msk [vmem:[#allocation2] sm:$0xf] %vm1720_vm8, %v1529_v61 }
 0x113   :  { %v1535_v22 = vpop.permute.xlu1 %1534  ;;  %1644 = vrot.lane.b32.xlu0 %v1510_v59, %s7089_s26 }
 0x114   :  { %1724 = vst.msk [vmem:[#allocation2 + $0xc] sm:$0xf] %vm1720_vm8, %v1535_v22  ;;  %v8710_v22 = vld [vmem:[%s12004_s0 + $0xa8] sm:$0xf] }
 0x115   :  { %1650 = vrot.lane.b32.xlu1 %v1520_v57, %s7089_s26  ;;  %v1533_v20 = vpop.permute.xlu0 %1532  ;;  %v8694_v57 = vld [vmem:[%s12004_s0 + $0x9c] sm:$0xf] }
 0x116   :  { %1723 = vst.msk [vmem:[#allocation2 + $0x8] sm:$0xf] %vm1720_vm8, %v1533_v20 }
 0x117   :  { %v1539_v19 = vpop.permute.xlu1 %1538  ;;  %1648 = vrot.lane.b32.xlu0 %v1517_v60, %s7089_s26 }
 0x118   :  { %1726 = vst.msk [vmem:[#allocation2 + $0x14] sm:$0xf] %vm1720_vm8, %v1539_v19 }
 0x119   :  { %1654 = vrot.lane.b32.xlu1 %v1527_v2, %s7089_s26  ;;  %v1537_v46 = vpop.permute.xlu0 %1536  ;;  %v8726_v2 = vld [vmem:[%s12004_s0 + $0xb4] sm:$0xf] }
 0x11a   :  { %1725 = vst.msk [vmem:[#allocation2 + $0x10] sm:$0xf] %vm1720_vm8, %v1537_v46 }
 0x11b   :  { %v1543_v12 = vpop.permute.xlu1 %1542  ;;  %1652 = vrot.lane.b32.xlu0 %v1524_v14, %s7089_s26  ;;  %v8731_v14 = vld [vmem:[%s12004_s0 + $0xc4] sm:$0xf] }
 0x11c   :  { %1728 = vst.msk [vmem:[#allocation2 + $0x1c] sm:$0xf] %vm1720_vm8, %v1543_v12  ;;  %v8742_v12 = vld [vmem:[%s12004_s0 + $0xc0] sm:$0xf] }
 0x11d   :  { %1948 = vrot.lane.b32.xlu1 %v8492_v25, %s7090_s12  ;;  %v1541_v34 = vpop.permute.xlu0 %1540 }
 0x11e   :  { %1727 = vst.msk [vmem:[#allocation2 + $0x18] sm:$0xf] %vm1720_vm8, %v1541_v34 }
 0x11f   :  { %v1547_v9 = vpop.permute.xlu1 %1546  ;;  %1946 = vrot.lane.b32.xlu0 %v8502_v37, %s7090_s12 }
 0x120   :  { %1730 = vst.msk [vmem:[#allocation2 + $0x24] sm:$0xf] %vm1720_vm8, %v1547_v9  ;;  %v8747_v9 = vld [vmem:[%s12004_s0 + $0xe8] sm:$0xf] }
 0x121   :  { %1952 = vrot.lane.b32.xlu1 %v8507_v0, %s7090_s12  ;;  %v1545_v29 = vpop.permute.xlu0 %1544 }
 0x122   :  { %1729 = vst.msk [vmem:[#allocation2 + $0x20] sm:$0xf] %vm1720_vm8, %v1545_v29 }
 0x123   :  { %v1551_v52 = vpop.permute.xlu1 %1550  ;;  %1950 = vrot.lane.b32.xlu0 %v8518_v27, %s7090_s12 }
 0x124   :  { %1732 = vst.msk [vmem:[#allocation2 + $0x2c] sm:$0xf] %vm1720_vm8, %v1551_v52  ;;  %v8758_v52 = vld [vmem:[%s12004_s0 + $0xe4] sm:$0xf] }
 0x125   :  { %1956 = vrot.lane.b32.xlu1 %v8523_v43, %s7090_s12  ;;  %v1549_v11 = vpop.permute.xlu0 %1548 }
 0x126   :  { %1731 = vst.msk [vmem:[#allocation2 + $0x28] sm:$0xf] %vm1720_vm8, %v1549_v11 }
 0x127   :  { %v1555_v3 = vpop.permute.xlu1 %1554  ;;  %1954 = vrot.lane.b32.xlu0 %v8534_v4, %s7090_s12 }
 0x128   :  { %1734 = vst.msk [vmem:[#allocation2 + $0x34] sm:$0xf] %vm1720_vm8, %v1555_v3  ;;  %v8763_v3 = vld [vmem:[%s12004_s0 + $0xf4] sm:$0xf] }
 0x129   :  { %1960 = vrot.lane.b32.xlu1 %v8539_v63, %s7090_s12  ;;  %v1553_v38 = vpop.permute.xlu0 %1552 }
 0x12a   :  { %1733 = vst.msk [vmem:[#allocation2 + $0x30] sm:$0xf] %vm1720_vm8, %v1553_v38 }
 0x12b   :  { %v1559_v26 = vpop.permute.xlu1 %1558  ;;  %1958 = vrot.lane.b32.xlu0 %v8550_v45, %s7090_s12 }
 0x12c   :  { %1736 = vst.msk [vmem:[#allocation2 + $0x3c] sm:$0xf] %vm1720_vm8, %v1559_v26  ;;  %v8774_v26 = vld [vmem:[%s12004_s0 + $0xf0] sm:$0xf] }
 0x12d   :  { %1964 = vrot.lane.b32.xlu1 %v8555_v47, %s7090_s12  ;;  %v1557_v35 = vpop.permute.xlu0 %1556 }
 0x12e   :  { %1735 = vst.msk [vmem:[#allocation2 + $0x38] sm:$0xf] %vm1720_vm8, %v1557_v35 }
 0x12f   :  { %v1563_v6 = vpop.permute.xlu1 %1562  ;;  %1962 = vrot.lane.b32.xlu0 %v8566_v55, %s7090_s12 }
 0x130   :  { %1738 = vst.msk [vmem:[#allocation2 + $0x44] sm:$0xf] %vm1720_vm8, %v1563_v6  ;;  %v8779_v6 = vld [vmem:[%s12004_s0 + $0x100] sm:$0xf] }
 0x131   :  { %1968 = vrot.lane.b32.xlu1 %v8571_v39, %s7090_s12  ;;  %v1561_v33 = vpop.permute.xlu0 %1560 }
 0x132   :  { %1737 = vst.msk [vmem:[#allocation2 + $0x40] sm:$0xf] %vm1720_vm8, %v1561_v33 }
 0x133   :  { %v1567_v31 = vpop.permute.xlu1 %1566  ;;  %1966 = vrot.lane.b32.xlu0 %v8582_v15, %s7090_s12 }
 0x134   :  { %1740 = vst.msk [vmem:[#allocation2 + $0x4c] sm:$0xf] %vm1720_vm8, %v1567_v31  ;;  %v8790_v31 = vld [vmem:[%s12004_s0 + $0xfc] sm:$0xf] }
 0x135   :  { %1972 = vrot.lane.b32.xlu1 %v8587_v7, %s7090_s12  ;;  %v1565_v36 = vpop.permute.xlu0 %1564 }
 0x136   :  { %1739 = vst.msk [vmem:[#allocation2 + $0x48] sm:$0xf] %vm1720_vm8, %v1565_v36 }
 0x137   :  { %v1571_v1 = vpop.permute.xlu1 %1570  ;;  %1970 = vrot.lane.b32.xlu0 %v8598_v42, %s7090_s12 }
 0x138   :  { %1742 = vst.msk [vmem:[#allocation2 + $0x54] sm:$0xf] %vm1720_vm8, %v1571_v1  ;;  %v8795_v1 = vld [vmem:[%s12004_s0 + $0x10c] sm:$0xf] }
 0x139   :  { %1976 = vrot.lane.b32.xlu1 %v8603_v51, %s7090_s12  ;;  %v1569_v18 = vpop.permute.xlu0 %1568 }
 0x13a   :  { %1741 = vst.msk [vmem:[#allocation2 + $0x50] sm:$0xf] %vm1720_vm8, %v1569_v18 }
 0x13b   :  { %v1575_v21 = vpop.permute.xlu1 %1574  ;;  %1974 = vrot.lane.b32.xlu0 %v8614_v32, %s7090_s12 }
 0x13c   :  { %1744 = vst.msk [vmem:[#allocation2 + $0x5c] sm:$0xf] %vm1720_vm8, %v1575_v21  ;;  %v8806_v21 = vld [vmem:[%s12004_s0 + $0x108] sm:$0xf] }
 0x13d   :  { %1980 = vrot.lane.b32.xlu1 %v8619_v49, %s7090_s12  ;;  %v1573_v13 = vpop.permute.xlu0 %1572  ;;  %12131 = vst [vmem:[#allocation6_spill] sm:$0xff] %v8806_v21 }
 0x13e   :  { %1743 = vst.msk [vmem:[#allocation2 + $0x58] sm:$0xf] %vm1720_vm8, %v1573_v13 }
 0x13f   :  { %v1579_v28 = vpop.permute.xlu1 %1578  ;;  %1978 = vrot.lane.b32.xlu0 %v8630_v16, %s7090_s12 }
 0x140   :  { %1746 = vst.msk [vmem:[#allocation2 + $0x64] sm:$0xf] %vm1720_vm8, %v1579_v28  ;;  %v8811_v28 = vld [vmem:[%s12004_s0 + $0x118] sm:$0xf] }
 0x141   :  { %1984 = vrot.lane.b32.xlu1 %v8635_v30, %s7090_s12  ;;  %v1577_v44 = vpop.permute.xlu0 %1576  ;;  %12132 = vst [vmem:[#allocation8_spill] sm:$0xff] %v8811_v28 }
 0x142   :  { %1745 = vst.msk [vmem:[#allocation2 + $0x60] sm:$0xf] %vm1720_vm8, %v1577_v44 }
 0x143   :  { %v1583_v10 = vpop.permute.xlu1 %1582  ;;  %1982 = vrot.lane.b32.xlu0 %v8646_v24, %s7090_s12 }
 0x144   :  { %1748 = vst.msk [vmem:[#allocation2 + $0x6c] sm:$0xf] %vm1720_vm8, %v1583_v10  ;;  %v8822_v10 = vld [vmem:[%s12004_s0 + $0x114] sm:$0xf] }
 0x145   :  { %1988 = vrot.lane.b32.xlu1 %v8651_v53, %s7090_s12  ;;  %v1581_v41 = vpop.permute.xlu0 %1580  ;;  %12133 = vst [vmem:[#allocation7_spill] sm:$0xff] %v8822_v10 }
 0x146   :  { %1747 = vst.msk [vmem:[#allocation2 + $0x68] sm:$0xf] %vm1720_vm8, %v1581_v41 }
 0x147   :  { %v1587_v8 = vpop.permute.xlu1 %1586  ;;  %1986 = vrot.lane.b32.xlu0 %v8662_v17, %s7090_s12 }
 0x148   :  { %1750 = vst.msk [vmem:[#allocation2 + $0x74] sm:$0xf] %vm1720_vm8, %v1587_v8  ;;  %v6514_v8 = vld [vmem:[%s12004_s0 + $0x124] sm:$0xf] }
 0x149   :  { %1992 = vrot.lane.b32.xlu1 %v8667_v62, %s7090_s12  ;;  %v1585_v59 = vpop.permute.xlu0 %1584 }
 0x14a   :  { %1749 = vst.msk [vmem:[#allocation2 + $0x70] sm:$0xf] %vm1720_vm8, %v1585_v59 }
 0x14b   :  { %v1591_v61 = vpop.permute.xlu1 %1590  ;;  %1990 = vrot.lane.b32.xlu0 %v8678_v50, %s7090_s12 }
 0x14c   :  { %1752 = vst.msk [vmem:[#allocation2 + $0x7c] sm:$0xf] %vm1720_vm8, %v1591_v61  ;;  %v6513_v61 = vld [vmem:[%s12004_s0 + $0x120] sm:$0xf] }
 0x14d   :  { %1996 = vrot.lane.b32.xlu1 %v8683_v5, %s7090_s12  ;;  %v1589_v58 = vpop.permute.xlu0 %1588 }
 0x14e   :  { %1751 = vst.msk [vmem:[#allocation2 + $0x78] sm:$0xf] %vm1720_vm8, %v1589_v58 }
 0x14f   :  { %v1595_v54 = vpop.permute.xlu1 %1594  ;;  %1994 = vrot.lane.b32.xlu0 %v8694_v57, %s7090_s12 }
 0x150   :  { %1754 = vst.msk [vmem:[#allocation2 + $0x84] sm:$0xf] %vm1720_vm8, %v1595_v54  ;;  %v6517_v54 = vld [vmem:[%s12004_s0 + $0x130] sm:$0xf] }
 0x151   :  { %2000 = vrot.lane.b32.xlu1 %v8699_v48, %s7090_s12  ;;  %v1593_v60 = vpop.permute.xlu0 %1592 }
 0x152   :  { %1753 = vst.msk [vmem:[#allocation2 + $0x80] sm:$0xf] %vm1720_vm8, %v1593_v60 }
 0x153   :  { %v1599_v20 = vpop.permute.xlu1 %1598  ;;  %1998 = vrot.lane.b32.xlu0 %v8710_v22, %s7090_s12 }
 0x154   :  { %1756 = vst.msk [vmem:[#allocation2 + $0x8c] sm:$0xf] %vm1720_vm8, %v1599_v20  ;;  %v6516_v20 = vld [vmem:[%s12004_s0 + $0x12c] sm:$0xf] }
 0x155   :  { %2004 = vrot.lane.b32.xlu1 %v8715_v40, %s7090_s12  ;;  %v1597_v19 = vpop.permute.xlu0 %1596 }
 0x156   :  { %1755 = vst.msk [vmem:[#allocation2 + $0x88] sm:$0xf] %vm1720_vm8, %v1597_v19 }
 0x157   :  { %v1603_v46 = vpop.permute.xlu1 %1602  ;;  %2002 = vrot.lane.b32.xlu0 %v8726_v2, %s7090_s12 }
 0x158   :  { %1758 = vst.msk [vmem:[#allocation2 + $0x94] sm:$0xf] %vm1720_vm8, %v1603_v46  ;;  %v6520_v46 = vld [vmem:[%s12004_s0 + $0x13c] sm:$0xf] }
 0x159   :  { %2008 = vrot.lane.b32.xlu1 %v8731_v14, %s7090_s12  ;;  %v1601_v34 = vpop.permute.xlu0 %1600 }
 0x15a   :  { %1757 = vst.msk [vmem:[#allocation2 + $0x90] sm:$0xf] %vm1720_vm8, %v1601_v34 }
 0x15b   :  { %v1607_v29 = vpop.permute.xlu1 %1606  ;;  %2006 = vrot.lane.b32.xlu0 %v8742_v12, %s7090_s12 }
 0x15c   :  { %1760 = vst.msk [vmem:[#allocation2 + $0x9c] sm:$0xf] %vm1720_vm8, %v1607_v29  ;;  %v6519_v29 = vld [vmem:[%s12004_s0 + $0x138] sm:$0xf] }
 0x15d   :  { %2012 = vrot.lane.b32.xlu1 %v8747_v9, %s7090_s12  ;;  %v1605_v11 = vpop.permute.xlu0 %1604 }
 0x15e   :  { %1759 = vst.msk [vmem:[#allocation2 + $0x98] sm:$0xf] %vm1720_vm8, %v1605_v11 }
 0x15f   :  { %v1611_v38 = vpop.permute.xlu1 %1610  ;;  %2010 = vrot.lane.b32.xlu0 %v8758_v52, %s7090_s12 }
 0x160   :  { %1762 = vst.msk [vmem:[#allocation2 + $0xa4] sm:$0xf] %vm1720_vm8, %v1611_v38  ;;  %v6523_v38 = vld [vmem:[%s12004_s0 + $0x148] sm:$0xf] }
 0x161   :  { %2016 = vrot.lane.b32.xlu1 %v8763_v3, %s7090_s12  ;;  %v1609_v35 = vpop.permute.xlu0 %1608 }
 0x162   :  { %1761 = vst.msk [vmem:[#allocation2 + $0xa0] sm:$0xf] %vm1720_vm8, %v1609_v35 }
 0x163   :  { %v1615_v33 = vpop.permute.xlu1 %1614  ;;  %2014 = vrot.lane.b32.xlu0 %v8774_v26, %s7090_s12 }
 0x164   :  { %1764 = vst.msk [vmem:[#allocation2 + $0xac] sm:$0xf] %vm1720_vm8, %v1615_v33  ;;  %v6522_v33 = vld [vmem:[%s12004_s0 + $0x144] sm:$0xf] }
 0x165   :  { %2020 = vrot.lane.b32.xlu1 %v8779_v6, %s7090_s12  ;;  %v1613_v36 = vpop.permute.xlu0 %1612 }
 0x166   :  { %1763 = vst.msk [vmem:[#allocation2 + $0xa8] sm:$0xf] %vm1720_vm8, %v1613_v36 }
 0x167   :  { %v1619_v18 = vpop.permute.xlu1 %1618  ;;  %2018 = vrot.lane.b32.xlu0 %v8790_v31, %s7090_s12 }
 0x168   :  { %1766 = vst.msk [vmem:[#allocation2 + $0xb4] sm:$0xf] %vm1720_vm8, %v1619_v18  ;;  %v6526_v18 = vld [vmem:[%s12004_s0 + $0x154] sm:$0xf] }
 0x169   :  { %2024 = vrot.lane.b32.xlu1 %v8795_v1, %s7090_s12  ;;  %v1617_v13 = vpop.permute.xlu0 %1616 }
 0x16a   :  { %1765 = vst.msk [vmem:[#allocation2 + $0xb0] sm:$0xf] %vm1720_vm8, %v1617_v13 }
 0x16b   :  { %v1623_v44 = vpop.permute.xlu1 %1622  ;;  %2022 = vrot.lane.b32.xlu0 %v8806_v21, %s7090_s12  ;;  %v2303_v21 = vshll.u32 %v8566_v55, 16 }
 0x16c   :  { %1768 = vst.msk [vmem:[#allocation2 + $0xbc] sm:$0xf] %vm1720_vm8, %v1623_v44  ;;  %v6525_v44 = vld [vmem:[%s12004_s0 + $0x150] sm:$0xf] }
 0x16d   :  { %2028 = vrot.lane.b32.xlu1 %v8811_v28, %s7090_s12  ;;  %v1621_v41 = vpop.permute.xlu0 %1620 }
 0x16e   :  { %1767 = vst.msk [vmem:[#allocation2 + $0xb8] sm:$0xf] %vm1720_vm8, %v1621_v41 }
 0x16f   :  { %v1627_v59 = vpop.permute.xlu1 %1626  ;;  %2026 = vrot.lane.b32.xlu0 %v8822_v10, %s7090_s12 }
 0x170   :  { %1770 = vst.msk [vmem:[#allocation2 + $0xc4] sm:$0xf] %vm1720_vm8, %v1627_v59 }
 0x171   :  { %2032 = vrot.lane.b32.xlu1 %v6514_v8, %s7090_s12  ;;  %v1625_v58 = vpop.permute.xlu0 %1624  ;;  %v6529_v8 = vld [vmem:[%s12004_s0 + $0x160] sm:$0xf] }
 0x172   :  { %1769 = vst.msk [vmem:[#allocation2 + $0xc0] sm:$0xf] %vm1720_vm8, %v1625_v58 }
 0x173   :  { %v1631_v60 = vpop.permute.xlu1 %1630  ;;  %2030 = vrot.lane.b32.xlu0 %v6513_v61, %s7090_s12  ;;  %v6528_v61 = vld [vmem:[%s12004_s0 + $0x15c] sm:$0xf] }
 0x174   :  { %1772 = vst.msk [vmem:[#allocation2 + $0xcc] sm:$0xf] %vm1720_vm8, %v1631_v60 }
 0x175   :  { %2036 = vrot.lane.b32.xlu1 %v6517_v54, %s7090_s12  ;;  %v1629_v19 = vpop.permute.xlu0 %1628  ;;  %v6532_v54 = vld [vmem:[%s12004_s0 + $0x16c] sm:$0xf] }
 0x176   :  { %1771 = vst.msk [vmem:[#allocation2 + $0xc8] sm:$0xf] %vm1720_vm8, %v1629_v19  ;;  %v2213_v19 = vshll.u32 %v8492_v25, 16 }
 0x177   :  { %v1635_v34 = vpop.permute.xlu1 %1634  ;;  %2034 = vrot.lane.b32.xlu0 %v6516_v20, %s7090_s12  ;;  %v6531_v20 = vld [vmem:[%s12004_s0 + $0x168] sm:$0xf] }
 0x178   :  { %1774 = vst.msk [vmem:[#allocation2 + $0xd4] sm:$0xf] %vm1720_vm8, %v1635_v34 }
 0x179   :  { %2040 = vrot.lane.b32.xlu1 %v6520_v46, %s7090_s12  ;;  %v1633_v11 = vpop.permute.xlu0 %1632  ;;  %v2217_v46 = vshrl.u32 %v8492_v25, 16  ;;  %v6534_v25 = vld [vmem:[%s12004_s0 + $0x174] sm:$0xf] }
 0x17a   :  { %1773 = vst.msk [vmem:[#allocation2 + $0xd0] sm:$0xf] %vm1720_vm8, %v1633_v11 }
 0x17b   :  { %v1639_v35 = vpop.permute.xlu1 %1638  ;;  %2038 = vrot.lane.b32.xlu0 %v6519_v29, %s7090_s12  ;;  %v6535_v29 = vld [vmem:[%s12004_s0 + $0x178] sm:$0xf] }
 0x17c   :  { %1776 = vst.msk [vmem:[#allocation2 + $0xdc] sm:$0xf] %vm1720_vm8, %v1639_v35  ;;  %v2207_v35 = vshll.u32 %v8502_v37, 16 }
 0x17d   :  { %2044 = vrot.lane.b32.xlu1 %v6523_v38, %s7090_s12  ;;  %v1637_v36 = vpop.permute.xlu0 %1636  ;;  %v2204_v38 = vshrl.u32 %v8502_v37, 16  ;;  %v6538_v37 = vld [vmem:[%s12004_s0 + $0x184] sm:$0xf] }
 0x17e   :  { %1775 = vst.msk [vmem:[#allocation2 + $0xd8] sm:$0xf] %vm1720_vm8, %v1637_v36  ;;  %v2219_v36 = vrot.slane %v2217_v46, 4 }
 0x17f   :  { %v1643_v13 = vpop.permute.xlu1 %1642  ;;  %2042 = vrot.lane.b32.xlu0 %v6522_v33, %s7090_s12  ;;  %v8909_v33 = vrot.slane %v2213_v19, 5 }
 0x180   :  { %1778 = vst.msk [vmem:[#allocation2 + $0xe4] sm:$0xf] %vm1720_vm8, %v1643_v13  ;;  %v2241_v13 = vshrl.u32 %v8507_v0, 16 }
 0x181   :  { %2048 = vrot.lane.b32.xlu1 %v6526_v18, %s7090_s12  ;;  %v1641_v41 = vpop.permute.xlu0 %1640  ;;  %v2237_v18 = vshll.u32 %v8507_v0, 16  ;;  %v2261_v0 = vshll.u32 %v8523_v43, 16 }
 0x182   :  { %1777 = vst.msk [vmem:[#allocation2 + $0xe0] sm:$0xf] %vm1720_vm8, %v1641_v41  ;;  %v2228_v41 = vshrl.u32 %v8518_v27, 16  ;;  %v2243_v19 = vrot.slane %v2241_v13, 4 }
 0x183   :  { %v1647_v59 = vpop.permute.xlu1 %1646  ;;  %2046 = vrot.lane.b32.xlu0 %v6525_v44, %s7090_s12  ;;  %v8941_v13 = vrot.slane %v2261_v0, 5 }
 0x184   :  { %1780 = vst.msk [vmem:[#allocation2 + $0xec] sm:$0xf] %vm1720_vm8, %v1647_v59 }
 0x185   :  { %2052 = vrot.lane.b32.xlu1 %v6529_v8, %s7090_s12  ;;  %v1645_v58 = vpop.permute.xlu0 %1644  ;;  %v2231_v8 = vshll.u32 %v8518_v27, 16  ;;  %v6537_v27 = vld [vmem:[%s12004_s0 + $0x180] sm:$0xf] }
 0x186   :  { %1779 = vst.msk [vmem:[#allocation2 + $0xe8] sm:$0xf] %vm1720_vm8, %v1645_v58  ;;  %v2206_v58 = vrot.slane %v2204_v38, 4  ;;  %v2230_v38 = vrot.slane %v2228_v41, 4 }
 0x187   :  { %v1651_v60 = vpop.permute.xlu1 %1650  ;;  %2050 = vrot.lane.b32.xlu0 %v6528_v61, %s7090_s12  ;;  %v6452_v61 = vld [vmem:[%s12004_s0 + $0x14] sm:$0x1] }
 0x188   :  { %1782 = vst.msk [vmem:[#allocation2 + $0xf4] sm:$0xf] %vm1720_vm8, %v1651_v60  ;;  %v2265_v60 = vshrl.u32 %v8523_v43, 16  ;;  %v2252_v43 = vshrl.u32 %v8534_v4, 16 }
 0x189   :  { %2056 = vrot.lane.b32.xlu1 %v6532_v54, %s7090_s12  ;;  %v1649_v34 = vpop.permute.xlu0 %1648  ;;  %v2209_v54 = vrot.slane %v2207_v35, 5  ;;  %v2233_v35 = vrot.slane %v2231_v8, 5  ;;  %v2289_v8 = vshrl.u32 %v8539_v63, 16 }
 0x18a   :  { %1781 = vst.msk [vmem:[#allocation2 + $0xf0] sm:$0xf] %vm1720_vm8, %v1649_v34  ;;  %v6541_v34 = vld [vmem:[%s12004_s0 + $0x190] sm:$0xf]  ;;  %v2267_v41 = vrot.slane %v2265_v60, 4  ;;  %v2279_v60 = vshll.u32 %v8550_v45, 16 }
 0x18b   :  { %v1655_v11 = vpop.permute.xlu1 %1654  ;;  %2054 = vrot.lane.b32.xlu0 %v6531_v20, %s7090_s12  ;;  %v8930_v20 = vrot.slane %v2237_v18, 5  ;;  %v6455_v18 = vld [vmem:[%s12004_s0 + $0x20] sm:$0x1] }
 0x18c   :  { %1784 = vst.msk [vmem:[#allocation2 + $0xfc] sm:$0xf] %vm1720_vm8, %v1655_v11  ;;  %v2223_v11 = vshll.u32 %v6452_v61, 16 }
 0x18d   :  { %2060 = vrot.lane.b32.xlu1 %v6535_v29, %s7090_s12  ;;  %v1653_v44 = vpop.permute.xlu0 %1652  ;;  %v2220_v29 = vor.u32 %v2219_v36, %v8909_v33  ;;  %v2210_v36 = vor.u32 %v2209_v54, %v2206_v58  ;;  %v8959_v58 = vrot.slane %v2252_v43, 4  ;;  %v2276_v54 = vshrl.u32 %v8550_v45, 16  ;;  %v6543_v45 = vld [vmem:[%s12004_s0 + $0x198] sm:$0xf] }
 0x18e   :  { %1783 = vst.msk [vmem:[#allocation2 + $0xf8] sm:$0xf] %vm1720_vm8, %v1653_v44  ;;  %v2255_v44 = vshll.u32 %v8534_v4, 16  ;;  %v6544_v4 = vld [vmem:[%s12004_s0 + $0x19c] sm:$0xf]  ;;  %v2234_v43 = vor.u32 %v2233_v35, %v2230_v38 }
 0x18f   :  { %v1949_v59 = vpop.permute.xlu1 %1948  ;;  %2058 = vrot.lane.b32.xlu0 %v6534_v25, %s7090_s12  ;;  %v2221_v0 = vrot.slane %v2220_v29, 4  ;;  %v2309_v29 = vshll.u32 %v8555_v47, 16  ;;  %v6461_v35 = vld [vmem:[%s12004_s0 + $0x38] sm:$0x1] }
 0x190   :  { %2140 = vst.msk [vmem:[#allocation2 + $0x4] sm:$0xf] %vm2138_vm9, %v1949_v59  ;;  %v6540_v59 = vld [vmem:[%s12004_s0 + $0x18c] sm:$0xf]  ;;  %v2257_v56 = vrot.slane %v2255_v44, 5 }
 0x191   :  { %2064 = vrot.lane.b32.xlu1 %v6538_v37, %s7090_s12  ;;  %v1947_v46 = vpop.permute.xlu0 %1946  ;;  %v2285_v37 = vshll.u32 %v8539_v63, 16  ;;  %v6458_v63 = vld [vmem:[%s12004_s0 + $0x2c] sm:$0x1] }
 0x192   :  { %2139 = vst.msk [vmem:[#allocation2] sm:$0xf] %vm2138_vm9, %v1947_v46  ;;  %v2225_v46 = vrot.slane %v2223_v11, 5  ;;  %v2291_v11 = vrot.slane %v2289_v8, 4  ;;  %v2271_v44 = vshll.u32 %v6458_v63, 16  ;;  %v2281_v8 = vrot.slane %v2279_v60, 5 }
 0x193   :  { %v1953_v25 = vpop.permute.xlu1 %1952  ;;  %2062 = vrot.lane.b32.xlu0 %v6537_v27, %s7090_s12  ;;  %v2244_v27 = vor.u32 %v2243_v19, %v8930_v20  ;;  %v8964_v10 = vrot.slane %v2285_v37, 5  ;;  %v2211_v19 = vrot.slane %v2210_v36, 4  ;;  %v2313_v37 = vshrl.u32 %v8555_v47, 16 }
 0x194   :  { %2142 = vst.msk [vmem:[#allocation2 + $0xc] sm:$0xf] %vm2138_vm9, %v1953_v25  ;;  %v2247_v25 = vshll.u32 %v6455_v18, 16  ;;  %v2268_v18 = vor.u32 %v2267_v41, %v8941_v13  ;;  %v2278_v36 = vrot.slane %v2276_v54, 4  ;;  %v8983_v47 = vrot.slane %v2309_v29, 5 }
 0x195   :  { %2068 = vrot.lane.b32.xlu1 %v6541_v34, %s7090_s12  ;;  %v1951_v61 = vpop.permute.xlu0 %1950  ;;  %v2245_v28 = vrot.slane %v2244_v27, 4  ;;  %v2333_v41 = vshll.u32 %v8571_v39, 16  ;;  %v2258_v63 = vor.u32 %v2257_v56, %v8959_v58  ;;  %v2315_v54 = vrot.slane %v2313_v37, 4  ;;  %v6464_v56 = vld [vmem:[%s12004_s0 + $0x44] sm:$0x1] }
 0x196   :  { %2141 = vst.msk [vmem:[#allocation2 + $0x8] sm:$0xf] %vm2138_vm9, %v1951_v61  ;;  %v2269_v27 = vrot.slane %v2268_v18, 4  ;;  %v2292_v29 = vor.u32 %v2291_v11, %v8964_v10  ;;  %v2361_v11 = vshrl.u32 %v8587_v7, 16 }
 0x197   :  { %v1957_v34 = vpop.permute.xlu1 %1956  ;;  %2066 = vrot.lane.b32.xlu0 %v6540_v59, %s7090_s12  ;;  %v2226_v59 = vsel %vm7167_vm3, %v2221_v0, %v2225_v46  ;;  %v2337_v0 = vshrl.u32 %v8571_v39, 16  ;;  %v2235_v46 = vrot.slane %v2234_v43, 4  ;;  %v9003_v58 = vrot.slane %v2333_v41, 5 }
 0x198   :  { %2144 = vst.msk [vmem:[#allocation2 + $0x14] sm:$0xf] %vm2138_vm9, %v1957_v34  ;;  %v2249_v34 = vrot.slane %v2247_v25, 5  ;;  %v2273_v25 = vrot.slane %v2271_v44, 5  ;;  %v2259_v37 = vrot.slane %v2258_v63, 4 }
 0x199   :  { %2072 = vrot.lane.b32.xlu1 %v6544_v4, %s7090_s12  ;;  %v1955_v61 = vpop.permute.xlu0 %1954  ;;  %v2300_v4 = vshrl.u32 %v8566_v55, 16  ;;  %v2216_v55 = vsel %vm7167_vm3, %v2211_v19, %v8909_v33  ;;  %v2324_v33 = vshrl.u32 %v8582_v15, 16  ;;  %v2327_v19 = vshll.u32 %v8582_v15, 16 }
 0x19a   :  { %2143 = vst.msk [vmem:[#allocation2 + $0x10] sm:$0xf] %vm2138_vm9, %v1955_v61  ;;  %v2250_v39 = vsel %vm7167_vm3, %v2245_v28, %v2249_v34  ;;  %v2357_v28 = vshll.u32 %v8587_v7, 16  ;;  %v2339_v18 = vrot.slane %v2337_v0, 4  ;;  %v2240_v15 = vsel %vm7167_vm3, %v2235_v46, %v8930_v20 }
 0x19b   :  { %v1961_v38 = vpop.permute.xlu1 %1960  ;;  %2070 = vrot.lane.b32.xlu0 %v6543_v45, %s7090_s12  ;;  %v2295_v45 = vshll.u32 %v6461_v35, 16  ;;  %v2302_v61 = vrot.slane %v2300_v4, 4  ;;  %v2274_v44 = vsel %vm7167_vm3, %v2269_v27, %v2273_v25  ;;  %v2293_v34 = vrot.slane %v2292_v29, 4 }
 0x19c   :  { %2146 = vst.msk [vmem:[#allocation2 + $0x1c] sm:$0xf] %vm2138_vm9, %v1961_v38  ;;  %v2305_v38 = vrot.slane %v2303_v21, 5  ;;  %v2282_v21 = vor.u32 %v2281_v8, %v2278_v36  ;;  %v2316_v7 = vor.u32 %v2315_v54, %v8983_v47  ;;  %v2319_v35 = vshll.u32 %v6464_v56, 16  ;;  %v6467_v36 = vld [vmem:[%s12004_s0 + $0x50] sm:$0x1] }
 0x19d   :  { %2973 = vrot.lane.b32.xlu1 %v2226_v59, %s7091_s22  ;;  %v1959_v60 = vpop.permute.xlu0 %1958  ;;  %v2297_v4 = vrot.slane %v2295_v45, 5  ;;  %v9019_v8 = vrot.slane %v2324_v33, 4  ;;  %v2329_v41 = vrot.slane %v2327_v19, 5  ;;  %v2348_v0 = vshrl.u32 %v8598_v42, 16 }
 0x19e   :  { %2145 = vst.msk [vmem:[#allocation2 + $0x18] sm:$0xf] %vm2138_vm9, %v1959_v60  ;;  %v2351_v20 = vshll.u32 %v8598_v42, 16  ;;  %v9024_v46 = vrot.slane %v2357_v28, 5  ;;  %v2363_v27 = vrot.slane %v2361_v11, 4  ;;  %v2381_v25 = vshll.u32 %v8603_v51, 16 }
 0x19f   :  { %v1965_v43 = vpop.permute.xlu1 %1964  ;;  %2971 = vrot.lane.b32.xlu0 %v2216_v55, %s7091_s22  ;;  %v2283_v63 = vrot.slane %v2282_v21, 4  ;;  %v2264_v54 = vsel %vm7167_vm3, %v2259_v37, %v8941_v13  ;;  %v2306_v42 = vor.u32 %v2305_v38, %v2302_v61  ;;  %v2340_v60 = vor.u32 %v2339_v18, %v9003_v58  ;;  %v6470_v61 = vld [vmem:[%s12004_s0 + $0x5c] sm:$0x1] }
 0x1a0   :  { %2148 = vst.msk [vmem:[#allocation2 + $0x24] sm:$0xf] %vm2138_vm9, %v1965_v43  ;;  %v2385_v29 = vshrl.u32 %v8603_v51, 16  ;;  %v2298_v33 = vsel %vm7167_vm3, %v2293_v34, %v2297_v4  ;;  %v2317_v19 = vrot.slane %v2316_v7, 4  ;;  %v2321_v43 = vrot.slane %v2319_v35, 5 }
 0x1a1   :  { %2977 = vrot.lane.b32.xlu1 %v2250_v39, %s7091_s22  ;;  %v1963_v59 = vpop.permute.xlu0 %1962  ;;  %v2343_v39 = vshll.u32 %v6467_v36, 16  ;;  %v2350_v56 = vrot.slane %v2348_v0, 4  ;;  %v2353_v28 = vrot.slane %v2351_v20, 5  ;;  %v2372_v11 = vshrl.u32 %v8614_v32, 16 }
 0x1a2   :  { %2147 = vst.msk [vmem:[#allocation2 + $0x20] sm:$0xf] %vm2138_vm9, %v1963_v59  ;;  %v2375_v21 = vshll.u32 %v8614_v32, 16  ;;  %v9043_v51 = vrot.slane %v2381_v25, 5  ;;  %v2405_v38 = vshll.u32 %v8619_v49, 16  ;;  %v2409_v18 = vshrl.u32 %v8619_v49, 16 }
 0x1a3   :  { %v1969_v55 = vpop.permute.xlu1 %1968  ;;  %2975 = vrot.lane.b32.xlu0 %v2240_v15, %s7091_s22  ;;  %v2288_v32 = vsel %vm7167_vm3, %v2283_v63, %v8964_v10  ;;  %v2307_v15 = vrot.slane %v2306_v42, 4  ;;  %v2345_v37 = vrot.slane %v2343_v39, 5  ;;  %v2330_v59 = vor.u32 %v2329_v41, %v9019_v8  ;;  %v6473_v8 = vld [vmem:[%s12004_s0 + $0x68] sm:$0x1] }
 0x1a4   :  { %2150 = vst.msk [vmem:[#allocation2 + $0x2c] sm:$0xf] %vm2138_vm9, %v1969_v55  ;;  %v2387_v34 = vrot.slane %v2385_v29, 4  ;;  %v2322_v49 = vsel %vm7167_vm3, %v2317_v19, %v2321_v43  ;;  %v2364_v7 = vor.u32 %v2363_v27, %v9024_v46  ;;  %v2367_v35 = vshll.u32 %v6470_v61, 16  ;;  %v6476_v19 = vld [vmem:[%s12004_s0 + $0x74] sm:$0x1] }
 0x1a5   :  { %2981 = vrot.lane.b32.xlu1 %v2274_v44, %s7091_s22  ;;  %v1967_v45 = vpop.permute.xlu0 %1966  ;;  %v2341_v44 = vrot.slane %v2340_v60, 4  ;;  %v2374_v36 = vrot.slane %v2372_v11, 4  ;;  %v2377_v0 = vrot.slane %v2375_v21, 5  ;;  %v2396_v20 = vshrl.u32 %v8630_v16, 16 }
 0x1a6   :  { %2149 = vst.msk [vmem:[#allocation2 + $0x28] sm:$0xf] %vm2138_vm9, %v1967_v45  ;;  %v2399_v10 = vshll.u32 %v8630_v16, 16  ;;  %v9063_v41 = vrot.slane %v2405_v38, 5  ;;  %v2429_v25 = vshll.u32 %v8635_v30, 16  ;;  %v2433_v27 = vshrl.u32 %v8635_v30, 16 }
 0x1a7   :  { %v1973_v13 = vpop.permute.xlu1 %1972  ;;  %2979 = vrot.lane.b32.xlu0 %v2264_v54, %s7091_s22  ;;  %v2354_v63 = vor.u32 %v2353_v28, %v2350_v56  ;;  %v2411_v54 = vrot.slane %v2409_v18, 4  ;;  %v2312_v16 = vsel %vm7167_vm3, %v2307_v15, %v8983_v47  ;;  %v2346_v42 = vsel %vm7167_vm3, %v2341_v44, %v2345_v37 }
 0x1a8   :  { %2152 = vst.msk [vmem:[#allocation2 + $0x34] sm:$0xf] %vm2138_vm9, %v1973_v13  ;;  %v2331_v60 = vrot.slane %v2330_v59, 4  ;;  %v2365_v29 = vrot.slane %v2364_v7, 4  ;;  %v2369_v45 = vrot.slane %v2367_v35, 5  ;;  %v2388_v30 = vor.u32 %v2387_v34, %v9043_v51 }
 0x1a9   :  { %2985 = vrot.lane.b32.xlu1 %v2298_v33, %s7091_s22  ;;  %v1971_v4 = vpop.permute.xlu0 %1970  ;;  %v2391_v33 = vshll.u32 %v6473_v8, 16  ;;  %v9079_v43 = vrot.slane %v2396_v20, 4  ;;  %v2401_v56 = vrot.slane %v2399_v10, 5  ;;  %v2420_v28 = vshrl.u32 %v8646_v24, 16 }
 0x1aa   :  { %2151 = vst.msk [vmem:[#allocation2 + $0x30] sm:$0xf] %vm2138_vm9, %v1971_v4  ;;  %v2423_v47 = vshll.u32 %v8646_v24, 16  ;;  %v9084_v21 = vrot.slane %v2429_v25, 5  ;;  %v2435_v13 = vrot.slane %v2433_v27, 4  ;;  %v2453_v61 = vshll.u32 %v8651_v53, 16 }
 0x1ab   :  { %v1977_v55 = vpop.permute.xlu1 %1976  ;;  %2983 = vrot.lane.b32.xlu0 %v2288_v32, %s7091_s22  ;;  %v2355_v38 = vrot.slane %v2354_v63, 4  ;;  %v2336_v18 = vsel %vm7167_vm3, %v2331_v60, %v9003_v58  ;;  %v2378_v24 = vor.u32 %v2377_v0, %v2374_v36  ;;  %v2412_v32 = vor.u32 %v2411_v54, %v9063_v41  ;;  %v6479_v36 = vld [vmem:[%s12004_s0 + $0x80] sm:$0x1] }
 0x1ac   :  { %2154 = vst.msk [vmem:[#allocation2 + $0x3c] sm:$0xf] %vm2138_vm9, %v1977_v55  ;;  %v2415_v15 = vshll.u32 %v6476_v19, 16  ;;  %v2457_v44 = vshrl.u32 %v8651_v53, 16  ;;  %v2370_v59 = vsel %vm7167_vm3, %v2365_v29, %v2369_v45  ;;  %v2389_v34 = vrot.slane %v2388_v30, 4 }
 0x1ad   :  { %2989 = vrot.lane.b32.xlu1 %v2322_v49, %s7091_s22  ;;  %v1975_v39 = vpop.permute.xlu0 %1974  ;;  %v2393_v4 = vrot.slane %v2391_v33, 5  ;;  %v2422_v49 = vrot.slane %v2420_v28, 4  ;;  %v2425_v7 = vrot.slane %v2423_v47, 5  ;;  %v2444_v35 = vshrl.u32 %v8662_v17, 16  ;;  %v6482_v30 = vld [vmem:[%s12004_s0 + $0x8c] sm:$0x1] }
 0x1ae   :  { %2153 = vst.msk [vmem:[#allocation2 + $0x38] sm:$0xf] %vm2138_vm9, %v1975_v39  ;;  %v2447_v20 = vshll.u32 %v8662_v17, 16  ;;  %v9103_v53 = vrot.slane %v2453_v61, 5  ;;  %v2477_v0 = vshll.u32 %v8667_v62, 16  ;;  %v2481_v10 = vshrl.u32 %v8667_v62, 16 }
 0x1af   :  { %v1981_v11 = vpop.permute.xlu1 %1980  ;;  %2987 = vrot.lane.b32.xlu0 %v2312_v16, %s7091_s22  ;;  %v2360_v17 = vsel %vm7167_vm3, %v2355_v38, %v9024_v46  ;;  %v2379_v55 = vrot.slane %v2378_v24, 4  ;;  %v2413_v8 = vrot.slane %v2412_v32, 4  ;;  %v2417_v25 = vrot.slane %v2415_v15, 5  ;;  %v6485_v24 = vld [vmem:[%s12004_s0 + $0x98] sm:$0x1] }
 0x1b0   :  { %2156 = vst.msk [vmem:[#allocation2 + $0x44] sm:$0xf] %vm2138_vm9, %v1981_v11  ;;  %v2402_v27 = vor.u32 %v2401_v56, %v9079_v43  ;;  %v2459_v63 = vrot.slane %v2457_v44, 4  ;;  %v2394_v62 = vsel %vm7167_vm3, %v2389_v34, %v2393_v4  ;;  %v2436_v16 = vor.u32 %v2435_v13, %v9084_v21 }
 0x1b1   :  { %2993 = vrot.lane.b32.xlu1 %v2346_v42, %s7091_s22  ;;  %v1979_v37 = vpop.permute.xlu0 %1978  ;;  %v2439_v42 = vshll.u32 %v6479_v36, 16  ;;  %v2446_v60 = vrot.slane %v2444_v35, 4  ;;  %v2449_v39 = vrot.slane %v2447_v20, 5  ;;  %v2468_v29 = vshrl.u32 %v8678_v50, 16 }
 0x1b2   :  { %2155 = vst.msk [vmem:[#allocation2 + $0x40] sm:$0xf] %vm2138_vm9, %v1979_v37  ;;  %v2471_v46 = vshll.u32 %v8678_v50, 16  ;;  %v9123_v33 = vrot.slane %v2477_v0, 5  ;;  %v2501_v19 = vshll.u32 %v8683_v5, 16  ;;  %v2505_v43 = vshrl.u32 %v8683_v5, 16 }
 0x1b3   :  { %v1985_v58 = vpop.permute.xlu1 %1984  ;;  %2991 = vrot.lane.b32.xlu0 %v2336_v18, %s7091_s22  ;;  %v2426_v56 = vor.u32 %v2425_v7, %v2422_v49  ;;  %v2483_v28 = vrot.slane %v2481_v10, 4  ;;  %v2384_v50 = vsel %vm7167_vm3, %v2379_v55, %v9043_v51  ;;  %v2418_v47 = vsel %vm7167_vm3, %v2413_v8, %v2417_v25 }
 0x1b4   :  { %2158 = vst.msk [vmem:[#allocation2 + $0x4c] sm:$0xf] %vm2138_vm9, %v1985_v58  ;;  %v2403_v11 = vrot.slane %v2402_v27, 4  ;;  %v2437_v61 = vrot.slane %v2436_v16, 4  ;;  %v2441_v38 = vrot.slane %v2439_v42, 5  ;;  %v2460_v5 = vor.u32 %v2459_v63, %v9103_v53 }
 0x1b5   :  { %2997 = vrot.lane.b32.xlu1 %v2370_v59, %s7091_s22  ;;  %v1983_v54 = vpop.permute.xlu0 %1982  ;;  %v2463_v18 = vshll.u32 %v6482_v30, 16  ;;  %v9139_v32 = vrot.slane %v2468_v29, 4  ;;  %v2473_v15 = vrot.slane %v2471_v46, 5  ;;  %v2492_v44 = vshrl.u32 %v8694_v57, 16  ;;  %v6488_v63 = vld [vmem:[%s12004_s0 + $0xa4] sm:$0x1] }
 0x1b6   :  { %2157 = vst.msk [vmem:[#allocation2 + $0x48] sm:$0xf] %vm2138_vm9, %v1983_v54  ;;  %v2495_v51 = vshll.u32 %v8694_v57, 16  ;;  %v9144_v59 = vrot.slane %v2501_v19, 5  ;;  %v2507_v34 = vrot.slane %v2505_v43, 4  ;;  %v2525_v4 = vshll.u32 %v8699_v48, 16 }
 0x1b7   :  { %v1989_v45 = vpop.permute.xlu1 %1988  ;;  %2995 = vrot.lane.b32.xlu0 %v2360_v17, %s7091_s22  ;;  %v2427_v49 = vrot.slane %v2426_v56, 4  ;;  %v2408_v7 = vsel %vm7167_vm3, %v2403_v11, %v9063_v41  ;;  %v2450_v57 = vor.u32 %v2449_v39, %v2446_v60  ;;  %v2484_v35 = vor.u32 %v2483_v28, %v9123_v33 }
 0x1b8   :  { %2160 = vst.msk [vmem:[#allocation2 + $0x54] sm:$0xf] %vm2138_vm9, %v1989_v45  ;;  %v2487_v20 = vshll.u32 %v6485_v24, 16  ;;  %v2529_v58 = vshrl.u32 %v8699_v48, 16  ;;  %v2442_v0 = vsel %vm7167_vm3, %v2437_v61, %v2441_v38  ;;  %v2461_v10 = vrot.slane %v2460_v5, 4 }
 0x1b9   :  { %3001 = vrot.lane.b32.xlu1 %v2394_v62, %s7091_s22  ;;  %v1987_v13 = vpop.permute.xlu0 %1986  ;;  %v2465_v17 = vrot.slane %v2463_v18, 5  ;;  %v2494_v55 = vrot.slane %v2492_v44, 4  ;;  %v2497_v8 = vrot.slane %v2495_v51, 5  ;;  %v2516_v25 = vshrl.u32 %v8710_v22, 16  ;;  %v6494_v51 = vld [vmem:[%s12004_s0 + $0xbc] sm:$0x1] }
 0x1ba   :  { %2159 = vst.msk [vmem:[#allocation2 + $0x50] sm:$0xf] %vm2138_vm9, %v1987_v13  ;;  %v2519_v27 = vshll.u32 %v8710_v22, 16  ;;  %v9163_v48 = vrot.slane %v2525_v4, 5  ;;  %v2549_v54 = vshll.u32 %v8715_v40, 16  ;;  %v2553_v62 = vshrl.u32 %v8715_v40, 16 }
 0x1bb   :  { %v1993_v37 = vpop.permute.xlu1 %1992  ;;  %2999 = vrot.lane.b32.xlu0 %v2384_v50, %s7091_s22  ;;  %v2432_v22 = vsel %vm7167_vm3, %v2427_v49, %v9084_v21  ;;  %v2451_v16 = vrot.slane %v2450_v57, 4  ;;  %v2485_v42 = vrot.slane %v2484_v35, 4  ;;  %v2489_v60 = vrot.slane %v2487_v20, 5  ;;  %v6491_v50 = vld [vmem:[%s12004_s0 + $0xb0] sm:$0x1] }
 0x1bc   :  { %2162 = vst.msk [vmem:[#allocation2 + $0x5c] sm:$0xf] %vm2138_vm9, %v1993_v37  ;;  %v2474_v39 = vor.u32 %v2473_v15, %v9139_v32  ;;  %v2531_v29 = vrot.slane %v2529_v58, 4  ;;  %v2466_v40 = vsel %vm7167_vm3, %v2461_v10, %v2465_v17  ;;  %v2508_v45 = vor.u32 %v2507_v34, %v9144_v59 }
 0x1bd   :  { %3005 = vrot.lane.b32.xlu1 %v2418_v47, %s7091_s22  ;;  %v1991_v36 = vpop.permute.xlu0 %1990  ;;  %v2511_v30 = vshll.u32 %v6488_v63, 16  ;;  %v2518_v19 = vrot.slane %v2516_v25, 4  ;;  %v2521_v43 = vrot.slane %v2519_v27, 5  ;;  %v2540_v56 = vshrl.u32 %v8726_v2, 16 }
 0x1be   :  { %2161 = vst.msk [vmem:[#allocation2 + $0x58] sm:$0xf] %vm2138_vm9, %v1991_v36  ;;  %v2543_v21 = vshll.u32 %v8726_v2, 16  ;;  %v9183_v47 = vrot.slane %v2549_v54, 5  ;;  %v2573_v11 = vshll.u32 %v8731_v14, 16  ;;  %v2577_v13 = vshrl.u32 %v8731_v14, 16 }
 0x1bf   :  { %v1997_v41 = vpop.permute.xlu1 %1996  ;;  %3003 = vrot.lane.b32.xlu0 %v2408_v7, %s7091_s22  ;;  %v2498_v61 = vor.u32 %v2497_v8, %v2494_v55  ;;  %v2555_v38 = vrot.slane %v2553_v62, 4  ;;  %v2456_v2 = vsel %vm7167_vm3, %v2451_v16, %v9103_v53  ;;  %v2490_v5 = vsel %vm7167_vm3, %v2485_v42, %v2489_v60  ;;  %v6497_v62 = vld [vmem:[%s12004_s0 + $0xc8] sm:$0x1] }
 0x1c0   :  { %2164 = vst.msk [vmem:[#allocation2 + $0x64] sm:$0xf] %vm2138_vm9, %v1997_v41  ;;  %v2475_v18 = vrot.slane %v2474_v39, 4  ;;  %v2509_v32 = vrot.slane %v2508_v45, 4  ;;  %v2513_v15 = vrot.slane %v2511_v30, 5  ;;  %v2532_v14 = vor.u32 %v2531_v29, %v9163_v48 }
 0x1c1   :  { %3009 = vrot.lane.b32.xlu1 %v2442_v0, %s7091_s22  ;;  %v1995_v46 = vpop.permute.xlu0 %1994  ;;  %v2535_v44 = vshll.u32 %v6491_v50, 16  ;;  %v9199_v37 = vrot.slane %v2540_v56, 4  ;;  %v2545_v34 = vrot.slane %v2543_v21, 5  ;;  %v2564_v4 = vshrl.u32 %v8742_v12, 16 }
 0x1c2   :  { %2163 = vst.msk [vmem:[#allocation2 + $0x60] sm:$0xf] %vm2138_vm9, %v1995_v46  ;;  %v2567_v53 = vshll.u32 %v8742_v12, 16  ;;  %v9204_v7 = vrot.slane %v2573_v11, 5  ;;  %v2579_v57 = vrot.slane %v2577_v13, 4  ;;  %v2597_v35 = vshll.u32 %v8747_v9, 16 }
 0x1c3   :  { %v2001_v28 = vpop.permute.xlu1 %2000  ;;  %3007 = vrot.lane.b32.xlu0 %v2432_v22, %s7091_s22  ;;  %v2499_v20 = vrot.slane %v2498_v61, 4  ;;  %v2480_v58 = vsel %vm7167_vm3, %v2475_v18, %v9123_v33  ;;  %v2522_v12 = vor.u32 %v2521_v43, %v2518_v19  ;;  %v2556_v36 = vor.u32 %v2555_v38, %v9183_v47 }
 0x1c4   :  { %2166 = vst.msk [vmem:[#allocation2 + $0x6c] sm:$0xf] %vm2138_vm9, %v2001_v28  ;;  %v2559_v0 = vshll.u32 %v6494_v51, 16  ;;  %v2601_v10 = vshrl.u32 %v8747_v9, 16  ;;  %v2514_v55 = vsel %vm7167_vm3, %v2509_v32, %v2513_v15  ;;  %v2533_v8 = vrot.slane %v2532_v14, 4 }
 0x1c5   :  { %3013 = vrot.lane.b32.xlu1 %v2466_v40, %s7091_s22  ;;  %v1999_v24 = vpop.permute.xlu0 %1998  ;;  %v2537_v25 = vrot.slane %v2535_v44, 5  ;;  %v2566_v27 = vrot.slane %v2564_v4, 4  ;;  %v2569_v41 = vrot.slane %v2567_v53, 5  ;;  %v2588_v63 = vshrl.u32 %v8758_v52, 16  ;;  %v6500_v28 = vld [vmem:[%s12004_s0 + $0xec] sm:$0x1] }
 0x1c6   :  { %2165 = vst.msk [vmem:[#allocation2 + $0x68] sm:$0xf] %vm2138_vm9, %v1999_v24  ;;  %v2591_v54 = vshll.u32 %v8758_v52, 16  ;;  %v9223_v9 = vrot.slane %v2597_v35, 5  ;;  %v2621_v22 = vshll.u32 %v8763_v3, 16  ;;  %v2625_v16 = vshrl.u32 %v8763_v3, 16 }
 0x1c7   :  { %v2005_v49 = vpop.permute.xlu1 %2004  ;;  %3011 = vrot.lane.b32.xlu0 %v2456_v2, %s7091_s22  ;;  %v2504_v52 = vsel %vm7167_vm3, %v2499_v20, %v9144_v59  ;;  %v2523_v42 = vrot.slane %v2522_v12, 4  ;;  %v2557_v60 = vrot.slane %v2556_v36, 4  ;;  %v2561_v39 = vrot.slane %v2559_v0, 5  ;;  %v6503_v14 = vld [vmem:[%s12004_s0 + $0xf8] sm:$0x1] }
 0x1c8   :  { %2168 = vst.msk [vmem:[#allocation2 + $0x74] sm:$0xf] %vm2138_vm9, %v2005_v49  ;;  %v2546_v29 = vor.u32 %v2545_v34, %v9199_v37  ;;  %v2603_v46 = vrot.slane %v2601_v10, 4  ;;  %v2538_v3 = vsel %vm7167_vm3, %v2533_v8, %v2537_v25  ;;  %v2580_v45 = vor.u32 %v2579_v57, %v9204_v7  ;;  %v12134_v25 = vld [vmem:[#allocation6_spill] sm:$0xff] }
 0x1c9   :  { %3017 = vrot.lane.b32.xlu1 %v2490_v5, %s7091_s22  ;;  %v2003_v17 = vpop.permute.xlu0 %2002  ;;  %v2583_v30 = vshll.u32 %v6497_v62, 16  ;;  %v2590_v19 = vrot.slane %v2588_v63, 4  ;;  %v2593_v43 = vrot.slane %v2591_v54, 5  ;;  %v2612_v56 = vshrl.u32 %v8774_v26, 16  ;;  %v6506_v63 = vld [vmem:[%s12004_s0 + $0x104] sm:$0x1] }
 0x1ca   :  { %2167 = vst.msk [vmem:[#allocation2 + $0x70] sm:$0xf] %vm2138_vm9, %v2003_v17  ;;  %v2615_v59 = vshll.u32 %v8774_v26, 16  ;;  %v9243_v50 = vrot.slane %v2621_v22, 5  ;;  %v2645_v11 = vshll.u32 %v8779_v6, 16  ;;  %v2649_v13 = vshrl.u32 %v8779_v6, 16 }
 0x1cb   :  { %v2009_v33 = vpop.permute.xlu1 %2008  ;;  %3015 = vrot.lane.b32.xlu0 %v2480_v58, %s7091_s22  ;;  %v2570_v61 = vor.u32 %v2569_v41, %v2566_v27  ;;  %v2627_v38 = vrot.slane %v2625_v16, 4  ;;  %v2528_v26 = vsel %vm7167_vm3, %v2523_v42, %v9163_v48  ;;  %v2562_v2 = vsel %vm7167_vm3, %v2557_v60, %v2561_v39  ;;  %v12135_v54 = vld [vmem:[#allocation8_spill] sm:$0xff] }
 0x1cc   :  { %2170 = vst.msk [vmem:[#allocation2 + $0x7c] sm:$0xf] %vm2138_vm9, %v2009_v33  ;;  %v2547_v5 = vrot.slane %v2546_v29, 4  ;;  %v2581_v24 = vrot.slane %v2580_v45, 4  ;;  %v2585_v32 = vrot.slane %v2583_v30, 5  ;;  %v2604_v6 = vor.u32 %v2603_v46, %v9223_v9 }
 0x1cd   :  { %3021 = vrot.lane.b32.xlu1 %v2514_v55, %s7091_s22  ;;  %v2007_v40 = vpop.permute.xlu0 %2006  ;;  %v2607_v15 = vshll.u32 %v6500_v28, 16  ;;  %v9259_v44 = vrot.slane %v2612_v56, 4  ;;  %v9261_v51 = vrot.slane %v2615_v59, 5  ;;  %v2636_v48 = vshrl.u32 %v8790_v31, 16 }
 0x1ce   :  { %2169 = vst.msk [vmem:[#allocation2 + $0x78] sm:$0xf] %vm2138_vm9, %v2007_v40  ;;  %v2639_v37 = vshll.u32 %v8790_v31, 16  ;;  %v9266_v4 = vrot.slane %v2645_v11, 5  ;;  %v2651_v53 = vrot.slane %v2649_v13, 4  ;;  %v2669_v49 = vshll.u32 %v8795_v1, 16 }
 0x1cf   :  { %v2013_v21 = vpop.permute.xlu1 %2012  ;;  %3019 = vrot.lane.b32.xlu0 %v2504_v52, %s7091_s22  ;;  %v2571_v57 = vrot.slane %v2570_v61, 4  ;;  %v2552_v35 = vsel %vm7167_vm3, %v2547_v5, %v9183_v47  ;;  %v2594_v31 = vor.u32 %v2593_v43, %v2590_v19  ;;  %v2628_v20 = vor.u32 %v2627_v38, %v9243_v50  ;;  %v6952_v43 = vld [vmem:[%s12004_s0 + $0x114] sm:$0xf]  ;;  %v6953_v11 = vld [vmem:[%s12004_s0 + $0x124] sm:$0xf] }
 0x1d0   :  { %2172 = vst.msk [vmem:[#allocation2 + $0x84] sm:$0xf] %vm2138_vm9, %v2013_v21  ;;  %v2631_v58 = vshll.u32 %v6503_v14, 16  ;;  %v2673_v12 = vshrl.u32 %v8795_v1, 16  ;;  %v2586_v0 = vsel %vm7167_vm3, %v2581_v24, %v2585_v32  ;;  %v2605_v10 = vrot.slane %v2604_v6, 4 }
 0x1d1   :  { %3025 = vrot.lane.b32.xlu1 %v2538_v3, %s7091_s22  ;;  %v2011_v18 = vpop.permute.xlu0 %2010  ;;  %v2609_v17 = vrot.slane %v2607_v15, 5  ;;  %v2638_v55 = vrot.slane %v2636_v48, 4  ;;  %v2641_v8 = vrot.slane %v2639_v37, 5  ;;  %v2660_v27 = vshrl.u32 %v12134_v25, 16  ;;  %v6509_v21 = vld [vmem:[%s12004_s0 + $0x110] sm:$0x1] }
 0x1d2   :  { %2171 = vst.msk [vmem:[#allocation2 + $0x80] sm:$0xf] %vm2138_vm9, %v2011_v18  ;;  %v2663_v41 = vshll.u32 %v12134_v25, 16  ;;  %v9285_v1 = vrot.slane %v2669_v49, 5  ;;  %v2693_v33 = vshll.u32 %v12135_v54, 16  ;;  %v2697_v62 = vshrl.u32 %v12135_v54, 16 }
 0x1d3   :  { %v2017_v34 = vpop.permute.xlu1 %2016  ;;  %3023 = vrot.lane.b32.xlu0 %v2528_v26, %s7091_s22  ;;  %v2576_v22 = vsel %vm7167_vm3, %v2571_v57, %v9204_v7  ;;  %v2595_v16 = vrot.slane %v2594_v31, 4  ;;  %v2629_v52 = vrot.slane %v2628_v20, 4  ;;  %v2633_v42 = vrot.slane %v2631_v58, 5  ;;  %v12136_v7 = vld [vmem:[#allocation7_spill] sm:$0xff] }
 0x1d4   :  { %2174 = vst.msk [vmem:[#allocation2 + $0x8c] sm:$0xf] %vm2138_vm9, %v2017_v34  ;;  %v2618_v60 = vor.u32 %v9261_v51, %v9259_v44  ;;  %v2675_v39 = vrot.slane %v2673_v12, 4  ;;  %v2610_v46 = vsel %vm7167_vm3, %v2605_v10, %v2609_v17  ;;  %v2652_v40 = vor.u32 %v2651_v53, %v9266_v4  ;;  %v6512_v44 = vld [vmem:[%s12004_s0 + $0x11c] sm:$0x1] }
 0x1d5   :  { %3029 = vrot.lane.b32.xlu1 %v2562_v2, %s7091_s22  ;;  %v2015_v36 = vpop.permute.xlu0 %2014  ;;  %v2655_v3 = vshll.u32 %v6506_v63, 16  ;;  %v9300_v45 = vrot.slane %v2660_v27, 4  ;;  %v9302_v30 = vrot.slane %v2663_v41, 5  ;;  %v2684_v19 = vshrl.u32 %v12136_v7, 16 }
 0x1d6   :  { %2173 = vst.msk [vmem:[#allocation2 + $0x88] sm:$0xf] %vm2138_vm9, %v2015_v36  ;;  %v2687_v56 = vshll.u32 %v6952_v43, 16  ;;  %v9312_v28 = vrot.slane %v2693_v33, 5  ;;  %v2717_v13 = vshll.u32 %v6953_v11, 16  ;;  %v2721_v61 = vshrl.u32 %v6953_v11, 16 }
 0x1d7   :  { %v2021_v47 = vpop.permute.xlu1 %2020  ;;  %3027 = vrot.lane.b32.xlu0 %v2552_v35, %s7091_s22  ;;  %v2642_v38 = vor.u32 %v2641_v8, %v2638_v55  ;;  %v2699_v26 = vrot.slane %v2697_v62, 4  ;;  %v2600_v2 = vsel %vm7167_vm3, %v2595_v16, %v9223_v9  ;;  %v2634_v5 = vsel %vm7167_vm3, %v2629_v52, %v2633_v42  ;;  %v6954_v9 = vld [vmem:[%s12004_s0 + $0x120] sm:$0xf]  ;;  %v6955_v35 = vld [vmem:[%s12004_s0 + $0x130] sm:$0xf] }
 0x1d8   :  { %2176 = vst.msk [vmem:[#allocation2 + $0x94] sm:$0xf] %vm2138_vm9, %v2021_v47  ;;  %v2619_v18 = vrot.slane %v2618_v60, 4  ;;  %v2653_v32 = vrot.slane %v2652_v40, 4  ;;  %v2657_v6 = vrot.slane %v2655_v3, 5  ;;  %v2676_v15 = vor.u32 %v2675_v39, %v9285_v1 }
 0x1d9   :  { %3033 = vrot.lane.b32.xlu1 %v2586_v0, %s7091_s22  ;;  %v2019_v29 = vpop.permute.xlu0 %2018  ;;  %v2679_v14 = vshll.u32 %v6509_v21, 16  ;;  %v9329_v51 = vrot.slane %v2684_v19, 4  ;;  %v9331_v48 = vrot.slane %v2687_v56, 5  ;;  %v2708_v37 = vshrl.u32 %v6954_v9, 16  ;;  %v6515_v33 = vld [vmem:[%s12004_s0 + $0x128] sm:$0x1] }
 0x1da   :  { %2175 = vst.msk [vmem:[#allocation2 + $0x90] sm:$0xf] %vm2138_vm9, %v2019_v29  ;;  %v2711_v34 = vshll.u32 %v6954_v9, 16  ;;  %v9337_v49 = vrot.slane %v2717_v13, 5  ;;  %v2723_v57 = vrot.slane %v2721_v61, 4  ;;  %v2741_v31 = vshll.u32 %v6955_v35, 16 }
 0x1db   :  { %v2025_v59 = vpop.permute.xlu1 %2024  ;;  %3031 = vrot.lane.b32.xlu0 %v2576_v22, %s7091_s22  ;;  %v2643_v20 = vrot.slane %v2642_v38, 4  ;;  %v2624_v58 = vsel %vm7167_vm3, %v2619_v18, %v9243_v50  ;;  %v2666_v12 = vor.u32 %v9302_v30, %v9300_v45  ;;  %v2700_v36 = vor.u32 %v2699_v26, %v9312_v28  ;;  %v6956_v50 = vld [vmem:[%s12004_s0 + $0x12c] sm:$0xf]  ;;  %v6957_v22 = vld [vmem:[%s12004_s0 + $0x13c] sm:$0xf] }
 0x1dc   :  { %2178 = vst.msk [vmem:[#allocation2 + $0x9c] sm:$0xf] %vm2138_vm9, %v2025_v59  ;;  %v2703_v0 = vshll.u32 %v6512_v44, 16  ;;  %v2745_v10 = vshrl.u32 %v6955_v35, 16  ;;  %v2658_v55 = vsel %vm7167_vm3, %v2653_v32, %v2657_v6  ;;  %v2677_v8 = vrot.slane %v2676_v15, 4 }
 0x1dd   :  { %3037 = vrot.lane.b32.xlu1 %v2610_v46, %s7091_s22  ;;  %v2023_v24 = vpop.permute.xlu0 %2022  ;;  %v2681_v25 = vrot.slane %v2679_v14, 5  ;;  %v9353_v27 = vrot.slane %v2708_v37, 4  ;;  %v9355_v41 = vrot.slane %v2711_v34, 5  ;;  %v2732_v47 = vshrl.u32 %v6956_v50, 16  ;;  %v9391_v11 = vld [vmem:[%s12004_s0 + $0x134] sm:$0x1] }
 0x1de   :  { %2177 = vst.msk [vmem:[#allocation2 + $0x98] sm:$0xf] %vm2138_vm9, %v2023_v24  ;;  %v2735_v63 = vshll.u32 %v6956_v50, 16  ;;  %v9364_v62 = vrot.slane %v2741_v31, 5  ;;  %v2765_v16 = vshll.u32 %v6957_v22, 16  ;;  %v2769_v52 = vshrl.u32 %v6957_v22, 16 }
 0x1df   :  { %v2029_v53 = vpop.permute.xlu1 %2028  ;;  %3035 = vrot.lane.b32.xlu0 %v2600_v2, %s7091_s22  ;;  %v2648_v42 = vsel %vm7167_vm3, %v2643_v20, %v9266_v4  ;;  %v2667_v60 = vrot.slane %v2666_v12, 4  ;;  %v2701_v39 = vrot.slane %v2700_v36, 4  ;;  %v2705_v29 = vrot.slane %v2703_v0, 5  ;;  %v6958_v4 = vld [vmem:[%s12004_s0 + $0x138] sm:$0xf] }
 0x1e0   :  { %2180 = vst.msk [vmem:[#allocation2 + $0xa4] sm:$0xf] %vm2138_vm9, %v2029_v53  ;;  %v2690_v46 = vor.u32 %v9331_v48, %v9329_v51  ;;  %v2747_v40 = vrot.slane %v2745_v10, 4  ;;  %v2682_v45 = vsel %vm7167_vm3, %v2677_v8, %v2681_v25  ;;  %v2724_v30 = vor.u32 %v2723_v57, %v9337_v49  ;;  %v6959_v61 = vld [vmem:[%s12004_s0 + $0x148] sm:$0xf] }
 0x1e1   :  { %3041 = vrot.lane.b32.xlu1 %v2634_v5, %s7091_s22  ;;  %v2027_v17 = vpop.permute.xlu0 %2026  ;;  %v2727_v7 = vshll.u32 %v6515_v33, 16  ;;  %v9380_v19 = vrot.slane %v2732_v47, 4  ;;  %v9382_v43 = vrot.slane %v2735_v63, 5  ;;  %v2756_v56 = vshrl.u32 %v6958_v4, 16  ;;  %v9413_v48 = vld [vmem:[%s12004_s0 + $0x140] sm:$0x1] }
 0x1e2   :  { %2179 = vst.msk [vmem:[#allocation2 + $0xa0] sm:$0xf] %vm2138_vm9, %v2027_v17  ;;  %v2759_v59 = vshll.u32 %v6958_v4, 16  ;;  %v9393_v13 = vrot.slane %v2765_v16, 5  ;;  %v2789_v38 = vshll.u32 %v6959_v61, 16  ;;  %v2793_v26 = vshrl.u32 %v6959_v61, 16 }
 0x1e3   :  { %v2033_v54 = vpop.permute.xlu1 %2032  ;;  %3039 = vrot.lane.b32.xlu0 %v2624_v58, %s7091_s22  ;;  %v2714_v2 = vor.u32 %v9355_v41, %v9353_v27  ;;  %v2771_v5 = vrot.slane %v2769_v52, 4  ;;  %v2672_v18 = vsel %vm7167_vm3, %v2667_v60, %v9285_v1  ;;  %v2706_v24 = vsel %vm7167_vm3, %v2701_v39, %v2705_v29  ;;  %v6960_v1 = vld [vmem:[%s12004_s0 + $0x144] sm:$0xf]  ;;  %v9428_v20 = vld [vmem:[%s12004_s0 + $0x154] sm:$0xf] }
 0x1e4   :  { %2182 = vst.msk [vmem:[#allocation2 + $0xac] sm:$0xf] %vm2138_vm9, %v2033_v54  ;;  %v2691_v32 = vrot.slane %v2690_v46, 4  ;;  %v2725_v15 = vrot.slane %v2724_v30, 4  ;;  %v2729_v14 = vrot.slane %v2727_v7, 5  ;;  %v2748_v44 = vor.u32 %v2747_v40, %v9364_v62 }
 0x1e5   :  { %3045 = vrot.lane.b32.xlu1 %v2658_v55, %s7091_s22  ;;  %v2031_v3 = vpop.permute.xlu0 %2030  ;;  %v2751_v51 = vshll.u32 %v9391_v11, 16  ;;  %v9415_v9 = vrot.slane %v2756_v56, 4  ;;  %v9417_v37 = vrot.slane %v2759_v59, 5  ;;  %v2780_v34 = vshrl.u32 %v6960_v1, 16  ;;  %v9459_v22 = vld [vmem:[%s12004_s0 + $0x14c] sm:$0x1] }
 0x1e6   :  { %2181 = vst.msk [vmem:[#allocation2 + $0xa8] sm:$0xf] %vm2138_vm9, %v2031_v3  ;;  %v2783_v53 = vshll.u32 %v6960_v1, 16  ;;  %v9423_v35 = vrot.slane %v2789_v38, 5  ;;  %v2795_v31 = vrot.slane %v2793_v26, 4  ;;  %v2813_v58 = vshll.u32 %v9428_v20, 16 }
 0x1e7   :  { %v2037_v21 = vpop.permute.xlu1 %2036  ;;  %3043 = vrot.lane.b32.xlu0 %v2648_v42, %s7091_s22  ;;  %v2715_v12 = vrot.slane %v2714_v2, 4  ;;  %v2696_v36 = vsel %vm7167_vm3, %v2691_v32, %v9312_v28  ;;  %v2738_v0 = vor.u32 %v9382_v43, %v9380_v19  ;;  %v2772_v10 = vor.u32 %v2771_v5, %v9393_v13  ;;  %v9451_v28 = vld [vmem:[%s12004_s0 + $0x150] sm:$0xf]  ;;  %v9466_v52 = vld [vmem:[%s12004_s0 + $0x160] sm:$0xf] }
 0x1e8   :  { %2184 = vst.msk [vmem:[#allocation2 + $0xb4] sm:$0xf] %vm2138_vm9, %v2037_v21  ;;  %v2775_v17 = vshll.u32 %v9413_v48, 16  ;;  %v2817_v55 = vshrl.u32 %v9428_v20, 16  ;;  %v2730_v25 = vsel %vm7167_vm3, %v2725_v15, %v2729_v14  ;;  %v2749_v27 = vrot.slane %v2748_v44, 4 }
 0x1e9   :  { %3049 = vrot.lane.b32.xlu1 %v2682_v45, %s7091_s22  ;;  %v2035_v6 = vpop.permute.xlu0 %2034  ;;  %v2753_v41 = vrot.slane %v2751_v51, 5  ;;  %v9444_v50 = vrot.slane %v2780_v34, 4  ;;  %v9446_v47 = vrot.slane %v2783_v53, 5  ;;  %v2804_v63 = vshrl.u32 %v9451_v28, 16  ;;  %v9489_v56 = vld [vmem:[%s12004_s0 + $0x15c] sm:$0xf] }
 0x1ea   :  { %2183 = vst.msk [vmem:[#allocation2 + $0xb0] sm:$0xf] %vm2138_vm9, %v2035_v6  ;;  %v2807_v54 = vshll.u32 %v9451_v28, 16  ;;  %v9461_v16 = vrot.slane %v2813_v58, 5  ;;  %v2837_v42 = vshll.u32 %v9466_v52, 16  ;;  %v2841_v60 = vshrl.u32 %v9466_v52, 16 }
 0x1eb   :  { %v2041_v57 = vpop.permute.xlu1 %2040  ;;  %3047 = vrot.lane.b32.xlu0 %v2672_v18, %s7091_s22  ;;  %v2720_v39 = vsel %vm7167_vm3, %v2715_v12, %v9337_v49  ;;  %v2739_v29 = vrot.slane %v2738_v0, 4  ;;  %v2773_v46 = vrot.slane %v2772_v10, 4  ;;  %v2777_v40 = vrot.slane %v2775_v17, 5  ;;  %v9497_v38 = vld [vmem:[%s12004_s0 + $0x158] sm:$0x1] }
 0x1ec   :  { %2186 = vst.msk [vmem:[#allocation2 + $0xbc] sm:$0xf] %vm2138_vm9, %v2041_v57  ;;  %v2762_v3 = vor.u32 %v9417_v37, %v9415_v9  ;;  %v2819_v45 = vrot.slane %v2817_v55, 4  ;;  %v2754_v7 = vsel %vm7167_vm3, %v2749_v27, %v2753_v41  ;;  %v2796_v19 = vor.u32 %v2795_v31, %v9423_v35  ;;  %v9504_v2 = vld [vmem:[%s12004_s0 + $0x16c] sm:$0xf] }
 0x1ed   :  { %3053 = vrot.lane.b32.xlu1 %v2706_v24, %s7091_s22  ;;  %v2039_v8 = vpop.permute.xlu0 %2038  ;;  %v2799_v43 = vshll.u32 %v9459_v22, 16  ;;  %v9482_v4 = vrot.slane %v2804_v63, 4  ;;  %v9484_v49 = vrot.slane %v2807_v54, 5  ;;  %v2828_v59 = vshrl.u32 %v9489_v56, 16  ;;  %v9523_v34 = vld [vmem:[%s12004_s0 + $0x164] sm:$0x1] }
 0x1ee   :  { %2185 = vst.msk [vmem:[#allocation2 + $0xb8] sm:$0xf] %vm2138_vm9, %v2039_v8  ;;  %v2831_v21 = vshll.u32 %v9489_v56, 16  ;;  %v9499_v26 = vrot.slane %v2837_v42, 5  ;;  %v2861_v5 = vshll.u32 %v9504_v2, 16  ;;  %v2865_v18 = vshrl.u32 %v9504_v2, 16 }
 0x1ef   :  { %v2045_v33 = vpop.permute.xlu1 %2044  ;;  %3051 = vrot.lane.b32.xlu0 %v2696_v36, %s7091_s22  ;;  %v2786_v24 = vor.u32 %v9446_v47, %v9444_v50  ;;  %v2843_v32 = vrot.slane %v2841_v60, 4  ;;  %v2744_v6 = vsel %vm7167_vm3, %v2739_v29, %v9364_v62  ;;  %v2778_v15 = vsel %vm7167_vm3, %v2773_v46, %v2777_v40  ;;  %v9532_v62 = vld [vmem:[%s12004_s0 + $0x168] sm:$0xf]  ;;  %v9542_v10 = vld [vmem:[%s12004_s0 + $0x178] sm:$0xf] }
 0x1f0   :  { %2188 = vst.msk [vmem:[#allocation2 + $0xc4] sm:$0xf] %vm2138_vm9, %v2045_v33  ;;  %v2763_v14 = vrot.slane %v2762_v3, 4  ;;  %v2797_v51 = vrot.slane %v2796_v19, 4  ;;  %v2801_v9 = vrot.slane %v2799_v43, 5  ;;  %v2820_v37 = vor.u32 %v2819_v45, %v9461_v16 }
 0x1f1   :  { %3057 = vrot.lane.b32.xlu1 %v2730_v25, %s7091_s22  ;;  %v2043_v30 = vpop.permute.xlu0 %2042  ;;  %v2823_v1 = vshll.u32 %v9497_v38, 16  ;;  %v9525_v53 = vrot.slane %v2828_v59, 4  ;;  %v9527_v57 = vrot.slane %v2831_v21, 5  ;;  %v2852_v31 = vshrl.u32 %v9532_v62, 16  ;;  %v9573_v40 = vld [vmem:[%s12004_s0 + $0x170] sm:$0x1] }
 0x1f2   :  { %2187 = vst.msk [vmem:[#allocation2 + $0xc0] sm:$0xf] %vm2138_vm9, %v2043_v30  ;;  %v2855_v58 = vshll.u32 %v9532_v62, 16  ;;  %v9537_v36 = vrot.slane %v2861_v5, 5  ;;  %v2867_v0 = vrot.slane %v2865_v18, 4  ;;  %v2885_v17 = vshll.u32 %v9542_v10, 16 }
 0x1f3   :  { %v2049_v61 = vpop.permute.xlu1 %2048  ;;  %3055 = vrot.lane.b32.xlu0 %v2720_v39, %s7091_s22  ;;  %v2787_v55 = vrot.slane %v2786_v24, 4  ;;  %v2768_v8 = vsel %vm7167_vm3, %v2763_v14, %v9393_v13  ;;  %v2810_v25 = vor.u32 %v9484_v49, %v9482_v4  ;;  %v2844_v27 = vor.u32 %v2843_v32, %v9499_v26  ;;  %v9565_v13 = vld [vmem:[%s12004_s0 + $0x174] sm:$0xf]  ;;  %v9580_v45 = vld [vmem:[%s12004_s0 + $0x184] sm:$0xf] }
 0x1f4   :  { %2190 = vst.msk [vmem:[#allocation2 + $0xcc] sm:$0xf] %vm2138_vm9, %v2049_v61  ;;  %v2847_v41 = vshll.u32 %v9523_v34, 16  ;;  %v2889_v50 = vshrl.u32 %v9542_v10, 16  ;;  %v2802_v63 = vsel %vm7167_vm3, %v2797_v51, %v2801_v9  ;;  %v2821_v54 = vrot.slane %v2820_v37, 4 }
 0x1f5   :  { %3061 = vrot.lane.b32.xlu1 %v2754_v7, %s7091_s22  ;;  %v2047_v44 = vpop.permute.xlu0 %2046  ;;  %v2825_v33 = vrot.slane %v2823_v1, 5  ;;  %v9558_v42 = vrot.slane %v2852_v31, 4  ;;  %v9560_v60 = vrot.slane %v2855_v58, 5  ;;  %v2876_v39 = vshrl.u32 %v9565_v13, 16  ;;  %v9607_v51 = vld [vmem:[%s12004_s0 + $0x17c] sm:$0x1] }
 0x1f6   :  { %2189 = vst.msk [vmem:[#allocation2 + $0xc8] sm:$0xf] %vm2138_vm9, %v2047_v44  ;;  %v2879_v29 = vshll.u32 %v9565_v13, 16  ;;  %v9575_v3 = vrot.slane %v2885_v17, 5  ;;  %v2909_v30 = vshll.u32 %v9580_v45, 16  ;;  %v2913_v7 = vshrl.u32 %v9580_v45, 16 }
 0x1f7   :  { %v2053_v12 = vpop.permute.xlu1 %2052  ;;  %3059 = vrot.lane.b32.xlu0 %v2744_v6, %s7091_s22  ;;  %v2792_v19 = vsel %vm7167_vm3, %v2787_v55, %v9423_v35  ;;  %v2811_v43 = vrot.slane %v2810_v25, 4  ;;  %v2845_v4 = vrot.slane %v2844_v27, 4  ;;  %v2849_v49 = vrot.slane %v2847_v41, 5  ;;  %v9599_v35 = vld [vmem:[%s12004_s0 + $0x180] sm:$0xf] }
 0x1f8   :  { %2192 = vst.msk [vmem:[#allocation2 + $0xd4] sm:$0xf] %vm2138_vm9, %v2053_v12  ;;  %v2834_v59 = vor.u32 %v9527_v57, %v9525_v53  ;;  %v2891_v21 = vrot.slane %v2889_v50, 4  ;;  %v2826_v5 = vsel %vm7167_vm3, %v2821_v54, %v2825_v33  ;;  %v2868_v18 = vor.u32 %v2867_v0, %v9537_v36  ;;  %v9614_v1 = vld [vmem:[%s12004_s0 + $0x190] sm:$0xf] }
 0x1f9   :  { %3065 = vrot.lane.b32.xlu1 %v2778_v15, %s7091_s22  ;;  %v2051_v47 = vpop.permute.xlu0 %2050  ;;  %v2871_v24 = vshll.u32 %v9573_v40, 16  ;;  %v2878_v32 = vrot.slane %v2876_v39, 4  ;;  %v2881_v6 = vrot.slane %v2879_v29, 5  ;;  %v2900_v15 = vshrl.u32 %v9599_v35, 16  ;;  %v9633_v41 = vld [vmem:[%s12004_s0 + $0x188] sm:$0x1] }
 0x1fa   :  { %2191 = vst.msk [vmem:[#allocation2 + $0xd0] sm:$0xf] %vm2138_vm9, %v2051_v47  ;;  %v2903_v14 = vshll.u32 %v9599_v35, 16  ;;  %v9609_v9 = vrot.slane %v2909_v30, 5  ;;  %v2915_v37 = vrot.slane %v2913_v7, 4  ;;  %v2933_v53 = vshll.u32 %v9614_v1, 16 }
 0x1fb   :  { %v2057_v46 = vpop.permute.xlu1 %2056  ;;  %3063 = vrot.lane.b32.xlu0 %v2768_v8, %s7091_s22  ;;  %v2937_v57 = vshrl.u32 %v9614_v1, 16  ;;  %v2816_v31 = vsel %vm7167_vm3, %v2811_v43, %v9461_v16  ;;  %v2850_v58 = vsel %vm7167_vm3, %v2845_v4, %v2849_v49  ;;  %v2835_v12 = vrot.slane %v2834_v59, 4  ;;  %v9638_v47 = vld [vmem:[%s12004_s0 + $0x18c] sm:$0xf]  ;;  %v9648_v39 = vld [vmem:[%s12004_s0 + $0x19c] sm:$0xf] }
 0x1fc   :  { %2194 = vst.msk [vmem:[#allocation2 + $0xdc] sm:$0xf] %vm2138_vm9, %v2057_v46  ;;  %v2858_v0 = vor.u32 %v9560_v60, %v9558_v42  ;;  %v2869_v55 = vrot.slane %v2868_v18, 4  ;;  %v2873_v8 = vrot.slane %v2871_v24, 5  ;;  %v2892_v25 = vor.u32 %v2891_v21, %v9575_v3 }
 0x1fd   :  { %3069 = vrot.lane.b32.xlu1 %v2802_v63, %s7091_s22  ;;  %v2055_v61 = vpop.permute.xlu0 %2054  ;;  %v2895_v27 = vshll.u32 %v9607_v51, 16  ;;  %v2902_v16 = vrot.slane %v2900_v15, 4  ;;  %v2905_v50 = vrot.slane %v2903_v14, 5  ;;  %v2924_v63 = vshrl.u32 %v9638_v47, 16 }
 0x1fe   :  { %2193 = vst.msk [vmem:[#allocation2 + $0xd8] sm:$0xf] %vm2138_vm9, %v2055_v61  ;;  %v2927_v54 = vshll.u32 %v9638_v47, 16  ;;  %v9643_v42 = vrot.slane %v2933_v53, 5  ;;  %v2939_v60 = vrot.slane %v2937_v57, 4  ;;  %v2957_v29 = vshll.u32 %v9648_v39, 16 }
 0x1ff   :  { %v2061_v44 = vpop.permute.xlu1 %2060  ;;  %3067 = vrot.lane.b32.xlu0 %v2792_v19, %s7091_s22  ;;  %v2882_v46 = vor.u32 %v2881_v6, %v2878_v32  ;;  %v2840_v30 = vsel %vm7167_vm3, %v2835_v12, %v9499_v26  ;;  %v2859_v7 = vrot.slane %v2858_v0, 4  ;;  %v2916_v19 = vor.u32 %v2915_v37, %v9609_v9  ;;  %v9666_v26 = vld [vmem:[%s12004_s0 + $0x194] sm:$0x1]  ;;  %v9673_v6 = vld [vmem:[%s12004_s0 + $0x198] sm:$0xf] }
 0x200   :  { %2196 = vst.msk [vmem:[#allocation2 + $0xe4] sm:$0xf] %vm2138_vm9, %v2061_v44  ;;  %v2919_v43 = vshll.u32 %v9633_v41, 16  ;;  %v2961_v4 = vshrl.u32 %v9648_v39, 16  ;;  %v2874_v59 = vsel %vm7167_vm3, %v2869_v55, %v2873_v8  ;;  %v2893_v21 = vrot.slane %v2892_v25, 4 }
 0x201   :  { %3073 = vrot.lane.b32.xlu1 %v2826_v5, %s7091_s22  ;;  %v2059_v17 = vpop.permute.xlu0 %2058  ;;  %v2897_v61 = vrot.slane %v2895_v27, 5  ;;  %v2926_v5 = vrot.slane %v2924_v63, 4  ;;  %v2929_v18 = vrot.slane %v2927_v54, 5  ;;  %v9668_v32 = vrot.slane %v2957_v29, 5  ;;  %v9691_v25 = vld [vmem:[%s12004_s0 + $0x1a0] sm:$0x1] }
 0x202   :  { %2195 = vst.msk [vmem:[#allocation2 + $0xe0] sm:$0xf] %vm2138_vm9, %v2059_v17  ;;  %v2948_v15 = vshrl.u32 %v9673_v6, 16  ;;  %v2951_v14 = vshll.u32 %v9673_v6, 16  ;;  %v2883_v44 = vrot.slane %v2882_v46, 4  ;;  %v2864_v37 = vsel %vm7167_vm3, %v2859_v7, %v9537_v36 }
 0x203   :  { %v2065_v33 = vpop.permute.xlu1 %2064  ;;  %3071 = vrot.lane.b32.xlu0 %v2816_v31, %s7091_s22  ;;  %v2917_v53 = vrot.slane %v2916_v19, 4  ;;  %v2921_v57 = vrot.slane %v2919_v43, 5  ;;  %v2906_v31 = vor.u32 %v2905_v50, %v2902_v16  ;;  %v2898_v0 = vsel %vm7167_vm3, %v2893_v21, %v2897_v61 }
 0x204   :  { %2198 = vst.msk [vmem:[#allocation2 + $0xec] sm:$0xf] %vm2138_vm9, %v2065_v33  ;;  %v2940_v17 = vor.u32 %v2939_v60, %v9643_v42  ;;  %v2943_v55 = vshll.u32 %v9666_v26, 16  ;;  %v2950_v36 = vrot.slane %v2948_v15, 4  ;;  %v2953_v27 = vrot.slane %v2951_v14, 5 }
 0x205   :  { %3077 = vrot.lane.b32.xlu1 %v2850_v58, %s7091_s22  ;;  %v2063_v49 = vpop.permute.xlu0 %2062  ;;  %v2963_v58 = vrot.slane %v2961_v4, 4  ;;  %v2888_v16 = vsel %vm7167_vm3, %v2883_v44, %v9575_v3  ;;  %v2922_v50 = vsel %vm7167_vm3, %v2917_v53, %v2921_v57  ;;  %v2907_v63 = vrot.slane %v2906_v31, 4  ;;  %v6975_v4 = vld [vmem:[%s12004_s0 + $0x10] sm:$0xf]  ;;  %v6976_v15 = vld [vmem:[%s12004_s0 + $0x1c] sm:$0xf] }
 0x206   :  { %2197 = vst.msk [vmem:[#allocation2 + $0xe8] sm:$0xf] %vm2138_vm9, %v2063_v49  ;;  %v2930_v54 = vor.u32 %v2929_v18, %v2926_v5  ;;  %v2941_v60 = vrot.slane %v2940_v17, 4  ;;  %v2945_v29 = vrot.slane %v2943_v55, 5  ;;  %v2954_v43 = vor.u32 %v2953_v27, %v2950_v36  ;;  %v6977_v57 = vld [vmem:[%s12004_s0 + $0x14] sm:$0x1] }
 0x207   :  { %v2069_v24 = vpop.permute.xlu1 %2068  ;;  %3075 = vrot.lane.b32.xlu0 %v2840_v30, %s7091_s22  ;;  %v2964_v46 = vor.u32 %v2963_v58, %v9668_v32  ;;  %v2967_v30 = vshll.u32 %v9691_v25, 16  ;;  %v2912_v3 = vsel %vm7167_vm3, %v2907_v63, %v9609_v9  ;;  %v3262_v49 = vrot.slane %v6975_v4, 5  ;;  %v6979_v17 = vld [vmem:[%s12004_s0 + $0x28] sm:$0xf] }
 0x208   :  { %2200 = vst.msk [vmem:[#allocation2 + $0xf4] sm:$0xf] %vm2138_vm9, %v2069_v24  ;;  %v2931_v19 = vrot.slane %v2930_v54, 4  ;;  %v2946_v21 = vsel %vm7167_vm3, %v2941_v60, %v2945_v29  ;;  %v2955_v24 = vrot.slane %v2954_v43, 4  ;;  %v3269_v14 = vrot.slane %v6976_v15, 5 }
 0x209   :  { %3081 = vrot.lane.b32.xlu1 %v2874_v59, %s7091_s22  ;;  %v2067_v12 = vpop.permute.xlu0 %2066  ;;  %v2965_v61 = vrot.slane %v2964_v46, 4  ;;  %v2969_v5 = vrot.slane %v2967_v30, 5  ;;  %v3264_v53 = vrot.slane %v3262_v49, 4  ;;  %v3265_v31 = vrot.slane %v6977_v57, 5  ;;  %v6982_v29 = vld [vmem:[%s12004_s0 + $0x34] sm:$0xf] }
 0x20a   :  { %2199 = vst.msk [vmem:[#allocation2 + $0xf0] sm:$0xf] %vm2138_vm9, %v2067_v12  ;;  %v2936_v9 = vsel %vm7167_vm3, %v2931_v19, %v9643_v42  ;;  %v6978_v42 = vld [vmem:[%s12004_s0 + $0xc] sm:$0xf]  ;;  %v3276_v55 = vrot.slane %v6979_v17, 5  ;;  %v3283_v46 = vrot.slane %v6982_v29, 5 }
 0x20b   :  { %v2073_v8 = vpop.permute.xlu1 %2072  ;;  %3079 = vrot.lane.b32.xlu0 %v2864_v37, %s7091_s22  ;;  %v2970_v37 = vsel %vm7167_vm3, %v2965_v61, %v2969_v5  ;;  %v6546_v12 = vrot.slane %v6978_v42, 9  ;;  %v3266_v27 = vsel %vm8093_vm7, %v3264_v53, %v3265_v31  ;;  %v6983_v19 = vld [vmem:[%s12004_s0 + $0x2c] sm:$0x1]  ;;  %v6985_v61 = vld [vmem:[%s12004_s0 + $0x40] sm:$0xf] }
 0x20c   :  { %2202 = vst.msk [vmem:[#allocation2 + $0xfc] sm:$0xf] %vm2138_vm9, %v2073_v8  ;;  %v3279_v43 = vrot.slane %v6983_v19, 5  ;;  %v3290_v5 = vrot.slane %v6985_v61, 5  ;;  %v6986_v15 = vld [vmem:[%s12004_s0 + $0x38] sm:$0x1] }
 0x20d   :  { %3085 = vrot.lane.b32.xlu1 %v2898_v0, %s7091_s22  ;;  %v2071_v33 = vpop.permute.xlu0 %2070  ;;  %v2960_v0 = vsel %vm7167_vm3, %v2955_v24, %v9668_v32  ;;  %v6981_v32 = vld [vmem:[%s12004_s0 + $0x18] sm:$0xf]  ;;  %v3263_v60 = vsel %vm8093_vm7, %v6546_v12, %v3262_v49  ;;  %v6984_v49 = vld [vmem:[%s12004_s0 + $0x24] sm:$0xf]  ;;  %v3285_v24 = vrot.slane %v3283_v46, 4 }
 0x20e   :  { %2201 = vst.msk [vmem:[#allocation2 + $0xf8] sm:$0xf] %vm2138_vm9, %v2071_v33  ;;  %v6547_v33 = vrot.slane %v6981_v32, 9  ;;  %v6988_v31 = vld [vmem:[%s12004_s0 + $0x4c] sm:$0xf] }
 0x20f   :  { %v2974_v7 = vpop.permute.xlu1 %2973  ;;  %3083 = vrot.lane.b32.xlu0 %v2888_v16, %s7091_s22  ;;  %v3271_v16 = vrot.slane %v3269_v14, 4  ;;  %v6989_v17 = vld [vmem:[%s12004_s0 + $0x44] sm:$0x1]  ;;  %v6992_v29 = vld [vmem:[%s12004_s0 + $0x50] sm:$0x1] }
 0x210   :  { %3165 = vst.msk [vmem:[#allocation2 + $0x4] sm:$0xf] %vm3163_vm10, %v2974_v7  ;;  %v6995_v61 = vld [vmem:[%s12004_s0 + $0x5c] sm:$0x1] }
 0x211   :  { %3089 = vrot.lane.b32.xlu1 %v2922_v50, %s7091_s22  ;;  %v2972_v59 = vpop.permute.xlu0 %2971  ;;  %v6980_v50 = vld [vmem:[%s12004_s0 + $0x20] sm:$0x1] }
 0x212   :  { %3164 = vst.msk [vmem:[#allocation2] sm:$0xf] %vm3163_vm10, %v2972_v59  ;;  %v3272_v63 = vrot.slane %v6980_v50, 5  ;;  %v6548_v59 = vrot.slane %v6984_v49, 9 }
 0x213   :  { %v2978_v18 = vpop.permute.xlu1 %2977  ;;  %3087 = vrot.lane.b32.xlu0 %v2912_v3, %s7091_s22  ;;  %v3278_v3 = vrot.slane %v3276_v55, 4 }
 0x214   :  { %3167 = vst.msk [vmem:[#allocation2 + $0xc] sm:$0xf] %vm3163_vm10, %v2978_v18  ;;  %v3273_v7 = vsel %vm8093_vm7, %v3271_v16, %v3272_v63  ;;  %v3277_v57 = vsel %vm8093_vm7, %v6548_v59, %v3276_v55  ;;  %v6990_v55 = vld [vmem:[%s12004_s0 + $0x3c] sm:$0xf]  ;;  %v6991_v63 = vld [vmem:[%s12004_s0 + $0x58] sm:$0xf] }
 0x215   :  { %3093 = vrot.lane.b32.xlu1 %v2946_v21, %s7091_s22  ;;  %v2976_v44 = vpop.permute.xlu0 %2975  ;;  %v3270_v21 = vsel %vm8093_vm7, %v6547_v33, %v3269_v14  ;;  %v6987_v14 = vld [vmem:[%s12004_s0 + $0x30] sm:$0xf]  ;;  %v6550_v16 = vrot.slane %v6990_v55, 9 }
 0x216   :  { %3166 = vst.msk [vmem:[#allocation2 + $0x8] sm:$0xf] %vm3163_vm10, %v2976_v44  ;;  %v3286_v44 = vrot.slane %v6986_v15, 5  ;;  %v6549_v53 = vrot.slane %v6987_v14, 9 }
 0x217   :  { %v2982_v58 = vpop.permute.xlu1 %2981  ;;  %3091 = vrot.lane.b32.xlu0 %v2936_v9, %s7091_s22  ;;  %v3280_v9 = vsel %vm8093_vm7, %v3278_v3, %v3279_v43  ;;  %v3291_v19 = vsel %vm8093_vm7, %v6550_v16, %v3290_v5  ;;  %v6994_v43 = vld [vmem:[%s12004_s0 + $0x64] sm:$0xf] }
 0x218   :  { %3169 = vst.msk [vmem:[#allocation2 + $0x14] sm:$0xf] %vm3163_vm10, %v2982_v58  ;;  %v3297_v58 = vrot.slane %v6988_v31, 5  ;;  %v3287_v12 = vsel %vm8093_vm7, %v3285_v24, %v3286_v44  ;;  %v3284_v50 = vsel %vm8093_vm7, %v6549_v53, %v3283_v46  ;;  %v6993_v46 = vld [vmem:[%s12004_s0 + $0x48] sm:$0xf] }
 0x219   :  { %3097 = vrot.lane.b32.xlu1 %v2970_v37, %s7091_s22  ;;  %v2980_v8 = vpop.permute.xlu0 %2979  ;;  %v6551_v3 = vrot.slane %v6993_v46, 9  ;;  %v6997_v44 = vld [vmem:[%s12004_s0 + $0x70] sm:$0xf]  ;;  %v6998_v31 = vld [vmem:[%s12004_s0 + $0x68] sm:$0x1] }
 0x21a   :  { %3168 = vst.msk [vmem:[#allocation2 + $0x10] sm:$0xf] %vm3163_vm10, %v2980_v8  ;;  %v3293_v8 = vrot.slane %v6989_v17, 5 }
 0x21b   :  { %v2986_v54 = vpop.permute.xlu1 %2985  ;;  %3095 = vrot.lane.b32.xlu0 %v2960_v0, %s7091_s22  ;;  %v3292_v0 = vrot.slane %v3290_v5, 4  ;;  %v6996_v5 = vld [vmem:[%s12004_s0 + $0x54] sm:$0xf]  ;;  %v3298_v15 = vsel %vm8093_vm7, %v6551_v3, %v3297_v58  ;;  %s7094_s22 = smov 28  }
 0x21c   :  { %3171 = vst.msk [vmem:[#allocation2 + $0x1c] sm:$0xf] %vm3163_vm10, %v2986_v54  ;;  %v3304_v54 = vrot.slane %v6991_v63, 5  ;;  %v6552_v24 = vrot.slane %v6996_v5, 9  ;;  %v7001_v63 = vld [vmem:[%s12004_s0 + $0x74] sm:$0x1] }
 0x21d   :  { %3486 = vrot.lane.b32.xlu1 %v3266_v27, %s7092_s13  ;;  %v2984_v30 = vpop.permute.xlu0 %2983  ;;  %v3294_v33 = vsel %vm8093_vm7, %v3292_v0, %v3293_v8  ;;  %v7000_v8 = vld [vmem:[%s12004_s0 + $0x7c] sm:$0xf] }
 0x21e   :  { %3170 = vst.msk [vmem:[#allocation2 + $0x18] sm:$0xf] %vm3163_vm10, %v2984_v30  ;;  %v3300_v30 = vrot.slane %v6992_v29, 5  ;;  %v3305_v17 = vsel %vm8093_vm7, %v6552_v24, %v3304_v54 }
 0x21f   :  { %v2990_v4 = vpop.permute.xlu1 %2989  ;;  %3484 = vrot.lane.b32.xlu0 %v3263_v60, %s7092_s13  ;;  %v3299_v60 = vrot.slane %v3297_v58, 4  ;;  %v6999_v58 = vld [vmem:[%s12004_s0 + $0x60] sm:$0xf] }
 0x220   :  { %3173 = vst.msk [vmem:[#allocation2 + $0x24] sm:$0xf] %vm3163_vm10, %v2990_v4  ;;  %v3311_v4 = vrot.slane %v6994_v43, 5  ;;  %v6553_v0 = vrot.slane %v6999_v58, 9  ;;  %v7004_v43 = vld [vmem:[%s12004_s0 + $0x80] sm:$0x1] }
 0x221   :  { %3490 = vrot.lane.b32.xlu1 %v3273_v7, %s7092_s13  ;;  %v2988_v18 = vpop.permute.xlu0 %2987  ;;  %v3301_v59 = vsel %vm8093_vm7, %v3299_v60, %v3300_v30  ;;  %v7003_v30 = vld [vmem:[%s12004_s0 + $0x88] sm:$0xf] }
 0x222   :  { %3172 = vst.msk [vmem:[#allocation2 + $0x20] sm:$0xf] %vm3163_vm10, %v2988_v18  ;;  %v3307_v18 = vrot.slane %v6995_v61, 5  ;;  %v3312_v29 = vsel %vm8093_vm7, %v6553_v0, %v3311_v4 }
 0x223   :  { %v2994_v37 = vpop.permute.xlu1 %2993  ;;  %3488 = vrot.lane.b32.xlu0 %v3270_v21, %s7092_s13  ;;  %v3306_v21 = vrot.slane %v3304_v54, 4  ;;  %v7002_v54 = vld [vmem:[%s12004_s0 + $0x6c] sm:$0xf] }
 0x224   :  { %3175 = vst.msk [vmem:[#allocation2 + $0x2c] sm:$0xf] %vm3163_vm10, %v2994_v37  ;;  %v3318_v37 = vrot.slane %v6997_v44, 5  ;;  %v6554_v60 = vrot.slane %v7002_v54, 9  ;;  %v7007_v44 = vld [vmem:[%s12004_s0 + $0x8c] sm:$0x1] }
 0x225   :  { %3494 = vrot.lane.b32.xlu1 %v3280_v9, %s7092_s13  ;;  %v2992_v42 = vpop.permute.xlu0 %2991  ;;  %v3308_v53 = vsel %vm8093_vm7, %v3306_v21, %v3307_v18  ;;  %v7006_v18 = vld [vmem:[%s12004_s0 + $0x94] sm:$0xf] }
 0x226   :  { %3174 = vst.msk [vmem:[#allocation2 + $0x28] sm:$0xf] %vm3163_vm10, %v2992_v42  ;;  %v3314_v42 = vrot.slane %v6998_v31, 5  ;;  %v3319_v61 = vsel %vm8093_vm7, %v6554_v60, %v3318_v37 }
 0x227   :  { %v2998_v27 = vpop.permute.xlu1 %2997  ;;  %3492 = vrot.lane.b32.xlu0 %v3277_v57, %s7092_s13  ;;  %v3313_v57 = vrot.slane %v3311_v4, 4  ;;  %v7005_v4 = vld [vmem:[%s12004_s0 + $0x78] sm:$0xf] }
 0x228   :  { %3177 = vst.msk [vmem:[#allocation2 + $0x34] sm:$0xf] %vm3163_vm10, %v2998_v27  ;;  %v3325_v27 = vrot.slane %v7000_v8, 5  ;;  %v6555_v21 = vrot.slane %v7005_v4, 9  ;;  %v7010_v8 = vld [vmem:[%s12004_s0 + $0x98] sm:$0x1] }
 0x229   :  { %3498 = vrot.lane.b32.xlu1 %v3287_v12, %s7092_s13  ;;  %v2996_v32 = vpop.permute.xlu0 %2995  ;;  %v3315_v16 = vsel %vm8093_vm7, %v3313_v57, %v3314_v42  ;;  %v7009_v42 = vld [vmem:[%s12004_s0 + $0xa0] sm:$0xf] }
 0x22a   :  { %3176 = vst.msk [vmem:[#allocation2 + $0x30] sm:$0xf] %vm3163_vm10, %v2996_v32  ;;  %v3321_v32 = vrot.slane %v7001_v63, 5  ;;  %v3326_v31 = vsel %vm8093_vm7, %v6555_v21, %v3325_v27 }
 0x22b   :  { %v3002_v7 = vpop.permute.xlu1 %3001  ;;  %3496 = vrot.lane.b32.xlu0 %v3284_v50, %s7092_s13  ;;  %v3320_v50 = vrot.slane %v3318_v37, 4  ;;  %v7008_v37 = vld [vmem:[%s12004_s0 + $0x84] sm:$0xf] }
 0x22c   :  { %3179 = vst.msk [vmem:[#allocation2 + $0x3c] sm:$0xf] %vm3163_vm10, %v3002_v7  ;;  %v3332_v7 = vrot.slane %v7003_v30, 5  ;;  %v6556_v57 = vrot.slane %v7008_v37, 9  ;;  %v7013_v30 = vld [vmem:[%s12004_s0 + $0xa4] sm:$0x1] }
 0x22d   :  { %3502 = vrot.lane.b32.xlu1 %v3294_v33, %s7092_s13  ;;  %v3000_v49 = vpop.permute.xlu0 %2999  ;;  %v3322_v3 = vsel %vm8093_vm7, %v3320_v50, %v3321_v32  ;;  %v7012_v32 = vld [vmem:[%s12004_s0 + $0xac] sm:$0xf] }
 0x22e   :  { %3178 = vst.msk [vmem:[#allocation2 + $0x38] sm:$0xf] %vm3163_vm10, %v3000_v49  ;;  %v3328_v49 = vrot.slane %v7004_v43, 5  ;;  %v3333_v63 = vsel %vm8093_vm7, %v6556_v57, %v3332_v7 }
 0x22f   :  { %v3006_v9 = vpop.permute.xlu1 %3005  ;;  %3500 = vrot.lane.b32.xlu0 %v3291_v19, %s7092_s13  ;;  %v3327_v19 = vrot.slane %v3325_v27, 4  ;;  %v7011_v27 = vld [vmem:[%s12004_s0 + $0x90] sm:$0xf] }
 0x230   :  { %3181 = vst.msk [vmem:[#allocation2 + $0x44] sm:$0xf] %vm3163_vm10, %v3006_v9  ;;  %v3339_v9 = vrot.slane %v7006_v18, 5  ;;  %v6557_v50 = vrot.slane %v7011_v27, 9  ;;  %v7016_v18 = vld [vmem:[%s12004_s0 + $0xb0] sm:$0x1] }
 0x231   :  { %3506 = vrot.lane.b32.xlu1 %v3301_v59, %s7092_s13  ;;  %v3004_v14 = vpop.permute.xlu0 %3003  ;;  %v3329_v24 = vsel %vm8093_vm7, %v3327_v19, %v3328_v49  ;;  %v7015_v49 = vld [vmem:[%s12004_s0 + $0xb8] sm:$0xf] }
 0x232   :  { %3180 = vst.msk [vmem:[#allocation2 + $0x40] sm:$0xf] %vm3163_vm10, %v3004_v14  ;;  %v3335_v14 = vrot.slane %v7007_v44, 5  ;;  %v3340_v43 = vsel %vm8093_vm7, %v6557_v50, %v3339_v9 }
 0x233   :  { %v3010_v12 = vpop.permute.xlu1 %3009  ;;  %3504 = vrot.lane.b32.xlu0 %v3298_v15, %s7092_s13  ;;  %v3334_v15 = vrot.slane %v3332_v7, 4  ;;  %v7014_v7 = vld [vmem:[%s12004_s0 + $0x9c] sm:$0xf] }
 0x234   :  { %3183 = vst.msk [vmem:[#allocation2 + $0x4c] sm:$0xf] %vm3163_vm10, %v3010_v12  ;;  %v3346_v12 = vrot.slane %v7009_v42, 5  ;;  %v6558_v19 = vrot.slane %v7014_v7, 9  ;;  %v7019_v42 = vld [vmem:[%s12004_s0 + $0xbc] sm:$0x1] }
 0x235   :  { %3510 = vrot.lane.b32.xlu1 %v3308_v53, %s7092_s13  ;;  %v3008_v55 = vpop.permute.xlu0 %3007  ;;  %v3336_v0 = vsel %vm8093_vm7, %v3334_v15, %v3335_v14  ;;  %v7018_v14 = vld [vmem:[%s12004_s0 + $0xc4] sm:$0xf] }
 0x236   :  { %3182 = vst.msk [vmem:[#allocation2 + $0x48] sm:$0xf] %vm3163_vm10, %v3008_v55  ;;  %v3342_v55 = vrot.slane %v7010_v8, 5  ;;  %v3347_v44 = vsel %vm8093_vm7, %v6558_v19, %v3346_v12 }
 0x237   :  { %v3014_v33 = vpop.permute.xlu1 %3013  ;;  %3508 = vrot.lane.b32.xlu0 %v3305_v17, %s7092_s13  ;;  %v3341_v17 = vrot.slane %v3339_v9, 4  ;;  %v7017_v9 = vld [vmem:[%s12004_s0 + $0xa8] sm:$0xf] }
 0x238   :  { %3185 = vst.msk [vmem:[#allocation2 + $0x54] sm:$0xf] %vm3163_vm10, %v3014_v33  ;;  %v3353_v33 = vrot.slane %v7012_v32, 5  ;;  %v6559_v15 = vrot.slane %v7017_v9, 9  ;;  %v7022_v32 = vld [vmem:[%s12004_s0 + $0xc8] sm:$0x1] }
 0x239   :  { %3514 = vrot.lane.b32.xlu1 %v3315_v16, %s7092_s13  ;;  %v3012_v46 = vpop.permute.xlu0 %3011  ;;  %v3343_v60 = vsel %vm8093_vm7, %v3341_v17, %v3342_v55  ;;  %v7021_v55 = vld [vmem:[%s12004_s0 + $0xe8] sm:$0xf] }
 0x23a   :  { %3184 = vst.msk [vmem:[#allocation2 + $0x50] sm:$0xf] %vm3163_vm10, %v3012_v46  ;;  %v3349_v46 = vrot.slane %v7013_v30, 5  ;;  %v3354_v8 = vsel %vm8093_vm7, %v6559_v15, %v3353_v33 }
 0x23b   :  { %v3018_v59 = vpop.permute.xlu1 %3017  ;;  %3512 = vrot.lane.b32.xlu0 %v3312_v29, %s7092_s13  ;;  %v3348_v29 = vrot.slane %v3346_v12, 4  ;;  %v7020_v12 = vld [vmem:[%s12004_s0 + $0xb4] sm:$0xf] }
 0x23c   :  { %3187 = vst.msk [vmem:[#allocation2 + $0x5c] sm:$0xf] %vm3163_vm10, %v3018_v59  ;;  %v3360_v59 = vrot.slane %v7015_v49, 5  ;;  %v6560_v17 = vrot.slane %v7020_v12, 9  ;;  %v7025_v49 = vld [vmem:[%s12004_s0 + $0xec] sm:$0x1] }
 0x23d   :  { %3518 = vrot.lane.b32.xlu1 %v3322_v3, %s7092_s13  ;;  %v3016_v5 = vpop.permute.xlu0 %3015  ;;  %v3350_v21 = vsel %vm8093_vm7, %v3348_v29, %v3349_v46  ;;  %v7024_v46 = vld [vmem:[%s12004_s0 + $0xf4] sm:$0xf] }
 0x23e   :  { %3186 = vst.msk [vmem:[#allocation2 + $0x58] sm:$0xf] %vm3163_vm10, %v3016_v5  ;;  %v3356_v5 = vrot.slane %v7016_v18, 5  ;;  %v3361_v30 = vsel %vm8093_vm7, %v6560_v17, %v3360_v59 }
 0x23f   :  { %v3022_v53 = vpop.permute.xlu1 %3021  ;;  %3516 = vrot.lane.b32.xlu0 %v3319_v61, %s7092_s13  ;;  %v3355_v61 = vrot.slane %v3353_v33, 4  ;;  %v7023_v33 = vld [vmem:[%s12004_s0 + $0xc0] sm:$0xf] }
 0x240   :  { %3189 = vst.msk [vmem:[#allocation2 + $0x64] sm:$0xf] %vm3163_vm10, %v3022_v53  ;;  %v3367_v53 = vrot.slane %v7018_v14, 5  ;;  %v6561_v29 = vrot.slane %v7023_v33, 9  ;;  %v7028_v14 = vld [vmem:[%s12004_s0 + $0xf8] sm:$0x1] }
 0x241   :  { %3522 = vrot.lane.b32.xlu1 %v3329_v24, %s7092_s13  ;;  %v3020_v58 = vpop.permute.xlu0 %3019  ;;  %v3357_v57 = vsel %vm8093_vm7, %v3355_v61, %v3356_v5  ;;  %v7027_v5 = vld [vmem:[%s12004_s0 + $0x100] sm:$0xf] }
 0x242   :  { %3188 = vst.msk [vmem:[#allocation2 + $0x60] sm:$0xf] %vm3163_vm10, %v3020_v58  ;;  %v3363_v58 = vrot.slane %v7019_v42, 5  ;;  %v3368_v18 = vsel %vm8093_vm7, %v6561_v29, %v3367_v53 }
 0x243   :  { %v3026_v16 = vpop.permute.xlu1 %3025  ;;  %3520 = vrot.lane.b32.xlu0 %v3326_v31, %s7092_s13  ;;  %v3362_v31 = vrot.slane %v3360_v59, 4  ;;  %v7026_v59 = vld [vmem:[%s12004_s0 + $0xe4] sm:$0xf] }
 0x244   :  { %3191 = vst.msk [vmem:[#allocation2 + $0x6c] sm:$0xf] %vm3163_vm10, %v3026_v16  ;;  %v3374_v16 = vrot.slane %v7021_v55, 5  ;;  %v6562_v61 = vrot.slane %v7026_v59, 9  ;;  %v7031_v55 = vld [vmem:[%s12004_s0 + $0x104] sm:$0x1] }
 0x245   :  { %3526 = vrot.lane.b32.xlu1 %v3336_v0, %s7092_s13  ;;  %v3024_v54 = vpop.permute.xlu0 %3023  ;;  %v3364_v50 = vsel %vm8093_vm7, %v3362_v31, %v3363_v58  ;;  %v7030_v58 = vld [vmem:[%s12004_s0 + $0x10c] sm:$0xf] }
 0x246   :  { %3190 = vst.msk [vmem:[#allocation2 + $0x68] sm:$0xf] %vm3163_vm10, %v3024_v54  ;;  %v3370_v54 = vrot.slane %v7022_v32, 5  ;;  %v3375_v42 = vsel %vm8093_vm7, %v6562_v61, %v3374_v16 }
 0x247   :  { %v3030_v3 = vpop.permute.xlu1 %3029  ;;  %3524 = vrot.lane.b32.xlu0 %v3333_v63, %s7092_s13  ;;  %v3369_v63 = vrot.slane %v3367_v53, 4  ;;  %v7029_v53 = vld [vmem:[%s12004_s0 + $0xf0] sm:$0xf] }
 0x248   :  { %3193 = vst.msk [vmem:[#allocation2 + $0x74] sm:$0xf] %vm3163_vm10, %v3030_v3  ;;  %v3381_v3 = vrot.slane %v7024_v46, 5  ;;  %v6563_v31 = vrot.slane %v7029_v53, 9  ;;  %v7034_v46 = vld [vmem:[%s12004_s0 + $0x110] sm:$0x1] }
 0x249   :  { %3530 = vrot.lane.b32.xlu1 %v3343_v60, %s7092_s13  ;;  %v3028_v4 = vpop.permute.xlu0 %3027  ;;  %v3371_v19 = vsel %vm8093_vm7, %v3369_v63, %v3370_v54  ;;  %v7033_v54 = vld [vmem:[%s12004_s0 + $0x118] sm:$0xf] }
 0x24a   :  { %3192 = vst.msk [vmem:[#allocation2 + $0x70] sm:$0xf] %vm3163_vm10, %v3028_v4  ;;  %v3377_v4 = vrot.slane %v7025_v49, 5  ;;  %v3382_v32 = vsel %vm8093_vm7, %v6563_v31, %v3381_v3 }
 0x24b   :  { %v3034_v24 = vpop.permute.xlu1 %3033  ;;  %3528 = vrot.lane.b32.xlu0 %v3340_v43, %s7092_s13  ;;  %v3376_v43 = vrot.slane %v3374_v16, 4  ;;  %v7032_v16 = vld [vmem:[%s12004_s0 + $0xfc] sm:$0xf] }
 0x24c   :  { %3195 = vst.msk [vmem:[#allocation2 + $0x7c] sm:$0xf] %vm3163_vm10, %v3034_v24  ;;  %v3388_v24 = vrot.slane %v7027_v5, 5  ;;  %v6564_v63 = vrot.slane %v7032_v16, 9  ;;  %v7037_v5 = vld [vmem:[%s12004_s0 + $0x11c] sm:$0x1] }
 0x24d   :  { %3534 = vrot.lane.b32.xlu1 %v3350_v21, %s7092_s13  ;;  %v3032_v37 = vpop.permute.xlu0 %3031  ;;  %v3378_v15 = vsel %vm8093_vm7, %v3376_v43, %v3377_v4  ;;  %v7036_v4 = vld [vmem:[%s12004_s0 + $0x124] sm:$0xf] }
 0x24e   :  { %3194 = vst.msk [vmem:[#allocation2 + $0x78] sm:$0xf] %vm3163_vm10, %v3032_v37  ;;  %v3384_v37 = vrot.slane %v7028_v14, 5  ;;  %v3389_v49 = vsel %vm8093_vm7, %v6564_v63, %v3388_v24 }
 0x24f   :  { %v3038_v0 = vpop.permute.xlu1 %3037  ;;  %3532 = vrot.lane.b32.xlu0 %v3347_v44, %s7092_s13  ;;  %v3383_v44 = vrot.slane %v3381_v3, 4  ;;  %v7035_v3 = vld [vmem:[%s12004_s0 + $0x108] sm:$0xf] }
 0x250   :  { %3197 = vst.msk [vmem:[#allocation2 + $0x84] sm:$0xf] %vm3163_vm10, %v3038_v0  ;;  %v3395_v0 = vrot.slane %v7030_v58, 5  ;;  %v6565_v43 = vrot.slane %v7035_v3, 9  ;;  %v7040_v58 = vld [vmem:[%s12004_s0 + $0x128] sm:$0x1] }
 0x251   :  { %3538 = vrot.lane.b32.xlu1 %v3357_v57, %s7092_s13  ;;  %v3036_v27 = vpop.permute.xlu0 %3035  ;;  %v3385_v17 = vsel %vm8093_vm7, %v3383_v44, %v3384_v37  ;;  %v7039_v37 = vld [vmem:[%s12004_s0 + $0x130] sm:$0xf] }
 0x252   :  { %3196 = vst.msk [vmem:[#allocation2 + $0x80] sm:$0xf] %vm3163_vm10, %v3036_v27  ;;  %v3391_v27 = vrot.slane %v7031_v55, 5  ;;  %v3396_v14 = vsel %vm8093_vm7, %v6565_v43, %v3395_v0  ;;  %v3426_v43 = vrot.slane %v9413_v48, 5 }
 0x253   :  { %v3042_v60 = vpop.permute.xlu1 %3041  ;;  %3536 = vrot.lane.b32.xlu0 %v3354_v8, %s7092_s13  ;;  %v3390_v8 = vrot.slane %v3388_v24, 4  ;;  %v7038_v24 = vld [vmem:[%s12004_s0 + $0x114] sm:$0xf] }
 0x254   :  { %3199 = vst.msk [vmem:[#allocation2 + $0x8c] sm:$0xf] %vm3163_vm10, %v3042_v60  ;;  %v3402_v60 = vrot.slane %v7033_v54, 5  ;;  %v6566_v44 = vrot.slane %v7038_v24, 9  ;;  %v3419_v54 = vrot.slane %v9391_v11, 5 }
 0x255   :  { %3542 = vrot.lane.b32.xlu1 %v3364_v50, %s7092_s13  ;;  %v3040_v7 = vpop.permute.xlu0 %3039  ;;  %v3392_v29 = vsel %vm8093_vm7, %v3390_v8, %v3391_v27  ;;  %v7042_v27 = vld [vmem:[%s12004_s0 + $0x13c] sm:$0xf]  ;;  %v7044_v11 = vld [vmem:[%s12004_s0 + $0x148] sm:$0xf]  ;;  %v7046_v24 = vld [vmem:[%s12004_s0 + $0x144] sm:$0xf] }
 0x256   :  { %3198 = vst.msk [vmem:[#allocation2 + $0x88] sm:$0xf] %vm3163_vm10, %v3040_v7  ;;  %v3398_v7 = vrot.slane %v7034_v46, 5  ;;  %v3403_v55 = vsel %vm8093_vm7, %v6566_v44, %v3402_v60  ;;  %v3430_v46 = vrot.slane %v7044_v11, 5  ;;  %v6570_v44 = vrot.slane %v7046_v24, 9 }
 0x257   :  { %v3046_v21 = vpop.permute.xlu1 %3045  ;;  %3540 = vrot.lane.b32.xlu0 %v3361_v30, %s7092_s13  ;;  %v3397_v30 = vrot.slane %v3395_v0, 4  ;;  %v7041_v0 = vld [vmem:[%s12004_s0 + $0x120] sm:$0xf] }
 0x258   :  { %3201 = vst.msk [vmem:[#allocation2 + $0x94] sm:$0xf] %vm3163_vm10, %v3046_v21  ;;  %v3409_v21 = vrot.slane %v7036_v4, 5  ;;  %v6567_v8 = vrot.slane %v7041_v0, 9  ;;  %v7045_v4 = vld [vmem:[%s12004_s0 + $0x138] sm:$0xf] }
 0x259   :  { %3546 = vrot.lane.b32.xlu1 %v3371_v19, %s7092_s13  ;;  %v3044_v9 = vpop.permute.xlu0 %3043  ;;  %v3399_v61 = vsel %vm8093_vm7, %v3397_v30, %v3398_v7  ;;  %v3447_v0 = vrot.slane %v9523_v34, 5 }
 0x25a   :  { %3200 = vst.msk [vmem:[#allocation2 + $0x90] sm:$0xf] %vm3163_vm10, %v3044_v9  ;;  %v3405_v9 = vrot.slane %v7037_v5, 5  ;;  %v3410_v30 = vsel %vm8093_vm7, %v6567_v8, %v3409_v21  ;;  %v3432_v5 = vrot.slane %v3430_v46, 4 }
 0x25b   :  { %v3050_v57 = vpop.permute.xlu1 %3049  ;;  %3544 = vrot.lane.b32.xlu0 %v3368_v18, %s7092_s13  ;;  %v3404_v18 = vrot.slane %v3402_v60, 4  ;;  %v7043_v60 = vld [vmem:[%s12004_s0 + $0x12c] sm:$0xf] }
 0x25c   :  { %3203 = vst.msk [vmem:[#allocation2 + $0x9c] sm:$0xf] %vm3163_vm10, %v3050_v57  ;;  %v3416_v57 = vrot.slane %v7039_v37, 5 }
 0x25d   :  { %3550 = vrot.lane.b32.xlu1 %v3378_v15, %s7092_s13  ;;  %v3048_v12 = vpop.permute.xlu0 %3047  ;;  %v3406_v31 = vsel %vm8093_vm7, %v3404_v18, %v3405_v9  ;;  %v3433_v9 = vrot.slane %v9459_v22, 5 }
 0x25e   :  { %3202 = vst.msk [vmem:[#allocation2 + $0x98] sm:$0xf] %vm3163_vm10, %v3048_v12  ;;  %v3412_v12 = vrot.slane %v7040_v58, 5  ;;  %v3451_v58 = vrot.slane %v9504_v2, 5 }
 0x25f   :  { %v3054_v50 = vpop.permute.xlu1 %3053  ;;  %3548 = vrot.lane.b32.xlu0 %v3375_v42, %s7092_s13  ;;  %v3411_v42 = vrot.slane %v3409_v21, 4  ;;  %v6569_v21 = vrot.slane %v7045_v4, 9  ;;  %v3434_v37 = vsel %vm8093_vm7, %v3432_v5, %v3433_v9  ;;  %v3475_v4 = vrot.slane %v9666_v26, 5 }
 0x260   :  { %3205 = vst.msk [vmem:[#allocation2 + $0xa4] sm:$0xf] %vm3163_vm10, %v3054_v50  ;;  %v3423_v50 = vrot.slane %v7042_v27, 5  ;;  %v3482_v26 = vrot.slane %v9691_v25, 5 }
 0x261   :  { %3554 = vrot.lane.b32.xlu1 %v3385_v17, %s7092_s13  ;;  %v3052_v33 = vpop.permute.xlu0 %3051  ;;  %v3413_v63 = vsel %vm8093_vm7, %v3411_v42, %v3412_v12  ;;  %v6571_v42 = vrot.slane %v9451_v28, 9  ;;  %v6572_v28 = vrot.slane %v9489_v56, 9  ;;  %v6573_v56 = vrot.slane %v9532_v62, 9 }
 0x262   :  { %3204 = vst.msk [vmem:[#allocation2 + $0xa0] sm:$0xf] %vm3163_vm10, %v3052_v33  ;;  %v3425_v3 = vrot.slane %v3423_v50, 4  ;;  %v6574_v62 = vrot.slane %v9565_v13, 9  ;;  %v6575_v13 = vrot.slane %v9599_v35, 9  ;;  %v6576_v35 = vrot.slane %v9638_v47, 9 }
 0x263   :  { %v3058_v19 = vpop.permute.xlu1 %3057  ;;  %3552 = vrot.lane.b32.xlu0 %v3382_v32, %s7092_s13  ;;  %v3418_v32 = vrot.slane %v3416_v57, 4  ;;  %v6577_v47 = vrot.slane %v9673_v6, 9 }
 0x264   :  { %3207 = vst.msk [vmem:[#allocation2 + $0xac] sm:$0xf] %vm3163_vm10, %v3058_v19  ;;  %v3427_v18 = vsel %vm8093_vm7, %v3425_v3, %v3426_v43  ;;  %v3479_v3 = vrot.slane %v9648_v39, 5 }
 0x265   :  { %3558 = vrot.lane.b32.xlu1 %v3392_v29, %s7092_s13  ;;  %v3056_v59 = vpop.permute.xlu0 %3055  ;;  %v6568_v29 = vrot.slane %v7043_v60, 9  ;;  %v3420_v19 = vsel %vm8093_vm7, %v3418_v32, %v3419_v54  ;;  %v3465_v32 = vrot.slane %v9580_v45, 5  ;;  %v3461_v60 = vrot.slane %v9607_v51, 5 }
 0x266   :  { %3206 = vst.msk [vmem:[#allocation2 + $0xa8] sm:$0xf] %vm3163_vm10, %v3056_v59  ;;  %v3452_v45 = vsel %vm8093_vm7, %v6573_v56, %v3451_v58  ;;  %v3480_v6 = vsel %vm8093_vm7, %v6577_v47, %v3479_v3  ;;  %v6597_v56 = vld [vmem:[%s12004_s0 + $0x64] sm:$0xf]  ;;  %v6614_v47 = vld [vmem:[%s12004_s0 + $0xa8] sm:$0xf] }
 0x267   :  { %v3062_v15 = vpop.permute.xlu1 %3061  ;;  %3556 = vrot.lane.b32.xlu0 %v3389_v49, %s7092_s13  ;;  %v3417_v59 = vsel %vm8093_vm7, %v6568_v29, %v3416_v57  ;;  %v3466_v39 = vsel %vm8093_vm7, %v6575_v13, %v3465_v32  ;;  %v6609_v13 = vld [vmem:[%s12004_s0 + $0x94] sm:$0xf] }
 0x268   :  { %3209 = vst.msk [vmem:[#allocation2 + $0xb4] sm:$0xf] %vm3163_vm10, %v3062_v15 }
 0x269   :  { %3562 = vrot.lane.b32.xlu1 %v3399_v61, %s7092_s13  ;;  %v3060_v53 = vpop.permute.xlu0 %3059  ;;  %v3437_v61 = vrot.slane %v9428_v20, 5  ;;  %v3424_v20 = vsel %vm8093_vm7, %v6569_v21, %v3423_v50  ;;  %v3453_v50 = vrot.slane %v3451_v58, 4  ;;  %v10269_v58 = vld [vmem:[%s12004_s0 + $0x30] sm:$0xf] }
 0x26a   :  { %3208 = vst.msk [vmem:[#allocation2 + $0xb0] sm:$0xf] %vm3163_vm10, %v3060_v53  ;;  %v3440_v53 = vrot.slane %v9497_v38, 5 }
 0x26b   :  { %v3066_v17 = vpop.permute.xlu1 %3065  ;;  %3560 = vrot.lane.b32.xlu0 %v3396_v14, %s7092_s13  ;;  %v3444_v14 = vrot.slane %v9466_v52, 5  ;;  %v3439_v57 = vrot.slane %v3437_v61, 4  ;;  %v3431_v52 = vsel %vm8093_vm7, %v6570_v44, %v3430_v46  ;;  %v3438_v2 = vsel %vm8093_vm7, %v6571_v42, %v3437_v61  ;;  %v10227_v44 = vld [vmem:[%s12004_s0 + $0x1c] sm:$0xf]  ;;  %v10258_v42 = vld [vmem:[%s12004_s0 + $0x34] sm:$0xf] }
 0x26c   :  { %3211 = vst.msk [vmem:[#allocation2 + $0xbc] sm:$0xf] %vm3163_vm10, %v3066_v17  ;;  %v3467_v46 = vrot.slane %v3465_v32, 4  ;;  %v6596_v32 = vld [vmem:[%s12004_s0 + $0x60] sm:$0xf] }
 0x26d   :  { %3566 = vrot.lane.b32.xlu1 %v3406_v31, %s7092_s13  ;;  %v3064_v16 = vpop.permute.xlu0 %3063  ;;  %v3441_v38 = vsel %vm8093_vm7, %v3439_v57, %v3440_v53  ;;  %v3446_v17 = vrot.slane %v3444_v14, 4  ;;  %v10253_v53 = vld [vmem:[%s12004_s0 + $0x24] sm:$0xf] }
 0x26e   :  { %3210 = vst.msk [vmem:[#allocation2 + $0xb8] sm:$0xf] %vm3163_vm10, %v3064_v16  ;;  %v3454_v16 = vrot.slane %v9573_v40, 5 }
 0x26f   :  { %v3070_v33 = vpop.permute.xlu1 %3069  ;;  %3564 = vrot.lane.b32.xlu0 %v3403_v55, %s7092_s13  ;;  %v3458_v55 = vrot.slane %v9542_v10, 5  ;;  %v3448_v34 = vsel %vm8093_vm7, %v3446_v17, %v3447_v0  ;;  %v3445_v10 = vsel %vm8093_vm7, %v6572_v28, %v3444_v14  ;;  %v10237_v14 = vld [vmem:[%s12004_s0 + $0x18] sm:$0xf]  ;;  %v10285_v0 = vld [vmem:[%s12004_s0 + $0x3c] sm:$0xf] }
 0x270   :  { %3213 = vst.msk [vmem:[#allocation2 + $0xc4] sm:$0xf] %vm3163_vm10, %v3070_v33  ;;  %v3455_v40 = vsel %vm8093_vm7, %v3453_v50, %v3454_v16  ;;  %v10290_v28 = vld [vmem:[%s12004_s0 + $0x4c] sm:$0xf]  ;;  %v10317_v16 = vld [vmem:[%s12004_s0 + $0x54] sm:$0xf] }
 0x271   :  { %3570 = vrot.lane.b32.xlu1 %v3413_v63, %s7092_s13  ;;  %v3068_v7 = vpop.permute.xlu0 %3067  ;;  %v3460_v33 = vrot.slane %v3458_v55, 4 }
 0x272   :  { %3212 = vst.msk [vmem:[#allocation2 + $0xc0] sm:$0xf] %vm3163_vm10, %v3068_v7  ;;  %v3468_v7 = vrot.slane %v9633_v41, 5 }
 0x273   :  { %v3074_v49 = vpop.permute.xlu1 %3073  ;;  %3568 = vrot.lane.b32.xlu0 %v3410_v30, %s7092_s13  ;;  %v3472_v30 = vrot.slane %v9614_v1, 5  ;;  %v3462_v51 = vsel %vm8093_vm7, %v3460_v33, %v3461_v60  ;;  %v3459_v1 = vsel %vm8093_vm7, %v6574_v62, %v3458_v55  ;;  %v10301_v55 = vld [vmem:[%s12004_s0 + $0x48] sm:$0xf]  ;;  %v6599_v60 = vld [vmem:[%s12004_s0 + $0x6c] sm:$0xf] }
 0x274   :  { %3215 = vst.msk [vmem:[#allocation2 + $0xcc] sm:$0xf] %vm3163_vm10, %v3074_v49  ;;  %v3469_v41 = vsel %vm8093_vm7, %v3467_v46, %v3468_v7  ;;  %v6603_v62 = vld [vmem:[%s12004_s0 + $0x7c] sm:$0xf]  ;;  %v6605_v7 = vld [vmem:[%s12004_s0 + $0x84] sm:$0xf] }
 0x275   :  { %3574 = vrot.lane.b32.xlu1 %v3420_v19, %s7092_s13  ;;  %v3072_v48 = vpop.permute.xlu0 %3071  ;;  %v3474_v49 = vrot.slane %v3472_v30, 4  ;;  %v3473_v5 = vsel %vm8093_vm7, %v6576_v35, %v3472_v30  ;;  %v6602_v30 = vld [vmem:[%s12004_s0 + $0x78] sm:$0xf]  ;;  %v4173_v35 = vshrl.u32 %v10227_v44, 16 }
 0x276   :  { %3214 = vst.msk [vmem:[#allocation2 + $0xc8] sm:$0xf] %vm3163_vm10, %v3072_v48  ;;  %v3481_v48 = vrot.slane %v3479_v3, 4  ;;  %v6608_v3 = vld [vmem:[%s12004_s0 + $0x90] sm:$0xf] }
 0x277   :  { %v3078_v15 = vpop.permute.xlu1 %3077  ;;  %3572 = vrot.lane.b32.xlu0 %v3417_v59, %s7092_s13  ;;  %v3476_v61 = vsel %vm8093_vm7, %v3474_v49, %v3475_v4  ;;  %v6611_v4 = vld [vmem:[%s12004_s0 + $0x9c] sm:$0xf] }
 0x278   :  { %3217 = vst.msk [vmem:[#allocation2 + $0xd4] sm:$0xf] %vm3163_vm10, %v3078_v15  ;;  %v3483_v15 = vsel %vm8093_vm7, %v3481_v48, %v3482_v26  ;;  %v4160_v48 = vshrl.u32 %v10237_v14, 16  ;;  %v10392_v26 = vld [vmem:[%s12004_s0 + $0xf4] sm:$0xf] }
 0x279   :  { %3578 = vrot.lane.b32.xlu1 %v3427_v18, %s7092_s13  ;;  %v3076_v22 = vpop.permute.xlu0 %3075 }
 0x27a   :  { %3216 = vst.msk [vmem:[#allocation2 + $0xd0] sm:$0xf] %vm3163_vm10, %v3076_v22 }
 0x27b   :  { %v3082_v31 = vpop.permute.xlu1 %3081  ;;  %3576 = vrot.lane.b32.xlu0 %v3424_v20, %s7092_s13 }
 0x27c   :  { %3219 = vst.msk [vmem:[#allocation2 + $0xdc] sm:$0xf] %vm3163_vm10, %v3082_v31 }
 0x27d   :  { %3582 = vrot.lane.b32.xlu1 %v3434_v37, %s7092_s13  ;;  %v3080_v12 = vpop.permute.xlu0 %3079  ;;  %v10242_v37 = vld [vmem:[%s12004_s0 + $0x28] sm:$0xf] }
 0x27e   :  { %3218 = vst.msk [vmem:[#allocation2 + $0xd8] sm:$0xf] %vm3163_vm10, %v3080_v12 }
 0x27f   :  { %v3086_v8 = vpop.permute.xlu1 %3085  ;;  %3580 = vrot.lane.b32.xlu0 %v3431_v52, %s7092_s13 }
 0x280   :  { %3221 = vst.msk [vmem:[#allocation2 + $0xe4] sm:$0xf] %vm3163_vm10, %v3086_v8 }
 0x281   :  { %3586 = vrot.lane.b32.xlu1 %v3441_v38, %s7092_s13  ;;  %v3084_v27 = vpop.permute.xlu0 %3083  ;;  %v10274_v38 = vld [vmem:[%s12004_s0 + $0x40] sm:$0xf] }
 0x282   :  { %3220 = vst.msk [vmem:[#allocation2 + $0xe0] sm:$0xf] %vm3163_vm10, %v3084_v27 }
 0x283   :  { %v3090_v63 = vpop.permute.xlu1 %3089  ;;  %3584 = vrot.lane.b32.xlu0 %v3438_v2, %s7092_s13 }
 0x284   :  { %3223 = vst.msk [vmem:[#allocation2 + $0xec] sm:$0xf] %vm3163_vm10, %v3090_v63 }
 0x285   :  { %3590 = vrot.lane.b32.xlu1 %v3448_v34, %s7092_s13  ;;  %v3088_v54 = vpop.permute.xlu0 %3087  ;;  %v10306_v34 = vld [vmem:[%s12004_s0 + $0x58] sm:$0xf] }
 0x286   :  { %3222 = vst.msk [vmem:[#allocation2 + $0xe8] sm:$0xf] %vm3163_vm10, %v3088_v54 }
 0x287   :  { %v3094_v29 = vpop.permute.xlu1 %3093  ;;  %3588 = vrot.lane.b32.xlu0 %v3445_v10, %s7092_s13 }
 0x288   :  { %3225 = vst.msk [vmem:[#allocation2 + $0xf4] sm:$0xf] %vm3163_vm10, %v3094_v29 }
 0x289   :  { %3594 = vrot.lane.b32.xlu1 %v3455_v40, %s7092_s13  ;;  %v3092_v11 = vpop.permute.xlu0 %3091  ;;  %v6600_v40 = vld [vmem:[%s12004_s0 + $0x70] sm:$0xf] }
 0x28a   :  { %3224 = vst.msk [vmem:[#allocation2 + $0xf0] sm:$0xf] %vm3163_vm10, %v3092_v11 }
 0x28b   :  { %v3098_v19 = vpop.permute.xlu1 %3097  ;;  %3592 = vrot.lane.b32.xlu0 %v3452_v45, %s7092_s13 }
 0x28c   :  { %3227 = vst.msk [vmem:[#allocation2 + $0xfc] sm:$0xf] %vm3163_vm10, %v3098_v19 }
 0x28d   :  { %3598 = vrot.lane.b32.xlu1 %v3462_v51, %s7092_s13  ;;  %v3096_v43 = vpop.permute.xlu0 %3095  ;;  %v6606_v51 = vld [vmem:[%s12004_s0 + $0x88] sm:$0xf] }
 0x28e   :  { %3226 = vst.msk [vmem:[#allocation2 + $0xf8] sm:$0xf] %vm3163_vm10, %v3096_v43 }
 0x28f   :  { %v3487_v21 = vpop.permute.xlu1 %3486  ;;  %3596 = vrot.lane.b32.xlu0 %v3459_v1, %s7092_s13 }
 0x290   :  { %3678 = vst.msk [vmem:[#allocation2 + $0x4] sm:$0xf] %vm3676_vm11, %v3487_v21  ;;  %v4169_v21 = vshll.u32 %v10227_v44, 16 }
 0x291   :  { %3602 = vrot.lane.b32.xlu1 %v3469_v41, %s7092_s13  ;;  %v3485_v59 = vpop.permute.xlu0 %3484  ;;  %v6612_v41 = vld [vmem:[%s12004_s0 + $0xa0] sm:$0xf] }
 0x292   :  { %3677 = vst.msk [vmem:[#allocation2] sm:$0xf] %vm3676_vm11, %v3485_v59  ;;  %v6615_v59 = vld [vmem:[%s12004_s0 + $0xac] sm:$0xf] }
 0x293   :  { %v3491_v18 = vpop.permute.xlu1 %3490  ;;  %3600 = vrot.lane.b32.xlu0 %v3466_v39, %s7092_s13 }
 0x294   :  { %3680 = vst.msk [vmem:[#allocation2 + $0xc] sm:$0xf] %vm3676_vm11, %v3491_v18  ;;  %v4163_v18 = vshll.u32 %v10237_v14, 16 }
 0x295   :  { %3606 = vrot.lane.b32.xlu1 %v3476_v61, %s7092_s13  ;;  %v3489_v9 = vpop.permute.xlu0 %3488 }
 0x296   :  { %3679 = vst.msk [vmem:[#allocation2 + $0x8] sm:$0xf] %vm3676_vm11, %v3489_v9  ;;  %v4557_v9 = vshrl.u32 %v10392_v26, 16 }
 0x297   :  { %v3495_v25 = vpop.permute.xlu1 %3494  ;;  %3604 = vrot.lane.b32.xlu0 %v3473_v5, %s7092_s13  ;;  %v4553_v5 = vshll.u32 %v10392_v26, 16 }
 0x298   :  { %3682 = vst.msk [vmem:[#allocation2 + $0x14] sm:$0xf] %vm3676_vm11, %v3495_v25  ;;  %v4175_v25 = vrot.slane %v4173_v35, 4 }
 0x299   :  { %3610 = vrot.lane.b32.xlu1 %v3483_v15, %s7092_s13  ;;  %v3493_v24 = vpop.permute.xlu0 %3492  ;;  %v10401_v15 = vrot.slane %v4169_v21, 5  ;;  %v10463_v21 = vld [vmem:[%s12004_s0 + $0x2c] sm:$0x1] }
 0x29a   :  { %3681 = vst.msk [vmem:[#allocation2 + $0x10] sm:$0xf] %vm3676_vm11, %v3493_v24  ;;  %v6618_v24 = vld [vmem:[%s12004_s0 + $0xb8] sm:$0xf] }
 0x29b   :  { %v3499_v20 = vpop.permute.xlu1 %3498  ;;  %3608 = vrot.lane.b32.xlu0 %v3480_v6, %s7092_s13 }
 0x29c   :  { %3684 = vst.msk [vmem:[#allocation2 + $0x1c] sm:$0xf] %vm3676_vm11, %v3499_v20 }
 0x29d   :  { %3904 = vrot.lane.b32.xlu1 %v10227_v44, %s7093_s20  ;;  %v3497_v22 = vpop.permute.xlu0 %3496 }
 0x29e   :  { %3683 = vst.msk [vmem:[#allocation2 + $0x18] sm:$0xf] %vm3676_vm11, %v3497_v22  ;;  %v10410_v22 = vld [vmem:[%s12004_s0 + $0xf0] sm:$0xf] }
 0x29f   :  { %v3503_v57 = vpop.permute.xlu1 %3502  ;;  %3902 = vrot.lane.b32.xlu0 %v10237_v14, %s7093_s20 }
 0x2a0   :  { %3686 = vst.msk [vmem:[#allocation2 + $0x24] sm:$0xf] %vm3676_vm11, %v3503_v57  ;;  %v10415_v57 = vld [vmem:[%s12004_s0 + $0x20] sm:$0x1] }
 0x2a1   :  { %3908 = vrot.lane.b32.xlu1 %v10242_v37, %s7093_s20  ;;  %v3501_v31 = vpop.permute.xlu0 %3500 }
 0x2a2   :  { %3685 = vst.msk [vmem:[#allocation2 + $0x20] sm:$0xf] %vm3676_vm11, %v3501_v31  ;;  %v4162_v31 = vrot.slane %v4160_v48, 4 }
 0x2a3   :  { %v3507_v52 = vpop.permute.xlu1 %3506  ;;  %3906 = vrot.lane.b32.xlu0 %v10253_v53, %s7093_s20 }
 0x2a4   :  { %3688 = vst.msk [vmem:[#allocation2 + $0x2c] sm:$0xf] %vm3676_vm11, %v3507_v52  ;;  %v4193_v52 = vshll.u32 %v10242_v37, 16 }
 0x2a5   :  { %3912 = vrot.lane.b32.xlu1 %v10258_v42, %s7093_s20  ;;  %v3505_v12 = vpop.permute.xlu0 %3504 }
 0x2a6   :  { %3687 = vst.msk [vmem:[#allocation2 + $0x28] sm:$0xf] %vm3676_vm11, %v3505_v12  ;;  %v4544_v12 = vshrl.u32 %v10410_v22, 16 }
 0x2a7   :  { %v3511_v17 = vpop.permute.xlu1 %3510  ;;  %3910 = vrot.lane.b32.xlu0 %v10269_v58, %s7093_s20 }
 0x2a8   :  { %3690 = vst.msk [vmem:[#allocation2 + $0x34] sm:$0xf] %vm3676_vm11, %v3511_v17  ;;  %v4165_v17 = vrot.slane %v4163_v18, 5 }
 0x2a9   :  { %3916 = vrot.lane.b32.xlu1 %v10274_v38, %s7093_s20  ;;  %v3509_v8 = vpop.permute.xlu0 %3508 }
 0x2aa   :  { %3689 = vst.msk [vmem:[#allocation2 + $0x30] sm:$0xf] %vm3676_vm11, %v3509_v8  ;;  %v6617_v8 = vld [vmem:[%s12004_s0 + $0xb4] sm:$0xf] }
 0x2ab   :  { %v3515_v2 = vpop.permute.xlu1 %3514  ;;  %3914 = vrot.lane.b32.xlu0 %v10285_v0, %s7093_s20 }
 0x2ac   :  { %3692 = vst.msk [vmem:[#allocation2 + $0x3c] sm:$0xf] %vm3676_vm11, %v3515_v2  ;;  %v10425_v2 = vrot.slane %v4553_v5, 5 }
 0x2ad   :  { %3920 = vrot.lane.b32.xlu1 %v10290_v28, %s7093_s20  ;;  %v3513_v27 = vpop.permute.xlu0 %3512 }
 0x2ae   :  { %3691 = vst.msk [vmem:[#allocation2 + $0x38] sm:$0xf] %vm3676_vm11, %v3513_v27  ;;  %v4559_v27 = vrot.slane %v4557_v9, 4 }
 0x2af   :  { %v3519_v50 = vpop.permute.xlu1 %3518  ;;  %3918 = vrot.lane.b32.xlu0 %v10301_v55, %s7093_s20 }
 0x2b0   :  { %3694 = vst.msk [vmem:[#allocation2 + $0x44] sm:$0xf] %vm3676_vm11, %v3519_v50  ;;  %v4547_v50 = vshll.u32 %v10410_v22, 16 }
 0x2b1   :  { %3924 = vrot.lane.b32.xlu1 %v10306_v34, %s7093_s20  ;;  %v3517_v63 = vpop.permute.xlu0 %3516 }
 0x2b2   :  { %3693 = vst.msk [vmem:[#allocation2 + $0x40] sm:$0xf] %vm3676_vm11, %v3517_v63  ;;  %v4197_v63 = vshrl.u32 %v10242_v37, 16 }
 0x2b3   :  { %v3523_v10 = vpop.permute.xlu1 %3522  ;;  %3922 = vrot.lane.b32.xlu0 %v10317_v16, %s7093_s20 }
 0x2b4   :  { %3696 = vst.msk [vmem:[#allocation2 + $0x4c] sm:$0xf] %vm3676_vm11, %v3523_v10  ;;  %v4176_v10 = vor.u32 %v4175_v25, %v10401_v15 }
 0x2b5   :  { %3928 = vrot.lane.b32.xlu1 %v6597_v56, %s7093_s20  ;;  %v3521_v54 = vpop.permute.xlu0 %3520 }
 0x2b6   :  { %3695 = vst.msk [vmem:[#allocation2 + $0x48] sm:$0xf] %vm3676_vm11, %v3521_v54  ;;  %v10434_v54 = vld [vmem:[%s12004_s0 + $0xf8] sm:$0x1] }
 0x2b7   :  { %v3527_v33 = vpop.permute.xlu1 %3526  ;;  %3926 = vrot.lane.b32.xlu0 %v6596_v32, %s7093_s20  ;;  %v4179_v32 = vshll.u32 %v10415_v57, 16 }
 0x2b8   :  { %3698 = vst.msk [vmem:[#allocation2 + $0x54] sm:$0xf] %vm3676_vm11, %v3527_v33 }
 0x2b9   :  { %3932 = vrot.lane.b32.xlu1 %v6600_v40, %s7093_s20  ;;  %v3525_v29 = vpop.permute.xlu0 %3524  ;;  %v4184_v40 = vshrl.u32 %v10253_v53, 16 }
 0x2ba   :  { %3697 = vst.msk [vmem:[#allocation2 + $0x50] sm:$0xf] %vm3676_vm11, %v3525_v29  ;;  %v10443_v29 = vrot.slane %v4193_v52, 5  ;;  %v10482_v52 = vld [vmem:[%s12004_s0 + $0x104] sm:$0x1] }
 0x2bb   :  { %v3531_v45 = vpop.permute.xlu1 %3530  ;;  %3930 = vrot.lane.b32.xlu0 %v6599_v60, %s7093_s20  ;;  %v10441_v60 = vld [vmem:[%s12004_s0 + $0x100] sm:$0xf] }
 0x2bc   :  { %3700 = vst.msk [vmem:[#allocation2 + $0x5c] sm:$0xf] %vm3676_vm11, %v3531_v45  ;;  %v4546_v45 = vrot.slane %v4544_v12, 4 }
 0x2bd   :  { %3936 = vrot.lane.b32.xlu1 %v6603_v62, %s7093_s20  ;;  %v3529_v11 = vpop.permute.xlu0 %3528  ;;  %v4187_v62 = vshll.u32 %v10253_v53, 16 }
 0x2be   :  { %3699 = vst.msk [vmem:[#allocation2 + $0x58] sm:$0xf] %vm3676_vm11, %v3529_v11  ;;  %v4549_v11 = vrot.slane %v4547_v50, 5 }
 0x2bf   :  { %v3535_v46 = vpop.permute.xlu1 %3534  ;;  %3934 = vrot.lane.b32.xlu0 %v6602_v30, %s7093_s20  ;;  %v4577_v30 = vshll.u32 %v10441_v60, 16  ;;  %v4189_v35 = vrot.slane %v4187_v62, 5 }
 0x2c0   :  { %3702 = vst.msk [vmem:[#allocation2 + $0x64] sm:$0xf] %vm3676_vm11, %v3535_v46  ;;  %v4560_v46 = vor.u32 %v4559_v27, %v10425_v2  ;;  %v4550_v5 = vor.u32 %v4549_v11, %v4546_v45  ;;  %v5218_v11 = vrot.slane %v10227_v44, 5 }
 0x2c1   :  { %3940 = vrot.lane.b32.xlu1 %v6606_v51, %s7093_s20  ;;  %v3533_v19 = vpop.permute.xlu0 %3532  ;;  %v4166_v51 = vor.u32 %v4165_v17, %v4162_v31 }
 0x2c2   :  { %3701 = vst.msk [vmem:[#allocation2 + $0x60] sm:$0xf] %vm3676_vm11, %v3533_v19  ;;  %v4199_v19 = vrot.slane %v4197_v63, 4  ;;  %v4561_v18 = vrot.slane %v4560_v46, 4  ;;  %v4551_v50 = vrot.slane %v4550_v5, 4  ;;  %v5333_v5 = vrot.slane %v10434_v54, 5 }
 0x2c3   :  { %v3539_v1 = vpop.permute.xlu1 %3538  ;;  %3938 = vrot.lane.b32.xlu0 %v6605_v7, %s7093_s20  ;;  %v4563_v7 = vshll.u32 %v10434_v54, 16  ;;  %v4167_v48 = vrot.slane %v4166_v51, 4 }
 0x2c4   :  { %3704 = vst.msk [vmem:[#allocation2 + $0x6c] sm:$0xf] %vm3676_vm11, %v3539_v1  ;;  %v4581_v1 = vshrl.u32 %v10441_v60, 16 }
 0x2c5   :  { %3944 = vrot.lane.b32.xlu1 %v6609_v13, %s7093_s20  ;;  %v3537_v43 = vpop.permute.xlu0 %3536 }
 0x2c6   :  { %3703 = vst.msk [vmem:[#allocation2 + $0x68] sm:$0xf] %vm3676_vm11, %v3537_v43  ;;  %v4181_v43 = vrot.slane %v4179_v32, 5  ;;  %v4583_v25 = vrot.slane %v4581_v1, 4  ;;  %v5330_v1 = vrot.slane %v10392_v26, 5 }
 0x2c7   :  { %v3543_v49 = vpop.permute.xlu1 %3542  ;;  %3942 = vrot.lane.b32.xlu0 %v6608_v3, %s7093_s20  ;;  %v4177_v3 = vrot.slane %v4176_v10, 4 }
 0x2c8   :  { %3706 = vst.msk [vmem:[#allocation2 + $0x74] sm:$0xf] %vm3676_vm11, %v3543_v49 }
 0x2c9   :  { %3948 = vrot.lane.b32.xlu1 %v6612_v41, %s7093_s20  ;;  %v3541_v39 = vpop.permute.xlu0 %3540  ;;  %v4186_v41 = vrot.slane %v4184_v40, 4 }
 0x2ca   :  { %3705 = vst.msk [vmem:[#allocation2 + $0x70] sm:$0xf] %vm3676_vm11, %v3541_v39  ;;  %v10468_v39 = vrot.slane %v4577_v30, 5 }
 0x2cb   :  { %v3547_v61 = vpop.permute.xlu1 %3546  ;;  %3946 = vrot.lane.b32.xlu0 %v6611_v4, %s7093_s20  ;;  %v10458_v4 = vld [vmem:[%s12004_s0 + $0xfc] sm:$0xf]  ;;  %v4190_v63 = vor.u32 %v4189_v35, %v4186_v41  ;;  %v5220_v41 = vrot.slane %v5218_v11, 4  ;;  %v6897_v35 = vld [vmem:[%s12005_s1 + $0x10] ss:$0 sps:$4 sm:$0x33]  }
 0x2cc   :  { %3708 = vst.msk [vmem:[#allocation2 + $0x7c] sm:$0xf] %vm3676_vm11, %v3547_v61  ;;  %v4571_v61 = vshll.u32 %v10458_v4, 16  ;;  %v4584_v40 = vor.u32 %v4583_v25, %v10468_v39  ;;  %6885 = vmatprep.subr.msk.bf16.mxu0 %vm6045_vm12, %v6897_v35  ;;  %6886 = vmatprep.subr.msk.bf16.mxu1 %vm6045_vm12, %v6897_v35 }
 0x2cd   :  { %3952 = vrot.lane.b32.xlu1 %v6615_v59, %s7093_s20  ;;  %v3545_v6 = vpop.permute.xlu0 %3544  ;;  %v4568_v59 = vshrl.u32 %v10458_v4, 16  ;;  %v4191_v45 = vrot.slane %v4190_v63, 4  ;;  %v5340_v63 = vrot.slane %v10482_v52, 5 }
 0x2ce   :  { %3707 = vst.msk [vmem:[#allocation2 + $0x78] sm:$0xf] %vm3676_vm11, %v3545_v6  ;;  %v4182_v6 = vsel %vm7167_vm3, %v4177_v3, %v4181_v43  ;;  %v4573_v17 = vrot.slane %v4571_v61, 5  ;;  %v5225_v61 = vrot.slane %v10242_v37, 5  ;;  %v6690_v37 = vrot.slane %v10410_v22, 9 }
 0x2cf   :  { %v3551_v20 = vpop.permute.xlu1 %3550  ;;  %3950 = vrot.lane.b32.xlu0 %v6614_v47, %s7093_s20  ;;  %v4565_v47 = vrot.slane %v4563_v7, 5  ;;  %v4570_v12 = vrot.slane %v4568_v59, 4  ;;  %v4585_v7 = vrot.slane %v4584_v40, 4 }
 0x2d0   :  { %3710 = vst.msk [vmem:[#allocation2 + $0x84] sm:$0xf] %vm3676_vm11, %v3551_v20  ;;  %v4203_v20 = vshll.u32 %v10463_v21, 16 }
 0x2d1   :  { %3956 = vrot.lane.b32.xlu1 %v6618_v24, %s7093_s20  ;;  %v3549_v56 = vpop.permute.xlu0 %3548  ;;  %v4200_v24 = vor.u32 %v4199_v19, %v10443_v29  ;;  %v4566_v27 = vsel %vm7167_vm3, %v4561_v18, %v4565_v47  ;;  %v4574_v30 = vor.u32 %v4573_v17, %v4570_v12  ;;  %v5332_v47 = vrot.slane %v5330_v1, 4 }
 0x2d2   :  { %3709 = vst.msk [vmem:[#allocation2 + $0x80] sm:$0xf] %vm3676_vm11, %v3549_v56  ;;  %v4205_v32 = vrot.slane %v4203_v20, 5  ;;  %v5228_v20 = vrot.slane %v10463_v21, 5  ;;  %v4217_v12 = vshll.u32 %v10258_v42, 16  ;;  %v5331_v21 = vsel %vm8093_vm7, %v6690_v37, %v5330_v1 }
 0x2d3   :  { %v3555_v33 = vpop.permute.xlu1 %3554  ;;  %3954 = vrot.lane.b32.xlu0 %v6617_v8, %s7093_s20  ;;  %v4172_v8 = vsel %vm7167_vm3, %v4167_v48, %v10401_v15  ;;  %v4201_v10 = vrot.slane %v4200_v24, 4  ;;  %v4556_v15 = vsel %vm7167_vm3, %v4551_v50, %v10425_v2  ;;  %v4196_v2 = vsel %vm7167_vm3, %v4191_v45, %v10443_v29 }
 0x2d4   :  { %3712 = vst.msk [vmem:[#allocation2 + $0x8c] sm:$0xf] %vm3676_vm11, %v3555_v33  ;;  %v4587_v33 = vshll.u32 %v10482_v52, 16  ;;  %v4575_v44 = vrot.slane %v4574_v30, 4  ;;  %v6674_v29 = vrot.slane %v10237_v14, 9  ;;  %v6898_v14 = vld [vmem:[%s12005_s1 + $0x8] sm:$0xff]  }
 0x2d5   :  { %3968 = vrot.lane.b32.xlu1 %v10392_v26, %s7093_s20  ;;  %v3553_v13 = vpop.permute.xlu0 %3552  ;;  %v4206_v46 = vsel %vm7167_vm3, %v4201_v10, %v4205_v32  ;;  %v6047_v26 = vsel %vm6045_vm12, %v6897_v35, 0  ;;  %v5227_v24 = vrot.slane %v5225_v61, 4  ;;  %v4221_v17 = vshrl.u32 %v10258_v42, 16  ;;  %v10568_v32 = vld [vmem:[%s12004_s0 + $0x10c] sm:$0xf] }
 0x2d6   :  { %3711 = vst.msk [vmem:[#allocation2 + $0x88] sm:$0xf] %vm3676_vm11, %v3553_v13  ;;  %v4589_v19 = vrot.slane %v4587_v33, 5  ;;  %6810 = vmatpush3.bf16.msra.mxu0 %v6047_v26  ;;  %6882 = vmatpush3.bf16.msra.mxu1 %v6047_v26  ;;  %v5219_v54 = vsel %vm8093_vm7, %v6674_v29, %v5218_v11  ;;  %v4211_v10 = vshll.u32 %v10269_v58, 16  ;;  %v6691_v52 = vrot.slane %v10458_v4, 9 }
 0x2d7   :  { %v3559_v49 = vpop.permute.xlu1 %3558  ;;  %3966 = vrot.lane.b32.xlu0 %v10410_v22, %s7093_s20  ;;  %6811 = vmatprep.subr.bf16.mxu0 %v6898_v14  ;;  %v6900_v22 = vld [vmem:[%s12005_s1] sm:$0xff]   ;;  %v4601_v33 = vshll.u32 %v10568_v32, 16  ;;  %v4223_v45 = vrot.slane %v4221_v17, 4  ;;  %v10607_v26 = vld [vmem:[%s12004_s0 + $0x110] sm:$0x1]  ;;  %v4232_v29 = vshrl.u32 %v10285_v0, 16 }
 0x2d8   :  { %3714 = vst.msk [vmem:[#allocation2 + $0x94] sm:$0xf] %vm3676_vm11, %v3559_v49  ;;  %v4590_v43 = vsel %vm7167_vm3, %v4585_v7, %v4589_v19  ;;  %v5221_v49 = vrot.slane %v10415_v57, 5  ;;  %v4580_v57 = vsel %vm7167_vm3, %v4575_v44, %v10468_v39  ;;  %v5337_v39 = vrot.slane %v10441_v60, 5  ;;  %6880 = vmatprep.subr.bf16.mxu1 %v6898_v14 }
 0x2d9   :  { %3972 = vrot.lane.b32.xlu1 %v10441_v60, %s7093_s20  ;;  %v3557_v9 = vpop.permute.xlu0 %3556  ;;  %v6675_v60 = vrot.slane %v10253_v53, 9  ;;  %v4213_v19 = vrot.slane %v4211_v10, 5  ;;  %v10598_v1 = vrot.slane %v4601_v33, 5 }
 0x2da   :  { %3713 = vst.msk [vmem:[#allocation2 + $0x90] sm:$0xf] %vm3676_vm11, %v3557_v9  ;;  %v5222_v18 = vsel %vm8093_vm7, %v5220_v41, %v5221_v49  ;;  %6812 = vmatpush3.bf16.msra.mxu0 %v6898_v14  ;;  %6883 = vmatpush3.bf16.msra.mxu1 %v6898_v14  ;;  %v5339_v50 = vrot.slane %v5337_v39, 4  ;;  %v5338_v44 = vsel %vm8093_vm7, %v6691_v52, %v5337_v39  ;;  %v4245_v41 = vshrl.u32 %v10274_v38, 16 }
 0x2db   :  { %v3563_v31 = vpop.permute.xlu1 %3562  ;;  %3970 = vrot.lane.b32.xlu0 %v10458_v4, %s7093_s20  ;;  %6813 = vmatprep.subr.bf16.mxu0 %v6900_v22  ;;  %v5226_v40 = vsel %vm8093_vm7, %v6675_v60, %v5225_v61  ;;  %v10584_v4 = vld [vmem:[%s12004_s0 + $0x108] sm:$0xf]  ;;  %v10614_v61 = vld [vmem:[%s12004_s0 + $0x118] sm:$0xf]  ;;  %v10631_v60 = vld [vmem:[%s12004_s0 + $0x114] sm:$0xf] }
 0x2dc   :  { %3716 = vst.msk [vmem:[#allocation2 + $0x9c] sm:$0xf] %vm3676_vm11, %v3563_v31  ;;  %6881 = vmatprep.subr.bf16.mxu1 %v6900_v22  ;;  %v5341_v11 = vsel %vm8093_vm7, %v5339_v50, %v5340_v63  ;;  %v4247_v39 = vrot.slane %v4245_v41, 4 }
 0x2dd   :  { %4929 = vrot.lane.b32.xlu1 %v4182_v6, %s7094_s22  ;;  %v3561_v56 = vpop.permute.xlu0 %3560  ;;  %v5334_v6 = vsel %vm8093_vm7, %v5332_v47, %v5333_v5  ;;  %v4625_v5 = vshll.u32 %v10614_v61, 16 }
 0x2de   :  { %3715 = vst.msk [vmem:[#allocation2 + $0x98] sm:$0xf] %vm3676_vm11, %v3561_v56  ;;  %6814 = vmatpush3.bf16.msra.mxu0 %v6900_v22  ;;  %6884 = vmatpush3.bf16.msra.mxu1 %v6900_v22  ;;  %v4208_v56 = vshrl.u32 %v10269_v58, 16  ;;  %v4234_v22 = vrot.slane %v4232_v29, 4 }
 0x2df   :  { %v3567_v62 = vpop.permute.xlu1 %3566  ;;  %4927 = vrot.lane.b32.xlu0 %v4172_v8, %s7094_s22  ;;  %v10641_v17 = vrot.slane %v4625_v5, 5 }
 0x2e0   :  { %3718 = vst.msk [vmem:[#allocation2 + $0xa4] sm:$0xf] %vm3676_vm11, %v3567_v62  ;;  %v4605_v62 = vshrl.u32 %v10568_v32, 16  ;;  %v4210_v7 = vrot.slane %v4208_v56, 4 }
 0x2e1   :  { %4993 = vrot.lane.b32.xlu1 %v4566_v27, %s7094_s22  ;;  %v3565_v51 = vpop.permute.xlu0 %3564  ;;  %v5229_v27 = vsel %vm8093_vm7, %v5227_v24, %v5228_v20 }
 0x2e2   :  { %3717 = vst.msk [vmem:[#allocation2 + $0xa0] sm:$0xf] %vm3676_vm11, %v3565_v51 }
 0x2e3   :  { %v3571_v13 = vpop.permute.xlu1 %3570  ;;  %4991 = vrot.lane.b32.xlu0 %v4556_v15, %s7094_s22  ;;  %v10576_v15 = vrot.slane %v4217_v12, 5  ;;  %v10636_v12 = vld [vmem:[%s12004_s0 + $0x44] sm:$0x1] }
 0x2e4   :  { %3720 = vst.msk [vmem:[#allocation2 + $0xac] sm:$0xf] %vm3676_vm11, %v3571_v13  ;;  %v4241_v13 = vshll.u32 %v10274_v38, 16 }
 0x2e5   :  { %4933 = vrot.lane.b32.xlu1 %v4206_v46, %s7094_s22  ;;  %v3569_v3 = vpop.permute.xlu0 %3568  ;;  %v10589_v46 = vld [vmem:[%s12004_s0 + $0x38] sm:$0x1]  ;;  %v4224_v35 = vor.u32 %v4223_v45, %v10576_v15 }
 0x2e6   :  { %3719 = vst.msk [vmem:[#allocation2 + $0xa8] sm:$0xf] %vm3676_vm11, %v3569_v3  ;;  %v4607_v3 = vrot.slane %v4605_v62, 4  ;;  %v4251_v62 = vshll.u32 %v10636_v12, 16 }
 0x2e7   :  { %v3575_v59 = vpop.permute.xlu1 %3574  ;;  %4931 = vrot.lane.b32.xlu0 %v4196_v2, %s7094_s22  ;;  %v4592_v2 = vshrl.u32 %v10584_v4, 16  ;;  %v4225_v24 = vrot.slane %v4224_v35, 4 }
 0x2e8   :  { %3722 = vst.msk [vmem:[#allocation2 + $0xb4] sm:$0xf] %vm3676_vm11, %v3575_v59  ;;  %v4227_v59 = vshll.u32 %v10589_v46, 16  ;;  %v4608_v37 = vor.u32 %v4607_v3, %v10598_v1 }
 0x2e9   :  { %4997 = vrot.lane.b32.xlu1 %v4590_v43, %s7094_s22  ;;  %v3573_v48 = vpop.permute.xlu0 %3572  ;;  %v4595_v43 = vshll.u32 %v10584_v4, 16  ;;  %v4594_v47 = vrot.slane %v4592_v2, 4 }
 0x2ea   :  { %3721 = vst.msk [vmem:[#allocation2 + $0xb0] sm:$0xf] %vm3676_vm11, %v3573_v48  ;;  %v10616_v48 = vrot.slane %v4241_v13, 5  ;;  %v4229_v20 = vrot.slane %v4227_v59, 5  ;;  %v4609_v63 = vrot.slane %v4608_v37, 4  ;;  %v5344_v37 = vrot.slane %v10568_v32, 5 }
 0x2eb   :  { %v3579_v9 = vpop.permute.xlu1 %3578  ;;  %4995 = vrot.lane.b32.xlu0 %v4580_v57, %s7094_s22  ;;  %v4597_v14 = vrot.slane %v4595_v43, 5  ;;  %v4253_v43 = vrot.slane %v4251_v62, 5 }
 0x2ec   :  { %3724 = vst.msk [vmem:[#allocation2 + $0xbc] sm:$0xf] %vm3676_vm11, %v3579_v9  ;;  %v4214_v9 = vor.u32 %v4213_v19, %v4210_v7  ;;  %v4248_v33 = vor.u32 %v4247_v39, %v10616_v48 }
 0x2ed   :  { %5442 = vrot.lane.b32.xlu1 %v5222_v18, %s7095_s21  ;;  %v3577_v25 = vpop.permute.xlu0 %3576  ;;  %v4235_v18 = vshll.u32 %v10285_v0, 16  ;;  %v4598_v56 = vor.u32 %v4597_v14, %v4594_v47 }
 0x2ee   :  { %3723 = vst.msk [vmem:[#allocation2 + $0xb8] sm:$0xf] %vm3676_vm11, %v3577_v25  ;;  %v4215_v50 = vrot.slane %v4214_v9, 4  ;;  %v4249_v3 = vrot.slane %v4248_v33, 4 }
 0x2ef   :  { %v3583_v31 = vpop.permute.xlu1 %3582  ;;  %5440 = vrot.lane.b32.xlu0 %v5219_v54, %s7095_s21  ;;  %v4611_v54 = vshll.u32 %v10607_v26, 16  ;;  %v4599_v13 = vrot.slane %v4598_v56, 4  ;;  %v4265_v56 = vshll.u32 %v10290_v28, 16 }
 0x2f0   :  { %3726 = vst.msk [vmem:[#allocation2 + $0xc4] sm:$0xf] %vm3676_vm11, %v3583_v31  ;;  %v4220_v7 = vsel %vm7167_vm3, %v4215_v50, %v10576_v15  ;;  %v4254_v47 = vsel %vm7167_vm3, %v4249_v3, %v4253_v43  ;;  %v10753_v43 = vld [vmem:[%s12004_s0 + $0x50] sm:$0x1] }
 0x2f1   :  { %5506 = vrot.lane.b32.xlu1 %v5334_v6, %s7095_s21  ;;  %v3581_v8 = vpop.permute.xlu0 %3580  ;;  %v4629_v6 = vshrl.u32 %v10614_v61, 16  ;;  %v4604_v15 = vsel %vm7167_vm3, %v4599_v13, %v10598_v1 }
 0x2f2   :  { %3725 = vst.msk [vmem:[#allocation2 + $0xc0] sm:$0xf] %vm3676_vm11, %v3581_v8  ;;  %v4616_v8 = vshrl.u32 %v10631_v60, 16 }
 0x2f3   :  { %v3587_v53 = vpop.permute.xlu1 %3586  ;;  %5504 = vrot.lane.b32.xlu0 %v5331_v21, %s7095_s21  ;;  %v4237_v21 = vrot.slane %v4235_v18, 5  ;;  %v4631_v52 = vrot.slane %v4629_v6, 4  ;;  %v5235_v6 = vrot.slane %v10589_v46, 5 }
 0x2f4   :  { %3728 = vst.msk [vmem:[#allocation2 + $0xcc] sm:$0xf] %vm3676_vm11, %v3587_v53  ;;  %v4613_v53 = vrot.slane %v4611_v54, 5 }
 0x2f5   :  { %5446 = vrot.lane.b32.xlu1 %v5229_v27, %s7095_s21  ;;  %v3585_v30 = vpop.permute.xlu0 %3584  ;;  %v4619_v27 = vshll.u32 %v10631_v60, 16  ;;  %v4238_v2 = vor.u32 %v4237_v21, %v4234_v22  ;;  %v4632_v41 = vor.u32 %v4631_v52, %v10641_v17  ;;  %v5347_v21 = vrot.slane %v10607_v26, 5 }
 0x2f6   :  { %3727 = vst.msk [vmem:[#allocation2 + $0xc8] sm:$0xf] %vm3676_vm11, %v3585_v30  ;;  %v10655_v30 = vld [vmem:[%s12004_s0 + $0x11c] sm:$0x1]  ;;  %v4614_v19 = vsel %vm7167_vm3, %v4609_v63, %v4613_v53  ;;  %v5242_v63 = vrot.slane %v10636_v12, 5 }
 0x2f7   :  { %v3591_v51 = vpop.permute.xlu1 %3590  ;;  %5444 = vrot.lane.b32.xlu0 %v5226_v40, %s7095_s21  ;;  %v4230_v40 = vsel %vm7167_vm3, %v4225_v24, %v4229_v20  ;;  %v4239_v59 = vrot.slane %v4238_v2, 4  ;;  %v4633_v5 = vrot.slane %v4632_v41, 4  ;;  %v5239_v20 = vrot.slane %v10274_v38, 5 }
 0x2f8   :  { %3730 = vst.msk [vmem:[#allocation2 + $0xd4] sm:$0xf] %vm3676_vm11, %v3591_v51  ;;  %v4621_v51 = vrot.slane %v4619_v27, 5  ;;  %v5354_v33 = vrot.slane %v10655_v30, 5 }
 0x2f9   :  { %5510 = vrot.lane.b32.xlu1 %v5341_v11, %s7095_s21  ;;  %v3589_v49 = vpop.permute.xlu0 %3588  ;;  %v4618_v11 = vrot.slane %v4616_v8, 4  ;;  %v4244_v1 = vsel %vm7167_vm3, %v4239_v59, %v10616_v48  ;;  %v6676_v48 = vrot.slane %v10269_v58, 9  ;;  %v6692_v58 = vrot.slane %v10584_v4, 9 }
 0x2fa   :  { %3729 = vst.msk [vmem:[#allocation2 + $0xd0] sm:$0xf] %vm3676_vm11, %v3589_v49  ;;  %v4635_v49 = vshll.u32 %v10655_v30, 16  ;;  %v5241_v50 = vrot.slane %v5239_v20, 4 }
 0x2fb   :  { %v3595_v57 = vpop.permute.xlu1 %3594  ;;  %5508 = vrot.lane.b32.xlu0 %v5338_v44, %s7095_s21  ;;  %v4622_v29 = vor.u32 %v4621_v51, %v4618_v11  ;;  %v10732_v11 = vld [vmem:[%s12004_s0 + $0x124] sm:$0xf]  ;;  %v6693_v51 = vrot.slane %v10631_v60, 9 }
 0x2fc   :  { %3732 = vst.msk [vmem:[#allocation2 + $0xdc] sm:$0xf] %vm3676_vm11, %v3595_v57  ;;  %v5232_v57 = vrot.slane %v10258_v42, 5  ;;  %v4637_v14 = vrot.slane %v4635_v49, 5  ;;  %v5243_v12 = vsel %vm8093_vm7, %v5241_v50, %v5242_v63 }
 0x2fd   :  { %3976 = vrot.lane.b32.xlu1 %v10568_v32, %s7093_s20  ;;  %v3593_v25 = vpop.permute.xlu0 %3592  ;;  %v4623_v42 = vrot.slane %v4622_v29, 4 }
 0x2fe   :  { %3731 = vst.msk [vmem:[#allocation2 + $0xd8] sm:$0xf] %vm3676_vm11, %v3593_v25  ;;  %v4638_v39 = vsel %vm7167_vm3, %v4633_v5, %v4637_v14  ;;  %v5234_v25 = vrot.slane %v5232_v57, 4  ;;  %v5233_v38 = vsel %vm8093_vm7, %v6676_v48, %v5232_v57 }
 0x2ff   :  { %v3599_v31 = vpop.permute.xlu1 %3598  ;;  %3974 = vrot.lane.b32.xlu0 %v10584_v4, %s7093_s20  ;;  %v4628_v32 = vsel %vm7167_vm3, %v4623_v42, %v10641_v17  ;;  %v5351_v17 = vrot.slane %v10614_v61, 5  ;;  %v6677_v4 = vrot.slane %v10285_v0, 9  ;;  %v4256_v0 = vshrl.u32 %v10301_v55, 16 }
 0x300   :  { %3734 = vst.msk [vmem:[#allocation2 + $0xe4] sm:$0xf] %vm3676_vm11, %v3599_v31  ;;  %v5236_v46 = vsel %vm8093_vm7, %v5234_v25, %v5235_v6  ;;  %v5346_v31 = vrot.slane %v5344_v37, 4  ;;  %v4280_v42 = vshrl.u32 %v10317_v16, 16 }
 0x301   :  { %3980 = vrot.lane.b32.xlu1 %v10614_v61, %s7093_s20  ;;  %v3597_v10 = vpop.permute.xlu0 %3596  ;;  %v5345_v61 = vsel %vm8093_vm7, %v6692_v58, %v5344_v37  ;;  %v5240_v30 = vsel %vm8093_vm7, %v6677_v4, %v5239_v20  ;;  %v4258_v41 = vrot.slane %v4256_v0, 4  ;;  %v5352_v59 = vsel %vm8093_vm7, %v6693_v51, %v5351_v17  ;;  %v10819_v0 = vld [vmem:[%s12004_s0 + $0x134] sm:$0x1] }
 0x302   :  { %3733 = vst.msk [vmem:[#allocation2 + $0xe0] sm:$0xf] %vm3676_vm11, %v3597_v10  ;;  %v5348_v26 = vsel %vm8093_vm7, %v5346_v31, %v5347_v21  ;;  %v4269_v10 = vshrl.u32 %v10290_v28, 16 }
 0x303   :  { %v3603_v45 = vpop.permute.xlu1 %3602  ;;  %3978 = vrot.lane.b32.xlu0 %v10631_v60, %s7093_s20  ;;  %v10748_v60 = vld [vmem:[%s12004_s0 + $0x120] sm:$0xf] }
 0x304   :  { %3736 = vst.msk [vmem:[#allocation2 + $0xec] sm:$0xf] %vm3676_vm11, %v3603_v45  ;;  %v4259_v45 = vshll.u32 %v10301_v55, 16  ;;  %v4653_v55 = vshrl.u32 %v10732_v11, 16  ;;  %v4271_v13 = vrot.slane %v4269_v10, 4 }
 0x305   :  { %4937 = vrot.lane.b32.xlu1 %v4230_v40, %s7094_s22  ;;  %v3601_v44 = vpop.permute.xlu0 %3600  ;;  %v5353_v40 = vrot.slane %v5351_v17, 4  ;;  %v10800_v17 = vld [vmem:[%s12004_s0 + $0x5c] sm:$0x1] }
 0x306   :  { %3735 = vst.msk [vmem:[#allocation2 + $0xe8] sm:$0xf] %vm3676_vm11, %v3601_v44  ;;  %v4261_v49 = vrot.slane %v4259_v45, 5  ;;  %v4655_v57 = vrot.slane %v4653_v55, 4 }
 0x307   :  { %v3607_v35 = vpop.permute.xlu1 %3606  ;;  %4935 = vrot.lane.b32.xlu0 %v4220_v7, %s7094_s22  ;;  %v4649_v7 = vshll.u32 %v10732_v11, 16  ;;  %v5355_v44 = vsel %vm8093_vm7, %v5353_v40, %v5354_v33  ;;  %v4299_v33 = vshll.u32 %v10800_v17, 16 }
 0x308   :  { %3738 = vst.msk [vmem:[#allocation2 + $0xf4] sm:$0xf] %vm3676_vm11, %v3607_v35  ;;  %v4289_v35 = vshll.u32 %v10306_v34, 16  ;;  %v4262_v48 = vor.u32 %v4261_v49, %v4258_v41  ;;  %v4683_v49 = vshll.u32 %v10819_v0, 16 }
 0x309   :  { %5001 = vrot.lane.b32.xlu1 %v4614_v19, %s7094_s22  ;;  %v3605_v18 = vpop.permute.xlu0 %3604  ;;  %v10740_v19 = vrot.slane %v4265_v56, 5  ;;  %v10762_v29 = vrot.slane %v4649_v7, 5 }
 0x30a   :  { %3737 = vst.msk [vmem:[#allocation2 + $0xf0] sm:$0xf] %vm3676_vm11, %v3605_v18  ;;  %v4643_v18 = vshll.u32 %v10748_v60, 16 }
 0x30b   :  { %v3611_v9 = vpop.permute.xlu1 %3610  ;;  %4999 = vrot.lane.b32.xlu0 %v4604_v15, %s7094_s22  ;;  %v4640_v15 = vshrl.u32 %v10748_v60, 16  ;;  %v4272_v14 = vor.u32 %v4271_v13, %v10740_v19 }
 0x30c   :  { %3740 = vst.msk [vmem:[#allocation2 + $0xfc] sm:$0xf] %vm3676_vm11, %v3611_v9  ;;  %v4275_v9 = vshll.u32 %v10753_v43, 16 }
 0x30d   :  { %4941 = vrot.lane.b32.xlu1 %v4254_v47, %s7094_s22  ;;  %v3609_v54 = vpop.permute.xlu0 %3608  ;;  %v4293_v47 = vshrl.u32 %v10306_v34, 16  ;;  %v10780_v34 = vrot.slane %v4289_v35, 5  ;;  %v4642_v25 = vrot.slane %v4640_v15, 4  ;;  %v4273_v31 = vrot.slane %v4272_v14, 4 }
 0x30e   :  { %3739 = vst.msk [vmem:[#allocation2 + $0xf8] sm:$0xf] %vm3676_vm11, %v3609_v54  ;;  %v10778_v54 = vld [vmem:[%s12004_s0 + $0x130] sm:$0xf]  ;;  %v4277_v21 = vrot.slane %v4275_v9, 5  ;;  %v4685_v14 = vrot.slane %v4683_v49, 5 }
 0x30f   :  { %v3905_v24 = vpop.permute.xlu1 %3904  ;;  %4939 = vrot.lane.b32.xlu0 %v4244_v1, %s7094_s22  ;;  %v10771_v1 = vld [vmem:[%s12004_s0 + $0x128] sm:$0x1]  ;;  %v4673_v6 = vshll.u32 %v10778_v54, 16 }
 0x310   :  { %4096 = vst.msk [vmem:[#allocation2 + $0x4] sm:$0xf] %vm4094_vm13, %v3905_v24  ;;  %v4645_v24 = vrot.slane %v4643_v18, 5  ;;  %v4659_v20 = vshll.u32 %v10771_v1, 16  ;;  %v10933_v49 = vld [vmem:[%s12004_s0 + $0x68] sm:$0x1] }
 0x311   :  { %5005 = vrot.lane.b32.xlu1 %v4638_v39, %s7094_s22  ;;  %v3903_v22 = vpop.permute.xlu0 %3902  ;;  %v4283_v39 = vshll.u32 %v10317_v16, 16  ;;  %v4677_v16 = vshrl.u32 %v10778_v54, 16 }
 0x312   :  { %4095 = vst.msk [vmem:[#allocation2] sm:$0xf] %vm4094_vm13, %v3903_v22  ;;  %v4295_v22 = vrot.slane %v4293_v47, 4  ;;  %v4661_v56 = vrot.slane %v4659_v20, 5 }
 0x313   :  { %v3909_v8 = vpop.permute.xlu1 %3908  ;;  %5003 = vrot.lane.b32.xlu0 %v4628_v32, %s7094_s22  ;;  %v4656_v32 = vor.u32 %v4655_v57, %v10762_v29  ;;  %v5246_v57 = vrot.slane %v10290_v28, 5 }
 0x314   :  { %4098 = vst.msk [vmem:[#allocation2 + $0xc] sm:$0xf] %vm4094_vm13, %v3909_v8  ;;  %v4282_v8 = vrot.slane %v4280_v42, 4  ;;  %v4296_v40 = vor.u32 %v4295_v22, %v10780_v34  ;;  %v5358_v42 = vrot.slane %v10732_v11, 5 }
 0x315   :  { %5450 = vrot.lane.b32.xlu1 %v5236_v46, %s7095_s21  ;;  %v3907_v27 = vpop.permute.xlu0 %3906  ;;  %v4657_v4 = vrot.slane %v4656_v32, 4 }
 0x316   :  { %4097 = vst.msk [vmem:[#allocation2 + $0x8] sm:$0xf] %vm4094_vm13, %v3907_v27  ;;  %v4285_v27 = vrot.slane %v4283_v39, 5 }
 0x317   :  { %v3913_v53 = vpop.permute.xlu1 %3912  ;;  %5448 = vrot.lane.b32.xlu0 %v5233_v38, %s7095_s21  ;;  %v10795_v38 = vld [vmem:[%s12004_s0 + $0x12c] sm:$0xf]  ;;  %v4662_v7 = vsel %vm7167_vm3, %v4657_v4, %v4661_v56 }
 0x318   :  { %4100 = vst.msk [vmem:[#allocation2 + $0x14] sm:$0xf] %vm4094_vm13, %v3913_v53  ;;  %v4664_v50 = vshrl.u32 %v10795_v38, 16  ;;  %v4667_v63 = vshll.u32 %v10795_v38, 16  ;;  %v4263_v53 = vrot.slane %v4262_v48, 4  ;;  %v4286_v13 = vor.u32 %v4285_v27, %v4282_v8 }
 0x319   :  { %5514 = vrot.lane.b32.xlu1 %v5348_v26, %s7095_s21  ;;  %v3911_v52 = vpop.permute.xlu0 %3910  ;;  %v10805_v26 = vrot.slane %v4673_v6, 5  ;;  %v5249_v6 = vrot.slane %v10753_v43, 5  ;;  %v7048_v43 = vld [vmem:[%s12004_s0 + $0x58] sm:$0xf] }
 0x31a   :  { %4099 = vst.msk [vmem:[#allocation2 + $0x10] sm:$0xf] %vm4094_vm13, %v3911_v52  ;;  %v4679_v52 = vrot.slane %v4677_v16, 4  ;;  %v4666_v45 = vrot.slane %v4664_v50, 4  ;;  %v4669_v51 = vrot.slane %v4667_v63, 5  ;;  %v4287_v15 = vrot.slane %v4286_v13, 4 }
 0x31b   :  { %v3917_v62 = vpop.permute.xlu1 %3916  ;;  %5512 = vrot.lane.b32.xlu0 %v5345_v61, %s7095_s21  ;;  %v4646_v61 = vor.u32 %v4645_v24, %v4642_v25  ;;  %v5248_v25 = vrot.slane %v5246_v57, 4  ;;  %v5253_v32 = vrot.slane %v7048_v43, 5  ;;  %v5361_v16 = vrot.slane %v10771_v1, 5 }
 0x31c   :  { %4102 = vst.msk [vmem:[#allocation2 + $0x1c] sm:$0xf] %vm4094_vm13, %v3917_v62  ;;  %v4680_v41 = vor.u32 %v4679_v52, %v10805_v26  ;;  %v5256_v50 = vrot.slane %v10800_v17, 5 }
 0x31d   :  { %5454 = vrot.lane.b32.xlu1 %v5243_v12, %s7095_s21  ;;  %v3915_v2 = vpop.permute.xlu0 %3914  ;;  %v4278_v12 = vsel %vm7167_vm3, %v4273_v31, %v4277_v21  ;;  %v4647_v55 = vrot.slane %v4646_v61, 4  ;;  %v5250_v22 = vsel %vm8093_vm7, %v5248_v25, %v5249_v6  ;;  %v6694_v21 = vrot.slane %v10748_v60, 9 }
 0x31e   :  { %4101 = vst.msk [vmem:[#allocation2 + $0x18] sm:$0xf] %vm4094_vm13, %v3915_v2 }
 0x31f   :  { %v3921_v3 = vpop.permute.xlu1 %3920  ;;  %5452 = vrot.lane.b32.xlu0 %v5240_v30, %s7095_s21  ;;  %v4268_v30 = vsel %vm7167_vm3, %v4263_v53, %v10740_v19  ;;  %v4652_v19 = vsel %vm7167_vm3, %v4647_v55, %v10762_v29  ;;  %v4292_v29 = vsel %vm7167_vm3, %v4287_v15, %v10780_v34  ;;  %v7047_v34 = vld [vmem:[%s12004_s0 + $0x48] sm:$0xf]  ;;  %v5359_v17 = vsel %vm8093_vm7, %v6694_v21, %v5358_v42  ;;  %v10938_v15 = vld [vmem:[%s12004_s0 + $0x70] sm:$0xf] }
 0x320   :  { %4104 = vst.msk [vmem:[#allocation2 + $0x24] sm:$0xf] %vm4094_vm13, %v3921_v3  ;;  %v4301_v3 = vrot.slane %v4299_v33, 5  ;;  %v6678_v48 = vrot.slane %v7047_v34, 9  ;;  %v10903_v33 = vld [vmem:[%s12004_s0 + $0x60] sm:$0xf] }
 0x321   :  { %5518 = vrot.lane.b32.xlu1 %v5355_v44, %s7095_s21  ;;  %v3919_v5 = vpop.permute.xlu0 %3918  ;;  %v4297_v44 = vrot.slane %v4296_v40, 4  ;;  %v10969_v34 = vld [vmem:[%s12004_s0 + $0x148] sm:$0xf] }
 0x322   :  { %4103 = vst.msk [vmem:[#allocation2 + $0x20] sm:$0xf] %vm4094_vm13, %v3919_v5  ;;  %v4681_v5 = vrot.slane %v4680_v41, 4  ;;  %v5247_v8 = vsel %vm8093_vm7, %v6678_v48, %v5246_v57  ;;  %v4721_v43 = vshll.u32 %v10969_v34, 16  ;;  %v4725_v21 = vshrl.u32 %v10969_v34, 16 }
 0x323   :  { %v3925_v37 = vpop.permute.xlu1 %3924  ;;  %5516 = vrot.lane.b32.xlu0 %v5352_v59, %s7095_s21  ;;  %v4670_v59 = vor.u32 %v4669_v51, %v4666_v45  ;;  %v4302_v47 = vsel %vm7167_vm3, %v4297_v44, %v4301_v3  ;;  %v4307_v45 = vshll.u32 %v10903_v33, 16  ;;  %v6695_v51 = vrot.slane %v10795_v38, 9 }
 0x324   :  { %4106 = vst.msk [vmem:[#allocation2 + $0x2c] sm:$0xf] %vm4094_vm13, %v3925_v37  ;;  %v4686_v39 = vsel %vm7167_vm3, %v4681_v5, %v4685_v14 }
 0x325   :  { %3984 = vrot.lane.b32.xlu1 %v10732_v11, %s7093_s20  ;;  %v3923_v46 = vpop.permute.xlu0 %3922  ;;  %v4671_v28 = vrot.slane %v4670_v59, 4  ;;  %v4337_v59 = vshll.u32 %v10938_v15, 16 }
 0x326   :  { %4105 = vst.msk [vmem:[#allocation2 + $0x28] sm:$0xf] %vm4094_vm13, %v3923_v46  ;;  %v5360_v46 = vrot.slane %v5358_v42, 4  ;;  %v4323_v42 = vshll.u32 %v10933_v49, 16 }
 0x327   :  { %v3929_v58 = vpop.permute.xlu1 %3928  ;;  %3982 = vrot.lane.b32.xlu0 %v10748_v60, %s7093_s20  ;;  %v4676_v11 = vsel %vm7167_vm3, %v4671_v28, %v10805_v26  ;;  %v5255_v26 = vrot.slane %v5253_v32, 4  ;;  %v7049_v60 = vld [vmem:[%s12004_s0 + $0x54] sm:$0xf]  ;;  %v10971_v48 = vrot.slane %v4337_v59, 5 }
 0x328   :  { %4108 = vst.msk [vmem:[#allocation2 + $0x34] sm:$0xf] %vm4094_vm13, %v3929_v58  ;;  %v5365_v58 = vrot.slane %v10778_v54, 5  ;;  %v5362_v1 = vsel %vm8093_vm7, %v5360_v46, %v5361_v16  ;;  %v6679_v53 = vrot.slane %v7049_v60, 9  ;;  %v10995_v60 = vrot.slane %v4721_v43, 5 }
 0x329   :  { %3988 = vrot.lane.b32.xlu1 %v10778_v54, %s7093_s20  ;;  %v3927_v10 = vpop.permute.xlu0 %3926  ;;  %v10889_v54 = vld [vmem:[%s12004_s0 + $0x64] sm:$0xf] }
 0x32a   :  { %4107 = vst.msk [vmem:[#allocation2 + $0x30] sm:$0xf] %vm4094_vm13, %v3927_v10  ;;  %v4313_v4 = vshll.u32 %v10889_v54, 16  ;;  %v4317_v56 = vshrl.u32 %v10889_v54, 16  ;;  %v5257_v10 = vsel %vm8093_vm7, %v5255_v26, %v5256_v50  ;;  %v5367_v52 = vrot.slane %v5365_v58, 4 }
 0x32b   :  { %v3933_v62 = vpop.permute.xlu1 %3932  ;;  %3986 = vrot.lane.b32.xlu0 %v10795_v38, %s7093_s20  ;;  %v10928_v38 = vld [vmem:[%s12004_s0 + $0x138] sm:$0xf]  ;;  %v10985_v26 = vld [vmem:[%s12004_s0 + $0x144] sm:$0xf]  ;;  %v10990_v50 = vld [vmem:[%s12004_s0 + $0x74] sm:$0x1] }
 0x32c   :  { %4110 = vst.msk [vmem:[#allocation2 + $0x3c] sm:$0xf] %vm4094_vm13, %v3933_v62  ;;  %v4304_v62 = vshrl.u32 %v10903_v33, 16  ;;  %v10920_v13 = vrot.slane %v4313_v4, 5  ;;  %v4688_v57 = vshrl.u32 %v10928_v38, 16  ;;  %v4691_v14 = vshll.u32 %v10928_v38, 16 }
 0x32d   :  { %4945 = vrot.lane.b32.xlu1 %v4278_v12, %s7094_s22  ;;  %v3931_v2 = vpop.permute.xlu0 %3930  ;;  %v5368_v12 = vrot.slane %v10819_v0, 5  ;;  %v10912_v0 = vld [vmem:[%s12004_s0 + $0x13c] sm:$0xf]  ;;  %v4715_v4 = vshll.u32 %v10985_v26, 16 }
 0x32e   :  { %4109 = vst.msk [vmem:[#allocation2 + $0x38] sm:$0xf] %vm4094_vm13, %v3931_v2  ;;  %v4701_v55 = vshrl.u32 %v10912_v0, 16  ;;  %v4319_v2 = vrot.slane %v4317_v56, 4 }
 0x32f   :  { %v3937_v35 = vpop.permute.xlu1 %3936  ;;  %4943 = vrot.lane.b32.xlu0 %v4268_v30, %s7094_s22  ;;  %v5254_v30 = vsel %vm8093_vm7, %v6679_v53, %v5253_v32  ;;  %v5369_v3 = vsel %vm8093_vm7, %v5367_v52, %v5368_v12  ;;  %v4693_v32 = vrot.slane %v4691_v14, 5  ;;  %v4712_v53 = vshrl.u32 %v10985_v26, 16 }
 0x330   :  { %4112 = vst.msk [vmem:[#allocation2 + $0x44] sm:$0xf] %vm4094_vm13, %v3937_v35  ;;  %v4306_v35 = vrot.slane %v4304_v62, 4  ;;  %v4703_v5 = vrot.slane %v4701_v55, 4  ;;  %v4320_v28 = vor.u32 %v4319_v2, %v10920_v13  ;;  %v4727_v12 = vrot.slane %v4725_v21, 4 }
 0x331   :  { %5009 = vrot.lane.b32.xlu1 %v4662_v7, %s7094_s22  ;;  %v3935_v18 = vpop.permute.xlu0 %3934  ;;  %v4697_v7 = vshll.u32 %v10912_v0, 16  ;;  %v4717_v55 = vrot.slane %v4715_v4, 5 }
 0x332   :  { %4111 = vst.msk [vmem:[#allocation2 + $0x40] sm:$0xf] %vm4094_vm13, %v3935_v18  ;;  %v5366_v18 = vsel %vm8093_vm7, %v6695_v51, %v5365_v58  ;;  %v4325_v58 = vrot.slane %v4323_v42, 5 }
 0x333   :  { %v3941_v9 = vpop.permute.xlu1 %3940  ;;  %5007 = vrot.lane.b32.xlu0 %v4652_v19, %s7094_s22  ;;  %v4309_v19 = vrot.slane %v4307_v45, 5  ;;  %v4347_v45 = vshll.u32 %v10990_v50, 16 }
 0x334   :  { %4114 = vst.msk [vmem:[#allocation2 + $0x4c] sm:$0xf] %vm4094_vm13, %v3941_v9  ;;  %v4341_v9 = vshrl.u32 %v10938_v15, 16 }
 0x335   :  { %4949 = vrot.lane.b32.xlu1 %v4302_v47, %s7094_s22  ;;  %v3939_v37 = vpop.permute.xlu0 %3938  ;;  %v10947_v47 = vrot.slane %v4697_v7, 5  ;;  %v4714_v7 = vrot.slane %v4712_v53, 4  ;;  %v4349_v59 = vrot.slane %v4347_v45, 5 }
 0x336   :  { %4113 = vst.msk [vmem:[#allocation2 + $0x48] sm:$0xf] %vm4094_vm13, %v3939_v37  ;;  %v10956_v37 = vld [vmem:[%s12004_s0 + $0x140] sm:$0x1]  ;;  %v4343_v16 = vrot.slane %v4341_v9, 4 }
 0x337   :  { %v3945_v24 = vpop.permute.xlu1 %3944  ;;  %4947 = vrot.lane.b32.xlu0 %v4292_v29, %s7094_s22  ;;  %v4707_v46 = vshll.u32 %v10956_v37, 16  ;;  %v4718_v9 = vor.u32 %v4717_v55, %v4714_v7  ;;  %v6697_v7 = vrot.slane %v10985_v26, 9 }
 0x338   :  { %4116 = vst.msk [vmem:[#allocation2 + $0x54] sm:$0xf] %vm4094_vm13, %v3945_v24  ;;  %v4344_v62 = vor.u32 %v4343_v16, %v10971_v48  ;;  %v5267_v16 = vrot.slane %v10938_v15, 5 }
 0x339   :  { %5013 = vrot.lane.b32.xlu1 %v4686_v39, %s7094_s22  ;;  %v3943_v20 = vpop.permute.xlu0 %3942  ;;  %v10961_v39 = vld [vmem:[%s12004_s0 + $0x6c] sm:$0xf] }
 0x33a   :  { %4115 = vst.msk [vmem:[#allocation2 + $0x50] sm:$0xf] %vm4094_vm13, %v3943_v20  ;;  %v4328_v25 = vshrl.u32 %v10961_v39, 16  ;;  %v4331_v6 = vshll.u32 %v10961_v39, 16  ;;  %v4310_v20 = vor.u32 %v4309_v19, %v4306_v35  ;;  %v4345_v19 = vrot.slane %v4344_v62, 4 }
 0x33b   :  { %v3949_v31 = vpop.permute.xlu1 %3948  ;;  %5011 = vrot.lane.b32.xlu0 %v4676_v11, %s7094_s22  ;;  %v4690_v11 = vrot.slane %v4688_v57, 4  ;;  %v4728_v57 = vor.u32 %v4727_v12, %v10995_v60  ;;  %v6681_v4 = vrot.slane %v10961_v39, 9  ;;  %v11083_v39 = vld [vmem:[%s12004_s0 + $0x78] sm:$0xf] }
 0x33c   :  { %4118 = vst.msk [vmem:[#allocation2 + $0x5c] sm:$0xf] %vm4094_vm13, %v3949_v31  ;;  %v4350_v42 = vsel %vm7167_vm3, %v4345_v19, %v4349_v59  ;;  %v4355_v45 = vshll.u32 %v11083_v39, 16 }
 0x33d   :  { %5458 = vrot.lane.b32.xlu1 %v5250_v22, %s7095_s21  ;;  %v3947_v27 = vpop.permute.xlu0 %3946  ;;  %v4704_v22 = vor.u32 %v4703_v5, %v10947_v47 }
 0x33e   :  { %4117 = vst.msk [vmem:[#allocation2 + $0x58] sm:$0xf] %vm4094_vm13, %v3947_v27  ;;  %v4330_v27 = vrot.slane %v4328_v25, 4  ;;  %v4729_v25 = vrot.slane %v4728_v57, 4  ;;  %v11113_v57 = vld [vmem:[%s12004_s0 + $0x150] sm:$0xf] }
 0x33f   :  { %v3953_v63 = vpop.permute.xlu1 %3952  ;;  %5456 = vrot.lane.b32.xlu0 %v5247_v8, %s7095_s21  ;;  %v4321_v8 = vrot.slane %v4320_v28, 4  ;;  %v4705_v56 = vrot.slane %v4704_v22, 4  ;;  %v5263_v22 = vrot.slane %v10933_v49, 5 }
 0x340   :  { %4120 = vst.msk [vmem:[#allocation2 + $0x64] sm:$0xf] %vm4094_vm13, %v3953_v63  ;;  %v4333_v63 = vrot.slane %v4331_v6, 5 }
 0x341   :  { %5522 = vrot.lane.b32.xlu1 %v5362_v1, %s7095_s21  ;;  %v3951_v61 = vpop.permute.xlu0 %3950 }
 0x342   :  { %4119 = vst.msk [vmem:[#allocation2 + $0x60] sm:$0xf] %vm4094_vm13, %v3951_v61  ;;  %v4709_v61 = vrot.slane %v4707_v46, 5 }
 0x343   :  { %v3957_v40 = vpop.permute.xlu1 %3956  ;;  %5520 = vrot.lane.b32.xlu0 %v5359_v17, %s7095_s21  ;;  %v4311_v17 = vrot.slane %v4310_v20, 4 }
 0x344   :  { %4122 = vst.msk [vmem:[#allocation2 + $0x6c] sm:$0xf] %vm4094_vm13, %v3957_v40  ;;  %v4326_v40 = vsel %vm7167_vm3, %v4321_v8, %v4325_v58  ;;  %v5375_v8 = vrot.slane %v10956_v37, 5 }
 0x345   :  { %5462 = vrot.lane.b32.xlu1 %v5257_v10, %s7095_s21  ;;  %v3955_v44 = vpop.permute.xlu0 %3954  ;;  %v4694_v10 = vor.u32 %v4693_v32, %v4690_v11  ;;  %v4316_v2 = vsel %vm7167_vm3, %v4311_v17, %v10920_v13  ;;  %v5372_v11 = vrot.slane %v10912_v0, 5 }
 0x346   :  { %4121 = vst.msk [vmem:[#allocation2 + $0x68] sm:$0xf] %vm4094_vm13, %v3955_v44  ;;  %v4710_v44 = vsel %vm7167_vm3, %v4705_v56, %v4709_v61  ;;  %v4352_v56 = vshrl.u32 %v11083_v39, 16 }
 0x347   :  { %v3969_v41 = vpop.permute.xlu1 %3968  ;;  %5460 = vrot.lane.b32.xlu0 %v5254_v30, %s7095_s21  ;;  %v11009_v30 = vld [vmem:[%s12004_s0 + $0x14c] sm:$0x1]  ;;  %v5374_v21 = vrot.slane %v5372_v11, 4 }
 0x348   :  { %4128 = vst.msk [vmem:[#allocation2 + $0x84] sm:$0xf] %vm4094_vm13, %v3969_v41  ;;  %v4334_v41 = vor.u32 %v4333_v63, %v4330_v27  ;;  %v5379_v27 = vrot.slane %v10969_v34, 5  ;;  %v5269_v63 = vrot.slane %v5267_v16, 4 }
 0x349   :  { %5526 = vrot.lane.b32.xlu1 %v5369_v3, %s7095_s21  ;;  %v3967_v29 = vpop.permute.xlu0 %3966  ;;  %v4695_v3 = vrot.slane %v4694_v10, 4  ;;  %v5376_v37 = vsel %vm8093_vm7, %v5374_v21, %v5375_v8 }
 0x34a   :  { %4127 = vst.msk [vmem:[#allocation2 + $0x80] sm:$0xf] %vm4094_vm13, %v3967_v29  ;;  %v4335_v14 = vrot.slane %v4334_v41, 4  ;;  %v5260_v29 = vrot.slane %v10889_v54, 5  ;;  %v4719_v54 = vrot.slane %v4718_v9, 4  ;;  %v5381_v12 = vrot.slane %v5379_v27, 4 }
 0x34b   :  { %v3973_v24 = vpop.permute.xlu1 %3972  ;;  %5524 = vrot.lane.b32.xlu0 %v5366_v18, %s7095_s21  ;;  %v4731_v18 = vshll.u32 %v11009_v30, 16  ;;  %v4700_v13 = vsel %vm7167_vm3, %v4695_v3, %v10947_v47  ;;  %v4354_v41 = vrot.slane %v4352_v56, 4 }
 0x34c   :  { %4130 = vst.msk [vmem:[#allocation2 + $0x8c] sm:$0xf] %vm4094_vm13, %v3973_v24  ;;  %v4340_v47 = vsel %vm7167_vm3, %v4335_v14, %v10971_v48  ;;  %v5262_v20 = vrot.slane %v5260_v29, 4  ;;  %v6680_v48 = vrot.slane %v10903_v33, 9  ;;  %v6696_v33 = vrot.slane %v10928_v38, 9 }
 0x34d   :  { %3992 = vrot.lane.b32.xlu1 %v10912_v0, %s7093_s20  ;;  %v3971_v31 = vpop.permute.xlu0 %3970  ;;  %v4733_v6 = vrot.slane %v4731_v18, 5  ;;  %v4724_v0 = vsel %vm7167_vm3, %v4719_v54, %v10995_v60  ;;  %v5270_v60 = vrot.slane %v10990_v50, 5  ;;  %v11118_v18 = vld [vmem:[%s12004_s0 + $0x80] sm:$0x1] }
 0x34e   :  { %4129 = vst.msk [vmem:[#allocation2 + $0x88] sm:$0xf] %vm4094_vm13, %v3971_v31  ;;  %v5264_v49 = vsel %vm8093_vm7, %v5262_v20, %v5263_v22  ;;  %v5261_v15 = vsel %vm8093_vm7, %v6680_v48, %v5260_v29  ;;  %v5373_v50 = vsel %vm8093_vm7, %v6696_v33, %v5372_v11  ;;  %v4736_v29 = vshrl.u32 %v11113_v57, 16  ;;  %v11155_v48 = vld [vmem:[%s12004_s0 + $0x160] sm:$0xf] }
 0x34f   :  { %v4930_v1 = vpop.permute.xlu1 %4929  ;;  %3990 = vrot.lane.b32.xlu0 %v10928_v38, %s7093_s20  ;;  %v4734_v32 = vsel %vm7167_vm3, %v4729_v25, %v4733_v6  ;;  %v11073_v38 = vld [vmem:[%s12004_s0 + $0x7c] sm:$0xf]  ;;  %v4739_v6 = vshll.u32 %v11113_v57, 16  ;;  %v4371_v11 = vshll.u32 %v11118_v18, 16 }
 0x350   :  { %5121 = vst.msk [vmem:[#allocation2 + $0x4] sm:$0xf] %vm5119_vm14, %v4930_v1  ;;  %v4365_v17 = vshrl.u32 %v11073_v38, 16 }
 0x351   :  { %3996 = vrot.lane.b32.xlu1 %v10969_v34, %s7093_s20  ;;  %v4928_v52 = vpop.permute.xlu0 %4927  ;;  %v4361_v34 = vshll.u32 %v11073_v38, 16  ;;  %v4741_v21 = vrot.slane %v4739_v6, 5 }
 0x352   :  { %5120 = vst.msk [vmem:[#allocation2] sm:$0xf] %vm5119_vm14, %v4928_v52  ;;  %v5271_v52 = vsel %vm8093_vm7, %v5269_v63, %v5270_v60  ;;  %v4367_v3 = vrot.slane %v4365_v17, 4  ;;  %v4373_v63 = vrot.slane %v4371_v11, 5 }
 0x353   :  { %v4994_v51 = vpop.permute.xlu1 %4993  ;;  %3994 = vrot.lane.b32.xlu0 %v10985_v26, %s7093_s20 }
 0x354   :  { %5153 = vst.msk [vmem:[#allocation2 + $0x84] sm:$0xf] %vm5119_vm14, %v4994_v51  ;;  %v11097_v51 = vld [vmem:[%s12004_s0 + $0x154] sm:$0xf] }
 0x355   :  { %4953 = vrot.lane.b32.xlu1 %v4326_v40, %s7094_s22  ;;  %v4992_v35 = vpop.permute.xlu0 %4991  ;;  %v5382_v40 = vrot.slane %v11009_v30, 5  ;;  %v5268_v30 = vsel %vm8093_vm7, %v6681_v4, %v5267_v16  ;;  %v4745_v55 = vshll.u32 %v11097_v51, 16  ;;  %v11172_v4 = vld [vmem:[%s12004_s0 + $0x15c] sm:$0xf] }
 0x356   :  { %5152 = vst.msk [vmem:[#allocation2 + $0x80] sm:$0xf] %vm5119_vm14, %v4992_v35  ;;  %v4760_v56 = vshrl.u32 %v11172_v4, 16 }
 0x357   :  { %v4934_v5 = vpop.permute.xlu1 %4933  ;;  %4951 = vrot.lane.b32.xlu0 %v4316_v2, %s7094_s22  ;;  %v4749_v2 = vshrl.u32 %v11097_v51, 16  ;;  %v5383_v59 = vsel %vm8093_vm7, %v5381_v12, %v5382_v40 }
 0x358   :  { %5123 = vst.msk [vmem:[#allocation2 + $0xc] sm:$0xf] %vm5119_vm14, %v4934_v5  ;;  %v4357_v5 = vrot.slane %v4355_v45, 5 }
 0x359   :  { %5017 = vrot.lane.b32.xlu1 %v4710_v44, %s7094_s22  ;;  %v4932_v28 = vpop.permute.xlu0 %4931  ;;  %v11105_v44 = vrot.slane %v4361_v34, 5  ;;  %v4751_v25 = vrot.slane %v4749_v2, 4  ;;  %v11177_v34 = vld [vmem:[%s12004_s0 + $0x8c] sm:$0x1] }
 0x35a   :  { %5122 = vst.msk [vmem:[#allocation2 + $0x8] sm:$0xf] %vm5119_vm14, %v4932_v28  ;;  %v5380_v28 = vsel %vm8093_vm7, %v6697_v7, %v5379_v27  ;;  %v4358_v8 = vor.u32 %v4357_v5, %v4354_v41  ;;  %v4762_v41 = vrot.slane %v4760_v56, 4 }
 0x35b   :  { %v4998_v24 = vpop.permute.xlu1 %4997  ;;  %5015 = vrot.lane.b32.xlu0 %v4700_v13, %s7094_s22  ;;  %v11123_v13 = vld [vmem:[%s12004_s0 + $0x88] sm:$0xf]  ;;  %v4368_v54 = vor.u32 %v4367_v3, %v11105_v44  ;;  %v11197_v3 = vld [vmem:[%s12004_s0 + $0x164] sm:$0x1] }
 0x35c   :  { %5155 = vst.msk [vmem:[#allocation2 + $0x8c] sm:$0xf] %vm5119_vm14, %v4998_v24  ;;  %v4385_v14 = vshll.u32 %v11123_v13, 16  ;;  %v4389_v9 = vshrl.u32 %v11123_v13, 16 }
 0x35d   :  { %4957 = vrot.lane.b32.xlu1 %v4350_v42, %s7094_s22  ;;  %v4996_v43 = vpop.permute.xlu0 %4995  ;;  %v11134_v42 = vrot.slane %v4745_v55, 5  ;;  %v4395_v55 = vshll.u32 %v11177_v34, 16 }
 0x35e   :  { %5154 = vst.msk [vmem:[#allocation2 + $0x88] sm:$0xf] %vm5119_vm14, %v4996_v43  ;;  %v11142_v43 = vld [vmem:[%s12004_s0 + $0x158] sm:$0x1]  ;;  %v4391_v16 = vrot.slane %v4389_v9, 4 }
 0x35f   :  { %v5443_v46 = vpop.permute.xlu1 %5442  ;;  %4955 = vrot.lane.b32.xlu0 %v4340_v47, %s7094_s22  ;;  %v4755_v33 = vshll.u32 %v11142_v43, 16 }
 0x360   :  { %5634 = vst.msk [vmem:[#allocation2 + $0x4] sm:$0xf] %vm5632_vm15, %v5443_v46 }
 0x361   :  { %5021 = vrot.lane.b32.xlu1 %v4734_v32, %s7094_s22  ;;  %v5441_v31 = vpop.permute.xlu0 %5440  ;;  %v11147_v32 = vld [vmem:[%s12004_s0 + $0x84] sm:$0xf]  ;;  %v4757_v12 = vrot.slane %v4755_v33, 5 }
 0x362   :  { %5633 = vst.msk [vmem:[#allocation2] sm:$0xf] %vm5632_vm15, %v5441_v31  ;;  %v4376_v20 = vshrl.u32 %v11147_v32, 16  ;;  %v4379_v22 = vshll.u32 %v11147_v32, 16  ;;  %v4738_v31 = vrot.slane %v4736_v29, 4  ;;  %v4397_v29 = vrot.slane %v4395_v55, 5 }
 0x363   :  { %v5507_v58 = vpop.permute.xlu1 %5506  ;;  %5019 = vrot.lane.b32.xlu0 %v4724_v0, %s7094_s22  ;;  %v11157_v0 = vrot.slane %v4385_v14, 5 }
 0x364   :  { %5666 = vst.msk [vmem:[#allocation2 + $0x84] sm:$0xf] %vm5632_vm15, %v5507_v58  ;;  %v4752_v58 = vor.u32 %v4751_v25, %v11134_v42  ;;  %v4378_v60 = vrot.slane %v4376_v20, 4  ;;  %v4381_v17 = vrot.slane %v4379_v22, 5  ;;  %v4742_v40 = vor.u32 %v4741_v21, %v4738_v31 }
 0x365   :  { %5466 = vrot.lane.b32.xlu1 %v5264_v49, %s7095_s21  ;;  %v5505_v1 = vpop.permute.xlu0 %5504  ;;  %v4769_v49 = vshll.u32 %v11155_v48, 16  ;;  %v4779_v25 = vshll.u32 %v11197_v3, 16  ;;  %v5386_v31 = vrot.slane %v11097_v51, 5 }
 0x366   :  { %5665 = vst.msk [vmem:[#allocation2 + $0x80] sm:$0xf] %vm5632_vm15, %v5505_v1  ;;  %v4773_v1 = vshrl.u32 %v11155_v48, 16  ;;  %v4382_v5 = vor.u32 %v4381_v17, %v4378_v60  ;;  %v5393_v60 = vrot.slane %v11155_v48, 5 }
 0x367   :  { %v5447_v53 = vpop.permute.xlu1 %5446  ;;  %5464 = vrot.lane.b32.xlu0 %v5261_v15, %s7095_s21 }
 0x368   :  { %5636 = vst.msk [vmem:[#allocation2 + $0xc] sm:$0xf] %vm5632_vm15, %v5447_v53  ;;  %v4775_v45 = vrot.slane %v4773_v1, 4  ;;  %v5388_v1 = vrot.slane %v5386_v31, 4 }
 0x369   :  { %5530 = vrot.lane.b32.xlu1 %v5376_v37, %s7095_s21  ;;  %v5445_v61 = vpop.permute.xlu0 %5444  ;;  %v6899_v10 = vld [vmem:[#allocation2] sm:$0xff]   ;;  %v4369_v37 = vrot.slane %v4368_v54, 4  ;;  %v5274_v54 = vrot.slane %v11073_v38, 5 }
 0x36a   :  { %5635 = vst.msk [vmem:[#allocation2 + $0x8] sm:$0xf] %vm5632_vm15, %v5445_v61  ;;  %6815 = vmatprep.mubr.msk.bf16.mxu0 %vm5948_vm0, %v6899_v10  ;;  %v4763_v61 = vshll.u32 %v11172_v4, 16  ;;  %v4359_v10 = vrot.slane %v4358_v8, 4 }
 0x36b   :  { %v5511_v62 = vpop.permute.xlu1 %5510  ;;  %5528 = vrot.lane.b32.xlu0 %v5373_v50, %s7095_s21  ;;  %v11183_v50 = vrot.slane %v4769_v49, 5  ;;  %v4374_v7 = vsel %vm7167_vm3, %v4369_v37, %v4373_v63  ;;  %v5276_v8 = vrot.slane %v5274_v54, 4  ;;  %v5389_v37 = vrot.slane %v11142_v43, 5 }
 0x36c   :  { %5668 = vst.msk [vmem:[#allocation2 + $0x8c] sm:$0xf] %vm5632_vm15, %v5511_v62 }
 0x36d   :  { %5470 = vrot.lane.b32.xlu1 %v5271_v52, %s7095_s21  ;;  %v5509_v35 = vpop.permute.xlu0 %5508  ;;  %v6901_v19 = vld [vmem:[#allocation2 + $0x80] sm:$0xff]   ;;  %v4753_v52 = vrot.slane %v4752_v58, 4  ;;  %v5277_v58 = vrot.slane %v11118_v18, 5  ;;  %v5390_v43 = vsel %vm8093_vm7, %v5388_v1, %v5389_v37 }
 0x36e   :  { %5667 = vst.msk [vmem:[#allocation2 + $0x88] sm:$0xf] %vm5632_vm15, %v5509_v35  ;;  %6847 = vmatprep.mubr.msk.bf16.mxu1 %vm5948_vm0, %v6901_v19  ;;  %v4765_v35 = vrot.slane %v4763_v61, 5  ;;  %v4364_v19 = vsel %vm7167_vm3, %v4359_v10, %v11105_v44 }
 0x36f   :  { %v3977_v26 = vpop.permute.xlu1 %3976  ;;  %5468 = vrot.lane.b32.xlu0 %v5268_v30, %s7095_s21  ;;  %v4392_v30 = vor.u32 %v4391_v16, %v11157_v0  ;;  %v5278_v18 = vsel %vm8093_vm7, %v5276_v8, %v5277_v58 }
 0x370   :  { %4132 = vst.msk [vmem:[#allocation2 + $0x94] sm:$0xf] %vm4094_vm13, %v3977_v26  ;;  %v4743_v26 = vrot.slane %v4742_v40, 4 }
 0x371   :  { %5534 = vrot.lane.b32.xlu1 %v5383_v59, %s7095_s21  ;;  %v3975_v24 = vpop.permute.xlu0 %3974  ;;  %v6902_v47 = vld [vmem:[#allocation2 + $0x8] sm:$0xff]   ;;  %v4758_v59 = vsel %vm7167_vm3, %v4753_v52, %v4757_v12  ;;  %v4393_v9 = vrot.slane %v4392_v30, 4  ;;  %v11271_v52 = vld [vmem:[%s12004_s0 + $0x90] sm:$0xf] }
 0x372   :  { %4131 = vst.msk [vmem:[#allocation2 + $0x90] sm:$0xf] %vm4094_vm13, %v3975_v24  ;;  %6816 = vmatmul.mubr.msk.bf16.vlgmr.msra.gmra.mxu0 %vm5948_vm0, %v6902_v47  ;;  %v4748_v44 = vsel %vm7167_vm3, %v4743_v26, %v11134_v42  ;;  %v4383_v24 = vrot.slane %v4382_v5, 4  ;;  %v4766_v47 = vor.u32 %v4765_v35, %v4762_v41  ;;  %v4403_v55 = vshll.u32 %v11271_v52, 16 }
 0x373   :  { %v3981_v46 = vpop.permute.xlu1 %3980  ;;  %5532 = vrot.lane.b32.xlu0 %v5380_v28, %s7095_s21  ;;  %v4776_v28 = vor.u32 %v4775_v45, %v11183_v50  ;;  %v4398_v20 = vsel %vm7167_vm3, %v4393_v9, %v4397_v29  ;;  %v5395_v45 = vrot.slane %v5393_v60, 4  ;;  %v6699_v41 = vrot.slane %v11172_v4, 9 }
 0x374   :  { %4134 = vst.msk [vmem:[#allocation2 + $0x9c] sm:$0xf] %vm4094_vm13, %v3981_v46  ;;  %v4781_v46 = vrot.slane %v4779_v25, 5  ;;  %v4388_v42 = vsel %vm7167_vm3, %v4383_v24, %v11157_v0  ;;  %v4767_v38 = vrot.slane %v4766_v47, 4  ;;  %v5281_v0 = vrot.slane %v11123_v13, 5 }
 0x375   :  { %4000 = vrot.lane.b32.xlu1 %v11097_v51, %s7093_s20  ;;  %v3979_v15 = vpop.permute.xlu0 %3978  ;;  %v6903_v27 = vld [vmem:[#allocation2 + $0x88] sm:$0xff]   ;;  %v4777_v22 = vrot.slane %v4776_v28, 4  ;;  %v11306_v25 = vld [vmem:[%s12004_s0 + $0x98] sm:$0x1] }
 0x376   :  { %4133 = vst.msk [vmem:[#allocation2 + $0x98] sm:$0xf] %vm4094_vm13, %v3979_v15  ;;  %6848 = vmatmul.mubr.msk.bf16.vlgmr.msra.gmra.mxu1 %vm5948_vm0, %v6903_v27  ;;  %v6682_v15 = vrot.slane %v11083_v39, 9  ;;  %v4772_v51 = vsel %vm7167_vm3, %v4767_v38, %v11183_v50  ;;  %v6698_v39 = vrot.slane %v11113_v57, 9  ;;  %v5283_v17 = vrot.slane %v5281_v0, 4 }
 0x377   :  { %v4938_v53 = vpop.permute.xlu1 %4937  ;;  %3998 = vrot.lane.b32.xlu0 %v11113_v57, %s7093_s20  ;;  %v4782_v21 = vsel %vm7167_vm3, %v4777_v22, %v4781_v46  ;;  %v5284_v50 = vrot.slane %v11177_v34, 5  ;;  %v6683_v57 = vrot.slane %v11147_v32, 9  ;;  %v4400_v32 = vshrl.u32 %v11271_v52, 16  ;;  %v11301_v28 = vld [vmem:[%s12004_s0 + $0x168] sm:$0xf] }
 0x378   :  { %5125 = vst.msk [vmem:[#allocation2 + $0x14] sm:$0xf] %vm5119_vm14, %v4938_v53  ;;  %v5275_v13 = vsel %vm8093_vm7, %v6682_v15, %v5274_v54  ;;  %v5387_v34 = vsel %vm8093_vm7, %v6698_v39, %v5386_v31  ;;  %v4784_v54 = vshrl.u32 %v11301_v28, 16  ;;  %v4787_v46 = vshll.u32 %v11301_v28, 16  ;;  %v11343_v15 = vld [vmem:[%s12004_s0 + $0x178] sm:$0xf] }
 0x379   :  { %4004 = vrot.lane.b32.xlu1 %v11155_v48, %s7093_s20  ;;  %v4936_v62 = vpop.permute.xlu0 %4935  ;;  %v11261_v48 = vld [vmem:[%s12004_s0 + $0x94] sm:$0xf]  ;;  %v4402_v5 = vrot.slane %v4400_v32, 4  ;;  %v4419_v31 = vshll.u32 %v11306_v25, 16 }
 0x37a   :  { %5124 = vst.msk [vmem:[#allocation2 + $0x10] sm:$0xf] %vm5119_vm14, %v4936_v62  ;;  %v4409_v61 = vshll.u32 %v11261_v48, 16  ;;  %v4413_v10 = vshrl.u32 %v11261_v48, 16  ;;  %v5285_v62 = vsel %vm8093_vm7, %v5283_v17, %v5284_v50  ;;  %v4789_v1 = vrot.slane %v4787_v46, 5 }
 0x37b   :  { %v5002_v2 = vpop.permute.xlu1 %5001  ;;  %4002 = vrot.lane.b32.xlu0 %v11172_v4, %s7093_s20  ;;  %v4421_v17 = vrot.slane %v4419_v31, 5 }
 0x37c   :  { %5157 = vst.msk [vmem:[#allocation2 + $0x94] sm:$0xf] %vm5119_vm14, %v5002_v2  ;;  %v11285_v2 = vld [vmem:[%s12004_s0 + $0x16c] sm:$0xf]  ;;  %v4415_v26 = vrot.slane %v4413_v10, 4 }
 0x37d   :  { %4961 = vrot.lane.b32.xlu1 %v4374_v7, %s7094_s22  ;;  %v5000_v14 = vpop.permute.xlu0 %4999  ;;  %v5396_v7 = vrot.slane %v11197_v3, 5  ;;  %v5282_v3 = vsel %vm8093_vm7, %v6683_v57, %v5281_v0  ;;  %v4793_v35 = vshll.u32 %v11285_v2, 16  ;;  %v11360_v57 = vld [vmem:[%s12004_s0 + $0x174] sm:$0xf] }
 0x37e   :  { %5156 = vst.msk [vmem:[#allocation2 + $0x90] sm:$0xf] %vm5119_vm14, %v5000_v14  ;;  %v4808_v32 = vshrl.u32 %v11360_v57, 16 }
 0x37f   :  { %v4942_v6 = vpop.permute.xlu1 %4941  ;;  %4959 = vrot.lane.b32.xlu0 %v4364_v19, %s7094_s22  ;;  %v4797_v19 = vshrl.u32 %v11285_v2, 16  ;;  %v5397_v29 = vsel %vm8093_vm7, %v5395_v45, %v5396_v7 }
 0x380   :  { %5127 = vst.msk [vmem:[#allocation2 + $0x1c] sm:$0xf] %vm5119_vm14, %v4942_v6  ;;  %v4405_v6 = vrot.slane %v4403_v55, 5 }
 0x381   :  { %5025 = vrot.lane.b32.xlu1 %v4758_v59, %s7094_s22  ;;  %v4940_v11 = vpop.permute.xlu0 %4939  ;;  %v11293_v59 = vrot.slane %v4409_v61, 5  ;;  %v4799_v22 = vrot.slane %v4797_v19, 4  ;;  %v11365_v61 = vld [vmem:[%s12004_s0 + $0xa4] sm:$0x1] }
 0x382   :  { %5126 = vst.msk [vmem:[#allocation2 + $0x18] sm:$0xf] %vm5119_vm14, %v4940_v11  ;;  %v5394_v11 = vsel %vm8093_vm7, %v6699_v41, %v5393_v60  ;;  %v4406_v37 = vor.u32 %v4405_v6, %v4402_v5  ;;  %v4810_v5 = vrot.slane %v4808_v32, 4 }
 0x383   :  { %v5006_v16 = vpop.permute.xlu1 %5005  ;;  %5023 = vrot.lane.b32.xlu0 %v4748_v44, %s7094_s22  ;;  %v11311_v44 = vld [vmem:[%s12004_s0 + $0xa0] sm:$0xf]  ;;  %v4416_v38 = vor.u32 %v4415_v26, %v11293_v59  ;;  %v11385_v26 = vld [vmem:[%s12004_s0 + $0x17c] sm:$0x1] }
 0x384   :  { %5159 = vst.msk [vmem:[#allocation2 + $0x9c] sm:$0xf] %vm5119_vm14, %v5006_v16  ;;  %v4433_v24 = vshll.u32 %v11311_v44, 16  ;;  %v4437_v47 = vshrl.u32 %v11311_v44, 16 }
 0x385   :  { %4965 = vrot.lane.b32.xlu1 %v4398_v20, %s7094_s22  ;;  %v5004_v49 = vpop.permute.xlu0 %5003  ;;  %v11322_v20 = vrot.slane %v4793_v35, 5  ;;  %v4443_v35 = vshll.u32 %v11365_v61, 16 }
 0x386   :  { %5158 = vst.msk [vmem:[#allocation2 + $0x98] sm:$0xf] %vm5119_vm14, %v5004_v49  ;;  %v11330_v49 = vld [vmem:[%s12004_s0 + $0x170] sm:$0x1]  ;;  %v4439_v0 = vrot.slane %v4437_v47, 4 }
 0x387   :  { %v5451_v33 = vpop.permute.xlu1 %5450  ;;  %4963 = vrot.lane.b32.xlu0 %v4388_v42, %s7094_s22  ;;  %v4803_v39 = vshll.u32 %v11330_v49, 16 }
 0x388   :  { %5638 = vst.msk [vmem:[#allocation2 + $0x14] sm:$0xf] %vm5632_vm15, %v5451_v33 }
 0x389   :  { %5029 = vrot.lane.b32.xlu1 %v4782_v21, %s7094_s22  ;;  %v5449_v27 = vpop.permute.xlu0 %5448  ;;  %v11335_v21 = vld [vmem:[%s12004_s0 + $0x9c] sm:$0xf]  ;;  %v4805_v45 = vrot.slane %v4803_v39, 5 }
 0x38a   :  { %5637 = vst.msk [vmem:[#allocation2 + $0x10] sm:$0xf] %vm5632_vm15, %v5449_v27  ;;  %v4424_v8 = vshrl.u32 %v11335_v21, 16  ;;  %v4427_v58 = vshll.u32 %v11335_v21, 16  ;;  %v4786_v27 = vrot.slane %v4784_v54, 4  ;;  %v4445_v54 = vrot.slane %v4443_v35, 5 }
 0x38b   :  { %v5515_v63 = vpop.permute.xlu1 %5514  ;;  %5027 = vrot.lane.b32.xlu0 %v4772_v51, %s7094_s22  ;;  %v11345_v51 = vrot.slane %v4433_v24, 5 }
 0x38c   :  { %5670 = vst.msk [vmem:[#allocation2 + $0x94] sm:$0xf] %vm5632_vm15, %v5515_v63  ;;  %v4800_v63 = vor.u32 %v4799_v22, %v11322_v20  ;;  %v4426_v50 = vrot.slane %v4424_v8, 4  ;;  %v4429_v10 = vrot.slane %v4427_v58, 5  ;;  %v4790_v7 = vor.u32 %v4789_v1, %v4786_v27 }
 0x38d   :  { %5474 = vrot.lane.b32.xlu1 %v5278_v18, %s7095_s21  ;;  %v5513_v53 = vpop.permute.xlu0 %5512  ;;  %v4817_v18 = vshll.u32 %v11343_v15, 16  ;;  %v4827_v22 = vshll.u32 %v11385_v26, 16  ;;  %v5400_v27 = vrot.slane %v11285_v2, 5 }
 0x38e   :  { %5669 = vst.msk [vmem:[#allocation2 + $0x90] sm:$0xf] %vm5632_vm15, %v5513_v53  ;;  %v4821_v53 = vshrl.u32 %v11343_v15, 16  ;;  %v4430_v6 = vor.u32 %v4429_v10, %v4426_v50  ;;  %v5407_v50 = vrot.slane %v11343_v15, 5 }
 0x38f   :  { %v5455_v56 = vpop.permute.xlu1 %5454  ;;  %5472 = vrot.lane.b32.xlu0 %v5275_v13, %s7095_s21 }
 0x390   :  { %5640 = vst.msk [vmem:[#allocation2 + $0x1c] sm:$0xf] %vm5632_vm15, %v5455_v56  ;;  %v4823_v55 = vrot.slane %v4821_v53, 4  ;;  %v5402_v53 = vrot.slane %v5400_v27, 4 }
 0x391   :  { %5538 = vrot.lane.b32.xlu1 %v5390_v43, %s7095_s21  ;;  %v5453_v12 = vpop.permute.xlu0 %5452  ;;  %v6904_v40 = vld [vmem:[#allocation2 + $0x10] sm:$0xff]   ;;  %v4417_v43 = vrot.slane %v4416_v38, 4  ;;  %v5288_v38 = vrot.slane %v11261_v48, 5 }
 0x392   :  { %5639 = vst.msk [vmem:[#allocation2 + $0x18] sm:$0xf] %vm5632_vm15, %v5453_v12  ;;  %6819 = vmatprep.mubr.msk.bf16.mxu0 %vm5948_vm0, %v6904_v40  ;;  %v4811_v12 = vshll.u32 %v11360_v57, 16  ;;  %v4407_v40 = vrot.slane %v4406_v37, 4 }
 0x393   :  { %v5519_v30 = vpop.permute.xlu1 %5518  ;;  %5536 = vrot.lane.b32.xlu0 %v5387_v34, %s7095_s21  ;;  %v11371_v34 = vrot.slane %v4817_v18, 5  ;;  %v4422_v41 = vsel %vm7167_vm3, %v4417_v43, %v4421_v17  ;;  %v5290_v37 = vrot.slane %v5288_v38, 4  ;;  %v5403_v43 = vrot.slane %v11330_v49, 5 }
 0x394   :  { %5672 = vst.msk [vmem:[#allocation2 + $0x9c] sm:$0xf] %vm5632_vm15, %v5519_v30 }
 0x395   :  { %5478 = vrot.lane.b32.xlu1 %v5285_v62, %s7095_s21  ;;  %v5517_v14 = vpop.permute.xlu0 %5516  ;;  %v6905_v9 = vld [vmem:[#allocation2 + $0x90] sm:$0xff]   ;;  %v4801_v62 = vrot.slane %v4800_v63, 4  ;;  %v5291_v63 = vrot.slane %v11306_v25, 5  ;;  %v5404_v49 = vsel %vm8093_vm7, %v5402_v53, %v5403_v43 }
 0x396   :  { %5671 = vst.msk [vmem:[#allocation2 + $0x98] sm:$0xf] %vm5632_vm15, %v5517_v14  ;;  %6851 = vmatprep.mubr.msk.bf16.mxu1 %vm5948_vm0, %v6905_v9  ;;  %v4813_v14 = vrot.slane %v4811_v12, 5  ;;  %v4412_v9 = vsel %vm7167_vm3, %v4407_v40, %v11293_v59 }
 0x397   :  { %v3985_v4 = vpop.permute.xlu1 %3984  ;;  %5476 = vrot.lane.b32.xlu0 %v5282_v3, %s7095_s21  ;;  %v4440_v3 = vor.u32 %v4439_v0, %v11345_v51  ;;  %v5292_v25 = vsel %vm8093_vm7, %v5290_v37, %v5291_v63 }
 0x398   :  { %4136 = vst.msk [vmem:[#allocation2 + $0xa4] sm:$0xf] %vm4094_vm13, %v3985_v4  ;;  %v4791_v4 = vrot.slane %v4790_v7, 4 }
 0x399   :  { %5542 = vrot.lane.b32.xlu1 %v5397_v29, %s7095_s21  ;;  %v3983_v16 = vpop.permute.xlu0 %3982  ;;  %v6906_v42 = vld [vmem:[#allocation2 + $0x18] sm:$0xff]   ;;  %v4806_v29 = vsel %vm7167_vm3, %v4801_v62, %v4805_v45  ;;  %v4441_v47 = vrot.slane %v4440_v3, 4  ;;  %v11459_v62 = vld [vmem:[%s12004_s0 + $0xa8] sm:$0xf] }
 0x39a   :  { %4135 = vst.msk [vmem:[#allocation2 + $0xa0] sm:$0xf] %vm4094_vm13, %v3983_v16  ;;  %6820 = vmatmul.mubr.msk.bf16.gmra.mxu0 %vm5948_vm0, %v6906_v42  ;;  %v4796_v59 = vsel %vm7167_vm3, %v4791_v4, %v11322_v20  ;;  %v4431_v16 = vrot.slane %v4430_v6, 4  ;;  %v4814_v42 = vor.u32 %v4813_v14, %v4810_v5  ;;  %v4451_v35 = vshll.u32 %v11459_v62, 16 }
 0x39b   :  { %v3989_v33 = vpop.permute.xlu1 %3988  ;;  %5540 = vrot.lane.b32.xlu0 %v5394_v11, %s7095_s21  ;;  %v4824_v11 = vor.u32 %v4823_v55, %v11371_v34  ;;  %v4446_v8 = vsel %vm7167_vm3, %v4441_v47, %v4445_v54  ;;  %v5409_v55 = vrot.slane %v5407_v50, 4  ;;  %v6701_v5 = vrot.slane %v11360_v57, 9 }
 0x39c   :  { %4138 = vst.msk [vmem:[#allocation2 + $0xac] sm:$0xf] %vm4094_vm13, %v3989_v33  ;;  %v4829_v33 = vrot.slane %v4827_v22, 5  ;;  %v4436_v20 = vsel %vm7167_vm3, %v4431_v16, %v11345_v51  ;;  %v4815_v48 = vrot.slane %v4814_v42, 4  ;;  %v5295_v51 = vrot.slane %v11311_v44, 5 }
 0x39d   :  { %4008 = vrot.lane.b32.xlu1 %v11285_v2, %s7093_s20  ;;  %v3987_v13 = vpop.permute.xlu0 %3986  ;;  %v6907_v60 = vld [vmem:[#allocation2 + $0x98] sm:$0xff]   ;;  %v4825_v58 = vrot.slane %v4824_v11, 4  ;;  %v11489_v11 = vld [vmem:[%s12004_s0 + $0x180] sm:$0xf]  ;;  %v11494_v22 = vld [vmem:[%s12004_s0 + $0xb0] sm:$0x1] }
 0x39e   :  { %4137 = vst.msk [vmem:[#allocation2 + $0xa8] sm:$0xf] %vm4094_vm13, %v3987_v13  ;;  %6852 = vmatmul.mubr.msk.bf16.gmra.mxu1 %vm5948_vm0, %v6907_v60  ;;  %v6684_v13 = vrot.slane %v11271_v52, 9  ;;  %v4820_v2 = vsel %vm7167_vm3, %v4815_v48, %v11371_v34  ;;  %v6700_v52 = vrot.slane %v11301_v28, 9  ;;  %v5297_v10 = vrot.slane %v5295_v51, 4 }
 0x39f   :  { %v4946_v56 = vpop.permute.xlu1 %4945  ;;  %4006 = vrot.lane.b32.xlu0 %v11301_v28, %s7093_s20  ;;  %v4830_v1 = vsel %vm7167_vm3, %v4825_v58, %v4829_v33  ;;  %v5298_v34 = vrot.slane %v11365_v61, 5  ;;  %v6685_v28 = vrot.slane %v11335_v21, 9  ;;  %v4448_v21 = vshrl.u32 %v11459_v62, 16 }
 0x3a0   :  { %5129 = vst.msk [vmem:[#allocation2 + $0x24] sm:$0xf] %vm5119_vm14, %v4946_v56  ;;  %v5289_v44 = vsel %vm8093_vm7, %v6684_v13, %v5288_v38  ;;  %v5401_v61 = vsel %vm8093_vm7, %v6700_v52, %v5400_v27  ;;  %v4832_v38 = vshrl.u32 %v11489_v11, 16  ;;  %v4835_v33 = vshll.u32 %v11489_v11, 16  ;;  %v11531_v13 = vld [vmem:[%s12004_s0 + $0x190] sm:$0xf] }
 0x3a1   :  { %4012 = vrot.lane.b32.xlu1 %v11343_v15, %s7093_s20  ;;  %v4944_v30 = vpop.permute.xlu0 %4943  ;;  %v11449_v15 = vld [vmem:[%s12004_s0 + $0xac] sm:$0xf]  ;;  %v4450_v6 = vrot.slane %v4448_v21, 4  ;;  %v4467_v27 = vshll.u32 %v11494_v22, 16 }
 0x3a2   :  { %5128 = vst.msk [vmem:[#allocation2 + $0x20] sm:$0xf] %vm5119_vm14, %v4944_v30  ;;  %v4457_v12 = vshll.u32 %v11449_v15, 16  ;;  %v4461_v40 = vshrl.u32 %v11449_v15, 16  ;;  %v5299_v30 = vsel %vm8093_vm7, %v5297_v10, %v5298_v34  ;;  %v4837_v53 = vrot.slane %v4835_v33, 5 }
 0x3a3   :  { %v5010_v19 = vpop.permute.xlu1 %5009  ;;  %4010 = vrot.lane.b32.xlu0 %v11360_v57, %s7093_s20  ;;  %v4469_v10 = vrot.slane %v4467_v27, 5 }
 0x3a4   :  { %5161 = vst.msk [vmem:[#allocation2 + $0xa4] sm:$0xf] %vm5119_vm14, %v5010_v19  ;;  %v11473_v19 = vld [vmem:[%s12004_s0 + $0x184] sm:$0xf]  ;;  %v4463_v4 = vrot.slane %v4461_v40, 4 }
 0x3a5   :  { %4969 = vrot.lane.b32.xlu1 %v4422_v41, %s7094_s22  ;;  %v5008_v24 = vpop.permute.xlu0 %5007  ;;  %v5410_v41 = vrot.slane %v11385_v26, 5  ;;  %v5296_v26 = vsel %vm8093_vm7, %v6685_v28, %v5295_v51  ;;  %v4841_v14 = vshll.u32 %v11473_v19, 16  ;;  %v11548_v28 = vld [vmem:[%s12004_s0 + $0x18c] sm:$0xf] }
 0x3a6   :  { %5160 = vst.msk [vmem:[#allocation2 + $0xa0] sm:$0xf] %vm5119_vm14, %v5008_v24  ;;  %v4856_v21 = vshrl.u32 %v11548_v28, 16 }
 0x3a7   :  { %v4950_v46 = vpop.permute.xlu1 %4949  ;;  %4967 = vrot.lane.b32.xlu0 %v4412_v9, %s7094_s22  ;;  %v4845_v9 = vshrl.u32 %v11473_v19, 16  ;;  %v5411_v54 = vsel %vm8093_vm7, %v5409_v55, %v5410_v41 }
 0x3a8   :  { %5131 = vst.msk [vmem:[#allocation2 + $0x2c] sm:$0xf] %vm5119_vm14, %v4950_v46  ;;  %v4453_v46 = vrot.slane %v4451_v35, 5 }
 0x3a9   :  { %5033 = vrot.lane.b32.xlu1 %v4806_v29, %s7094_s22  ;;  %v4948_v31 = vpop.permute.xlu0 %4947  ;;  %v11481_v29 = vrot.slane %v4457_v12, 5  ;;  %v4847_v58 = vrot.slane %v4845_v9, 4  ;;  %v11553_v12 = vld [vmem:[%s12004_s0 + $0xbc] sm:$0x1] }
 0x3aa   :  { %5130 = vst.msk [vmem:[#allocation2 + $0x28] sm:$0xf] %vm5119_vm14, %v4948_v31  ;;  %v5408_v31 = vsel %vm8093_vm7, %v6701_v5, %v5407_v50  ;;  %v4454_v43 = vor.u32 %v4453_v46, %v4450_v6  ;;  %v4858_v6 = vrot.slane %v4856_v21, 4 }
 0x3ab   :  { %v5014_v0 = vpop.permute.xlu1 %5013  ;;  %5031 = vrot.lane.b32.xlu0 %v4796_v59, %s7094_s22  ;;  %v11499_v59 = vld [vmem:[%s12004_s0 + $0xb8] sm:$0xf]  ;;  %v4464_v48 = vor.u32 %v4463_v4, %v11481_v29  ;;  %v11573_v4 = vld [vmem:[%s12004_s0 + $0x194] sm:$0x1] }
 0x3ac   :  { %5163 = vst.msk [vmem:[#allocation2 + $0xac] sm:$0xf] %vm5119_vm14, %v5014_v0  ;;  %v4481_v16 = vshll.u32 %v11499_v59, 16  ;;  %v4485_v42 = vshrl.u32 %v11499_v59, 16 }
 0x3ad   :  { %4973 = vrot.lane.b32.xlu1 %v4446_v8, %s7094_s22  ;;  %v5012_v18 = vpop.permute.xlu0 %5011  ;;  %v11510_v8 = vrot.slane %v4841_v14, 5  ;;  %v4491_v14 = vshll.u32 %v11553_v12, 16 }
 0x3ae   :  { %5162 = vst.msk [vmem:[#allocation2 + $0xa8] sm:$0xf] %vm5119_vm14, %v5012_v18  ;;  %v11518_v18 = vld [vmem:[%s12004_s0 + $0x188] sm:$0x1]  ;;  %v4487_v51 = vrot.slane %v4485_v42, 4 }
 0x3af   :  { %v5459_v39 = vpop.permute.xlu1 %5458  ;;  %4971 = vrot.lane.b32.xlu0 %v4436_v20, %s7094_s22  ;;  %v4851_v52 = vshll.u32 %v11518_v18, 16 }
 0x3b0   :  { %5642 = vst.msk [vmem:[#allocation2 + $0x24] sm:$0xf] %vm5632_vm15, %v5459_v39 }
 0x3b1   :  { %5037 = vrot.lane.b32.xlu1 %v4830_v1, %s7094_s22  ;;  %v5457_v60 = vpop.permute.xlu0 %5456  ;;  %v11523_v1 = vld [vmem:[%s12004_s0 + $0xb4] sm:$0xf]  ;;  %v4853_v55 = vrot.slane %v4851_v52, 5 }
 0x3b2   :  { %5641 = vst.msk [vmem:[#allocation2 + $0x20] sm:$0xf] %vm5632_vm15, %v5457_v60  ;;  %v4472_v37 = vshrl.u32 %v11523_v1, 16  ;;  %v4475_v63 = vshll.u32 %v11523_v1, 16  ;;  %v4834_v60 = vrot.slane %v4832_v38, 4  ;;  %v4493_v38 = vrot.slane %v4491_v14, 5 }
 0x3b3   :  { %v5523_v17 = vpop.permute.xlu1 %5522  ;;  %5035 = vrot.lane.b32.xlu0 %v4820_v2, %s7094_s22  ;;  %v11533_v2 = vrot.slane %v4481_v16, 5 }
 0x3b4   :  { %5674 = vst.msk [vmem:[#allocation2 + $0xa4] sm:$0xf] %vm5632_vm15, %v5523_v17  ;;  %v4848_v17 = vor.u32 %v4847_v58, %v11510_v8  ;;  %v4474_v34 = vrot.slane %v4472_v37, 4  ;;  %v4477_v40 = vrot.slane %v4475_v63, 5  ;;  %v4838_v41 = vor.u32 %v4837_v53, %v4834_v60 }
 0x3b5   :  { %5482 = vrot.lane.b32.xlu1 %v5292_v25, %s7095_s21  ;;  %v5521_v56 = vpop.permute.xlu0 %5520  ;;  %v4865_v25 = vshll.u32 %v11531_v13, 16  ;;  %v4875_v58 = vshll.u32 %v11573_v4, 16  ;;  %v5414_v60 = vrot.slane %v11473_v19, 5 }
 0x3b6   :  { %5673 = vst.msk [vmem:[#allocation2 + $0xa0] sm:$0xf] %vm5632_vm15, %v5521_v56  ;;  %v4869_v56 = vshrl.u32 %v11531_v13, 16  ;;  %v4478_v46 = vor.u32 %v4477_v40, %v4474_v34  ;;  %v5421_v34 = vrot.slane %v11531_v13, 5 }
 0x3b7   :  { %v5463_v32 = vpop.permute.xlu1 %5462  ;;  %5480 = vrot.lane.b32.xlu0 %v5289_v44, %s7095_s21 }
 0x3b8   :  { %5644 = vst.msk [vmem:[#allocation2 + $0x2c] sm:$0xf] %vm5632_vm15, %v5463_v32  ;;  %v4871_v35 = vrot.slane %v4869_v56, 4  ;;  %v5416_v56 = vrot.slane %v5414_v60, 4 }
 0x3b9   :  { %5546 = vrot.lane.b32.xlu1 %v5404_v49, %s7095_s21  ;;  %v5461_v45 = vpop.permute.xlu0 %5460  ;;  %v6908_v7 = vld [vmem:[#allocation2 + $0x20] sm:$0xff]   ;;  %v4465_v49 = vrot.slane %v4464_v48, 4  ;;  %v5302_v48 = vrot.slane %v11449_v15, 5 }
 0x3ba   :  { %5643 = vst.msk [vmem:[#allocation2 + $0x28] sm:$0xf] %vm5632_vm15, %v5461_v45  ;;  %6823 = vmatprep.mubr.msk.bf16.mxu0 %vm5948_vm0, %v6908_v7  ;;  %v4859_v45 = vshll.u32 %v11548_v28, 16  ;;  %v4455_v7 = vrot.slane %v4454_v43, 4 }
 0x3bb   :  { %v5527_v3 = vpop.permute.xlu1 %5526  ;;  %5544 = vrot.lane.b32.xlu0 %v5401_v61, %s7095_s21  ;;  %v11559_v61 = vrot.slane %v4865_v25, 5  ;;  %v4470_v5 = vsel %vm7167_vm3, %v4465_v49, %v4469_v10  ;;  %v5304_v43 = vrot.slane %v5302_v48, 4  ;;  %v5417_v49 = vrot.slane %v11518_v18, 5 }
 0x3bc   :  { %5676 = vst.msk [vmem:[#allocation2 + $0xac] sm:$0xf] %vm5632_vm15, %v5527_v3 }
 0x3bd   :  { %5486 = vrot.lane.b32.xlu1 %v5299_v30, %s7095_s21  ;;  %v5525_v24 = vpop.permute.xlu0 %5524  ;;  %v6909_v47 = vld [vmem:[#allocation2 + $0xa0] sm:$0xff]   ;;  %v4849_v30 = vrot.slane %v4848_v17, 4  ;;  %v5305_v17 = vrot.slane %v11494_v22, 5  ;;  %v5418_v18 = vsel %vm8093_vm7, %v5416_v56, %v5417_v49 }
 0x3be   :  { %5675 = vst.msk [vmem:[#allocation2 + $0xa8] sm:$0xf] %vm5632_vm15, %v5525_v24  ;;  %6855 = vmatprep.mubr.msk.bf16.mxu1 %vm5948_vm0, %v6909_v47  ;;  %v4861_v24 = vrot.slane %v4859_v45, 5  ;;  %v4460_v47 = vsel %vm7167_vm3, %v4455_v7, %v11481_v29 }
 0x3bf   :  { %v3993_v57 = vpop.permute.xlu1 %3992  ;;  %5484 = vrot.lane.b32.xlu0 %v5296_v26, %s7095_s21  ;;  %v4488_v26 = vor.u32 %v4487_v51, %v11533_v2  ;;  %v5306_v22 = vsel %vm8093_vm7, %v5304_v43, %v5305_v17  ;;  %v11717_v17 = vld [vmem:[%s12004_s0 + $0xcc] sm:$0xf] }
 0x3c0   :  { %4140 = vst.msk [vmem:[#allocation2 + $0xb4] sm:$0xf] %vm4094_vm13, %v3993_v57  ;;  %v4839_v57 = vrot.slane %v4838_v41, 4 }
 0x3c1   :  { %5550 = vrot.lane.b32.xlu1 %v5411_v54, %s7095_s21  ;;  %v3991_v0 = vpop.permute.xlu0 %3990  ;;  %v6910_v20 = vld [vmem:[#allocation2 + $0x28] sm:$0xff]   ;;  %v4854_v54 = vsel %vm7167_vm3, %v4849_v30, %v4853_v55  ;;  %v4489_v42 = vrot.slane %v4488_v26, 4  ;;  %v5424_v55 = vrot.slane %v11573_v4, 5 }
 0x3c2   :  { %4139 = vst.msk [vmem:[#allocation2 + $0xb0] sm:$0xf] %vm4094_vm13, %v3991_v0  ;;  %6824 = vmatmul.mubr.msk.bf16.gmra.mxu0 %vm5948_vm0, %v6910_v20  ;;  %v4844_v29 = vsel %vm7167_vm3, %v4839_v57, %v11510_v8  ;;  %v4479_v0 = vrot.slane %v4478_v46, 4  ;;  %v4862_v20 = vor.u32 %v4861_v24, %v4858_v6  ;;  %v11668_v57 = vld [vmem:[%s12004_s0 + $0xc0] sm:$0xf] }
 0x3c3   :  { %v3997_v39 = vpop.permute.xlu1 %3996  ;;  %5548 = vrot.lane.b32.xlu0 %v5408_v31, %s7095_s21  ;;  %v4872_v31 = vor.u32 %v4871_v35, %v11559_v61  ;;  %v4494_v37 = vsel %vm7167_vm3, %v4489_v42, %v4493_v38  ;;  %v4496_v46 = vshrl.u32 %v11668_v57, 16  ;;  %v4499_v42 = vshll.u32 %v11668_v57, 16 }
 0x3c4   :  { %4142 = vst.msk [vmem:[#allocation2 + $0xbc] sm:$0xf] %vm4094_vm13, %v3997_v39  ;;  %v4877_v39 = vrot.slane %v4875_v58, 5  ;;  %v4484_v8 = vsel %vm7167_vm3, %v4479_v0, %v11533_v2  ;;  %v4863_v15 = vrot.slane %v4862_v20, 4  ;;  %v5309_v2 = vrot.slane %v11499_v59, 5 }
 0x3c5   :  { %4016 = vrot.lane.b32.xlu1 %v11473_v19, %s7093_s20  ;;  %v3995_v44 = vpop.permute.xlu0 %3994  ;;  %v6911_v50 = vld [vmem:[#allocation2 + $0xa8] sm:$0xff]   ;;  %v4873_v63 = vrot.slane %v4872_v31, 4 }
 0x3c6   :  { %4141 = vst.msk [vmem:[#allocation2 + $0xb8] sm:$0xf] %vm4094_vm13, %v3995_v44  ;;  %6856 = vmatmul.mubr.msk.bf16.gmra.mxu1 %vm5948_vm0, %v6911_v50  ;;  %v6686_v44 = vrot.slane %v11459_v62, 9  ;;  %v4868_v19 = vsel %vm7167_vm3, %v4863_v15, %v11559_v61  ;;  %v6702_v62 = vrot.slane %v11489_v11, 9  ;;  %v5311_v40 = vrot.slane %v5309_v2, 4 }
 0x3c7   :  { %v4954_v32 = vpop.permute.xlu1 %4953  ;;  %4014 = vrot.lane.b32.xlu0 %v11489_v11, %s7093_s20  ;;  %v4878_v53 = vsel %vm7167_vm3, %v4873_v63, %v4877_v39  ;;  %v5312_v61 = vrot.slane %v11553_v12, 5  ;;  %v6687_v11 = vrot.slane %v11523_v1, 9  ;;  %v5423_v12 = vrot.slane %v5421_v34, 4 }
 0x3c8   :  { %5133 = vst.msk [vmem:[#allocation2 + $0x34] sm:$0xf] %vm5119_vm14, %v4954_v32  ;;  %v5303_v59 = vsel %vm8093_vm7, %v6686_v44, %v5302_v48  ;;  %v6703_v1 = vrot.slane %v11548_v28, 9  ;;  %v11690_v48 = vld [vmem:[%s12004_s0 + $0x198] sm:$0xf] }
 0x3c9   :  { %4020 = vrot.lane.b32.xlu1 %v11531_v13, %s7093_s20  ;;  %v4952_v3 = vpop.permute.xlu0 %4951  ;;  %v5415_v13 = vsel %vm8093_vm7, %v6702_v62, %v5414_v60  ;;  %v5313_v30 = vsel %vm8093_vm7, %v5311_v40, %v5312_v61  ;;  %v5425_v26 = vsel %vm8093_vm7, %v5423_v12, %v5424_v55  ;;  %v4880_v63 = vshrl.u32 %v11690_v48, 16  ;;  %v11754_v12 = vld [vmem:[%s12004_s0 + $0xd4] sm:$0x1] }
 0x3ca   :  { %5132 = vst.msk [vmem:[#allocation2 + $0x30] sm:$0xf] %vm5119_vm14, %v4952_v3  ;;  %v5310_v3 = vsel %vm8093_vm7, %v6687_v11, %v5309_v2  ;;  %v4883_v39 = vshll.u32 %v11690_v48, 16  ;;  %v6704_v23 = vrot.slane %v11690_v48, 9 }
 0x3cb   :  { %v5018_v9 = vpop.permute.xlu1 %5017  ;;  %4018 = vrot.lane.b32.xlu0 %v11548_v28, %s7093_s20  ;;  %v5422_v28 = vsel %vm8093_vm7, %v6703_v1, %v5421_v34  ;;  %v4882_v56 = vrot.slane %v4880_v63, 4 }
 0x3cc   :  { %5165 = vst.msk [vmem:[#allocation2 + $0xb4] sm:$0xf] %vm5119_vm14, %v5018_v9  ;;  %v11660_v9 = vld [vmem:[%s12004_s0 + $0xc4] sm:$0xf]  ;;  %v4885_v49 = vrot.slane %v4883_v39, 5 }
 0x3cd   :  { %4977 = vrot.lane.b32.xlu1 %v4470_v5, %s7094_s22  ;;  %v5016_v16 = vpop.permute.xlu0 %5015  ;;  %v4505_v24 = vshll.u32 %v11660_v9, 16 }
 0x3ce   :  { %5164 = vst.msk [vmem:[#allocation2 + $0xb0] sm:$0xf] %vm5119_vm14, %v5016_v16  ;;  %v11677_v16 = vld [vmem:[%s12004_s0 + $0x19c] sm:$0xf] }
 0x3cf   :  { %v4958_v33 = vpop.permute.xlu1 %4957  ;;  %4975 = vrot.lane.b32.xlu0 %v4460_v47, %s7094_s22  ;;  %v4509_v47 = vshrl.u32 %v11660_v9, 16  ;;  %v4889_v38 = vshll.u32 %v11677_v16, 16  ;;  %v4893_v31 = vshrl.u32 %v11677_v16, 16 }
 0x3d0   :  { %5135 = vst.msk [vmem:[#allocation2 + $0x3c] sm:$0xf] %vm5119_vm14, %v4958_v33  ;;  %v11684_v33 = vrot.slane %v4505_v24, 5 }
 0x3d1   :  { %5041 = vrot.lane.b32.xlu1 %v4854_v54, %s7094_s22  ;;  %v4956_v27 = vpop.permute.xlu0 %4955  ;;  %v11708_v15 = vrot.slane %v4889_v38, 5  ;;  %v4895_v60 = vrot.slane %v4893_v31, 4 }
 0x3d2   :  { %5134 = vst.msk [vmem:[#allocation2 + $0x38] sm:$0xf] %vm5119_vm14, %v4956_v27  ;;  %v11695_v27 = vld [vmem:[%s12004_s0 + $0xc8] sm:$0x1] }
 0x3d3   :  { %v5022_v51 = vpop.permute.xlu1 %5021  ;;  %5039 = vrot.lane.b32.xlu0 %v4844_v29, %s7094_s22  ;;  %v4511_v29 = vrot.slane %v4509_v47, 4  ;;  %v4515_v44 = vshll.u32 %v11695_v27, 16  ;;  %v4539_v47 = vshll.u32 %v11754_v12, 16 }
 0x3d4   :  { %5167 = vst.msk [vmem:[#allocation2 + $0xbc] sm:$0xf] %vm5119_vm14, %v5022_v51  ;;  %v11706_v51 = vld [vmem:[%s12004_s0 + $0xd0] sm:$0xf] }
 0x3d5   :  { %4981 = vrot.lane.b32.xlu1 %v4494_v37, %s7094_s22  ;;  %v5020_v25 = vpop.permute.xlu0 %5019  ;;  %v4498_v37 = vrot.slane %v4496_v46, 4  ;;  %v4533_v43 = vshrl.u32 %v11706_v51, 16  ;;  %v11773_v46 = vld [vmem:[%s12004_s0 + $0x1ac] sm:$0x1]  ;;  %v4541_v63 = vrot.slane %v4539_v47, 5 }
 0x3d6   :  { %5166 = vst.msk [vmem:[#allocation2 + $0xb8] sm:$0xf] %vm5119_vm14, %v5020_v25  ;;  %v4529_v25 = vshll.u32 %v11706_v51, 16 }
 0x3d7   :  { %v5467_v52 = vpop.permute.xlu1 %5466  ;;  %4979 = vrot.lane.b32.xlu0 %v4484_v8, %s7094_s22  ;;  %v4501_v8 = vrot.slane %v4499_v42, 5  ;;  %v4535_v61 = vrot.slane %v4533_v43, 4  ;;  %v5316_v43 = vrot.slane %v11660_v9, 5 }
 0x3d8   :  { %5646 = vst.msk [vmem:[#allocation2 + $0x34] sm:$0xf] %vm5632_vm15, %v5467_v52  ;;  %v4512_v52 = vor.u32 %v4511_v29, %v11684_v33 }
 0x3d9   :  { %5045 = vrot.lane.b32.xlu1 %v4878_v53, %s7094_s22  ;;  %v5465_v50 = vpop.permute.xlu0 %5464  ;;  %v4502_v34 = vor.u32 %v4501_v8, %v4498_v37  ;;  %v4923_v8 = vshll.u32 %v11773_v46, 16 }
 0x3da   :  { %5645 = vst.msk [vmem:[#allocation2 + $0x30] sm:$0xf] %vm5632_vm15, %v5465_v50  ;;  %v4520_v50 = vshrl.u32 %v11717_v17, 16  ;;  %v4513_v11 = vrot.slane %v4512_v52, 4 }
 0x3db   :  { %v5531_v10 = vpop.permute.xlu1 %5530  ;;  %5043 = vrot.lane.b32.xlu0 %v4868_v19, %s7094_s22  ;;  %v11724_v19 = vld [vmem:[%s12004_s0 + $0x1a0] sm:$0x1] }
 0x3dc   :  { %5678 = vst.msk [vmem:[#allocation2 + $0xb4] sm:$0xf] %vm5632_vm15, %v5531_v10  ;;  %v4523_v10 = vshll.u32 %v11717_v17, 16 }
 0x3dd   :  { %5490 = vrot.lane.b32.xlu1 %v5306_v22, %s7095_s21  ;;  %v5529_v32 = vpop.permute.xlu0 %5528  ;;  %v11731_v22 = vld [vmem:[%s12004_s0 + $0x1a8] sm:$0xf] }
 0x3de   :  { %5677 = vst.msk [vmem:[#allocation2 + $0xb0] sm:$0xf] %vm5632_vm15, %v5529_v32  ;;  %v4913_v62 = vshll.u32 %v11731_v22, 16  ;;  %v4896_v32 = vor.u32 %v4895_v60, %v11708_v15  ;;  %v4525_v55 = vrot.slane %v4523_v10, 5 }
 0x3df   :  { %v5471_v21 = vpop.permute.xlu1 %5470  ;;  %5488 = vrot.lane.b32.xlu0 %v5303_v59, %s7095_s21  ;;  %v11738_v59 = vrot.slane %v4529_v25, 5 }
 0x3e0   :  { %5648 = vst.msk [vmem:[#allocation2 + $0x3c] sm:$0xf] %vm5632_vm15, %v5471_v21  ;;  %v4917_v21 = vshrl.u32 %v11731_v22, 16 }
 0x3e1   :  { %5554 = vrot.lane.b32.xlu1 %v5418_v18, %s7095_s21  ;;  %v5469_v45 = vpop.permute.xlu0 %5468  ;;  %v6912_v7 = vld [vmem:[#allocation2 + $0x30] sm:$0xff]   ;;  %v4899_v18 = vshll.u32 %v11724_v19, 16  ;;  %v4536_v24 = vor.u32 %v4535_v61, %v11738_v59 }
 0x3e2   :  { %5647 = vst.msk [vmem:[#allocation2 + $0x38] sm:$0xf] %vm5632_vm15, %v5469_v45  ;;  %6827 = vmatprep.mubr.msk.bf16.mxu0 %vm5948_vm0, %v6912_v7  ;;  %v4522_v45 = vrot.slane %v4520_v50, 4  ;;  %v4925_v50 = vrot.slane %v4923_v8, 5 }
 0x3e3   :  { %v5535_v41 = vpop.permute.xlu1 %5534  ;;  %5552 = vrot.lane.b32.xlu0 %v5415_v13, %s7095_s21  ;;  %v4517_v13 = vrot.slane %v4515_v44, 5  ;;  %v4537_v37 = vrot.slane %v4536_v24, 4 }
 0x3e4   :  { %5680 = vst.msk [vmem:[#allocation2 + $0xbc] sm:$0xf] %vm5632_vm15, %v5535_v41  ;;  %v11759_v41 = vrot.slane %v4913_v62, 5 }
 0x3e5   :  { %5494 = vrot.lane.b32.xlu1 %v5313_v30, %s7095_s21  ;;  %v5533_v35 = vpop.permute.xlu0 %5532  ;;  %v6913_v5 = vld [vmem:[#allocation2 + $0xb0] sm:$0xff]   ;;  %v11749_v30 = vld [vmem:[%s12004_s0 + $0x1a4] sm:$0xf]  ;;  %v4542_v44 = vsel %vm7167_vm3, %v4537_v37, %v4541_v63 }
 0x3e6   :  { %5679 = vst.msk [vmem:[#allocation2 + $0xb8] sm:$0xf] %vm5632_vm15, %v5533_v35  ;;  %6859 = vmatprep.mubr.msk.bf16.mxu1 %vm5948_vm0, %v6913_v5  ;;  %v4904_v1 = vshrl.u32 %v11749_v30, 16  ;;  %v4503_v35 = vrot.slane %v4502_v34, 4  ;;  %v4897_v5 = vrot.slane %v4896_v32, 4  ;;  %v5318_v34 = vrot.slane %v5316_v43, 4 }
 0x3e7   :  { %v4001_v14 = vpop.permute.xlu1 %4000  ;;  %5492 = vrot.lane.b32.xlu0 %v5310_v3, %s7095_s21  ;;  %v4907_v3 = vshll.u32 %v11749_v30, 16  ;;  %v5319_v32 = vrot.slane %v11695_v27, 5 }
 0x3e8   :  { %4144 = vst.msk [vmem:[#allocation2 + $0xc4] sm:$0xf] %vm4094_vm13, %v4001_v14  ;;  %v4886_v14 = vor.u32 %v4885_v49, %v4882_v56  ;;  %v4906_v42 = vrot.slane %v4904_v1, 4  ;;  %v4508_v31 = vsel %vm7167_vm3, %v4503_v35, %v11684_v33  ;;  %v5428_v49 = vrot.slane %v11677_v16, 5 }
 0x3e9   :  { %5558 = vrot.lane.b32.xlu1 %v5425_v26, %s7095_s21  ;;  %v3999_v4 = vpop.permute.xlu0 %3998  ;;  %v6914_v6 = vld [vmem:[#allocation2 + $0x38] sm:$0xff]   ;;  %v4901_v26 = vrot.slane %v4899_v18, 5  ;;  %v4909_v38 = vrot.slane %v4907_v3, 5  ;;  %v5320_v27 = vsel %vm8093_vm7, %v5318_v34, %v5319_v32  ;;  %v5326_v1 = vrot.slane %v11754_v12, 5 }
 0x3ea   :  { %4143 = vst.msk [vmem:[#allocation2 + $0xc0] sm:$0xf] %vm4094_vm13, %v3999_v4  ;;  %6828 = vmatmul.mubr.msk.bf16.gmra.mxu0 %vm5948_vm0, %v6914_v6  ;;  %v4919_v4 = vrot.slane %v4917_v21, 4  ;;  %v4518_v6 = vsel %vm7167_vm3, %v4513_v11, %v4517_v13  ;;  %v4887_v29 = vrot.slane %v4886_v14, 4  ;;  %v5430_v11 = vrot.slane %v5428_v49, 4 }
 0x3eb   :  { %v4005_v54 = vpop.permute.xlu1 %4004  ;;  %5556 = vrot.lane.b32.xlu0 %v5422_v28, %s7095_s21  ;;  %v5431_v13 = vrot.slane %v11724_v19, 5  ;;  %v5438_v14 = vrot.slane %v11773_v46, 5 }
 0x3ec   :  { %4146 = vst.msk [vmem:[#allocation2 + $0xcc] sm:$0xf] %vm4094_vm13, %v4005_v54  ;;  %v4920_v39 = vor.u32 %v4919_v4, %v11759_v41  ;;  %v4892_v33 = vsel %vm7167_vm3, %v4887_v29, %v11708_v15 }
 0x3ed   :  { %3960 = vrot.lane.b32.xlu1 %v11660_v9, %s7093_s20  ;;  %v4003_v58 = vpop.permute.xlu0 %4002  ;;  %v6915_v0 = vld [vmem:[#allocation2 + $0xb8] sm:$0xff]  }
 0x3ee   :  { %4145 = vst.msk [vmem:[#allocation2 + $0xc8] sm:$0xf] %vm4094_vm13, %v4003_v58  ;;  %6860 = vmatmul.mubr.msk.bf16.gmra.mxu1 %vm5948_vm0, %v6915_v0  ;;  %v4902_v58 = vsel %vm7167_vm3, %v4897_v5, %v4901_v26  ;;  %v4526_v0 = vor.u32 %v4525_v55, %v4522_v45  ;;  %v5432_v55 = vsel %vm8093_vm7, %v5430_v11, %v5431_v13 }
 0x3ef   :  { %v4962_v20 = vpop.permute.xlu1 %4961  ;;  %3958 = vrot.lane.b32.xlu0 %v11668_v57, %s7093_s20 }
 0x3f0   :  { %5137 = vst.msk [vmem:[#allocation2 + $0x44] sm:$0xf] %vm5119_vm14, %v4962_v20  ;;  %v4527_v25 = vrot.slane %v4526_v0, 4 }
 0x3f1   :  { %4024 = vrot.lane.b32.xlu1 %v11677_v16, %s7093_s20  ;;  %v4960_v53 = vpop.permute.xlu0 %4959 }
 0x3f2   :  { %5136 = vst.msk [vmem:[#allocation2 + $0x40] sm:$0xf] %vm5119_vm14, %v4960_v53  ;;  %v4910_v53 = vor.u32 %v4909_v38, %v4906_v42  ;;  %v4532_v15 = vsel %vm7167_vm3, %v4527_v25, %v11738_v59  ;;  %v5323_v59 = vrot.slane %v11706_v51, 5 }
 0x3f3   :  { %v5026_v2 = vpop.permute.xlu1 %5025  ;;  %4022 = vrot.lane.b32.xlu0 %v11690_v48, %s7093_s20  ;;  %v6689_v48 = vrot.slane %v11717_v17, 9 }
 0x3f4   :  { %5169 = vst.msk [vmem:[#allocation2 + $0xc4] sm:$0xf] %vm5119_vm14, %v5026_v2  ;;  %v4921_v2 = vrot.slane %v4920_v39, 4  ;;  %v4911_v9 = vrot.slane %v4910_v53, 4 }
 0x3f5   :  { %3964 = vrot.lane.b32.xlu1 %v11706_v51, %s7093_s20  ;;  %v5024_v40 = vpop.permute.xlu0 %5023  ;;  %v5435_v51 = vrot.slane %v11731_v22, 5  ;;  %v5324_v4 = vsel %vm8093_vm7, %v6689_v48, %v5323_v59 }
 0x3f6   :  { %5168 = vst.msk [vmem:[#allocation2 + $0xc0] sm:$0xf] %vm5119_vm14, %v5024_v40  ;;  %v4926_v62 = vsel %vm7167_vm3, %v4921_v2, %v4925_v50  ;;  %v6688_v40 = vrot.slane %v11668_v57, 9  ;;  %v4916_v16 = vsel %vm7167_vm3, %v4911_v9, %v11759_v41  ;;  %v5325_v41 = vrot.slane %v5323_v59, 4 }
 0x3f7   :  { %v4966_v7 = vpop.permute.xlu1 %4965  ;;  %3962 = vrot.lane.b32.xlu0 %v11717_v17, %s7093_s20  ;;  %v5437_v26 = vrot.slane %v5435_v51, 4  ;;  %v6705_v17 = vrot.slane %v11749_v30, 9 }
 0x3f8   :  { %5139 = vst.msk [vmem:[#allocation2 + $0x4c] sm:$0xf] %vm5119_vm14, %v4966_v7  ;;  %v5317_v57 = vsel %vm8093_vm7, %v6688_v40, %v5316_v43  ;;  %v5327_v12 = vsel %vm8093_vm7, %v5325_v41, %v5326_v1 }
 0x3f9   :  { %4028 = vrot.lane.b32.xlu1 %v11731_v22, %s7093_s20  ;;  %v4964_v28 = vpop.permute.xlu0 %4963  ;;  %v5429_v22 = vsel %vm8093_vm7, %v6704_v23, %v5428_v49  ;;  %v5439_v47 = vsel %vm8093_vm7, %v5437_v26, %v5438_v14 }
 0x3fa   :  { %5138 = vst.msk [vmem:[#allocation2 + $0x48] sm:$0xf] %vm5119_vm14, %v4964_v28 }
 0x3fb   :  { %v5030_v54 = vpop.permute.xlu1 %5029  ;;  %4026 = vrot.lane.b32.xlu0 %v11749_v30, %s7093_s20  ;;  %v5436_v30 = vsel %vm8093_vm7, %v6705_v17, %v5435_v51 }
 0x3fc   :  { %5171 = vst.msk [vmem:[#allocation2 + $0xcc] sm:$0xf] %vm5119_vm14, %v5030_v54 }
 0x3fd   :  { %4985 = vrot.lane.b32.xlu1 %v4518_v6, %s7094_s22  ;;  %v5028_v20 = vpop.permute.xlu0 %5027 }
 0x3fe   :  { %5170 = vst.msk [vmem:[#allocation2 + $0xc8] sm:$0xf] %vm5119_vm14, %v5028_v20 }
 0x3ff   :  { %v5475_v60 = vpop.permute.xlu1 %5474  ;;  %4983 = vrot.lane.b32.xlu0 %v4508_v31, %s7094_s22 }
 0x400   :  { %5650 = vst.msk [vmem:[#allocation2 + $0x44] sm:$0xf] %vm5632_vm15, %v5475_v60  ;;  %v11875_v60 = vld [vmem:[%s12006_s2] ss:$0 sm:$0xff]  ;;  %s7096_s2 = smov [#allocation3]  }
 0x401   :  { %5049 = vrot.lane.b32.xlu1 %v4902_v58, %s7094_s22  ;;  %v5473_v52 = vpop.permute.xlu0 %5472 }
 0x402   :  { %5649 = vst.msk [vmem:[#allocation2 + $0x40] sm:$0xf] %vm5632_vm15, %v5473_v52 }
 0x403   :  { %v5539_v56 = vpop.permute.xlu1 %5538  ;;  %5047 = vrot.lane.b32.xlu0 %v4892_v33, %s7094_s22 }
 0x404   :  { %5682 = vst.msk [vmem:[#allocation2 + $0xc4] sm:$0xf] %vm5632_vm15, %v5539_v56 }
 0x405   :  { %4989 = vrot.lane.b32.xlu1 %v4542_v44, %s7094_s22  ;;  %v5537_v10 = vpop.permute.xlu0 %5536 }
 0x406   :  { %5681 = vst.msk [vmem:[#allocation2 + $0xc0] sm:$0xf] %vm5632_vm15, %v5537_v10 }
 0x407   :  { %v5479_v18 = vpop.permute.xlu1 %5478  ;;  %4987 = vrot.lane.b32.xlu0 %v4532_v15, %s7094_s22 }
 0x408   :  { %5652 = vst.msk [vmem:[#allocation2 + $0x4c] sm:$0xf] %vm5632_vm15, %v5479_v18 }
 0x409   :  { %5053 = vrot.lane.b32.xlu1 %v4926_v62, %s7094_s22  ;;  %v5477_v61 = vpop.permute.xlu0 %5476  ;;  %v6916_v21 = vld [vmem:[#allocation2 + $0x40] sm:$0xff]  }
 0x40a   :  { %5651 = vst.msk [vmem:[#allocation2 + $0x48] sm:$0xf] %vm5632_vm15, %v5477_v61  ;;  %6831 = vmatprep.mubr.msk.bf16.mxu0 %vm5948_vm0, %v6916_v21 }
 0x40b   :  { %v5543_v45 = vpop.permute.xlu1 %5542  ;;  %5051 = vrot.lane.b32.xlu0 %v4916_v16, %s7094_s22  ;;  %s6407_s22 = sshll.u32 %s7096_s2, 4  ;;  %s6408_s22 = int_to_ptr.vmem [resolvable:$true] %s6407_s22 }
 0x40c   :  { %5684 = vst.msk [vmem:[#allocation2 + $0xcc] sm:$0xf] %vm5632_vm15, %v5543_v45  ;;  %p7071_p1 = scmp.lt.s32.totalorder %s6408_s22, %s6408_s22 }
 0x40d   :  { %5498 = vrot.lane.b32.xlu1 %v5320_v27, %s7095_s21  ;;  %v5541_v7 = vpop.permute.xlu0 %5540  ;;  %v6917_v19 = vld [vmem:[#allocation2 + $0xc0] sm:$0xff]  }
 0x40e   :  { %5683 = vst.msk [vmem:[#allocation2 + $0xc8] sm:$0xf] %vm5632_vm15, %v5541_v7  ;;  %6863 = vmatprep.mubr.msk.bf16.mxu1 %vm5948_vm0, %v6917_v19 }
 0x40f   :  { %v4009_v3 = vpop.permute.xlu1 %4008  ;;  %5496 = vrot.lane.b32.xlu0 %v5317_v57, %s7095_s21 }
 0x410   :  { %4148 = vst.msk [vmem:[#allocation2 + $0xd4] sm:$0xf] %vm4094_vm13, %v4009_v3 }
 0x411   :  { %5562 = vrot.lane.b32.xlu1 %v5432_v55, %s7095_s21  ;;  %v4007_v35 = vpop.permute.xlu0 %4006  ;;  %v6918_v5 = vld [vmem:[#allocation2 + $0x48] sm:$0xff]  }
 0x412   :  { %4147 = vst.msk [vmem:[#allocation2 + $0xd0] sm:$0xf] %vm4094_vm13, %v4007_v35  ;;  %6832 = vmatmul.mubr.msk.bf16.gmra.mxu0 %vm5948_vm0, %v6918_v5 }
 0x413   :  { %v4013_v28 = vpop.permute.xlu1 %4012  ;;  %5560 = vrot.lane.b32.xlu0 %v5429_v22, %s7095_s21 }
 0x414   :  { %4150 = vst.msk [vmem:[#allocation2 + $0xdc] sm:$0xf] %vm4094_vm13, %v4013_v28 }
 0x415   :  { %5502 = vrot.lane.b32.xlu1 %v5327_v12, %s7095_s21  ;;  %v4011_v6 = vpop.permute.xlu0 %4010  ;;  %v6919_v24 = vld [vmem:[#allocation2 + $0xc8] sm:$0xff]  }
 0x416   :  { %4149 = vst.msk [vmem:[#allocation2 + $0xd8] sm:$0xf] %vm4094_vm13, %v4011_v6  ;;  %6864 = vmatmul.mubr.msk.bf16.gmra.mxu1 %vm5948_vm0, %v6919_v24 }
 0x417   :  { %v4970_v54 = vpop.permute.xlu1 %4969  ;;  %5500 = vrot.lane.b32.xlu0 %v5324_v4, %s7095_s21 }
 0x418   :  { %5141 = vst.msk [vmem:[#allocation2 + $0x54] sm:$0xf] %vm5119_vm14, %v4970_v54 }
 0x419   :  { %5566 = vrot.lane.b32.xlu1 %v5439_v47, %s7095_s21  ;;  %v4968_v46 = vpop.permute.xlu0 %4967 }
 0x41a   :  { %5140 = vst.msk [vmem:[#allocation2 + $0x50] sm:$0xf] %vm5119_vm14, %v4968_v46 }
 0x41b   :  { %v5034_v42 = vpop.permute.xlu1 %5033  ;;  %5564 = vrot.lane.b32.xlu0 %v5436_v30, %s7095_s21  ;;  %s7066_s21 = scalar_lea.vmem %s6408_s22, 8192 }
 0x41c   :  { %5173 = vst.msk [vmem:[#allocation2 + $0xd4] sm:$0xf] %vm5119_vm14, %v5034_v42  ;;  %p7067_p0 = scmp.ne.s32.totalorder %s6408_s22, %s7066_s21  ;;  %p7072_p2 = scmp.lt.s32.totalorder %s7066_s21, %s7066_s21 }
 0x41d   :  { %v5032_v38 = vpop.permute.xlu0 %5031 }
 0x41e   :  { %5172 = vst.msk [vmem:[#allocation2 + $0xd0] sm:$0xf] %vm5119_vm14, %v5032_v38  ;;  %p7073_p3 = por %p7072_p2, %p7071_p1 }
 0x41f   :  { %v4974_v31 = vpop.permute.xlu1 %4973 }
 0x420   :  { %5143 = vst.msk [vmem:[#allocation2 + $0x5c] sm:$0xf] %vm5119_vm14, %v4974_v31  ;;  %p7074_p4 = pnand %p7073_p3, %p7067_p0 }
 0x421   :  { %v4972_v58 = vpop.permute.xlu0 %4971 }
 0x422   :  { %5142 = vst.msk [vmem:[#allocation2 + $0x58] sm:$0xf] %vm5119_vm14, %v4972_v58 }
 0x423   :  { %v5038_v29 = vpop.permute.xlu1 %5037 }
 0x424   :  { %5175 = vst.msk [vmem:[#allocation2 + $0xdc] sm:$0xf] %vm5119_vm14, %v5038_v29 }
 0x425   :  { %v5036_v36 = vpop.permute.xlu0 %5035 }
 0x426   :  { %5174 = vst.msk [vmem:[#allocation2 + $0xd8] sm:$0xf] %vm5119_vm14, %v5036_v36 }
 0x427   :  { %v5483_v0 = vpop.permute.xlu1 %5482 }
 0x428   :  { %5654 = vst.msk [vmem:[#allocation2 + $0x54] sm:$0xf] %vm5632_vm15, %v5483_v0 }
 0x429   :  { %v5481_v20 = vpop.permute.xlu0 %5480 }
 0x42a   :  { %5653 = vst.msk [vmem:[#allocation2 + $0x50] sm:$0xf] %vm5632_vm15, %v5481_v20 }
 0x42b   :  { %v5547_v37 = vpop.permute.xlu1 %5546 }
 0x42c   :  { %5686 = vst.msk [vmem:[#allocation2 + $0xd4] sm:$0xf] %vm5632_vm15, %v5547_v37 }
 0x42d   :  { %v5545_v63 = vpop.permute.xlu0 %5544 }
 0x42e   :  { %5685 = vst.msk [vmem:[#allocation2 + $0xd0] sm:$0xf] %vm5632_vm15, %v5545_v63 }
 0x42f   :  { %v5487_v39 = vpop.permute.xlu1 %5486 }
 0x430   :  { %5656 = vst.msk [vmem:[#allocation2 + $0x5c] sm:$0xf] %vm5632_vm15, %v5487_v39 }
 0x431   :  { %v5485_v8 = vpop.permute.xlu0 %5484  ;;  %v6920_v33 = vld [vmem:[#allocation2 + $0x50] sm:$0xff]  }
 0x432   :  { %5655 = vst.msk [vmem:[#allocation2 + $0x58] sm:$0xf] %vm5632_vm15, %v5485_v8  ;;  %v6817_v53 = vpop.f32.mrf.mxu0  ;;  %6835 = vmatprep.mubr.msk.bf16.mxu0 %vm5948_vm0, %v6920_v33 }
 0x433   :  { %v5551_v25 = vpop.permute.xlu1 %5550  ;;  %v6092_v43 = vadd.f32 %v6817_v53, %v11875_v60 }
 0x434   :  { %5688 = vst.msk [vmem:[#allocation2 + $0xdc] sm:$0xf] %vm5632_vm15, %v5551_v25  ;;  %v6083_v44 = vpop.f32.mrf.mxu0 }
 0x435   :  { %v5549_v52 = vpop.permute.xlu0 %5548  ;;  %v6921_v2 = vld [vmem:[#allocation2 + $0xd0] sm:$0xff]   ;;  %6340 = vst [vmem:[#allocation3 + $0x10] sm:$0xff] %v6092_v43  ;;  %v6084_v50 = vadd.f32 %v11875_v60, %v6083_v44 }
 0x436   :  { %5687 = vst.msk [vmem:[#allocation2 + $0xd8] sm:$0xf] %vm5632_vm15, %v5549_v52  ;;  %v6818_v15 = vpop.f32.mrf.mxu0  ;;  %v6849_v9 = vpop.f32.mrf.mxu1  ;;  %6867 = vmatprep.mubr.msk.bf16.mxu1 %vm5948_vm0, %v6921_v2 }
 0x437   :  { %v4017_v56 = vpop.permute.xlu1 %4016  ;;  %6338 = vst [vmem:[#allocation3] sm:$0xff] %v6084_v50  ;;  %v6095_v49 = vadd.f32 %v6818_v15, %v11875_v60  ;;  %v6220_v10 = vadd.f32 %v6849_v9, %v11875_v60 }
 0x438   :  { %4152 = vst.msk [vmem:[#allocation2 + $0xe4] sm:$0xf] %vm4094_vm13, %v4017_v56  ;;  %v6086_v34 = vpop.f32.mrf.mxu0  ;;  %v6211_v40 = vpop.f32.mrf.mxu1 }
 0x439   :  { %v4015_v62 = vpop.permute.xlu0 %4014  ;;  %v6922_v32 = vld [vmem:[#allocation2 + $0x58] sm:$0xff]   ;;  %6341 = vst [vmem:[#allocation3 + $0x18] sm:$0xff] %v6095_v49  ;;  %6372 = vst [vmem:[#allocation3 + $0x110] sm:$0xff] %v6220_v10  ;;  %v6087_v18 = vadd.f32 %v11875_v60, %v6086_v34  ;;  %v6212_v59 = vadd.f32 %v11875_v60, %v6211_v40 }
 0x43a   :  { %4151 = vst.msk [vmem:[#allocation2 + $0xe0] sm:$0xf] %vm4094_vm13, %v4015_v62  ;;  %6836 = vmatmul.mubr.msk.bf16.gmra.mxu0 %vm5948_vm0, %v6922_v32  ;;  %v6850_v61 = vpop.f32.mrf.mxu1 }
 0x43b   :  { %v4021_v16 = vpop.permute.xlu1 %4020  ;;  %6339 = vst [vmem:[#allocation3 + $0x8] sm:$0xff] %v6087_v18  ;;  %6370 = vst [vmem:[#allocation3 + $0x100] sm:$0xff] %v6212_v59  ;;  %v6223_v21 = vadd.f32 %v6850_v61, %v11875_v60 }
 0x43c   :  { %4154 = vst.msk [vmem:[#allocation2 + $0xec] sm:$0xf] %vm4094_vm13, %v4021_v16  ;;  %v6214_v13 = vpop.f32.mrf.mxu1 }
 0x43d   :  { %v4019_v27 = vpop.permute.xlu0 %4018  ;;  %v6923_v11 = vld [vmem:[#allocation2 + $0xd8] sm:$0xff]   ;;  %6373 = vst [vmem:[#allocation3 + $0x118] sm:$0xff] %v6223_v21  ;;  %v6215_v23 = vadd.f32 %v11875_v60, %v6214_v13 }
 0x43e   :  { %4153 = vst.msk [vmem:[#allocation2 + $0xe8] sm:$0xf] %vm4094_vm13, %v4019_v27  ;;  %6868 = vmatmul.mubr.msk.bf16.gmra.mxu1 %vm5948_vm0, %v6923_v11 }
 0x43f   :  { %v4978_v45 = vpop.permute.xlu1 %4977  ;;  %6371 = vst [vmem:[#allocation3 + $0x108] sm:$0xff] %v6215_v23 }
 0x440   :  { %5145 = vst.msk [vmem:[#allocation2 + $0x64] sm:$0xf] %vm5119_vm14, %v4978_v45 }
 0x441   :  { %v4976_v57 = vpop.permute.xlu0 %4975 }
 0x442   :  { %5144 = vst.msk [vmem:[#allocation2 + $0x60] sm:$0xf] %vm5119_vm14, %v4976_v57 }
 0x443   :  { %v5042_v51 = vpop.permute.xlu1 %5041 }
 0x444   :  { %5177 = vst.msk [vmem:[#allocation2 + $0xe4] sm:$0xf] %vm5119_vm14, %v5042_v51 }
 0x445   :  { %v5040_v7 = vpop.permute.xlu0 %5039 }
 0x446   :  { %5176 = vst.msk [vmem:[#allocation2 + $0xe0] sm:$0xf] %vm5119_vm14, %v5040_v7 }
 0x447   :  { %v4982_v19 = vpop.permute.xlu1 %4981 }
 0x448   :  { %5147 = vst.msk [vmem:[#allocation2 + $0x6c] sm:$0xf] %vm5119_vm14, %v4982_v19 }
 0x449   :  { %v4980_v55 = vpop.permute.xlu0 %4979 }
 0x44a   :  { %5146 = vst.msk [vmem:[#allocation2 + $0x68] sm:$0xf] %vm5119_vm14, %v4980_v55 }
 0x44b   :  { %v5046_v41 = vpop.permute.xlu1 %5045 }
 0x44c   :  { %5179 = vst.msk [vmem:[#allocation2 + $0xec] sm:$0xf] %vm5119_vm14, %v5046_v41 }
 0x44d   :  { %v5044_v1 = vpop.permute.xlu0 %5043 }
 0x44e   :  { %5178 = vst.msk [vmem:[#allocation2 + $0xe8] sm:$0xf] %vm5119_vm14, %v5044_v1 }
 0x44f   :  { %v5491_v3 = vpop.permute.xlu1 %5490 }
 0x450   :  { %5658 = vst.msk [vmem:[#allocation2 + $0x64] sm:$0xf] %vm5632_vm15, %v5491_v3 }
 0x451   :  { %v5489_v48 = vpop.permute.xlu0 %5488 }
 0x452   :  { %5657 = vst.msk [vmem:[#allocation2 + $0x60] sm:$0xf] %vm5632_vm15, %v5489_v48 }
 0x453   :  { %v5555_v22 = vpop.permute.xlu1 %5554 }
 0x454   :  { %5690 = vst.msk [vmem:[#allocation2 + $0xe4] sm:$0xf] %vm5632_vm15, %v5555_v22 }
 0x455   :  { %v5553_v35 = vpop.permute.xlu0 %5552 }
 0x456   :  { %5689 = vst.msk [vmem:[#allocation2 + $0xe0] sm:$0xf] %vm5632_vm15, %v5553_v35 }
 0x457   :  { %v5495_v5 = vpop.permute.xlu1 %5494 }
 0x458   :  { %5660 = vst.msk [vmem:[#allocation2 + $0x6c] sm:$0xf] %vm5632_vm15, %v5495_v5 }
 0x459   :  { %v5493_v12 = vpop.permute.xlu0 %5492  ;;  %v6924_v26 = vld [vmem:[#allocation2 + $0x60] sm:$0xff]  }
 0x45a   :  { %5659 = vst.msk [vmem:[#allocation2 + $0x68] sm:$0xf] %vm5632_vm15, %v5493_v12  ;;  %v6821_v28 = vpop.f32.mrf.mxu0  ;;  %6839 = vmatprep.mubr.msk.bf16.mxu0 %vm5948_vm0, %v6924_v26 }
 0x45b   :  { %v5559_v14 = vpop.permute.xlu1 %5558  ;;  %v6108_v17 = vadd.f32 %v6821_v28, %v11875_v60 }
 0x45c   :  { %5692 = vst.msk [vmem:[#allocation2 + $0xec] sm:$0xf] %vm5632_vm15, %v5559_v14  ;;  %v6099_v6 = vpop.f32.mrf.mxu0 }
 0x45d   :  { %v5557_v4 = vpop.permute.xlu0 %5556  ;;  %v6925_v24 = vld [vmem:[#allocation2 + $0xe0] sm:$0xff]   ;;  %6344 = vst [vmem:[#allocation3 + $0x30] sm:$0xff] %v6108_v17  ;;  %v6100_v47 = vadd.f32 %v11875_v60, %v6099_v6 }
 0x45e   :  { %5691 = vst.msk [vmem:[#allocation2 + $0xe8] sm:$0xf] %vm5632_vm15, %v5557_v4  ;;  %v6822_v30 = vpop.f32.mrf.mxu0  ;;  %v6853_v46 = vpop.f32.mrf.mxu1  ;;  %6871 = vmatprep.mubr.msk.bf16.mxu1 %vm5948_vm0, %v6925_v24 }
 0x45f   :  { %v3961_v54 = vpop.permute.xlu1 %3960  ;;  %6342 = vst [vmem:[#allocation3 + $0x20] sm:$0xff] %v6100_v47  ;;  %v6111_v42 = vadd.f32 %v6822_v30, %v11875_v60  ;;  %v6236_v38 = vadd.f32 %v6853_v46, %v11875_v60 }
 0x460   :  { %4124 = vst.msk [vmem:[#allocation2 + $0x74] sm:$0xf] %vm4094_vm13, %v3961_v54  ;;  %v6102_v58 = vpop.f32.mrf.mxu0  ;;  %v6227_v0 = vpop.f32.mrf.mxu1 }
 0x461   :  { %v3959_v31 = vpop.permute.xlu0 %3958  ;;  %v6926_v29 = vld [vmem:[#allocation2 + $0x68] sm:$0xff]   ;;  %6345 = vst [vmem:[#allocation3 + $0x38] sm:$0xff] %v6111_v42  ;;  %6376 = vst [vmem:[#allocation3 + $0x130] sm:$0xff] %v6236_v38  ;;  %v6103_v36 = vadd.f32 %v11875_v60, %v6102_v58  ;;  %v6228_v37 = vadd.f32 %v11875_v60, %v6227_v0 }
 0x462   :  { %4123 = vst.msk [vmem:[#allocation2 + $0x70] sm:$0xf] %vm4094_vm13, %v3959_v31  ;;  %6840 = vmatmul.mubr.msk.bf16.gmra.mxu0 %vm5948_vm0, %v6926_v29  ;;  %v6854_v63 = vpop.f32.mrf.mxu1 }
 0x463   :  { %v4025_v20 = vpop.permute.xlu1 %4024  ;;  %6343 = vst [vmem:[#allocation3 + $0x28] sm:$0xff] %v6103_v36  ;;  %6374 = vst [vmem:[#allocation3 + $0x120] sm:$0xff] %v6228_v37  ;;  %v6239_v39 = vadd.f32 %v6854_v63, %v11875_v60 }
 0x464   :  { %4156 = vst.msk [vmem:[#allocation2 + $0xf4] sm:$0xf] %vm4094_vm13, %v4025_v20  ;;  %v6230_v25 = vpop.f32.mrf.mxu1 }
 0x465   :  { %v4023_v8 = vpop.permute.xlu0 %4022  ;;  %v6927_v33 = vld [vmem:[#allocation2 + $0xe8] sm:$0xff]   ;;  %6377 = vst [vmem:[#allocation3 + $0x138] sm:$0xff] %v6239_v39  ;;  %v6231_v43 = vadd.f32 %v11875_v60, %v6230_v25 }
 0x466   :  { %4155 = vst.msk [vmem:[#allocation2 + $0xf0] sm:$0xf] %vm4094_vm13, %v4023_v8  ;;  %6872 = vmatmul.mubr.msk.bf16.gmra.mxu1 %vm5948_vm0, %v6927_v33 }
 0x467   :  { %v3965_v53 = vpop.permute.xlu1 %3964  ;;  %6375 = vst [vmem:[#allocation3 + $0x128] sm:$0xff] %v6231_v43 }
 0x468   :  { %4126 = vst.msk [vmem:[#allocation2 + $0x7c] sm:$0xf] %vm4094_vm13, %v3965_v53 }
 0x469   :  { %v3963_v52 = vpop.permute.xlu0 %3962 }
 0x46a   :  { %4125 = vst.msk [vmem:[#allocation2 + $0x78] sm:$0xf] %vm4094_vm13, %v3963_v52 }
 0x46b   :  { %v4029_v44 = vpop.permute.xlu1 %4028 }
 0x46c   :  { %4158 = vst.msk [vmem:[#allocation2 + $0xfc] sm:$0xf] %vm4094_vm13, %v4029_v44 }
 0x46d   :  { %v4027_v2 = vpop.permute.xlu0 %4026 }
 0x46e   :  { %4157 = vst.msk [vmem:[#allocation2 + $0xf8] sm:$0xf] %vm4094_vm13, %v4027_v2 }
 0x46f   :  { %v4986_v50 = vpop.permute.xlu1 %4985 }
 0x470   :  { %5149 = vst.msk [vmem:[#allocation2 + $0x74] sm:$0xf] %vm5119_vm14, %v4986_v50 }
 0x471   :  { %v4984_v56 = vpop.permute.xlu0 %4983 }
 0x472   :  { %5148 = vst.msk [vmem:[#allocation2 + $0x70] sm:$0xf] %vm5119_vm14, %v4984_v56 }
 0x473   :  { %v5050_v15 = vpop.permute.xlu1 %5049 }
 0x474   :  { %5181 = vst.msk [vmem:[#allocation2 + $0xf4] sm:$0xf] %vm5119_vm14, %v5050_v15 }
 0x475   :  { %v5048_v9 = vpop.permute.xlu0 %5047 }
 0x476   :  { %5180 = vst.msk [vmem:[#allocation2 + $0xf0] sm:$0xf] %vm5119_vm14, %v5048_v9 }
 0x477   :  { %v4990_v49 = vpop.permute.xlu1 %4989 }
 0x478   :  { %5151 = vst.msk [vmem:[#allocation2 + $0x7c] sm:$0xf] %vm5119_vm14, %v4990_v49 }
 0x479   :  { %v4988_v10 = vpop.permute.xlu0 %4987 }
 0x47a   :  { %5150 = vst.msk [vmem:[#allocation2 + $0x78] sm:$0xf] %vm5119_vm14, %v4988_v10 }
 0x47b   :  { %v5054_v62 = vpop.permute.xlu1 %5053 }
 0x47c   :  { %5183 = vst.msk [vmem:[#allocation2 + $0xfc] sm:$0xf] %vm5119_vm14, %v5054_v62 }
 0x47d   :  { %v5052_v34 = vpop.permute.xlu0 %5051 }
 0x47e   :  { %5182 = vst.msk [vmem:[#allocation2 + $0xf8] sm:$0xf] %vm5119_vm14, %v5052_v34 }
 0x47f   :  { %v5499_v32 = vpop.permute.xlu1 %5498 }
 0x480   :  { %5662 = vst.msk [vmem:[#allocation2 + $0x74] sm:$0xf] %vm5632_vm15, %v5499_v32 }
 0x481   :  { %v5497_v18 = vpop.permute.xlu0 %5496 }
 0x482   :  { %5661 = vst.msk [vmem:[#allocation2 + $0x70] sm:$0xf] %vm5632_vm15, %v5497_v18  ;;  %v6825_v16 = vpop.f32.mrf.mxu0 }
 0x483   :  { %v5563_v40 = vpop.permute.xlu1 %5562  ;;  %v6124_v59 = vadd.f32 %v6825_v16, %v11875_v60 }
 0x484   :  { %5694 = vst.msk [vmem:[#allocation2 + $0xf4] sm:$0xf] %vm5632_vm15, %v5563_v40  ;;  %v6115_v21 = vpop.f32.mrf.mxu0 }
 0x485   :  { %v5561_v61 = vpop.permute.xlu0 %5560  ;;  %6348 = vst [vmem:[#allocation3 + $0x50] sm:$0xff] %v6124_v59  ;;  %v6116_v27 = vadd.f32 %v11875_v60, %v6115_v21 }
 0x486   :  { %5693 = vst.msk [vmem:[#allocation2 + $0xf0] sm:$0xf] %vm5632_vm15, %v5561_v61  ;;  %v6826_v13 = vpop.f32.mrf.mxu0  ;;  %v6857_v45 = vpop.f32.mrf.mxu1 }
 0x487   :  { %v5503_v11 = vpop.permute.xlu1 %5502  ;;  %6346 = vst [vmem:[#allocation3 + $0x40] sm:$0xff] %v6116_v27  ;;  %v6127_v23 = vadd.f32 %v6826_v13, %v11875_v60  ;;  %v6252_v57 = vadd.f32 %v6857_v45, %v11875_v60 }
 0x488   :  { %5664 = vst.msk [vmem:[#allocation2 + $0x7c] sm:$0xf] %vm5632_vm15, %v5503_v11  ;;  %v6118_v7 = vpop.f32.mrf.mxu0  ;;  %v6243_v41 = vpop.f32.mrf.mxu1 }
 0x489   :  { %v5501_v51 = vpop.permute.xlu0 %5500  ;;  %v6928_v19 = vld [vmem:[#allocation2 + $0x70] sm:$0xff]   ;;  %6349 = vst [vmem:[#allocation3 + $0x58] sm:$0xff] %v6127_v23  ;;  %6380 = vst [vmem:[#allocation3 + $0x150] sm:$0xff] %v6252_v57  ;;  %v6119_v55 = vadd.f32 %v11875_v60, %v6118_v7  ;;  %v6244_v3 = vadd.f32 %v11875_v60, %v6243_v41 }
 0x48a   :  { %5663 = vst.msk [vmem:[#allocation2 + $0x78] sm:$0xf] %vm5632_vm15, %v5501_v51  ;;  %6843 = vmatprep.mubr.msk.bf16.mxu0 %vm5948_vm0, %v6928_v19  ;;  %v6858_v48 = vpop.f32.mrf.mxu1 }
 0x48b   :  { %v5567_v1 = vpop.permute.xlu1 %5566  ;;  %6347 = vst [vmem:[#allocation3 + $0x48] sm:$0xff] %v6119_v55  ;;  %6378 = vst [vmem:[#allocation3 + $0x140] sm:$0xff] %v6244_v3  ;;  %v6255_v22 = vadd.f32 %v6858_v48, %v11875_v60 }
 0x48c   :  { %5696 = vst.msk [vmem:[#allocation2 + $0xfc] sm:$0xf] %vm5632_vm15, %v5567_v1  ;;  %v6246_v12 = vpop.f32.mrf.mxu1 }
 0x48d   :  { %v5565_v35 = vpop.permute.xlu0 %5564  ;;  %v6929_v5 = vld [vmem:[#allocation2 + $0xf0] sm:$0xff]   ;;  %6381 = vst [vmem:[#allocation3 + $0x158] sm:$0xff] %v6255_v22  ;;  %v6247_v26 = vadd.f32 %v11875_v60, %v6246_v12 }
 0x48e   :  { %5695 = vst.msk [vmem:[#allocation2 + $0xf8] sm:$0xf] %vm5632_vm15, %v5565_v35  ;;  %6875 = vmatprep.mubr.msk.bf16.mxu1 %vm5948_vm0, %v6929_v5 }
 0x48f   :  { %6379 = vst [vmem:[#allocation3 + $0x148] sm:$0xff] %v6247_v26 }
 0x491   :  { %v6930_v14 = vld [vmem:[#allocation2 + $0x78] sm:$0xff]  }
 0x492   :  { %6844 = vmatmul.mubr.msk.bf16.gmra.mxu0 %vm5948_vm0, %v6930_v14 }
 0x495   :  { %v6931_v28 = vld [vmem:[#allocation2 + $0xf8] sm:$0xff]  }
 0x496   :  { %6876 = vmatmul.mubr.msk.bf16.gmra.mxu1 %vm5948_vm0, %v6931_v28 }
 0x4aa   :  { %v6829_v17 = vpop.f32.mrf.mxu0 }
 0x4ab   :  { %v6140_v4 = vadd.f32 %v6829_v17, %v11875_v60 }
 0x4ac   :  { %v6131_v6 = vpop.f32.mrf.mxu0 }
 0x4ad   :  { %6352 = vst [vmem:[#allocation3 + $0x70] sm:$0xff] %v6140_v4  ;;  %v6132_v24 = vadd.f32 %v11875_v60, %v6131_v6 }
 0x4ae   :  { %v6830_v47 = vpop.f32.mrf.mxu0  ;;  %v6861_v54 = vpop.f32.mrf.mxu1 }
 0x4af   :  { %6350 = vst [vmem:[#allocation3 + $0x60] sm:$0xff] %v6132_v24  ;;  %v6143_v30 = vadd.f32 %v6830_v47, %v11875_v60  ;;  %v6268_v46 = vadd.f32 %v6861_v54, %v11875_v60 }
 0x4b0   :  { %v6134_v42 = vpop.f32.mrf.mxu0  ;;  %v6259_v38 = vpop.f32.mrf.mxu1 }
 0x4b1   :  { %6353 = vst [vmem:[#allocation3 + $0x78] sm:$0xff] %v6143_v30  ;;  %6384 = vst [vmem:[#allocation3 + $0x170] sm:$0xff] %v6268_v46  ;;  %v6135_v31 = vadd.f32 %v11875_v60, %v6134_v42  ;;  %v6260_v58 = vadd.f32 %v11875_v60, %v6259_v38 }
 0x4b2   :  { %v6862_v29 = vpop.f32.mrf.mxu1 }
 0x4b3   :  { %6351 = vst [vmem:[#allocation3 + $0x68] sm:$0xff] %v6135_v31  ;;  %6382 = vst [vmem:[#allocation3 + $0x160] sm:$0xff] %v6260_v58  ;;  %v6271_v36 = vadd.f32 %v6862_v29, %v11875_v60 }
 0x4b4   :  { %v6262_v0 = vpop.f32.mrf.mxu1 }
 0x4b5   :  { %6385 = vst [vmem:[#allocation3 + $0x178] sm:$0xff] %v6271_v36  ;;  %v6263_v20 = vadd.f32 %v11875_v60, %v6262_v0 }
 0x4b7   :  { %6383 = vst [vmem:[#allocation3 + $0x168] sm:$0xff] %v6263_v20 }
 0x4d2   :  { %v6833_v37 = vpop.f32.mrf.mxu0 }
 0x4d3   :  { %v6156_v63 = vadd.f32 %v6833_v37, %v11875_v60 }
 0x4d4   :  { %v6147_v39 = vpop.f32.mrf.mxu0 }
 0x4d5   :  { %6356 = vst [vmem:[#allocation3 + $0x90] sm:$0xff] %v6156_v63  ;;  %v6148_v8 = vadd.f32 %v11875_v60, %v6147_v39 }
 0x4d6   :  { %v6834_v33 = vpop.f32.mrf.mxu0  ;;  %v6865_v25 = vpop.f32.mrf.mxu1 }
 0x4d7   :  { %6354 = vst [vmem:[#allocation3 + $0x80] sm:$0xff] %v6148_v8  ;;  %v6159_v53 = vadd.f32 %v6834_v33, %v11875_v60  ;;  %v6284_v43 = vadd.f32 %v6865_v25, %v11875_v60 }
 0x4d8   :  { %v6150_v52 = vpop.f32.mrf.mxu0  ;;  %v6275_v44 = vpop.f32.mrf.mxu1 }
 0x4d9   :  { %6357 = vst [vmem:[#allocation3 + $0x98] sm:$0xff] %v6159_v53  ;;  %6388 = vst [vmem:[#allocation3 + $0x190] sm:$0xff] %v6284_v43  ;;  %v6151_v2 = vadd.f32 %v11875_v60, %v6150_v52  ;;  %v6276_v50 = vadd.f32 %v11875_v60, %v6275_v44 }
 0x4da   :  { %v6866_v56 = vpop.f32.mrf.mxu1 }
 0x4db   :  { %6355 = vst [vmem:[#allocation3 + $0x88] sm:$0xff] %v6151_v2  ;;  %6386 = vst [vmem:[#allocation3 + $0x180] sm:$0xff] %v6276_v50  ;;  %v6287_v15 = vadd.f32 %v6866_v56, %v11875_v60 }
 0x4dc   :  { %v6278_v9 = vpop.f32.mrf.mxu1 }
 0x4dd   :  { %6389 = vst [vmem:[#allocation3 + $0x198] sm:$0xff] %v6287_v15  ;;  %v6279_v49 = vadd.f32 %v11875_v60, %v6278_v9 }
 0x4df   :  { %6387 = vst [vmem:[#allocation3 + $0x188] sm:$0xff] %v6279_v49 }
 0x4fa   :  { %v6837_v10 = vpop.f32.mrf.mxu0 }
 0x4fb   :  { %v6172_v62 = vadd.f32 %v6837_v10, %v11875_v60 }
 0x4fc   :  { %v6163_v34 = vpop.f32.mrf.mxu0 }
 0x4fd   :  { %6360 = vst [vmem:[#allocation3 + $0xb0] sm:$0xff] %v6172_v62  ;;  %v6164_v32 = vadd.f32 %v11875_v60, %v6163_v34 }
 0x4fe   :  { %v6838_v18 = vpop.f32.mrf.mxu0  ;;  %v6869_v40 = vpop.f32.mrf.mxu1 }
 0x4ff   :  { %6358 = vst [vmem:[#allocation3 + $0xa0] sm:$0xff] %v6164_v32  ;;  %v6175_v16 = vadd.f32 %v6838_v18, %v11875_v60  ;;  %v6300_v59 = vadd.f32 %v6869_v40, %v11875_v60 }
 0x500   :  { %v6166_v61 = vpop.f32.mrf.mxu0  ;;  %v6291_v21 = vpop.f32.mrf.mxu1 }
 0x501   :  { %6361 = vst [vmem:[#allocation3 + $0xb8] sm:$0xff] %v6175_v16  ;;  %6392 = vst [vmem:[#allocation3 + $0x1b0] sm:$0xff] %v6300_v59  ;;  %v6167_v27 = vadd.f32 %v11875_v60, %v6166_v61  ;;  %v6292_v11 = vadd.f32 %v11875_v60, %v6291_v21 }
 0x502   :  { %v6870_v13 = vpop.f32.mrf.mxu1 }
 0x503   :  { %6359 = vst [vmem:[#allocation3 + $0xa8] sm:$0xff] %v6167_v27  ;;  %6390 = vst [vmem:[#allocation3 + $0x1a0] sm:$0xff] %v6292_v11  ;;  %v6303_v45 = vadd.f32 %v6870_v13, %v11875_v60 }
 0x504   :  { %v6294_v23 = vpop.f32.mrf.mxu1 }
 0x505   :  { %6393 = vst [vmem:[#allocation3 + $0x1b8] sm:$0xff] %v6303_v45  ;;  %v6295_v57 = vadd.f32 %v11875_v60, %v6294_v23 }
 0x507   :  { %6391 = vst [vmem:[#allocation3 + $0x1a8] sm:$0xff] %v6295_v57 }
 0x522   :  { %v6841_v51 = vpop.f32.mrf.mxu0 }
 0x523   :  { %v6188_v7 = vadd.f32 %v6841_v51, %v11875_v60 }
 0x524   :  { %v6179_v19 = vpop.f32.mrf.mxu0 }
 0x525   :  { %6364 = vst [vmem:[#allocation3 + $0xd0] sm:$0xff] %v6188_v7  ;;  %v6180_v55 = vadd.f32 %v11875_v60, %v6179_v19 }
 0x526   :  { %v6842_v41 = vpop.f32.mrf.mxu0  ;;  %v6873_v1 = vpop.f32.mrf.mxu1 }
 0x527   :  { %6362 = vst [vmem:[#allocation3 + $0xc0] sm:$0xff] %v6180_v55  ;;  %v6191_v3 = vadd.f32 %v6842_v41, %v11875_v60  ;;  %v6316_v48 = vadd.f32 %v6873_v1, %v11875_v60 }
 0x528   :  { %v6182_v22 = vpop.f32.mrf.mxu0  ;;  %v6307_v35 = vpop.f32.mrf.mxu1 }
 0x529   :  { %6365 = vst [vmem:[#allocation3 + $0xd8] sm:$0xff] %v6191_v3  ;;  %6396 = vst [vmem:[#allocation3 + $0x1d0] sm:$0xff] %v6316_v48  ;;  %v6183_v5 = vadd.f32 %v11875_v60, %v6182_v22  ;;  %v6308_v12 = vadd.f32 %v11875_v60, %v6307_v35 }
 0x52a   :  { %v6874_v26 = vpop.f32.mrf.mxu1 }
 0x52b   :  { %6363 = vst [vmem:[#allocation3 + $0xc8] sm:$0xff] %v6183_v5  ;;  %6394 = vst [vmem:[#allocation3 + $0x1c0] sm:$0xff] %v6308_v12  ;;  %v6319_v14 = vadd.f32 %v6874_v26, %v11875_v60 }
 0x52c   :  { %v6310_v28 = vpop.f32.mrf.mxu1 }
 0x52d   :  { %6397 = vst [vmem:[#allocation3 + $0x1d8] sm:$0xff] %v6319_v14  ;;  %v6311_v17 = vadd.f32 %v11875_v60, %v6310_v28 }
 0x52f   :  { %6395 = vst [vmem:[#allocation3 + $0x1c8] sm:$0xff] %v6311_v17 }
 0x552   :  { %v6845_v4 = vpop.f32.mrf.mxu0 }
 0x553   :  { %v6204_v6 = vadd.f32 %v6845_v4, %v11875_v60 }
 0x554   :  { %v6195_v24 = vpop.f32.mrf.mxu0 }
 0x555   :  { %6368 = vst [vmem:[#allocation3 + $0xf0] sm:$0xff] %v6204_v6  ;;  %v6196_v47 = vadd.f32 %v11875_v60, %v6195_v24 }
 0x556   :  { %v6846_v54 = vpop.f32.mrf.mxu0  ;;  %v6877_v30 = vpop.f32.mrf.mxu1 }
 0x557   :  { %6366 = vst [vmem:[#allocation3 + $0xe0] sm:$0xff] %v6196_v47  ;;  %v6207_v46 = vadd.f32 %v6846_v54, %v11875_v60  ;;  %v6332_v42 = vadd.f32 %v6877_v30, %v11875_v60 }
 0x558   :  { %v6198_v38 = vpop.f32.mrf.mxu0  ;;  %v6323_v31 = vpop.f32.mrf.mxu1 }
 0x559   :  { %6369 = vst [vmem:[#allocation3 + $0xf8] sm:$0xff] %v6207_v46  ;;  %6400 = vst [vmem:[#allocation3 + $0x1f0] sm:$0xff] %v6332_v42  ;;  %v6199_v58 = vadd.f32 %v11875_v60, %v6198_v38  ;;  %v6324_v29 = vadd.f32 %v11875_v60, %v6323_v31 }
 0x55a   :  { %v6878_v36 = vpop.f32.mrf.mxu1 }
 0x55b   :  { %6367 = vst [vmem:[#allocation3 + $0xe8] sm:$0xff] %v6199_v58  ;;  %6398 = vst [vmem:[#allocation3 + $0x1e0] sm:$0xff] %v6324_v29  ;;  %v6335_v0 = vadd.f32 %v6878_v36, %v11875_v60 }
 0x55c   :  { %v6326_v20 = vpop.f32.mrf.mxu1 }
 0x55d   :  { %6401 = vst [vmem:[#allocation3 + $0x1f8] sm:$0xff] %v6335_v0  ;;  %v6327_v37 = vadd.f32 %v11875_v60, %v6326_v20 }
 0x55f   :  { %6399 = vst [vmem:[#allocation3 + $0x1e8] sm:$0xff] %v6327_v37 }
 0x560   :  { %7077 = shalt.err (!%p7074_p4)
}
 0x561   :  { %s7097_s10 = smov 128  }
 0x562   :  { %6413 = dma.vmem_to_hbm [thread:$0]  %s6408_s22, 8192, %s12007_s3, [#allocation4], %s7097_s10, %s7097_s10, %s7089_s26  }
 0x563   :  { %7086 = dma.done.wait [#allocation4], 8192  }
 0x564   :  { %7087 = vsyncadd [#allocation4], 4294959104 }
 0x565   :  { %6417 = vsyncpa [#allocation4], 1 }

</bundles_post_ra>
